<compile_context>
chip_gen: v5e
topology: v5e:2x2
jax: 0.10.0
libtpu: 0.0.40
codegen_flags: <defaults>
</compile_context>

<pallas_src>
import functools

import jax
import jax.numpy as jnp
from jax.experimental import pallas as pl
from jax.experimental.pallas import tpu as pltpu


_VMEM_LIMIT = 32 * 1024 * 1024  # fits v7x's 64 MiB VMEM with headroom


# ----------------------------------------------------------------------------
# Pallas kernels
# ----------------------------------------------------------------------------
def _conv3x3_pool_relu_kernel(p00, p01, p10, p11, w_ref, b_ref, o_ref, *, S, L):
    """Fused Conv2d(3x3, pad=1) + bias + MaxPool2d(2,2) + ReLU for one image.

    p{r}{c}: (Cin, plane_len) bf16 -- the (row-parity r, col-parity c) plane of
             the zero-padded image, spatially flattened with row length S.
    w_ref:   (9, Cout, Cin) bf16, tap index t = ky*3 + kx.
    b_ref:   (Cout, 1) f32.
    o_ref:   (Cout, L) with L = Ho*S, S = Wo+1; column j == S-1 of every pooled
             row is a zeroed scratch column that the next layer reuses as pad.

    max(relu(.)) == relu(max(.)) and bias is per-channel constant, so doing
    bias + ReLU after the max over the 4 pooling taps matches PyTorch's
    Conv -> MaxPool -> ReLU exactly.
    """
    planes = ((p00, p01), (p10, p11))
    pooled = None
    for py in range(2):            # pooling-window row
        for px in range(2):        # pooling-window col
            acc = None
            for ky in range(3):
                for kx in range(3):
                    rpar, ra = (py + ky) % 2, (py + ky) // 2
                    cpar, cb = (px + kx) % 2, (px + kx) // 2
                    off = ra * S + cb
                    tap = planes[rpar][cpar][:, off:off + L]        # (Cin, L)
                    part = jnp.dot(w_ref[ky * 3 + kx], tap,
                                   preferred_element_type=jnp.float32)
                    acc = part if acc is None else acc + part
            pooled = acc if pooled is None else jnp.maximum(pooled, acc)
    pooled = jnp.maximum(pooled + b_ref[...], 0.0)     # bias + ReLU, f32 epilogue
    col = jax.lax.broadcasted_iota(jnp.int32, pooled.shape, 1)
    pooled = jnp.where(col % S == S - 1, 0.0, pooled)  # zero the scratch column
    o_ref[...] = pooled.astype(o_ref.dtype)


def _deconv2x2_act_kernel(x_ref, w_ref, b_ref, o_ref, *, act):
    """Fused ConvTranspose2d(k=2, s=2) + bias + ReLU/Sigmoid for one image.

    x: (Cin, P) pixels on lanes; w: (4*Cout, Cin), rows ordered (cout, ky, kx);
    out: (4*Cout, P). stride == kernel size -> each output pixel gets exactly
    one contribution, so the whole layer is a single GEMM + epilogue.
    """
    y = jnp.dot(w_ref[...], x_ref[...], preferred_element_type=jnp.float32)
    y = y + b_ref[...]
    if act == "relu":
        y = jnp.maximum(y, 0.0)
    else:  # sigmoid
        y = jax.nn.sigmoid(y)
    o_ref[...] = y.astype(o_ref.dtype)


# ----------------------------------------------------------------------------
# Layer glue (cheap pad / parity split / free reshapes; all compute in Pallas)
# ----------------------------------------------------------------------------
def conv3x3_pool_relu(x, w9, b, *, w_valid, right_zero_cols):
    """x: (N, Cin, H, w_valid + right_zero_cols) bf16, NCHW spatial.

    Returns ((N, Cout, Ho, Wo + 1) bf16 with a zero right column, Wo).
    """
    # TODO(synk): for very large spatial sizes, additionally tile the pixel axis
    # inside each image (currently one image's parity planes live in VMEM).
    N, Cin, H, Wst = x.shape
    W = w_valid
    assert Wst == W + right_zero_cols and H % 2 == 0 and W % 2 == 0
    Cout = w9.shape[1]
    Ho, Wo = H // 2, W // 2
    Wp = W + 2               # padded width (even)
    S = Wp // 2              # = Wo + 1: one scratch column per pooled row
    L = Ho * S
    Hp = H + 4               # top pad 1, bottom pad 3 (extra zero rows keep every
                             # in-kernel tap window inside its parity plane)
    xp = jnp.pad(x, ((0, 0), (0, 0), (1, 3), (1, 1 - right_zero_cols)))
    plane_len = (Hp // 2) * S
    planes = [xp[:, :, r::2, c::2].reshape(N, Cin, plane_len)
              for r in (0, 1) for c in (0, 1)]
    plane_spec = pl.BlockSpec((None, Cin, plane_len), lambda n: (n, 0, 0))

    out = pl.pallas_call(
        functools.partial(_conv3x3_pool_relu_kernel, S=S, L=L),
        out_shape=jax.ShapeDtypeStruct((N, Cout, L), jnp.bfloat16),
        grid=(N,),
        in_specs=[plane_spec] * 4 + [
            pl.BlockSpec((9, Cout, Cin), lambda n: (0, 0, 0)),
            pl.BlockSpec((Cout, 1), lambda n: (0, 0)),
        ],
        out_specs=pl.BlockSpec((None, Cout, L), lambda n: (n, 0, 0)),
        compiler_params=pltpu.CompilerParams(
            dimension_semantics=("parallel",),
            vmem_limit_bytes=_VMEM_LIMIT),
        cost_estimate=pl.CostEstimate(
            flops=2 * N * 4 * L * Cout * 9 * Cin,
            transcendentals=0,
            bytes_accessed=N * (4 * Cin * plane_len + Cout * L) * 2
                           + 9 * Cout * Cin * 2 + Cout * 4),
    )(*planes, w9, b)
    return out.reshape(N, Cout, Ho, S), Wo


def deconv2x2_s2(z, w4, b4, *, act, out_dtype):
    """z: (N, Cin, P) bf16; w4: (4*Cout, Cin) bf16; b4: (4*Cout, 1) f32.

    Returns (N, Cout, 4*P): 2x up-sampled activation in 'tap-major' pixel order
    p' = (ky*2+kx)*P + p.  The (N,4*Cout,P)->(N,Cout,4*P) reshape is a free
    contiguous view; the actual pixel shuffle is deferred to the end of the
    decoder and done once for all layers.
    """
    N, Cin, P = z.shape
    Cout4 = w4.shape[0]
    out_bytes = 2 if out_dtype == jnp.bfloat16 else 4
    out = pl.pallas_call(
        functools.partial(_deconv2x2_act_kernel, act=act),
        out_shape=jax.ShapeDtypeStruct((N, Cout4, P), out_dtype),
        grid=(N,),
        in_specs=[
            pl.BlockSpec((None, Cin, P), lambda n: (n, 0, 0)),
            pl.BlockSpec((Cout4, Cin), lambda n: (0, 0)),
            pl.BlockSpec((Cout4, 1), lambda n: (0, 0)),
        ],
        out_specs=pl.BlockSpec((None, Cout4, P), lambda n: (n, 0, 0)),
        compiler_params=pltpu.CompilerParams(
            dimension_semantics=("parallel",),
            vmem_limit_bytes=_VMEM_LIMIT),
        cost_estimate=pl.CostEstimate(
            flops=2 * N * P * Cout4 * Cin,
            transcendentals=(N * P * Cout4 if act == "sigmoid" else 0),
            bytes_accessed=N * Cin * P * 2 + Cout4 * Cin * 2 + Cout4 * 4
                           + N * Cout4 * P * out_bytes),
    )(z, w4, b4)
    return out.reshape(N, Cout4 // 4, 4 * P)


def _pixel_unshuffle_4x(z, h0, w0):
    """Undo the 4 deferred 2x2 pixel shuffles with a single transpose.

    z: (N, C, 256*h0*w0), pixel order (ky4,kx4, ky3,kx3, ky2,kx2, ky1,kx1, y0, x0).
    Target: Y = y0*16 + ky1*8 + ky2*4 + ky3*2 + ky4 (and likewise for X).
    """
    N, C, _ = z.shape
    z = z.reshape(N, C, 2, 2, 2, 2, 2, 2, 2, 2, h0, w0)
    z = jnp.transpose(z, (0, 1, 10, 8, 6, 4, 2, 11, 9, 7, 5, 3))
    return z.reshape(N, C, 16 * h0, 16 * w0)


# ----------------------------------------------------------------------------
# Parameters (deterministic synthetic init matching the nn.Module shapes)
# ----------------------------------------------------------------------------
def init_params(key):
    params = {}

    def uniform(k, shape, fan_in):
        bound = 1.0 / jnp.sqrt(jnp.float32(fan_in))
        return jax.random.uniform(k, shape, jnp.float32, -bound, bound)

    enc_dims = [(3, 6), (6, 12), (12, 24), (24, 16)]
    for i, (cin, cout) in enumerate(enc_dims):
        key, kw, kb = jax.random.split(key, 3)
        params[f"enc{i}_w"] = uniform(kw, (cout, cin, 3, 3), cin * 9)
        params[f"enc{i}_b"] = uniform(kb, (cout,), cin * 9)

    dec_dims = [(16, 24), (24, 12), (12, 6), (6, 3)]
    for i, (cin, cout) in enumerate(dec_dims):
        key, kw, kb = jax.random.split(key, 3)
        fan_in = cout * 4  # PyTorch ConvTranspose2d default: weight.size(1)*k*k
        params[f"dec{i}_w"] = uniform(kw, (cin, cout, 2, 2), fan_in)
        params[f"dec{i}_b"] = uniform(kb, (cout,), fan_in)
    return params


def prep_kernel_params(params):
    """Re-layout PyTorch-shaped parameters for the kernels (bf16 MXU, f32 bias)."""
    kp = {}
    for i in range(4):
        w = params[f"enc{i}_w"]                        # (Cout, Cin, 3, 3)
        cout, cin = w.shape[0], w.shape[1]
        kp[f"enc{i}_w"] = (jnp.transpose(w, (2, 3, 0, 1))    # (ky, kx, cout, cin)
                           .reshape(9, cout, cin).astype(jnp.bfloat16))
        kp[f"enc{i}_b"] = params[f"enc{i}_b"].reshape(cout, 1).astype(jnp.float32)
    for i in range(4):
        w = params[f"dec{i}_w"]                        # (Cin, Cout, 2, 2)
        cin, cout = w.shape[0], w.shape[1]
        kp[f"dec{i}_w"] = w.reshape(cin, 4 * cout).T.astype(jnp.bfloat16)
        kp[f"dec{i}_b"] = (jnp.repeat(params[f"dec{i}_b"], 4)
                           .reshape(4 * cout, 1).astype(jnp.float32))
    return kp


# ----------------------------------------------------------------------------
# Full forward pass (AutoEncoder.forward)
# ----------------------------------------------------------------------------
def autoencoder_forward(kparams, x_nchw):
    x = x_nchw.astype(jnp.bfloat16)                    # (N, 3, H, W), NCHW

    # encoder: 4 x (conv3x3 pad1 -> maxpool2x2 -> relu), fully fused per layer
    w_valid, rzc = x.shape[3], 0
    for i in range(4):
        x, w_valid = conv3x3_pool_relu(
            x, kparams[f"enc{i}_w"], kparams[f"enc{i}_b"],
            w_valid=w_valid, right_zero_cols=rzc)
        rzc = 1                                        # kernel emits a zero right col

    # drop the scratch column; flatten pixels for the decoder GEMMs
    N, C_lat = x.shape[0], x.shape[1]
    h0, w0 = x.shape[2], w_valid
    z = x[:, :, :, :w0].reshape(N, C_lat, h0 * w0)

    # decoder: 3 x (convT2x2 s2 -> relu), then convT2x2 s2 -> sigmoid
    for i in range(3):
        z = deconv2x2_s2(z, kparams[f"dec{i}_w"], kparams[f"dec{i}_b"],
                         act="relu", out_dtype=jnp.bfloat16)
    z = deconv2x2_s2(z, kparams["dec3_w"], kparams["dec3_b"],
                     act="sigmoid", out_dtype=jnp.float32)

    # one pixel-unshuffle transpose for all four deconv stages
    return _pixel_unshuffle_4x(z, h0, w0)


if __name__ == "__main__":
    key = jax.random.PRNGKey(0)
    key, xkey = jax.random.split(key)

    # 4 pooling stages -> spatial dims must be divisible by 16.
    x = jax.random.normal(xkey, (2, 3, 32, 32), dtype=jnp.float32)  # NCHW

    params = init_params(key)
    kparams = prep_kernel_params(params)

    fwd = jax.jit(autoencoder_forward)
    y = jax.block_until_ready(fwd(kparams, x))

    assert y.shape == (2, 3, 32, 32), y.shape
    assert y.dtype == jnp.float32
    assert bool(jnp.all(jnp.isfinite(y)))
    assert bool(jnp.all((y >= 0.0) & (y <= 1.0)))      # sigmoid output range
    print("KERNEL_OK")
</pallas_src>

<mosaic_0001>
module attributes {stable_mosaic.version = 11 : i64} {
  func.func @_conv3x3_pool_relu_kernel(%arg0: i32, %arg1: memref<1x3x306xbf16, #tpu.memory_space<vmem>>, %arg2: memref<1x3x306xbf16, #tpu.memory_space<vmem>>, %arg3: memref<1x3x306xbf16, #tpu.memory_space<vmem>>, %arg4: memref<1x3x306xbf16, #tpu.memory_space<vmem>>, %arg5: memref<9x6x3xbf16, #tpu.memory_space<vmem>>, %arg6: memref<6x1xf32, #tpu.memory_space<vmem>>, %arg7: memref<1x6x272xbf16, #tpu.memory_space<vmem>>) attributes {dimension_semantics = [#tpu.dimension_semantics<parallel>], iteration_bounds = array<i64: 2>, scalar_prefetch = 0 : i64, scratch_operands = 0 : i64, tpu.core_type = #tpu.core_type<tc>, window_params = [{transform_indices = @transform_0, window_bounds = array<i64: 1, 3, 306>}, {transform_indices = @transform_1, window_bounds = array<i64: 1, 3, 306>}, {transform_indices = @transform_2, window_bounds = array<i64: 1, 3, 306>}, {transform_indices = @transform_3, window_bounds = array<i64: 1, 3, 306>}, {pipeline_mode = #tpu.pipeline_mode<synchronous>, transform_indices = @transform_4, window_bounds = array<i64: 9, 6, 3>}, {pipeline_mode = #tpu.pipeline_mode<synchronous>, transform_indices = @transform_5, window_bounds = array<i64: 6, 1>}, {transform_indices = @transform_6, window_bounds = array<i64: 1, 6, 272>}]} {
    %c0 = arith.constant 0 : index
    %c0_0 = arith.constant 0 : index
    %c0_1 = arith.constant 0 : index
    %0 = vector.load %arg1[%c0, %c0_0, %c0_1] : memref<1x3x306xbf16, #tpu.memory_space<vmem>>, vector<1x3x272xbf16>
    %1 = vector.shape_cast %0 : vector<1x3x272xbf16> to vector<3x272xbf16>
    %c0_2 = arith.constant 0 : index
    %c0_3 = arith.constant 0 : index
    %c0_4 = arith.constant 0 : index
    %2 = vector.load %arg5[%c0_2, %c0_3, %c0_4] : memref<9x6x3xbf16, #tpu.memory_space<vmem>>, vector<1x6x3xbf16>
    %3 = vector.shape_cast %2 : vector<1x6x3xbf16> to vector<6x3xbf16>
    %cst = arith.constant dense<0.000000e+00> : vector<6x272xf32>
    %4 = tpu.matmul %3, %1, %cst {dimension_numbers = #tpu.dot_dimension_numbers<[1], [0], [0], [1], [0, 0, 1, 1], [], []>} : vector<6x3xbf16>, vector<3x272xbf16>, vector<6x272xf32> -> vector<6x272xf32>
    %c0_5 = arith.constant 0 : index
    %c0_6 = arith.constant 0 : index
    %c0_7 = arith.constant 0 : index
    %5 = vector.load %arg2[%c0_5, %c0_6, %c0_7] : memref<1x3x306xbf16, #tpu.memory_space<vmem>>, vector<1x3x272xbf16>
    %6 = vector.shape_cast %5 : vector<1x3x272xbf16> to vector<3x272xbf16>
    %c1 = arith.constant 1 : index
    %c0_8 = arith.constant 0 : index
    %c0_9 = arith.constant 0 : index
    %7 = vector.load %arg5[%c1, %c0_8, %c0_9] : memref<9x6x3xbf16, #tpu.memory_space<vmem>>, vector<1x6x3xbf16>
    %8 = vector.shape_cast %7 : vector<1x6x3xbf16> to vector<6x3xbf16>
    %cst_10 = arith.constant dense<0.000000e+00> : vector<6x272xf32>
    %9 = tpu.matmul %8, %6, %cst_10 {dimension_numbers = #tpu.dot_dimension_numbers<[1], [0], [0], [1], [0, 0, 1, 1], [], []>} : vector<6x3xbf16>, vector<3x272xbf16>, vector<6x272xf32> -> vector<6x272xf32>
    %10 = arith.addf %4, %9 : vector<6x272xf32>
    %c0_11 = arith.constant 0 : index
    %c0_12 = arith.constant 0 : index
    %c1_13 = arith.constant 1 : index
    %11 = vector.load %arg1[%c0_11, %c0_12, %c1_13] : memref<1x3x306xbf16, #tpu.memory_space<vmem>>, vector<1x3x272xbf16>
    %12 = vector.shape_cast %11 : vector<1x3x272xbf16> to vector<3x272xbf16>
    %c2 = arith.constant 2 : index
    %c0_14 = arith.constant 0 : index
    %c0_15 = arith.constant 0 : index
    %13 = vector.load %arg5[%c2, %c0_14, %c0_15] : memref<9x6x3xbf16, #tpu.memory_space<vmem>>, vector<1x6x3xbf16>
    %14 = vector.shape_cast %13 : vector<1x6x3xbf16> to vector<6x3xbf16>
    %cst_16 = arith.constant dense<0.000000e+00> : vector<6x272xf32>
    %15 = tpu.matmul %14, %12, %cst_16 {dimension_numbers = #tpu.dot_dimension_numbers<[1], [0], [0], [1], [0, 0, 1, 1], [], []>} : vector<6x3xbf16>, vector<3x272xbf16>, vector<6x272xf32> -> vector<6x272xf32>
    %16 = arith.addf %10, %15 : vector<6x272xf32>
    %c0_17 = arith.constant 0 : index
    %c0_18 = arith.constant 0 : index
    %c0_19 = arith.constant 0 : index
    %17 = vector.load %arg3[%c0_17, %c0_18, %c0_19] : memref<1x3x306xbf16, #tpu.memory_space<vmem>>, vector<1x3x272xbf16>
    %18 = vector.shape_cast %17 : vector<1x3x272xbf16> to vector<3x272xbf16>
    %c3 = arith.constant 3 : index
    %c0_20 = arith.constant 0 : index
    %c0_21 = arith.constant 0 : index
    %19 = vector.load %arg5[%c3, %c0_20, %c0_21] : memref<9x6x3xbf16, #tpu.memory_space<vmem>>, vector<1x6x3xbf16>
    %20 = vector.shape_cast %19 : vector<1x6x3xbf16> to vector<6x3xbf16>
    %cst_22 = arith.constant dense<0.000000e+00> : vector<6x272xf32>
    %21 = tpu.matmul %20, %18, %cst_22 {dimension_numbers = #tpu.dot_dimension_numbers<[1], [0], [0], [1], [0, 0, 1, 1], [], []>} : vector<6x3xbf16>, vector<3x272xbf16>, vector<6x272xf32> -> vector<6x272xf32>
    %22 = arith.addf %16, %21 : vector<6x272xf32>
    %c0_23 = arith.constant 0 : index
    %c0_24 = arith.constant 0 : index
    %c0_25 = arith.constant 0 : index
    %23 = vector.load %arg4[%c0_23, %c0_24, %c0_25] : memref<1x3x306xbf16, #tpu.memory_space<vmem>>, vector<1x3x272xbf16>
    %24 = vector.shape_cast %23 : vector<1x3x272xbf16> to vector<3x272xbf16>
    %c4 = arith.constant 4 : index
    %c0_26 = arith.constant 0 : index
    %c0_27 = arith.constant 0 : index
    %25 = vector.load %arg5[%c4, %c0_26, %c0_27] : memref<9x6x3xbf16, #tpu.memory_space<vmem>>, vector<1x6x3xbf16>
    %26 = vector.shape_cast %25 : vector<1x6x3xbf16> to vector<6x3xbf16>
    %cst_28 = arith.constant dense<0.000000e+00> : vector<6x272xf32>
    %27 = tpu.matmul %26, %24, %cst_28 {dimension_numbers = #tpu.dot_dimension_numbers<[1], [0], [0], [1], [0, 0, 1, 1], [], []>} : vector<6x3xbf16>, vector<3x272xbf16>, vector<6x272xf32> -> vector<6x272xf32>
    %28 = arith.addf %22, %27 : vector<6x272xf32>
    %c0_29 = arith.constant 0 : index
    %c0_30 = arith.constant 0 : index
    %c1_31 = arith.constant 1 : index
    %29 = vector.load %arg3[%c0_29, %c0_30, %c1_31] : memref<1x3x306xbf16, #tpu.memory_space<vmem>>, vector<1x3x272xbf16>
    %30 = vector.shape_cast %29 : vector<1x3x272xbf16> to vector<3x272xbf16>
    %c5 = arith.constant 5 : index
    %c0_32 = arith.constant 0 : index
    %c0_33 = arith.constant 0 : index
    %31 = vector.load %arg5[%c5, %c0_32, %c0_33] : memref<9x6x3xbf16, #tpu.memory_space<vmem>>, vector<1x6x3xbf16>
    %32 = vector.shape_cast %31 : vector<1x6x3xbf16> to vector<6x3xbf16>
    %cst_34 = arith.constant dense<0.000000e+00> : vector<6x272xf32>
    %33 = tpu.matmul %32, %30, %cst_34 {dimension_numbers = #tpu.dot_dimension_numbers<[1], [0], [0], [1], [0, 0, 1, 1], [], []>} : vector<6x3xbf16>, vector<3x272xbf16>, vector<6x272xf32> -> vector<6x272xf32>
    %34 = arith.addf %28, %33 : vector<6x272xf32>
    %c0_35 = arith.constant 0 : index
    %c0_36 = arith.constant 0 : index
    %c17 = arith.constant 17 : index
    %35 = vector.load %arg1[%c0_35, %c0_36, %c17] : memref<1x3x306xbf16, #tpu.memory_space<vmem>>, vector<1x3x272xbf16>
    %36 = vector.shape_cast %35 : vector<1x3x272xbf16> to vector<3x272xbf16>
    %c6 = arith.constant 6 : index
    %c0_37 = arith.constant 0 : index
    %c0_38 = arith.constant 0 : index
    %37 = vector.load %arg5[%c6, %c0_37, %c0_38] : memref<9x6x3xbf16, #tpu.memory_space<vmem>>, vector<1x6x3xbf16>
    %38 = vector.shape_cast %37 : vector<1x6x3xbf16> to vector<6x3xbf16>
    %cst_39 = arith.constant dense<0.000000e+00> : vector<6x272xf32>
    %39 = tpu.matmul %38, %36, %cst_39 {dimension_numbers = #tpu.dot_dimension_numbers<[1], [0], [0], [1], [0, 0, 1, 1], [], []>} : vector<6x3xbf16>, vector<3x272xbf16>, vector<6x272xf32> -> vector<6x272xf32>
    %40 = arith.addf %34, %39 : vector<6x272xf32>
    %c0_40 = arith.constant 0 : index
    %c0_41 = arith.constant 0 : index
    %c17_42 = arith.constant 17 : index
    %41 = vector.load %arg2[%c0_40, %c0_41, %c17_42] : memref<1x3x306xbf16, #tpu.memory_space<vmem>>, vector<1x3x272xbf16>
    %42 = vector.shape_cast %41 : vector<1x3x272xbf16> to vector<3x272xbf16>
    %c7 = arith.constant 7 : index
    %c0_43 = arith.constant 0 : index
    %c0_44 = arith.constant 0 : index
    %43 = vector.load %arg5[%c7, %c0_43, %c0_44] : memref<9x6x3xbf16, #tpu.memory_space<vmem>>, vector<1x6x3xbf16>
    %44 = vector.shape_cast %43 : vector<1x6x3xbf16> to vector<6x3xbf16>
    %cst_45 = arith.constant dense<0.000000e+00> : vector<6x272xf32>
    %45 = tpu.matmul %44, %42, %cst_45 {dimension_numbers = #tpu.dot_dimension_numbers<[1], [0], [0], [1], [0, 0, 1, 1], [], []>} : vector<6x3xbf16>, vector<3x272xbf16>, vector<6x272xf32> -> vector<6x272xf32>
    %46 = arith.addf %40, %45 : vector<6x272xf32>
    %c0_46 = arith.constant 0 : index
    %c0_47 = arith.constant 0 : index
    %c18 = arith.constant 18 : index
    %47 = vector.load %arg1[%c0_46, %c0_47, %c18] : memref<1x3x306xbf16, #tpu.memory_space<vmem>>, vector<1x3x272xbf16>
    %48 = vector.shape_cast %47 : vector<1x3x272xbf16> to vector<3x272xbf16>
    %c8 = arith.constant 8 : index
    %c0_48 = arith.constant 0 : index
    %c0_49 = arith.constant 0 : index
    %49 = vector.load %arg5[%c8, %c0_48, %c0_49] : memref<9x6x3xbf16, #tpu.memory_space<vmem>>, vector<1x6x3xbf16>
    %50 = vector.shape_cast %49 : vector<1x6x3xbf16> to vector<6x3xbf16>
    %cst_50 = arith.constant dense<0.000000e+00> : vector<6x272xf32>
    %51 = tpu.matmul %50, %48, %cst_50 {dimension_numbers = #tpu.dot_dimension_numbers<[1], [0], [0], [1], [0, 0, 1, 1], [], []>} : vector<6x3xbf16>, vector<3x272xbf16>, vector<6x272xf32> -> vector<6x272xf32>
    %52 = arith.addf %46, %51 : vector<6x272xf32>
    %c0_51 = arith.constant 0 : index
    %c0_52 = arith.constant 0 : index
    %c0_53 = arith.constant 0 : index
    %53 = vector.load %arg2[%c0_51, %c0_52, %c0_53] : memref<1x3x306xbf16, #tpu.memory_space<vmem>>, vector<1x3x272xbf16>
    %54 = vector.shape_cast %53 : vector<1x3x272xbf16> to vector<3x272xbf16>
    %c0_54 = arith.constant 0 : index
    %c0_55 = arith.constant 0 : index
    %c0_56 = arith.constant 0 : index
    %55 = vector.load %arg5[%c0_54, %c0_55, %c0_56] : memref<9x6x3xbf16, #tpu.memory_space<vmem>>, vector<1x6x3xbf16>
    %56 = vector.shape_cast %55 : vector<1x6x3xbf16> to vector<6x3xbf16>
    %cst_57 = arith.constant dense<0.000000e+00> : vector<6x272xf32>
    %57 = tpu.matmul %56, %54, %cst_57 {dimension_numbers = #tpu.dot_dimension_numbers<[1], [0], [0], [1], [0, 0, 1, 1], [], []>} : vector<6x3xbf16>, vector<3x272xbf16>, vector<6x272xf32> -> vector<6x272xf32>
    %c0_58 = arith.constant 0 : index
    %c0_59 = arith.constant 0 : index
    %c1_60 = arith.constant 1 : index
    %58 = vector.load %arg1[%c0_58, %c0_59, %c1_60] : memref<1x3x306xbf16, #tpu.memory_space<vmem>>, vector<1x3x272xbf16>
    %59 = vector.shape_cast %58 : vector<1x3x272xbf16> to vector<3x272xbf16>
    %c1_61 = arith.constant 1 : index
    %c0_62 = arith.constant 0 : index
    %c0_63 = arith.constant 0 : index
    %60 = vector.load %arg5[%c1_61, %c0_62, %c0_63] : memref<9x6x3xbf16, #tpu.memory_space<vmem>>, vector<1x6x3xbf16>
    %61 = vector.shape_cast %60 : vector<1x6x3xbf16> to vector<6x3xbf16>
    %cst_64 = arith.constant dense<0.000000e+00> : vector<6x272xf32>
    %62 = tpu.matmul %61, %59, %cst_64 {dimension_numbers = #tpu.dot_dimension_numbers<[1], [0], [0], [1], [0, 0, 1, 1], [], []>} : vector<6x3xbf16>, vector<3x272xbf16>, vector<6x272xf32> -> vector<6x272xf32>
    %63 = arith.addf %57, %62 : vector<6x272xf32>
    %c0_65 = arith.constant 0 : index
    %c0_66 = arith.constant 0 : index
    %c1_67 = arith.constant 1 : index
    %64 = vector.load %arg2[%c0_65, %c0_66, %c1_67] : memref<1x3x306xbf16, #tpu.memory_space<vmem>>, vector<1x3x272xbf16>
    %65 = vector.shape_cast %64 : vector<1x3x272xbf16> to vector<3x272xbf16>
    %c2_68 = arith.constant 2 : index
    %c0_69 = arith.constant 0 : index
    %c0_70 = arith.constant 0 : index
    %66 = vector.load %arg5[%c2_68, %c0_69, %c0_70] : memref<9x6x3xbf16, #tpu.memory_space<vmem>>, vector<1x6x3xbf16>
    %67 = vector.shape_cast %66 : vector<1x6x3xbf16> to vector<6x3xbf16>
    %cst_71 = arith.constant dense<0.000000e+00> : vector<6x272xf32>
    %68 = tpu.matmul %67, %65, %cst_71 {dimension_numbers = #tpu.dot_dimension_numbers<[1], [0], [0], [1], [0, 0, 1, 1], [], []>} : vector<6x3xbf16>, vector<3x272xbf16>, vector<6x272xf32> -> vector<6x272xf32>
    %69 = arith.addf %63, %68 : vector<6x272xf32>
    %c0_72 = arith.constant 0 : index
    %c0_73 = arith.constant 0 : index
    %c0_74 = arith.constant 0 : index
    %70 = vector.load %arg4[%c0_72, %c0_73, %c0_74] : memref<1x3x306xbf16, #tpu.memory_space<vmem>>, vector<1x3x272xbf16>
    %71 = vector.shape_cast %70 : vector<1x3x272xbf16> to vector<3x272xbf16>
    %c3_75 = arith.constant 3 : index
    %c0_76 = arith.constant 0 : index
    %c0_77 = arith.constant 0 : index
    %72 = vector.load %arg5[%c3_75, %c0_76, %c0_77] : memref<9x6x3xbf16, #tpu.memory_space<vmem>>, vector<1x6x3xbf16>
    %73 = vector.shape_cast %72 : vector<1x6x3xbf16> to vector<6x3xbf16>
    %cst_78 = arith.constant dense<0.000000e+00> : vector<6x272xf32>
    %74 = tpu.matmul %73, %71, %cst_78 {dimension_numbers = #tpu.dot_dimension_numbers<[1], [0], [0], [1], [0, 0, 1, 1], [], []>} : vector<6x3xbf16>, vector<3x272xbf16>, vector<6x272xf32> -> vector<6x272xf32>
    %75 = arith.addf %69, %74 : vector<6x272xf32>
    %c0_79 = arith.constant 0 : index
    %c0_80 = arith.constant 0 : index
    %c1_81 = arith.constant 1 : index
    %76 = vector.load %arg3[%c0_79, %c0_80, %c1_81] : memref<1x3x306xbf16, #tpu.memory_space<vmem>>, vector<1x3x272xbf16>
    %77 = vector.shape_cast %76 : vector<1x3x272xbf16> to vector<3x272xbf16>
    %c4_82 = arith.constant 4 : index
    %c0_83 = arith.constant 0 : index
    %c0_84 = arith.constant 0 : index
    %78 = vector.load %arg5[%c4_82, %c0_83, %c0_84] : memref<9x6x3xbf16, #tpu.memory_space<vmem>>, vector<1x6x3xbf16>
    %79 = vector.shape_cast %78 : vector<1x6x3xbf16> to vector<6x3xbf16>
    %cst_85 = arith.constant dense<0.000000e+00> : vector<6x272xf32>
    %80 = tpu.matmul %79, %77, %cst_85 {dimension_numbers = #tpu.dot_dimension_numbers<[1], [0], [0], [1], [0, 0, 1, 1], [], []>} : vector<6x3xbf16>, vector<3x272xbf16>, vector<6x272xf32> -> vector<6x272xf32>
    %81 = arith.addf %75, %80 : vector<6x272xf32>
    %c0_86 = arith.constant 0 : index
    %c0_87 = arith.constant 0 : index
    %c1_88 = arith.constant 1 : index
    %82 = vector.load %arg4[%c0_86, %c0_87, %c1_88] : memref<1x3x306xbf16, #tpu.memory_space<vmem>>, vector<1x3x272xbf16>
    %83 = vector.shape_cast %82 : vector<1x3x272xbf16> to vector<3x272xbf16>
    %c5_89 = arith.constant 5 : index
    %c0_90 = arith.constant 0 : index
    %c0_91 = arith.constant 0 : index
    %84 = vector.load %arg5[%c5_89, %c0_90, %c0_91] : memref<9x6x3xbf16, #tpu.memory_space<vmem>>, vector<1x6x3xbf16>
    %85 = vector.shape_cast %84 : vector<1x6x3xbf16> to vector<6x3xbf16>
    %cst_92 = arith.constant dense<0.000000e+00> : vector<6x272xf32>
    %86 = tpu.matmul %85, %83, %cst_92 {dimension_numbers = #tpu.dot_dimension_numbers<[1], [0], [0], [1], [0, 0, 1, 1], [], []>} : vector<6x3xbf16>, vector<3x272xbf16>, vector<6x272xf32> -> vector<6x272xf32>
    %87 = arith.addf %81, %86 : vector<6x272xf32>
    %c0_93 = arith.constant 0 : index
    %c0_94 = arith.constant 0 : index
    %c17_95 = arith.constant 17 : index
    %88 = vector.load %arg2[%c0_93, %c0_94, %c17_95] : memref<1x3x306xbf16, #tpu.memory_space<vmem>>, vector<1x3x272xbf16>
    %89 = vector.shape_cast %88 : vector<1x3x272xbf16> to vector<3x272xbf16>
    %c6_96 = arith.constant 6 : index
    %c0_97 = arith.constant 0 : index
    %c0_98 = arith.constant 0 : index
    %90 = vector.load %arg5[%c6_96, %c0_97, %c0_98] : memref<9x6x3xbf16, #tpu.memory_space<vmem>>, vector<1x6x3xbf16>
    %91 = vector.shape_cast %90 : vector<1x6x3xbf16> to vector<6x3xbf16>
    %cst_99 = arith.constant dense<0.000000e+00> : vector<6x272xf32>
    %92 = tpu.matmul %91, %89, %cst_99 {dimension_numbers = #tpu.dot_dimension_numbers<[1], [0], [0], [1], [0, 0, 1, 1], [], []>} : vector<6x3xbf16>, vector<3x272xbf16>, vector<6x272xf32> -> vector<6x272xf32>
    %93 = arith.addf %87, %92 : vector<6x272xf32>
    %c0_100 = arith.constant 0 : index
    %c0_101 = arith.constant 0 : index
    %c18_102 = arith.constant 18 : index
    %94 = vector.load %arg1[%c0_100, %c0_101, %c18_102] : memref<1x3x306xbf16, #tpu.memory_space<vmem>>, vector<1x3x272xbf16>
    %95 = vector.shape_cast %94 : vector<1x3x272xbf16> to vector<3x272xbf16>
    %c7_103 = arith.constant 7 : index
    %c0_104 = arith.constant 0 : index
    %c0_105 = arith.constant 0 : index
    %96 = vector.load %arg5[%c7_103, %c0_104, %c0_105] : memref<9x6x3xbf16, #tpu.memory_space<vmem>>, vector<1x6x3xbf16>
    %97 = vector.shape_cast %96 : vector<1x6x3xbf16> to vector<6x3xbf16>
    %cst_106 = arith.constant dense<0.000000e+00> : vector<6x272xf32>
    %98 = tpu.matmul %97, %95, %cst_106 {dimension_numbers = #tpu.dot_dimension_numbers<[1], [0], [0], [1], [0, 0, 1, 1], [], []>} : vector<6x3xbf16>, vector<3x272xbf16>, vector<6x272xf32> -> vector<6x272xf32>
    %99 = arith.addf %93, %98 : vector<6x272xf32>
    %c0_107 = arith.constant 0 : index
    %c0_108 = arith.constant 0 : index
    %c18_109 = arith.constant 18 : index
    %100 = vector.load %arg2[%c0_107, %c0_108, %c18_109] : memref<1x3x306xbf16, #tpu.memory_space<vmem>>, vector<1x3x272xbf16>
    %101 = vector.shape_cast %100 : vector<1x3x272xbf16> to vector<3x272xbf16>
    %c8_110 = arith.constant 8 : index
    %c0_111 = arith.constant 0 : index
    %c0_112 = arith.constant 0 : index
    %102 = vector.load %arg5[%c8_110, %c0_111, %c0_112] : memref<9x6x3xbf16, #tpu.memory_space<vmem>>, vector<1x6x3xbf16>
    %103 = vector.shape_cast %102 : vector<1x6x3xbf16> to vector<6x3xbf16>
    %cst_113 = arith.constant dense<0.000000e+00> : vector<6x272xf32>
    %104 = tpu.matmul %103, %101, %cst_113 {dimension_numbers = #tpu.dot_dimension_numbers<[1], [0], [0], [1], [0, 0, 1, 1], [], []>} : vector<6x3xbf16>, vector<3x272xbf16>, vector<6x272xf32> -> vector<6x272xf32>
    %105 = arith.addf %99, %104 : vector<6x272xf32>
    %106 = arith.maximumf %52, %105 : vector<6x272xf32>
    %c0_114 = arith.constant 0 : index
    %c0_115 = arith.constant 0 : index
    %c0_116 = arith.constant 0 : index
    %107 = vector.load %arg3[%c0_114, %c0_115, %c0_116] : memref<1x3x306xbf16, #tpu.memory_space<vmem>>, vector<1x3x272xbf16>
    %108 = vector.shape_cast %107 : vector<1x3x272xbf16> to vector<3x272xbf16>
    %c0_117 = arith.constant 0 : index
    %c0_118 = arith.constant 0 : index
    %c0_119 = arith.constant 0 : index
    %109 = vector.load %arg5[%c0_117, %c0_118, %c0_119] : memref<9x6x3xbf16, #tpu.memory_space<vmem>>, vector<1x6x3xbf16>
    %110 = vector.shape_cast %109 : vector<1x6x3xbf16> to vector<6x3xbf16>
    %cst_120 = arith.constant dense<0.000000e+00> : vector<6x272xf32>
    %111 = tpu.matmul %110, %108, %cst_120 {dimension_numbers = #tpu.dot_dimension_numbers<[1], [0], [0], [1], [0, 0, 1, 1], [], []>} : vector<6x3xbf16>, vector<3x272xbf16>, vector<6x272xf32> -> vector<6x272xf32>
    %c0_121 = arith.constant 0 : index
    %c0_122 = arith.constant 0 : index
    %c0_123 = arith.constant 0 : index
    %112 = vector.load %arg4[%c0_121, %c0_122, %c0_123] : memref<1x3x306xbf16, #tpu.memory_space<vmem>>, vector<1x3x272xbf16>
    %113 = vector.shape_cast %112 : vector<1x3x272xbf16> to vector<3x272xbf16>
    %c1_124 = arith.constant 1 : index
    %c0_125 = arith.constant 0 : index
    %c0_126 = arith.constant 0 : index
    %114 = vector.load %arg5[%c1_124, %c0_125, %c0_126] : memref<9x6x3xbf16, #tpu.memory_space<vmem>>, vector<1x6x3xbf16>
    %115 = vector.shape_cast %114 : vector<1x6x3xbf16> to vector<6x3xbf16>
    %cst_127 = arith.constant dense<0.000000e+00> : vector<6x272xf32>
    %116 = tpu.matmul %115, %113, %cst_127 {dimension_numbers = #tpu.dot_dimension_numbers<[1], [0], [0], [1], [0, 0, 1, 1], [], []>} : vector<6x3xbf16>, vector<3x272xbf16>, vector<6x272xf32> -> vector<6x272xf32>
    %117 = arith.addf %111, %116 : vector<6x272xf32>
    %c0_128 = arith.constant 0 : index
    %c0_129 = arith.constant 0 : index
    %c1_130 = arith.constant 1 : index
    %118 = vector.load %arg3[%c0_128, %c0_129, %c1_130] : memref<1x3x306xbf16, #tpu.memory_space<vmem>>, vector<1x3x272xbf16>
    %119 = vector.shape_cast %118 : vector<1x3x272xbf16> to vector<3x272xbf16>
    %c2_131 = arith.constant 2 : index
    %c0_132 = arith.constant 0 : index
    %c0_133 = arith.constant 0 : index
    %120 = vector.load %arg5[%c2_131, %c0_132, %c0_133] : memref<9x6x3xbf16, #tpu.memory_space<vmem>>, vector<1x6x3xbf16>
    %121 = vector.shape_cast %120 : vector<1x6x3xbf16> to vector<6x3xbf16>
    %cst_134 = arith.constant dense<0.000000e+00> : vector<6x272xf32>
    %122 = tpu.matmul %121, %119, %cst_134 {dimension_numbers = #tpu.dot_dimension_numbers<[1], [0], [0], [1], [0, 0, 1, 1], [], []>} : vector<6x3xbf16>, vector<3x272xbf16>, vector<6x272xf32> -> vector<6x272xf32>
    %123 = arith.addf %117, %122 : vector<6x272xf32>
    %c0_135 = arith.constant 0 : index
    %c0_136 = arith.constant 0 : index
    %c17_137 = arith.constant 17 : index
    %124 = vector.load %arg1[%c0_135, %c0_136, %c17_137] : memref<1x3x306xbf16, #tpu.memory_space<vmem>>, vector<1x3x272xbf16>
    %125 = vector.shape_cast %124 : vector<1x3x272xbf16> to vector<3x272xbf16>
    %c3_138 = arith.constant 3 : index
    %c0_139 = arith.constant 0 : index
    %c0_140 = arith.constant 0 : index
    %126 = vector.load %arg5[%c3_138, %c0_139, %c0_140] : memref<9x6x3xbf16, #tpu.memory_space<vmem>>, vector<1x6x3xbf16>
    %127 = vector.shape_cast %126 : vector<1x6x3xbf16> to vector<6x3xbf16>
    %cst_141 = arith.constant dense<0.000000e+00> : vector<6x272xf32>
    %128 = tpu.matmul %127, %125, %cst_141 {dimension_numbers = #tpu.dot_dimension_numbers<[1], [0], [0], [1], [0, 0, 1, 1], [], []>} : vector<6x3xbf16>, vector<3x272xbf16>, vector<6x272xf32> -> vector<6x272xf32>
    %129 = arith.addf %123, %128 : vector<6x272xf32>
    %c0_142 = arith.constant 0 : index
    %c0_143 = arith.constant 0 : index
    %c17_144 = arith.constant 17 : index
    %130 = vector.load %arg2[%c0_142, %c0_143, %c17_144] : memref<1x3x306xbf16, #tpu.memory_space<vmem>>, vector<1x3x272xbf16>
    %131 = vector.shape_cast %130 : vector<1x3x272xbf16> to vector<3x272xbf16>
    %c4_145 = arith.constant 4 : index
    %c0_146 = arith.constant 0 : index
    %c0_147 = arith.constant 0 : index
    %132 = vector.load %arg5[%c4_145, %c0_146, %c0_147] : memref<9x6x3xbf16, #tpu.memory_space<vmem>>, vector<1x6x3xbf16>
    %133 = vector.shape_cast %132 : vector<1x6x3xbf16> to vector<6x3xbf16>
    %cst_148 = arith.constant dense<0.000000e+00> : vector<6x272xf32>
    %134 = tpu.matmul %133, %131, %cst_148 {dimension_numbers = #tpu.dot_dimension_numbers<[1], [0], [0], [1], [0, 0, 1, 1], [], []>} : vector<6x3xbf16>, vector<3x272xbf16>, vector<6x272xf32> -> vector<6x272xf32>
    %135 = arith.addf %129, %134 : vector<6x272xf32>
    %c0_149 = arith.constant 0 : index
    %c0_150 = arith.constant 0 : index
    %c18_151 = arith.constant 18 : index
    %136 = vector.load %arg1[%c0_149, %c0_150, %c18_151] : memref<1x3x306xbf16, #tpu.memory_space<vmem>>, vector<1x3x272xbf16>
    %137 = vector.shape_cast %136 : vector<1x3x272xbf16> to vector<3x272xbf16>
    %c5_152 = arith.constant 5 : index
    %c0_153 = arith.constant 0 : index
    %c0_154 = arith.constant 0 : index
    %138 = vector.load %arg5[%c5_152, %c0_153, %c0_154] : memref<9x6x3xbf16, #tpu.memory_space<vmem>>, vector<1x6x3xbf16>
    %139 = vector.shape_cast %138 : vector<1x6x3xbf16> to vector<6x3xbf16>
    %cst_155 = arith.constant dense<0.000000e+00> : vector<6x272xf32>
    %140 = tpu.matmul %139, %137, %cst_155 {dimension_numbers = #tpu.dot_dimension_numbers<[1], [0], [0], [1], [0, 0, 1, 1], [], []>} : vector<6x3xbf16>, vector<3x272xbf16>, vector<6x272xf32> -> vector<6x272xf32>
    %141 = arith.addf %135, %140 : vector<6x272xf32>
    %c0_156 = arith.constant 0 : index
    %c0_157 = arith.constant 0 : index
    %c17_158 = arith.constant 17 : index
    %142 = vector.load %arg3[%c0_156, %c0_157, %c17_158] : memref<1x3x306xbf16, #tpu.memory_space<vmem>>, vector<1x3x272xbf16>
    %143 = vector.shape_cast %142 : vector<1x3x272xbf16> to vector<3x272xbf16>
    %c6_159 = arith.constant 6 : index
    %c0_160 = arith.constant 0 : index
    %c0_161 = arith.constant 0 : index
    %144 = vector.load %arg5[%c6_159, %c0_160, %c0_161] : memref<9x6x3xbf16, #tpu.memory_space<vmem>>, vector<1x6x3xbf16>
    %145 = vector.shape_cast %144 : vector<1x6x3xbf16> to vector<6x3xbf16>
    %cst_162 = arith.constant dense<0.000000e+00> : vector<6x272xf32>
    %146 = tpu.matmul %145, %143, %cst_162 {dimension_numbers = #tpu.dot_dimension_numbers<[1], [0], [0], [1], [0, 0, 1, 1], [], []>} : vector<6x3xbf16>, vector<3x272xbf16>, vector<6x272xf32> -> vector<6x272xf32>
    %147 = arith.addf %141, %146 : vector<6x272xf32>
    %c0_163 = arith.constant 0 : index
    %c0_164 = arith.constant 0 : index
    %c17_165 = arith.constant 17 : index
    %148 = vector.load %arg4[%c0_163, %c0_164, %c17_165] : memref<1x3x306xbf16, #tpu.memory_space<vmem>>, vector<1x3x272xbf16>
    %149 = vector.shape_cast %148 : vector<1x3x272xbf16> to vector<3x272xbf16>
    %c7_166 = arith.constant 7 : index
    %c0_167 = arith.constant 0 : index
    %c0_168 = arith.constant 0 : index
    %150 = vector.load %arg5[%c7_166, %c0_167, %c0_168] : memref<9x6x3xbf16, #tpu.memory_space<vmem>>, vector<1x6x3xbf16>
    %151 = vector.shape_cast %150 : vector<1x6x3xbf16> to vector<6x3xbf16>
    %cst_169 = arith.constant dense<0.000000e+00> : vector<6x272xf32>
    %152 = tpu.matmul %151, %149, %cst_169 {dimension_numbers = #tpu.dot_dimension_numbers<[1], [0], [0], [1], [0, 0, 1, 1], [], []>} : vector<6x3xbf16>, vector<3x272xbf16>, vector<6x272xf32> -> vector<6x272xf32>
    %153 = arith.addf %147, %152 : vector<6x272xf32>
    %c0_170 = arith.constant 0 : index
    %c0_171 = arith.constant 0 : index
    %c18_172 = arith.constant 18 : index
    %154 = vector.load %arg3[%c0_170, %c0_171, %c18_172] : memref<1x3x306xbf16, #tpu.memory_space<vmem>>, vector<1x3x272xbf16>
    %155 = vector.shape_cast %154 : vector<1x3x272xbf16> to vector<3x272xbf16>
    %c8_173 = arith.constant 8 : index
    %c0_174 = arith.constant 0 : index
    %c0_175 = arith.constant 0 : index
    %156 = vector.load %arg5[%c8_173, %c0_174, %c0_175] : memref<9x6x3xbf16, #tpu.memory_space<vmem>>, vector<1x6x3xbf16>
    %157 = vector.shape_cast %156 : vector<1x6x3xbf16> to vector<6x3xbf16>
    %cst_176 = arith.constant dense<0.000000e+00> : vector<6x272xf32>
    %158 = tpu.matmul %157, %155, %cst_176 {dimension_numbers = #tpu.dot_dimension_numbers<[1], [0], [0], [1], [0, 0, 1, 1], [], []>} : vector<6x3xbf16>, vector<3x272xbf16>, vector<6x272xf32> -> vector<6x272xf32>
    %159 = arith.addf %153, %158 : vector<6x272xf32>
    %160 = arith.maximumf %106, %159 : vector<6x272xf32>
    %c0_177 = arith.constant 0 : index
    %c0_178 = arith.constant 0 : index
    %c0_179 = arith.constant 0 : index
    %161 = vector.load %arg4[%c0_177, %c0_178, %c0_179] : memref<1x3x306xbf16, #tpu.memory_space<vmem>>, vector<1x3x272xbf16>
    %162 = vector.shape_cast %161 : vector<1x3x272xbf16> to vector<3x272xbf16>
    %c0_180 = arith.constant 0 : index
    %c0_181 = arith.constant 0 : index
    %c0_182 = arith.constant 0 : index
    %163 = vector.load %arg5[%c0_180, %c0_181, %c0_182] : memref<9x6x3xbf16, #tpu.memory_space<vmem>>, vector<1x6x3xbf16>
    %164 = vector.shape_cast %163 : vector<1x6x3xbf16> to vector<6x3xbf16>
    %cst_183 = arith.constant dense<0.000000e+00> : vector<6x272xf32>
    %165 = tpu.matmul %164, %162, %cst_183 {dimension_numbers = #tpu.dot_dimension_numbers<[1], [0], [0], [1], [0, 0, 1, 1], [], []>} : vector<6x3xbf16>, vector<3x272xbf16>, vector<6x272xf32> -> vector<6x272xf32>
    %c0_184 = arith.constant 0 : index
    %c0_185 = arith.constant 0 : index
    %c1_186 = arith.constant 1 : index
    %166 = vector.load %arg3[%c0_184, %c0_185, %c1_186] : memref<1x3x306xbf16, #tpu.memory_space<vmem>>, vector<1x3x272xbf16>
    %167 = vector.shape_cast %166 : vector<1x3x272xbf16> to vector<3x272xbf16>
    %c1_187 = arith.constant 1 : index
    %c0_188 = arith.constant 0 : index
    %c0_189 = arith.constant 0 : index
    %168 = vector.load %arg5[%c1_187, %c0_188, %c0_189] : memref<9x6x3xbf16, #tpu.memory_space<vmem>>, vector<1x6x3xbf16>
    %169 = vector.shape_cast %168 : vector<1x6x3xbf16> to vector<6x3xbf16>
    %cst_190 = arith.constant dense<0.000000e+00> : vector<6x272xf32>
    %170 = tpu.matmul %169, %167, %cst_190 {dimension_numbers = #tpu.dot_dimension_numbers<[1], [0], [0], [1], [0, 0, 1, 1], [], []>} : vector<6x3xbf16>, vector<3x272xbf16>, vector<6x272xf32> -> vector<6x272xf32>
    %171 = arith.addf %165, %170 : vector<6x272xf32>
    %c0_191 = arith.constant 0 : index
    %c0_192 = arith.constant 0 : index
    %c1_193 = arith.constant 1 : index
    %172 = vector.load %arg4[%c0_191, %c0_192, %c1_193] : memref<1x3x306xbf16, #tpu.memory_space<vmem>>, vector<1x3x272xbf16>
    %173 = vector.shape_cast %172 : vector<1x3x272xbf16> to vector<3x272xbf16>
    %c2_194 = arith.constant 2 : index
    %c0_195 = arith.constant 0 : index
    %c0_196 = arith.constant 0 : index
    %174 = vector.load %arg5[%c2_194, %c0_195, %c0_196] : memref<9x6x3xbf16, #tpu.memory_space<vmem>>, vector<1x6x3xbf16>
    %175 = vector.shape_cast %174 : vector<1x6x3xbf16> to vector<6x3xbf16>
    %cst_197 = arith.constant dense<0.000000e+00> : vector<6x272xf32>
    %176 = tpu.matmul %175, %173, %cst_197 {dimension_numbers = #tpu.dot_dimension_numbers<[1], [0], [0], [1], [0, 0, 1, 1], [], []>} : vector<6x3xbf16>, vector<3x272xbf16>, vector<6x272xf32> -> vector<6x272xf32>
    %177 = arith.addf %171, %176 : vector<6x272xf32>
    %c0_198 = arith.constant 0 : index
    %c0_199 = arith.constant 0 : index
    %c17_200 = arith.constant 17 : index
    %178 = vector.load %arg2[%c0_198, %c0_199, %c17_200] : memref<1x3x306xbf16, #tpu.memory_space<vmem>>, vector<1x3x272xbf16>
    %179 = vector.shape_cast %178 : vector<1x3x272xbf16> to vector<3x272xbf16>
    %c3_201 = arith.constant 3 : index
    %c0_202 = arith.constant 0 : index
    %c0_203 = arith.constant 0 : index
    %180 = vector.load %arg5[%c3_201, %c0_202, %c0_203] : memref<9x6x3xbf16, #tpu.memory_space<vmem>>, vector<1x6x3xbf16>
    %181 = vector.shape_cast %180 : vector<1x6x3xbf16> to vector<6x3xbf16>
    %cst_204 = arith.constant dense<0.000000e+00> : vector<6x272xf32>
    %182 = tpu.matmul %181, %179, %cst_204 {dimension_numbers = #tpu.dot_dimension_numbers<[1], [0], [0], [1], [0, 0, 1, 1], [], []>} : vector<6x3xbf16>, vector<3x272xbf16>, vector<6x272xf32> -> vector<6x272xf32>
    %183 = arith.addf %177, %182 : vector<6x272xf32>
    %c0_205 = arith.constant 0 : index
    %c0_206 = arith.constant 0 : index
    %c18_207 = arith.constant 18 : index
    %184 = vector.load %arg1[%c0_205, %c0_206, %c18_207] : memref<1x3x306xbf16, #tpu.memory_space<vmem>>, vector<1x3x272xbf16>
    %185 = vector.shape_cast %184 : vector<1x3x272xbf16> to vector<3x272xbf16>
    %c4_208 = arith.constant 4 : index
    %c0_209 = arith.constant 0 : index
    %c0_210 = arith.constant 0 : index
    %186 = vector.load %arg5[%c4_208, %c0_209, %c0_210] : memref<9x6x3xbf16, #tpu.memory_space<vmem>>, vector<1x6x3xbf16>
    %187 = vector.shape_cast %186 : vector<1x6x3xbf16> to vector<6x3xbf16>
    %cst_211 = arith.constant dense<0.000000e+00> : vector<6x272xf32>
    %188 = tpu.matmul %187, %185, %cst_211 {dimension_numbers = #tpu.dot_dimension_numbers<[1], [0], [0], [1], [0, 0, 1, 1], [], []>} : vector<6x3xbf16>, vector<3x272xbf16>, vector<6x272xf32> -> vector<6x272xf32>
    %189 = arith.addf %183, %188 : vector<6x272xf32>
    %c0_212 = arith.constant 0 : index
    %c0_213 = arith.constant 0 : index
    %c18_214 = arith.constant 18 : index
    %190 = vector.load %arg2[%c0_212, %c0_213, %c18_214] : memref<1x3x306xbf16, #tpu.memory_space<vmem>>, vector<1x3x272xbf16>
    %191 = vector.shape_cast %190 : vector<1x3x272xbf16> to vector<3x272xbf16>
    %c5_215 = arith.constant 5 : index
    %c0_216 = arith.constant 0 : index
    %c0_217 = arith.constant 0 : index
    %192 = vector.load %arg5[%c5_215, %c0_216, %c0_217] : memref<9x6x3xbf16, #tpu.memory_space<vmem>>, vector<1x6x3xbf16>
    %193 = vector.shape_cast %192 : vector<1x6x3xbf16> to vector<6x3xbf16>
    %cst_218 = arith.constant dense<0.000000e+00> : vector<6x272xf32>
    %194 = tpu.matmul %193, %191, %cst_218 {dimension_numbers = #tpu.dot_dimension_numbers<[1], [0], [0], [1], [0, 0, 1, 1], [], []>} : vector<6x3xbf16>, vector<3x272xbf16>, vector<6x272xf32> -> vector<6x272xf32>
    %195 = arith.addf %189, %194 : vector<6x272xf32>
    %c0_219 = arith.constant 0 : index
    %c0_220 = arith.constant 0 : index
    %c17_221 = arith.constant 17 : index
    %196 = vector.load %arg4[%c0_219, %c0_220, %c17_221] : memref<1x3x306xbf16, #tpu.memory_space<vmem>>, vector<1x3x272xbf16>
    %197 = vector.shape_cast %196 : vector<1x3x272xbf16> to vector<3x272xbf16>
    %c6_222 = arith.constant 6 : index
    %c0_223 = arith.constant 0 : index
    %c0_224 = arith.constant 0 : index
    %198 = vector.load %arg5[%c6_222, %c0_223, %c0_224] : memref<9x6x3xbf16, #tpu.memory_space<vmem>>, vector<1x6x3xbf16>
    %199 = vector.shape_cast %198 : vector<1x6x3xbf16> to vector<6x3xbf16>
    %cst_225 = arith.constant dense<0.000000e+00> : vector<6x272xf32>
    %200 = tpu.matmul %199, %197, %cst_225 {dimension_numbers = #tpu.dot_dimension_numbers<[1], [0], [0], [1], [0, 0, 1, 1], [], []>} : vector<6x3xbf16>, vector<3x272xbf16>, vector<6x272xf32> -> vector<6x272xf32>
    %201 = arith.addf %195, %200 : vector<6x272xf32>
    %c0_226 = arith.constant 0 : index
    %c0_227 = arith.constant 0 : index
    %c18_228 = arith.constant 18 : index
    %202 = vector.load %arg3[%c0_226, %c0_227, %c18_228] : memref<1x3x306xbf16, #tpu.memory_space<vmem>>, vector<1x3x272xbf16>
    %203 = vector.shape_cast %202 : vector<1x3x272xbf16> to vector<3x272xbf16>
    %c7_229 = arith.constant 7 : index
    %c0_230 = arith.constant 0 : index
    %c0_231 = arith.constant 0 : index
    %204 = vector.load %arg5[%c7_229, %c0_230, %c0_231] : memref<9x6x3xbf16, #tpu.memory_space<vmem>>, vector<1x6x3xbf16>
    %205 = vector.shape_cast %204 : vector<1x6x3xbf16> to vector<6x3xbf16>
    %cst_232 = arith.constant dense<0.000000e+00> : vector<6x272xf32>
    %206 = tpu.matmul %205, %203, %cst_232 {dimension_numbers = #tpu.dot_dimension_numbers<[1], [0], [0], [1], [0, 0, 1, 1], [], []>} : vector<6x3xbf16>, vector<3x272xbf16>, vector<6x272xf32> -> vector<6x272xf32>
    %207 = arith.addf %201, %206 : vector<6x272xf32>
    %c0_233 = arith.constant 0 : index
    %c0_234 = arith.constant 0 : index
    %c18_235 = arith.constant 18 : index
    %208 = vector.load %arg4[%c0_233, %c0_234, %c18_235] : memref<1x3x306xbf16, #tpu.memory_space<vmem>>, vector<1x3x272xbf16>
    %209 = vector.shape_cast %208 : vector<1x3x272xbf16> to vector<3x272xbf16>
    %c8_236 = arith.constant 8 : index
    %c0_237 = arith.constant 0 : index
    %c0_238 = arith.constant 0 : index
    %210 = vector.load %arg5[%c8_236, %c0_237, %c0_238] : memref<9x6x3xbf16, #tpu.memory_space<vmem>>, vector<1x6x3xbf16>
    %211 = vector.shape_cast %210 : vector<1x6x3xbf16> to vector<6x3xbf16>
    %cst_239 = arith.constant dense<0.000000e+00> : vector<6x272xf32>
    %212 = tpu.matmul %211, %209, %cst_239 {dimension_numbers = #tpu.dot_dimension_numbers<[1], [0], [0], [1], [0, 0, 1, 1], [], []>} : vector<6x3xbf16>, vector<3x272xbf16>, vector<6x272xf32> -> vector<6x272xf32>
    %213 = arith.addf %207, %212 : vector<6x272xf32>
    %214 = arith.maximumf %160, %213 : vector<6x272xf32>
    %c0_240 = arith.constant 0 : index
    %c0_241 = arith.constant 0 : index
    %215 = vector.load %arg6[%c0_240, %c0_241] : memref<6x1xf32, #tpu.memory_space<vmem>>, vector<6x1xf32>
    %216 = vector.broadcast %215 : vector<6x1xf32> to vector<6x272xf32>
    %217 = arith.addf %214, %216 : vector<6x272xf32>
    %cst_242 = arith.constant 0.000000e+00 : f32
    %218 = vector.broadcast %cst_242 : f32 to vector<6x272xf32>
    %219 = arith.maximumf %217, %218 : vector<6x272xf32>
    %220 = tpu.iota {dimensions = array<i32: 1>} : vector<6x272xi32>
    %c17_i32 = arith.constant 17 : i32
    %c0_i32 = arith.constant 0 : i32
    %221 = arith.cmpi eq, %c17_i32, %c0_i32 : i32
    %c1_i32 = arith.constant 1 : i32
    %222 = arith.select %221, %c1_i32, %c17_i32 : i32
    %223 = vector.broadcast %222 : i32 to vector<6x272xi32>
    %224 = arith.remsi %220, %223 : vector<6x272xi32>
    %c0_i32_243 = arith.constant 0 : i32
    %225 = vector.broadcast %c0_i32_243 : i32 to vector<6x272xi32>
    %226 = arith.cmpi ne, %224, %225 : vector<6x272xi32>
    %c0_i32_244 = arith.constant 0 : i32
    %227 = vector.broadcast %c0_i32_244 : i32 to vector<6x272xi32>
    %228 = arith.cmpi slt, %224, %227 : vector<6x272xi32>
    %c0_i32_245 = arith.constant 0 : i32
    %229 = arith.cmpi slt, %222, %c0_i32_245 : i32
    %230 = vector.broadcast %229 : i1 to vector<6x272xi1>
    %231 = vector.broadcast %230 : vector<6x272xi1> to vector<6x272xi1>
    %232 = arith.xori %228, %231 : vector<6x272xi1>
    %233 = arith.andi %232, %226 : vector<6x272xi1>
    %234 = vector.broadcast %222 : i32 to vector<6x272xi32>
    %235 = arith.addi %224, %234 : vector<6x272xi32>
    %236 = arith.select %233, %235, %224 : vector<6x272xi1>, vector<6x272xi32>
    %c16_i32 = arith.constant 16 : i32
    %237 = vector.broadcast %c16_i32 : i32 to vector<6x272xi32>
    %238 = arith.cmpi eq, %236, %237 : vector<6x272xi32>
    %cst_246 = arith.constant 0.000000e+00 : f32
    %239 = vector.broadcast %cst_246 : f32 to vector<6x272xf32>
    %240 = arith.select %238, %239, %219 : vector<6x272xi1>, vector<6x272xf32>
    %241 = arith.truncf %240 : vector<6x272xf32> to vector<6x272xbf16>
    %c0_247 = arith.constant 0 : index
    %c0_248 = arith.constant 0 : index
    %c0_249 = arith.constant 0 : index
    %242 = vector.load %arg7[%c0_247, %c0_248, %c0_249] : memref<1x6x272xbf16, #tpu.memory_space<vmem>>, vector<1x6x272xbf16>
    %243 = vector.shape_cast %242 : vector<1x6x272xbf16> to vector<6x272xbf16>
    %244 = vector.shape_cast %241 : vector<6x272xbf16> to vector<1x6x272xbf16>
    tpu.vector_store %arg7[%c0_247, %c0_248, %c0_249], %244 {strides = array<i32>} : memref<1x6x272xbf16, #tpu.memory_space<vmem>>, vector<1x6x272xbf16>,
    return
  }
  func.func @transform_0(%arg0: i32) -> (i32, i32, i32) {
    %c0_i32 = arith.constant 0 : i32
    %c0_i32_0 = arith.constant 0 : i32
    %c0_i32_1 = arith.constant 0 : i32
    return %arg0, %c0_i32, %c0_i32_0 : i32, i32, i32
  }
  func.func @transform_1(%arg0: i32) -> (i32, i32, i32) {
    %c0_i32 = arith.constant 0 : i32
    %c0_i32_0 = arith.constant 0 : i32
    %c0_i32_1 = arith.constant 0 : i32
    return %arg0, %c0_i32, %c0_i32_0 : i32, i32, i32
  }
  func.func @transform_2(%arg0: i32) -> (i32, i32, i32) {
    %c0_i32 = arith.constant 0 : i32
    %c0_i32_0 = arith.constant 0 : i32
    %c0_i32_1 = arith.constant 0 : i32
    return %arg0, %c0_i32, %c0_i32_0 : i32, i32, i32
  }
  func.func @transform_3(%arg0: i32) -> (i32, i32, i32) {
    %c0_i32 = arith.constant 0 : i32
    %c0_i32_0 = arith.constant 0 : i32
    %c0_i32_1 = arith.constant 0 : i32
    return %arg0, %c0_i32, %c0_i32_0 : i32, i32, i32
  }
  func.func @transform_4(%arg0: i32) -> (i32, i32, i32) {
    %c0_i32 = arith.constant 0 : i32
    %c0_i32_0 = arith.constant 0 : i32
    %c0_i32_1 = arith.constant 0 : i32
    %c0_i32_2 = arith.constant 0 : i32
    return %c0_i32, %c0_i32_0, %c0_i32_1 : i32, i32, i32
  }
  func.func @transform_5(%arg0: i32) -> (i32, i32) {
    %c0_i32 = arith.constant 0 : i32
    %c0_i32_0 = arith.constant 0 : i32
    %c0_i32_1 = arith.constant 0 : i32
    return %c0_i32, %c0_i32_0 : i32, i32
  }
  func.func @transform_6(%arg0: i32) -> (i32, i32, i32) {
    %c0_i32 = arith.constant 0 : i32
    %c0_i32_0 = arith.constant 0 : i32
    %c0_i32_1 = arith.constant 0 : i32
    return %arg0, %c0_i32, %c0_i32_0 : i32, i32, i32
  }
}

module attributes {stable_mosaic.version = 11 : i64} {
  func.func @_conv3x3_pool_relu_kernel(%arg0: i32, %arg1: memref<1x6x90xbf16, #tpu.memory_space<vmem>>, %arg2: memref<1x6x90xbf16, #tpu.memory_space<vmem>>, %arg3: memref<1x6x90xbf16, #tpu.memory_space<vmem>>, %arg4: memref<1x6x90xbf16, #tpu.memory_space<vmem>>, %arg5: memref<9x12x6xbf16, #tpu.memory_space<vmem>>, %arg6: memref<12x1xf32, #tpu.memory_space<vmem>>, %arg7: memref<1x12x72xbf16, #tpu.memory_space<vmem>>) attributes {dimension_semantics = [#tpu.dimension_semantics<parallel>], iteration_bounds = array<i64: 2>, scalar_prefetch = 0 : i64, scratch_operands = 0 : i64, tpu.core_type = #tpu.core_type<tc>, window_params = [{transform_indices = @transform_0, window_bounds = array<i64: 1, 6, 90>}, {transform_indices = @transform_1, window_bounds = array<i64: 1, 6, 90>}, {transform_indices = @transform_2, window_bounds = array<i64: 1, 6, 90>}, {transform_indices = @transform_3, window_bounds = array<i64: 1, 6, 90>}, {pipeline_mode = #tpu.pipeline_mode<synchronous>, transform_indices = @transform_4, window_bounds = array<i64: 9, 12, 6>}, {pipeline_mode = #tpu.pipeline_mode<synchronous>, transform_indices = @transform_5, window_bounds = array<i64: 12, 1>}, {transform_indices = @transform_6, window_bounds = array<i64: 1, 12, 72>}]} {
    %c0 = arith.constant 0 : index
    %c0_0 = arith.constant 0 : index
    %c0_1 = arith.constant 0 : index
    %0 = vector.load %arg1[%c0, %c0_0, %c0_1] : memref<1x6x90xbf16, #tpu.memory_space<vmem>>, vector<1x6x72xbf16>
    %1 = vector.shape_cast %0 : vector<1x6x72xbf16> to vector<6x72xbf16>
    %c0_2 = arith.constant 0 : index
    %c0_3 = arith.constant 0 : index
    %c0_4 = arith.constant 0 : index
    %2 = vector.load %arg5[%c0_2, %c0_3, %c0_4] : memref<9x12x6xbf16, #tpu.memory_space<vmem>>, vector<1x12x6xbf16>
    %3 = vector.shape_cast %2 : vector<1x12x6xbf16> to vector<12x6xbf16>
    %cst = arith.constant dense<0.000000e+00> : vector<12x72xf32>
    %4 = tpu.matmul %3, %1, %cst {dimension_numbers = #tpu.dot_dimension_numbers<[1], [0], [0], [1], [0, 0, 1, 1], [], []>} : vector<12x6xbf16>, vector<6x72xbf16>, vector<12x72xf32> -> vector<12x72xf32>
    %c0_5 = arith.constant 0 : index
    %c0_6 = arith.constant 0 : index
    %c0_7 = arith.constant 0 : index
    %5 = vector.load %arg2[%c0_5, %c0_6, %c0_7] : memref<1x6x90xbf16, #tpu.memory_space<vmem>>, vector<1x6x72xbf16>
    %6 = vector.shape_cast %5 : vector<1x6x72xbf16> to vector<6x72xbf16>
    %c1 = arith.constant 1 : index
    %c0_8 = arith.constant 0 : index
    %c0_9 = arith.constant 0 : index
    %7 = vector.load %arg5[%c1, %c0_8, %c0_9] : memref<9x12x6xbf16, #tpu.memory_space<vmem>>, vector<1x12x6xbf16>
    %8 = vector.shape_cast %7 : vector<1x12x6xbf16> to vector<12x6xbf16>
    %cst_10 = arith.constant dense<0.000000e+00> : vector<12x72xf32>
    %9 = tpu.matmul %8, %6, %cst_10 {dimension_numbers = #tpu.dot_dimension_numbers<[1], [0], [0], [1], [0, 0, 1, 1], [], []>} : vector<12x6xbf16>, vector<6x72xbf16>, vector<12x72xf32> -> vector<12x72xf32>
    %10 = arith.addf %4, %9 : vector<12x72xf32>
    %c0_11 = arith.constant 0 : index
    %c0_12 = arith.constant 0 : index
    %c1_13 = arith.constant 1 : index
    %11 = vector.load %arg1[%c0_11, %c0_12, %c1_13] : memref<1x6x90xbf16, #tpu.memory_space<vmem>>, vector<1x6x72xbf16>
    %12 = vector.shape_cast %11 : vector<1x6x72xbf16> to vector<6x72xbf16>
    %c2 = arith.constant 2 : index
    %c0_14 = arith.constant 0 : index
    %c0_15 = arith.constant 0 : index
    %13 = vector.load %arg5[%c2, %c0_14, %c0_15] : memref<9x12x6xbf16, #tpu.memory_space<vmem>>, vector<1x12x6xbf16>
    %14 = vector.shape_cast %13 : vector<1x12x6xbf16> to vector<12x6xbf16>
    %cst_16 = arith.constant dense<0.000000e+00> : vector<12x72xf32>
    %15 = tpu.matmul %14, %12, %cst_16 {dimension_numbers = #tpu.dot_dimension_numbers<[1], [0], [0], [1], [0, 0, 1, 1], [], []>} : vector<12x6xbf16>, vector<6x72xbf16>, vector<12x72xf32> -> vector<12x72xf32>
    %16 = arith.addf %10, %15 : vector<12x72xf32>
    %c0_17 = arith.constant 0 : index
    %c0_18 = arith.constant 0 : index
    %c0_19 = arith.constant 0 : index
    %17 = vector.load %arg3[%c0_17, %c0_18, %c0_19] : memref<1x6x90xbf16, #tpu.memory_space<vmem>>, vector<1x6x72xbf16>
    %18 = vector.shape_cast %17 : vector<1x6x72xbf16> to vector<6x72xbf16>
    %c3 = arith.constant 3 : index
    %c0_20 = arith.constant 0 : index
    %c0_21 = arith.constant 0 : index
    %19 = vector.load %arg5[%c3, %c0_20, %c0_21] : memref<9x12x6xbf16, #tpu.memory_space<vmem>>, vector<1x12x6xbf16>
    %20 = vector.shape_cast %19 : vector<1x12x6xbf16> to vector<12x6xbf16>
    %cst_22 = arith.constant dense<0.000000e+00> : vector<12x72xf32>
    %21 = tpu.matmul %20, %18, %cst_22 {dimension_numbers = #tpu.dot_dimension_numbers<[1], [0], [0], [1], [0, 0, 1, 1], [], []>} : vector<12x6xbf16>, vector<6x72xbf16>, vector<12x72xf32> -> vector<12x72xf32>
    %22 = arith.addf %16, %21 : vector<12x72xf32>
    %c0_23 = arith.constant 0 : index
    %c0_24 = arith.constant 0 : index
    %c0_25 = arith.constant 0 : index
    %23 = vector.load %arg4[%c0_23, %c0_24, %c0_25] : memref<1x6x90xbf16, #tpu.memory_space<vmem>>, vector<1x6x72xbf16>
    %24 = vector.shape_cast %23 : vector<1x6x72xbf16> to vector<6x72xbf16>
    %c4 = arith.constant 4 : index
    %c0_26 = arith.constant 0 : index
    %c0_27 = arith.constant 0 : index
    %25 = vector.load %arg5[%c4, %c0_26, %c0_27] : memref<9x12x6xbf16, #tpu.memory_space<vmem>>, vector<1x12x6xbf16>
    %26 = vector.shape_cast %25 : vector<1x12x6xbf16> to vector<12x6xbf16>
    %cst_28 = arith.constant dense<0.000000e+00> : vector<12x72xf32>
    %27 = tpu.matmul %26, %24, %cst_28 {dimension_numbers = #tpu.dot_dimension_numbers<[1], [0], [0], [1], [0, 0, 1, 1], [], []>} : vector<12x6xbf16>, vector<6x72xbf16>, vector<12x72xf32> -> vector<12x72xf32>
    %28 = arith.addf %22, %27 : vector<12x72xf32>
    %c0_29 = arith.constant 0 : index
    %c0_30 = arith.constant 0 : index
    %c1_31 = arith.constant 1 : index
    %29 = vector.load %arg3[%c0_29, %c0_30, %c1_31] : memref<1x6x90xbf16, #tpu.memory_space<vmem>>, vector<1x6x72xbf16>
    %30 = vector.shape_cast %29 : vector<1x6x72xbf16> to vector<6x72xbf16>
    %c5 = arith.constant 5 : index
    %c0_32 = arith.constant 0 : index
    %c0_33 = arith.constant 0 : index
    %31 = vector.load %arg5[%c5, %c0_32, %c0_33] : memref<9x12x6xbf16, #tpu.memory_space<vmem>>, vector<1x12x6xbf16>
    %32 = vector.shape_cast %31 : vector<1x12x6xbf16> to vector<12x6xbf16>
    %cst_34 = arith.constant dense<0.000000e+00> : vector<12x72xf32>
    %33 = tpu.matmul %32, %30, %cst_34 {dimension_numbers = #tpu.dot_dimension_numbers<[1], [0], [0], [1], [0, 0, 1, 1], [], []>} : vector<12x6xbf16>, vector<6x72xbf16>, vector<12x72xf32> -> vector<12x72xf32>
    %34 = arith.addf %28, %33 : vector<12x72xf32>
    %c0_35 = arith.constant 0 : index
    %c0_36 = arith.constant 0 : index
    %c9 = arith.constant 9 : index
    %35 = vector.load %arg1[%c0_35, %c0_36, %c9] : memref<1x6x90xbf16, #tpu.memory_space<vmem>>, vector<1x6x72xbf16>
    %36 = vector.shape_cast %35 : vector<1x6x72xbf16> to vector<6x72xbf16>
    %c6 = arith.constant 6 : index
    %c0_37 = arith.constant 0 : index
    %c0_38 = arith.constant 0 : index
    %37 = vector.load %arg5[%c6, %c0_37, %c0_38] : memref<9x12x6xbf16, #tpu.memory_space<vmem>>, vector<1x12x6xbf16>
    %38 = vector.shape_cast %37 : vector<1x12x6xbf16> to vector<12x6xbf16>
    %cst_39 = arith.constant dense<0.000000e+00> : vector<12x72xf32>
    %39 = tpu.matmul %38, %36, %cst_39 {dimension_numbers = #tpu.dot_dimension_numbers<[1], [0], [0], [1], [0, 0, 1, 1], [], []>} : vector<12x6xbf16>, vector<6x72xbf16>, vector<12x72xf32> -> vector<12x72xf32>
    %40 = arith.addf %34, %39 : vector<12x72xf32>
    %c0_40 = arith.constant 0 : index
    %c0_41 = arith.constant 0 : index
    %c9_42 = arith.constant 9 : index
    %41 = vector.load %arg2[%c0_40, %c0_41, %c9_42] : memref<1x6x90xbf16, #tpu.memory_space<vmem>>, vector<1x6x72xbf16>
    %42 = vector.shape_cast %41 : vector<1x6x72xbf16> to vector<6x72xbf16>
    %c7 = arith.constant 7 : index
    %c0_43 = arith.constant 0 : index
    %c0_44 = arith.constant 0 : index
    %43 = vector.load %arg5[%c7, %c0_43, %c0_44] : memref<9x12x6xbf16, #tpu.memory_space<vmem>>, vector<1x12x6xbf16>
    %44 = vector.shape_cast %43 : vector<1x12x6xbf16> to vector<12x6xbf16>
    %cst_45 = arith.constant dense<0.000000e+00> : vector<12x72xf32>
    %45 = tpu.matmul %44, %42, %cst_45 {dimension_numbers = #tpu.dot_dimension_numbers<[1], [0], [0], [1], [0, 0, 1, 1], [], []>} : vector<12x6xbf16>, vector<6x72xbf16>, vector<12x72xf32> -> vector<12x72xf32>
    %46 = arith.addf %40, %45 : vector<12x72xf32>
    %c0_46 = arith.constant 0 : index
    %c0_47 = arith.constant 0 : index
    %c10 = arith.constant 10 : index
    %47 = vector.load %arg1[%c0_46, %c0_47, %c10] : memref<1x6x90xbf16, #tpu.memory_space<vmem>>, vector<1x6x72xbf16>
    %48 = vector.shape_cast %47 : vector<1x6x72xbf16> to vector<6x72xbf16>
    %c8 = arith.constant 8 : index
    %c0_48 = arith.constant 0 : index
    %c0_49 = arith.constant 0 : index
    %49 = vector.load %arg5[%c8, %c0_48, %c0_49] : memref<9x12x6xbf16, #tpu.memory_space<vmem>>, vector<1x12x6xbf16>
    %50 = vector.shape_cast %49 : vector<1x12x6xbf16> to vector<12x6xbf16>
    %cst_50 = arith.constant dense<0.000000e+00> : vector<12x72xf32>
    %51 = tpu.matmul %50, %48, %cst_50 {dimension_numbers = #tpu.dot_dimension_numbers<[1], [0], [0], [1], [0, 0, 1, 1], [], []>} : vector<12x6xbf16>, vector<6x72xbf16>, vector<12x72xf32> -> vector<12x72xf32>
    %52 = arith.addf %46, %51 : vector<12x72xf32>
    %c0_51 = arith.constant 0 : index
    %c0_52 = arith.constant 0 : index
    %c0_53 = arith.constant 0 : index
    %53 = vector.load %arg2[%c0_51, %c0_52, %c0_53] : memref<1x6x90xbf16, #tpu.memory_space<vmem>>, vector<1x6x72xbf16>
    %54 = vector.shape_cast %53 : vector<1x6x72xbf16> to vector<6x72xbf16>
    %c0_54 = arith.constant 0 : index
    %c0_55 = arith.constant 0 : index
    %c0_56 = arith.constant 0 : index
    %55 = vector.load %arg5[%c0_54, %c0_55, %c0_56] : memref<9x12x6xbf16, #tpu.memory_space<vmem>>, vector<1x12x6xbf16>
    %56 = vector.shape_cast %55 : vector<1x12x6xbf16> to vector<12x6xbf16>
    %cst_57 = arith.constant dense<0.000000e+00> : vector<12x72xf32>
    %57 = tpu.matmul %56, %54, %cst_57 {dimension_numbers = #tpu.dot_dimension_numbers<[1], [0], [0], [1], [0, 0, 1, 1], [], []>} : vector<12x6xbf16>, vector<6x72xbf16>, vector<12x72xf32> -> vector<12x72xf32>
    %c0_58 = arith.constant 0 : index
    %c0_59 = arith.constant 0 : index
    %c1_60 = arith.constant 1 : index
    %58 = vector.load %arg1[%c0_58, %c0_59, %c1_60] : memref<1x6x90xbf16, #tpu.memory_space<vmem>>, vector<1x6x72xbf16>
    %59 = vector.shape_cast %58 : vector<1x6x72xbf16> to vector<6x72xbf16>
    %c1_61 = arith.constant 1 : index
    %c0_62 = arith.constant 0 : index
    %c0_63 = arith.constant 0 : index
    %60 = vector.load %arg5[%c1_61, %c0_62, %c0_63] : memref<9x12x6xbf16, #tpu.memory_space<vmem>>, vector<1x12x6xbf16>
    %61 = vector.shape_cast %60 : vector<1x12x6xbf16> to vector<12x6xbf16>
    %cst_64 = arith.constant dense<0.000000e+00> : vector<12x72xf32>
    %62 = tpu.matmul %61, %59, %cst_64 {dimension_numbers = #tpu.dot_dimension_numbers<[1], [0], [0], [1], [0, 0, 1, 1], [], []>} : vector<12x6xbf16>, vector<6x72xbf16>, vector<12x72xf32> -> vector<12x72xf32>
    %63 = arith.addf %57, %62 : vector<12x72xf32>
    %c0_65 = arith.constant 0 : index
    %c0_66 = arith.constant 0 : index
    %c1_67 = arith.constant 1 : index
    %64 = vector.load %arg2[%c0_65, %c0_66, %c1_67] : memref<1x6x90xbf16, #tpu.memory_space<vmem>>, vector<1x6x72xbf16>
    %65 = vector.shape_cast %64 : vector<1x6x72xbf16> to vector<6x72xbf16>
    %c2_68 = arith.constant 2 : index
    %c0_69 = arith.constant 0 : index
    %c0_70 = arith.constant 0 : index
    %66 = vector.load %arg5[%c2_68, %c0_69, %c0_70] : memref<9x12x6xbf16, #tpu.memory_space<vmem>>, vector<1x12x6xbf16>
    %67 = vector.shape_cast %66 : vector<1x12x6xbf16> to vector<12x6xbf16>
    %cst_71 = arith.constant dense<0.000000e+00> : vector<12x72xf32>
    %68 = tpu.matmul %67, %65, %cst_71 {dimension_numbers = #tpu.dot_dimension_numbers<[1], [0], [0], [1], [0, 0, 1, 1], [], []>} : vector<12x6xbf16>, vector<6x72xbf16>, vector<12x72xf32> -> vector<12x72xf32>
    %69 = arith.addf %63, %68 : vector<12x72xf32>
    %c0_72 = arith.constant 0 : index
    %c0_73 = arith.constant 0 : index
    %c0_74 = arith.constant 0 : index
    %70 = vector.load %arg4[%c0_72, %c0_73, %c0_74] : memref<1x6x90xbf16, #tpu.memory_space<vmem>>, vector<1x6x72xbf16>
    %71 = vector.shape_cast %70 : vector<1x6x72xbf16> to vector<6x72xbf16>
    %c3_75 = arith.constant 3 : index
    %c0_76 = arith.constant 0 : index
    %c0_77 = arith.constant 0 : index
    %72 = vector.load %arg5[%c3_75, %c0_76, %c0_77] : memref<9x12x6xbf16, #tpu.memory_space<vmem>>, vector<1x12x6xbf16>
    %73 = vector.shape_cast %72 : vector<1x12x6xbf16> to vector<12x6xbf16>
    %cst_78 = arith.constant dense<0.000000e+00> : vector<12x72xf32>
    %74 = tpu.matmul %73, %71, %cst_78 {dimension_numbers = #tpu.dot_dimension_numbers<[1], [0], [0], [1], [0, 0, 1, 1], [], []>} : vector<12x6xbf16>, vector<6x72xbf16>, vector<12x72xf32> -> vector<12x72xf32>
    %75 = arith.addf %69, %74 : vector<12x72xf32>
    %c0_79 = arith.constant 0 : index
    %c0_80 = arith.constant 0 : index
    %c1_81 = arith.constant 1 : index
    %76 = vector.load %arg3[%c0_79, %c0_80, %c1_81] : memref<1x6x90xbf16, #tpu.memory_space<vmem>>, vector<1x6x72xbf16>
    %77 = vector.shape_cast %76 : vector<1x6x72xbf16> to vector<6x72xbf16>
    %c4_82 = arith.constant 4 : index
    %c0_83 = arith.constant 0 : index
    %c0_84 = arith.constant 0 : index
    %78 = vector.load %arg5[%c4_82, %c0_83, %c0_84] : memref<9x12x6xbf16, #tpu.memory_space<vmem>>, vector<1x12x6xbf16>
    %79 = vector.shape_cast %78 : vector<1x12x6xbf16> to vector<12x6xbf16>
    %cst_85 = arith.constant dense<0.000000e+00> : vector<12x72xf32>
    %80 = tpu.matmul %79, %77, %cst_85 {dimension_numbers = #tpu.dot_dimension_numbers<[1], [0], [0], [1], [0, 0, 1, 1], [], []>} : vector<12x6xbf16>, vector<6x72xbf16>, vector<12x72xf32> -> vector<12x72xf32>
    %81 = arith.addf %75, %80 : vector<12x72xf32>
    %c0_86 = arith.constant 0 : index
    %c0_87 = arith.constant 0 : index
    %c1_88 = arith.constant 1 : index
    %82 = vector.load %arg4[%c0_86, %c0_87, %c1_88] : memref<1x6x90xbf16, #tpu.memory_space<vmem>>, vector<1x6x72xbf16>
    %83 = vector.shape_cast %82 : vector<1x6x72xbf16> to vector<6x72xbf16>
    %c5_89 = arith.constant 5 : index
    %c0_90 = arith.constant 0 : index
    %c0_91 = arith.constant 0 : index
    %84 = vector.load %arg5[%c5_89, %c0_90, %c0_91] : memref<9x12x6xbf16, #tpu.memory_space<vmem>>, vector<1x12x6xbf16>
    %85 = vector.shape_cast %84 : vector<1x12x6xbf16> to vector<12x6xbf16>
    %cst_92 = arith.constant dense<0.000000e+00> : vector<12x72xf32>
    %86 = tpu.matmul %85, %83, %cst_92 {dimension_numbers = #tpu.dot_dimension_numbers<[1], [0], [0], [1], [0, 0, 1, 1], [], []>} : vector<12x6xbf16>, vector<6x72xbf16>, vector<12x72xf32> -> vector<12x72xf32>
    %87 = arith.addf %81, %86 : vector<12x72xf32>
    %c0_93 = arith.constant 0 : index
    %c0_94 = arith.constant 0 : index
    %c9_95 = arith.constant 9 : index
    %88 = vector.load %arg2[%c0_93, %c0_94, %c9_95] : memref<1x6x90xbf16, #tpu.memory_space<vmem>>, vector<1x6x72xbf16>
    %89 = vector.shape_cast %88 : vector<1x6x72xbf16> to vector<6x72xbf16>
    %c6_96 = arith.constant 6 : index
    %c0_97 = arith.constant 0 : index
    %c0_98 = arith.constant 0 : index
    %90 = vector.load %arg5[%c6_96, %c0_97, %c0_98] : memref<9x12x6xbf16, #tpu.memory_space<vmem>>, vector<1x12x6xbf16>
    %91 = vector.shape_cast %90 : vector<1x12x6xbf16> to vector<12x6xbf16>
    %cst_99 = arith.constant dense<0.000000e+00> : vector<12x72xf32>
    %92 = tpu.matmul %91, %89, %cst_99 {dimension_numbers = #tpu.dot_dimension_numbers<[1], [0], [0], [1], [0, 0, 1, 1], [], []>} : vector<12x6xbf16>, vector<6x72xbf16>, vector<12x72xf32> -> vector<12x72xf32>
    %93 = arith.addf %87, %92 : vector<12x72xf32>
    %c0_100 = arith.constant 0 : index
    %c0_101 = arith.constant 0 : index
    %c10_102 = arith.constant 10 : index
    %94 = vector.load %arg1[%c0_100, %c0_101, %c10_102] : memref<1x6x90xbf16, #tpu.memory_space<vmem>>, vector<1x6x72xbf16>
    %95 = vector.shape_cast %94 : vector<1x6x72xbf16> to vector<6x72xbf16>
    %c7_103 = arith.constant 7 : index
    %c0_104 = arith.constant 0 : index
    %c0_105 = arith.constant 0 : index
    %96 = vector.load %arg5[%c7_103, %c0_104, %c0_105] : memref<9x12x6xbf16, #tpu.memory_space<vmem>>, vector<1x12x6xbf16>
    %97 = vector.shape_cast %96 : vector<1x12x6xbf16> to vector<12x6xbf16>
    %cst_106 = arith.constant dense<0.000000e+00> : vector<12x72xf32>
    %98 = tpu.matmul %97, %95, %cst_106 {dimension_numbers = #tpu.dot_dimension_numbers<[1], [0], [0], [1], [0, 0, 1, 1], [], []>} : vector<12x6xbf16>, vector<6x72xbf16>, vector<12x72xf32> -> vector<12x72xf32>
    %99 = arith.addf %93, %98 : vector<12x72xf32>
    %c0_107 = arith.constant 0 : index
    %c0_108 = arith.constant 0 : index
    %c10_109 = arith.constant 10 : index
    %100 = vector.load %arg2[%c0_107, %c0_108, %c10_109] : memref<1x6x90xbf16, #tpu.memory_space<vmem>>, vector<1x6x72xbf16>
    %101 = vector.shape_cast %100 : vector<1x6x72xbf16> to vector<6x72xbf16>
    %c8_110 = arith.constant 8 : index
    %c0_111 = arith.constant 0 : index
    %c0_112 = arith.constant 0 : index
    %102 = vector.load %arg5[%c8_110, %c0_111, %c0_112] : memref<9x12x6xbf16, #tpu.memory_space<vmem>>, vector<1x12x6xbf16>
    %103 = vector.shape_cast %102 : vector<1x12x6xbf16> to vector<12x6xbf16>
    %cst_113 = arith.constant dense<0.000000e+00> : vector<12x72xf32>
    %104 = tpu.matmul %103, %101, %cst_113 {dimension_numbers = #tpu.dot_dimension_numbers<[1], [0], [0], [1], [0, 0, 1, 1], [], []>} : vector<12x6xbf16>, vector<6x72xbf16>, vector<12x72xf32> -> vector<12x72xf32>
    %105 = arith.addf %99, %104 : vector<12x72xf32>
    %106 = arith.maximumf %52, %105 : vector<12x72xf32>
    %c0_114 = arith.constant 0 : index
    %c0_115 = arith.constant 0 : index
    %c0_116 = arith.constant 0 : index
    %107 = vector.load %arg3[%c0_114, %c0_115, %c0_116] : memref<1x6x90xbf16, #tpu.memory_space<vmem>>, vector<1x6x72xbf16>
    %108 = vector.shape_cast %107 : vector<1x6x72xbf16> to vector<6x72xbf16>
    %c0_117 = arith.constant 0 : index
    %c0_118 = arith.constant 0 : index
    %c0_119 = arith.constant 0 : index
    %109 = vector.load %arg5[%c0_117, %c0_118, %c0_119] : memref<9x12x6xbf16, #tpu.memory_space<vmem>>, vector<1x12x6xbf16>
    %110 = vector.shape_cast %109 : vector<1x12x6xbf16> to vector<12x6xbf16>
    %cst_120 = arith.constant dense<0.000000e+00> : vector<12x72xf32>
    %111 = tpu.matmul %110, %108, %cst_120 {dimension_numbers = #tpu.dot_dimension_numbers<[1], [0], [0], [1], [0, 0, 1, 1], [], []>} : vector<12x6xbf16>, vector<6x72xbf16>, vector<12x72xf32> -> vector<12x72xf32>
    %c0_121 = arith.constant 0 : index
    %c0_122 = arith.constant 0 : index
    %c0_123 = arith.constant 0 : index
    %112 = vector.load %arg4[%c0_121, %c0_122, %c0_123] : memref<1x6x90xbf16, #tpu.memory_space<vmem>>, vector<1x6x72xbf16>
    %113 = vector.shape_cast %112 : vector<1x6x72xbf16> to vector<6x72xbf16>
    %c1_124 = arith.constant 1 : index
    %c0_125 = arith.constant 0 : index
    %c0_126 = arith.constant 0 : index
    %114 = vector.load %arg5[%c1_124, %c0_125, %c0_126] : memref<9x12x6xbf16, #tpu.memory_space<vmem>>, vector<1x12x6xbf16>
    %115 = vector.shape_cast %114 : vector<1x12x6xbf16> to vector<12x6xbf16>
    %cst_127 = arith.constant dense<0.000000e+00> : vector<12x72xf32>
    %116 = tpu.matmul %115, %113, %cst_127 {dimension_numbers = #tpu.dot_dimension_numbers<[1], [0], [0], [1], [0, 0, 1, 1], [], []>} : vector<12x6xbf16>, vector<6x72xbf16>, vector<12x72xf32> -> vector<12x72xf32>
    %117 = arith.addf %111, %116 : vector<12x72xf32>
    %c0_128 = arith.constant 0 : index
    %c0_129 = arith.constant 0 : index
    %c1_130 = arith.constant 1 : index
    %118 = vector.load %arg3[%c0_128, %c0_129, %c1_130] : memref<1x6x90xbf16, #tpu.memory_space<vmem>>, vector<1x6x72xbf16>
    %119 = vector.shape_cast %118 : vector<1x6x72xbf16> to vector<6x72xbf16>
    %c2_131 = arith.constant 2 : index
    %c0_132 = arith.constant 0 : index
    %c0_133 = arith.constant 0 : index
    %120 = vector.load %arg5[%c2_131, %c0_132, %c0_133] : memref<9x12x6xbf16, #tpu.memory_space<vmem>>, vector<1x12x6xbf16>
    %121 = vector.shape_cast %120 : vector<1x12x6xbf16> to vector<12x6xbf16>
    %cst_134 = arith.constant dense<0.000000e+00> : vector<12x72xf32>
    %122 = tpu.matmul %121, %119, %cst_134 {dimension_numbers = #tpu.dot_dimension_numbers<[1], [0], [0], [1], [0, 0, 1, 1], [], []>} : vector<12x6xbf16>, vector<6x72xbf16>, vector<12x72xf32> -> vector<12x72xf32>
    %123 = arith.addf %117, %122 : vector<12x72xf32>
    %c0_135 = arith.constant 0 : index
    %c0_136 = arith.constant 0 : index
    %c9_137 = arith.constant 9 : index
    %124 = vector.load %arg1[%c0_135, %c0_136, %c9_137] : memref<1x6x90xbf16, #tpu.memory_space<vmem>>, vector<1x6x72xbf16>
    %125 = vector.shape_cast %124 : vector<1x6x72xbf16> to vector<6x72xbf16>
    %c3_138 = arith.constant 3 : index
    %c0_139 = arith.constant 0 : index
    %c0_140 = arith.constant 0 : index
    %126 = vector.load %arg5[%c3_138, %c0_139, %c0_140] : memref<9x12x6xbf16, #tpu.memory_space<vmem>>, vector<1x12x6xbf16>
    %127 = vector.shape_cast %126 : vector<1x12x6xbf16> to vector<12x6xbf16>
    %cst_141 = arith.constant dense<0.000000e+00> : vector<12x72xf32>
    %128 = tpu.matmul %127, %125, %cst_141 {dimension_numbers = #tpu.dot_dimension_numbers<[1], [0], [0], [1], [0, 0, 1, 1], [], []>} : vector<12x6xbf16>, vector<6x72xbf16>, vector<12x72xf32> -> vector<12x72xf32>
    %129 = arith.addf %123, %128 : vector<12x72xf32>
    %c0_142 = arith.constant 0 : index
    %c0_143 = arith.constant 0 : index
    %c9_144 = arith.constant 9 : index
    %130 = vector.load %arg2[%c0_142, %c0_143, %c9_144] : memref<1x6x90xbf16, #tpu.memory_space<vmem>>, vector<1x6x72xbf16>
    %131 = vector.shape_cast %130 : vector<1x6x72xbf16> to vector<6x72xbf16>
    %c4_145 = arith.constant 4 : index
    %c0_146 = arith.constant 0 : index
    %c0_147 = arith.constant 0 : index
    %132 = vector.load %arg5[%c4_145, %c0_146, %c0_147] : memref<9x12x6xbf16, #tpu.memory_space<vmem>>, vector<1x12x6xbf16>
    %133 = vector.shape_cast %132 : vector<1x12x6xbf16> to vector<12x6xbf16>
    %cst_148 = arith.constant dense<0.000000e+00> : vector<12x72xf32>
    %134 = tpu.matmul %133, %131, %cst_148 {dimension_numbers = #tpu.dot_dimension_numbers<[1], [0], [0], [1], [0, 0, 1, 1], [], []>} : vector<12x6xbf16>, vector<6x72xbf16>, vector<12x72xf32> -> vector<12x72xf32>
    %135 = arith.addf %129, %134 : vector<12x72xf32>
    %c0_149 = arith.constant 0 : index
    %c0_150 = arith.constant 0 : index
    %c10_151 = arith.constant 10 : index
    %136 = vector.load %arg1[%c0_149, %c0_150, %c10_151] : memref<1x6x90xbf16, #tpu.memory_space<vmem>>, vector<1x6x72xbf16>
    %137 = vector.shape_cast %136 : vector<1x6x72xbf16> to vector<6x72xbf16>
    %c5_152 = arith.constant 5 : index
    %c0_153 = arith.constant 0 : index
    %c0_154 = arith.constant 0 : index
    %138 = vector.load %arg5[%c5_152, %c0_153, %c0_154] : memref<9x12x6xbf16, #tpu.memory_space<vmem>>, vector<1x12x6xbf16>
    %139 = vector.shape_cast %138 : vector<1x12x6xbf16> to vector<12x6xbf16>
    %cst_155 = arith.constant dense<0.000000e+00> : vector<12x72xf32>
    %140 = tpu.matmul %139, %137, %cst_155 {dimension_numbers = #tpu.dot_dimension_numbers<[1], [0], [0], [1], [0, 0, 1, 1], [], []>} : vector<12x6xbf16>, vector<6x72xbf16>, vector<12x72xf32> -> vector<12x72xf32>
    %141 = arith.addf %135, %140 : vector<12x72xf32>
    %c0_156 = arith.constant 0 : index
    %c0_157 = arith.constant 0 : index
    %c9_158 = arith.constant 9 : index
    %142 = vector.load %arg3[%c0_156, %c0_157, %c9_158] : memref<1x6x90xbf16, #tpu.memory_space<vmem>>, vector<1x6x72xbf16>
    %143 = vector.shape_cast %142 : vector<1x6x72xbf16> to vector<6x72xbf16>
    %c6_159 = arith.constant 6 : index
    %c0_160 = arith.constant 0 : index
    %c0_161 = arith.constant 0 : index
    %144 = vector.load %arg5[%c6_159, %c0_160, %c0_161] : memref<9x12x6xbf16, #tpu.memory_space<vmem>>, vector<1x12x6xbf16>
    %145 = vector.shape_cast %144 : vector<1x12x6xbf16> to vector<12x6xbf16>
    %cst_162 = arith.constant dense<0.000000e+00> : vector<12x72xf32>
    %146 = tpu.matmul %145, %143, %cst_162 {dimension_numbers = #tpu.dot_dimension_numbers<[1], [0], [0], [1], [0, 0, 1, 1], [], []>} : vector<12x6xbf16>, vector<6x72xbf16>, vector<12x72xf32> -> vector<12x72xf32>
    %147 = arith.addf %141, %146 : vector<12x72xf32>
    %c0_163 = arith.constant 0 : index
    %c0_164 = arith.constant 0 : index
    %c9_165 = arith.constant 9 : index
    %148 = vector.load %arg4[%c0_163, %c0_164, %c9_165] : memref<1x6x90xbf16, #tpu.memory_space<vmem>>, vector<1x6x72xbf16>
    %149 = vector.shape_cast %148 : vector<1x6x72xbf16> to vector<6x72xbf16>
    %c7_166 = arith.constant 7 : index
    %c0_167 = arith.constant 0 : index
    %c0_168 = arith.constant 0 : index
    %150 = vector.load %arg5[%c7_166, %c0_167, %c0_168] : memref<9x12x6xbf16, #tpu.memory_space<vmem>>, vector<1x12x6xbf16>
    %151 = vector.shape_cast %150 : vector<1x12x6xbf16> to vector<12x6xbf16>
    %cst_169 = arith.constant dense<0.000000e+00> : vector<12x72xf32>
    %152 = tpu.matmul %151, %149, %cst_169 {dimension_numbers = #tpu.dot_dimension_numbers<[1], [0], [0], [1], [0, 0, 1, 1], [], []>} : vector<12x6xbf16>, vector<6x72xbf16>, vector<12x72xf32> -> vector<12x72xf32>
    %153 = arith.addf %147, %152 : vector<12x72xf32>
    %c0_170 = arith.constant 0 : index
    %c0_171 = arith.constant 0 : index
    %c10_172 = arith.constant 10 : index
    %154 = vector.load %arg3[%c0_170, %c0_171, %c10_172] : memref<1x6x90xbf16, #tpu.memory_space<vmem>>, vector<1x6x72xbf16>
    %155 = vector.shape_cast %154 : vector<1x6x72xbf16> to vector<6x72xbf16>
    %c8_173 = arith.constant 8 : index
    %c0_174 = arith.constant 0 : index
    %c0_175 = arith.constant 0 : index
    %156 = vector.load %arg5[%c8_173, %c0_174, %c0_175] : memref<9x12x6xbf16, #tpu.memory_space<vmem>>, vector<1x12x6xbf16>
    %157 = vector.shape_cast %156 : vector<1x12x6xbf16> to vector<12x6xbf16>
    %cst_176 = arith.constant dense<0.000000e+00> : vector<12x72xf32>
    %158 = tpu.matmul %157, %155, %cst_176 {dimension_numbers = #tpu.dot_dimension_numbers<[1], [0], [0], [1], [0, 0, 1, 1], [], []>} : vector<12x6xbf16>, vector<6x72xbf16>, vector<12x72xf32> -> vector<12x72xf32>
    %159 = arith.addf %153, %158 : vector<12x72xf32>
    %160 = arith.maximumf %106, %159 : vector<12x72xf32>
    %c0_177 = arith.constant 0 : index
    %c0_178 = arith.constant 0 : index
    %c0_179 = arith.constant 0 : index
    %161 = vector.load %arg4[%c0_177, %c0_178, %c0_179] : memref<1x6x90xbf16, #tpu.memory_space<vmem>>, vector<1x6x72xbf16>
    %162 = vector.shape_cast %161 : vector<1x6x72xbf16> to vector<6x72xbf16>
    %c0_180 = arith.constant 0 : index
    %c0_181 = arith.constant 0 : index
    %c0_182 = arith.constant 0 : index
    %163 = vector.load %arg5[%c0_180, %c0_181, %c0_182] : memref<9x12x6xbf16, #tpu.memory_space<vmem>>, vector<1x12x6xbf16>
    %164 = vector.shape_cast %163 : vector<1x12x6xbf16> to vector<12x6xbf16>
    %cst_183 = arith.constant dense<0.000000e+00> : vector<12x72xf32>
    %165 = tpu.matmul %164, %162, %cst_183 {dimension_numbers = #tpu.dot_dimension_numbers<[1], [0], [0], [1], [0, 0, 1, 1], [], []>} : vector<12x6xbf16>, vector<6x72xbf16>, vector<12x72xf32> -> vector<12x72xf32>
    %c0_184 = arith.constant 0 : index
    %c0_185 = arith.constant 0 : index
    %c1_186 = arith.constant 1 : index
    %166 = vector.load %arg3[%c0_184, %c0_185, %c1_186] : memref<1x6x90xbf16, #tpu.memory_space<vmem>>, vector<1x6x72xbf16>
    %167 = vector.shape_cast %166 : vector<1x6x72xbf16> to vector<6x72xbf16>
    %c1_187 = arith.constant 1 : index
    %c0_188 = arith.constant 0 : index
    %c0_189 = arith.constant 0 : index
    %168 = vector.load %arg5[%c1_187, %c0_188, %c0_189] : memref<9x12x6xbf16, #tpu.memory_space<vmem>>, vector<1x12x6xbf16>
    %169 = vector.shape_cast %168 : vector<1x12x6xbf16> to vector<12x6xbf16>
    %cst_190 = arith.constant dense<0.000000e+00> : vector<12x72xf32>
    %170 = tpu.matmul %169, %167, %cst_190 {dimension_numbers = #tpu.dot_dimension_numbers<[1], [0], [0], [1], [0, 0, 1, 1], [], []>} : vector<12x6xbf16>, vector<6x72xbf16>, vector<12x72xf32> -> vector<12x72xf32>
    %171 = arith.addf %165, %170 : vector<12x72xf32>
    %c0_191 = arith.constant 0 : index
    %c0_192 = arith.constant 0 : index
    %c1_193 = arith.constant 1 : index
    %172 = vector.load %arg4[%c0_191, %c0_192, %c1_193] : memref<1x6x90xbf16, #tpu.memory_space<vmem>>, vector<1x6x72xbf16>
    %173 = vector.shape_cast %172 : vector<1x6x72xbf16> to vector<6x72xbf16>
    %c2_194 = arith.constant 2 : index
    %c0_195 = arith.constant 0 : index
    %c0_196 = arith.constant 0 : index
    %174 = vector.load %arg5[%c2_194, %c0_195, %c0_196] : memref<9x12x6xbf16, #tpu.memory_space<vmem>>, vector<1x12x6xbf16>
    %175 = vector.shape_cast %174 : vector<1x12x6xbf16> to vector<12x6xbf16>
    %cst_197 = arith.constant dense<0.000000e+00> : vector<12x72xf32>
    %176 = tpu.matmul %175, %173, %cst_197 {dimension_numbers = #tpu.dot_dimension_numbers<[1], [0], [0], [1], [0, 0, 1, 1], [], []>} : vector<12x6xbf16>, vector<6x72xbf16>, vector<12x72xf32> -> vector<12x72xf32>
    %177 = arith.addf %171, %176 : vector<12x72xf32>
    %c0_198 = arith.constant 0 : index
    %c0_199 = arith.constant 0 : index
    %c9_200 = arith.constant 9 : index
    %178 = vector.load %arg2[%c0_198, %c0_199, %c9_200] : memref<1x6x90xbf16, #tpu.memory_space<vmem>>, vector<1x6x72xbf16>
    %179 = vector.shape_cast %178 : vector<1x6x72xbf16> to vector<6x72xbf16>
    %c3_201 = arith.constant 3 : index
    %c0_202 = arith.constant 0 : index
    %c0_203 = arith.constant 0 : index
    %180 = vector.load %arg5[%c3_201, %c0_202, %c0_203] : memref<9x12x6xbf16, #tpu.memory_space<vmem>>, vector<1x12x6xbf16>
    %181 = vector.shape_cast %180 : vector<1x12x6xbf16> to vector<12x6xbf16>
    %cst_204 = arith.constant dense<0.000000e+00> : vector<12x72xf32>
    %182 = tpu.matmul %181, %179, %cst_204 {dimension_numbers = #tpu.dot_dimension_numbers<[1], [0], [0], [1], [0, 0, 1, 1], [], []>} : vector<12x6xbf16>, vector<6x72xbf16>, vector<12x72xf32> -> vector<12x72xf32>
    %183 = arith.addf %177, %182 : vector<12x72xf32>
    %c0_205 = arith.constant 0 : index
    %c0_206 = arith.constant 0 : index
    %c10_207 = arith.constant 10 : index
    %184 = vector.load %arg1[%c0_205, %c0_206, %c10_207] : memref<1x6x90xbf16, #tpu.memory_space<vmem>>, vector<1x6x72xbf16>
    %185 = vector.shape_cast %184 : vector<1x6x72xbf16> to vector<6x72xbf16>
    %c4_208 = arith.constant 4 : index
    %c0_209 = arith.constant 0 : index
    %c0_210 = arith.constant 0 : index
    %186 = vector.load %arg5[%c4_208, %c0_209, %c0_210] : memref<9x12x6xbf16, #tpu.memory_space<vmem>>, vector<1x12x6xbf16>
    %187 = vector.shape_cast %186 : vector<1x12x6xbf16> to vector<12x6xbf16>
    %cst_211 = arith.constant dense<0.000000e+00> : vector<12x72xf32>
    %188 = tpu.matmul %187, %185, %cst_211 {dimension_numbers = #tpu.dot_dimension_numbers<[1], [0], [0], [1], [0, 0, 1, 1], [], []>} : vector<12x6xbf16>, vector<6x72xbf16>, vector<12x72xf32> -> vector<12x72xf32>
    %189 = arith.addf %183, %188 : vector<12x72xf32>
    %c0_212 = arith.constant 0 : index
    %c0_213 = arith.constant 0 : index
    %c10_214 = arith.constant 10 : index
    %190 = vector.load %arg2[%c0_212, %c0_213, %c10_214] : memref<1x6x90xbf16, #tpu.memory_space<vmem>>, vector<1x6x72xbf16>
    %191 = vector.shape_cast %190 : vector<1x6x72xbf16> to vector<6x72xbf16>
    %c5_215 = arith.constant 5 : index
    %c0_216 = arith.constant 0 : index
    %c0_217 = arith.constant 0 : index
    %192 = vector.load %arg5[%c5_215, %c0_216, %c0_217] : memref<9x12x6xbf16, #tpu.memory_space<vmem>>, vector<1x12x6xbf16>
    %193 = vector.shape_cast %192 : vector<1x12x6xbf16> to vector<12x6xbf16>
    %cst_218 = arith.constant dense<0.000000e+00> : vector<12x72xf32>
    %194 = tpu.matmul %193, %191, %cst_218 {dimension_numbers = #tpu.dot_dimension_numbers<[1], [0], [0], [1], [0, 0, 1, 1], [], []>} : vector<12x6xbf16>, vector<6x72xbf16>, vector<12x72xf32> -> vector<12x72xf32>
    %195 = arith.addf %189, %194 : vector<12x72xf32>
    %c0_219 = arith.constant 0 : index
    %c0_220 = arith.constant 0 : index
    %c9_221 = arith.constant 9 : index
    %196 = vector.load %arg4[%c0_219, %c0_220, %c9_221] : memref<1x6x90xbf16, #tpu.memory_space<vmem>>, vector<1x6x72xbf16>
    %197 = vector.shape_cast %196 : vector<1x6x72xbf16> to vector<6x72xbf16>
    %c6_222 = arith.constant 6 : index
    %c0_223 = arith.constant 0 : index
    %c0_224 = arith.constant 0 : index
    %198 = vector.load %arg5[%c6_222, %c0_223, %c0_224] : memref<9x12x6xbf16, #tpu.memory_space<vmem>>, vector<1x12x6xbf16>
    %199 = vector.shape_cast %198 : vector<1x12x6xbf16> to vector<12x6xbf16>
    %cst_225 = arith.constant dense<0.000000e+00> : vector<12x72xf32>
    %200 = tpu.matmul %199, %197, %cst_225 {dimension_numbers = #tpu.dot_dimension_numbers<[1], [0], [0], [1], [0, 0, 1, 1], [], []>} : vector<12x6xbf16>, vector<6x72xbf16>, vector<12x72xf32> -> vector<12x72xf32>
    %201 = arith.addf %195, %200 : vector<12x72xf32>
    %c0_226 = arith.constant 0 : index
    %c0_227 = arith.constant 0 : index
    %c10_228 = arith.constant 10 : index
    %202 = vector.load %arg3[%c0_226, %c0_227, %c10_228] : memref<1x6x90xbf16, #tpu.memory_space<vmem>>, vector<1x6x72xbf16>
    %203 = vector.shape_cast %202 : vector<1x6x72xbf16> to vector<6x72xbf16>
    %c7_229 = arith.constant 7 : index
    %c0_230 = arith.constant 0 : index
    %c0_231 = arith.constant 0 : index
    %204 = vector.load %arg5[%c7_229, %c0_230, %c0_231] : memref<9x12x6xbf16, #tpu.memory_space<vmem>>, vector<1x12x6xbf16>
    %205 = vector.shape_cast %204 : vector<1x12x6xbf16> to vector<12x6xbf16>
    %cst_232 = arith.constant dense<0.000000e+00> : vector<12x72xf32>
    %206 = tpu.matmul %205, %203, %cst_232 {dimension_numbers = #tpu.dot_dimension_numbers<[1], [0], [0], [1], [0, 0, 1, 1], [], []>} : vector<12x6xbf16>, vector<6x72xbf16>, vector<12x72xf32> -> vector<12x72xf32>
    %207 = arith.addf %201, %206 : vector<12x72xf32>
    %c0_233 = arith.constant 0 : index
    %c0_234 = arith.constant 0 : index
    %c10_235 = arith.constant 10 : index
    %208 = vector.load %arg4[%c0_233, %c0_234, %c10_235] : memref<1x6x90xbf16, #tpu.memory_space<vmem>>, vector<1x6x72xbf16>
    %209 = vector.shape_cast %208 : vector<1x6x72xbf16> to vector<6x72xbf16>
    %c8_236 = arith.constant 8 : index
    %c0_237 = arith.constant 0 : index
    %c0_238 = arith.constant 0 : index
    %210 = vector.load %arg5[%c8_236, %c0_237, %c0_238] : memref<9x12x6xbf16, #tpu.memory_space<vmem>>, vector<1x12x6xbf16>
    %211 = vector.shape_cast %210 : vector<1x12x6xbf16> to vector<12x6xbf16>
    %cst_239 = arith.constant dense<0.000000e+00> : vector<12x72xf32>
    %212 = tpu.matmul %211, %209, %cst_239 {dimension_numbers = #tpu.dot_dimension_numbers<[1], [0], [0], [1], [0, 0, 1, 1], [], []>} : vector<12x6xbf16>, vector<6x72xbf16>, vector<12x72xf32> -> vector<12x72xf32>
    %213 = arith.addf %207, %212 : vector<12x72xf32>
    %214 = arith.maximumf %160, %213 : vector<12x72xf32>
    %c0_240 = arith.constant 0 : index
    %c0_241 = arith.constant 0 : index
    %215 = vector.load %arg6[%c0_240, %c0_241] : memref<12x1xf32, #tpu.memory_space<vmem>>, vector<12x1xf32>
    %216 = vector.broadcast %215 : vector<12x1xf32> to vector<12x72xf32>
    %217 = arith.addf %214, %216 : vector<12x72xf32>
    %cst_242 = arith.constant 0.000000e+00 : f32
    %218 = vector.broadcast %cst_242 : f32 to vector<12x72xf32>
    %219 = arith.maximumf %217, %218 : vector<12x72xf32>
    %220 = tpu.iota {dimensions = array<i32: 1>} : vector<12x72xi32>
    %c9_i32 = arith.constant 9 : i32
    %c0_i32 = arith.constant 0 : i32
    %221 = arith.cmpi eq, %c9_i32, %c0_i32 : i32
    %c1_i32 = arith.constant 1 : i32
    %222 = arith.select %221, %c1_i32, %c9_i32 : i32
    %223 = vector.broadcast %222 : i32 to vector<12x72xi32>
    %224 = arith.remsi %220, %223 : vector<12x72xi32>
    %c0_i32_243 = arith.constant 0 : i32
    %225 = vector.broadcast %c0_i32_243 : i32 to vector<12x72xi32>
    %226 = arith.cmpi ne, %224, %225 : vector<12x72xi32>
    %c0_i32_244 = arith.constant 0 : i32
    %227 = vector.broadcast %c0_i32_244 : i32 to vector<12x72xi32>
    %228 = arith.cmpi slt, %224, %227 : vector<12x72xi32>
    %c0_i32_245 = arith.constant 0 : i32
    %229 = arith.cmpi slt, %222, %c0_i32_245 : i32
    %230 = vector.broadcast %229 : i1 to vector<12x72xi1>
    %231 = vector.broadcast %230 : vector<12x72xi1> to vector<12x72xi1>
    %232 = arith.xori %228, %231 : vector<12x72xi1>
    %233 = arith.andi %232, %226 : vector<12x72xi1>
    %234 = vector.broadcast %222 : i32 to vector<12x72xi32>
    %235 = arith.addi %224, %234 : vector<12x72xi32>
    %236 = arith.select %233, %235, %224 : vector<12x72xi1>, vector<12x72xi32>
    %c8_i32 = arith.constant 8 : i32
    %237 = vector.broadcast %c8_i32 : i32 to vector<12x72xi32>
    %238 = arith.cmpi eq, %236, %237 : vector<12x72xi32>
    %cst_246 = arith.constant 0.000000e+00 : f32
    %239 = vector.broadcast %cst_246 : f32 to vector<12x72xf32>
    %240 = arith.select %238, %239, %219 : vector<12x72xi1>, vector<12x72xf32>
    %241 = arith.truncf %240 : vector<12x72xf32> to vector<12x72xbf16>
    %c0_247 = arith.constant 0 : index
    %c0_248 = arith.constant 0 : index
    %c0_249 = arith.constant 0 : index
    %242 = vector.load %arg7[%c0_247, %c0_248, %c0_249] : memref<1x12x72xbf16, #tpu.memory_space<vmem>>, vector<1x12x72xbf16>
    %243 = vector.shape_cast %242 : vector<1x12x72xbf16> to vector<12x72xbf16>
    %244 = vector.shape_cast %241 : vector<12x72xbf16> to vector<1x12x72xbf16>
    tpu.vector_store %arg7[%c0_247, %c0_248, %c0_249], %244 {strides = array<i32>} : memref<1x12x72xbf16, #tpu.memory_space<vmem>>, vector<1x12x72xbf16>,
    return
  }
  func.func @transform_0(%arg0: i32) -> (i32, i32, i32) {
    %c0_i32 = arith.constant 0 : i32
    %c0_i32_0 = arith.constant 0 : i32
    %c0_i32_1 = arith.constant 0 : i32
    return %arg0, %c0_i32, %c0_i32_0 : i32, i32, i32
  }
  func.func @transform_1(%arg0: i32) -> (i32, i32, i32) {
    %c0_i32 = arith.constant 0 : i32
    %c0_i32_0 = arith.constant 0 : i32
    %c0_i32_1 = arith.constant 0 : i32
    return %arg0, %c0_i32, %c0_i32_0 : i32, i32, i32
  }
  func.func @transform_2(%arg0: i32) -> (i32, i32, i32) {
    %c0_i32 = arith.constant 0 : i32
    %c0_i32_0 = arith.constant 0 : i32
    %c0_i32_1 = arith.constant 0 : i32
    return %arg0, %c0_i32, %c0_i32_0 : i32, i32, i32
  }
  func.func @transform_3(%arg0: i32) -> (i32, i32, i32) {
    %c0_i32 = arith.constant 0 : i32
    %c0_i32_0 = arith.constant 0 : i32
    %c0_i32_1 = arith.constant 0 : i32
    return %arg0, %c0_i32, %c0_i32_0 : i32, i32, i32
  }
  func.func @transform_4(%arg0: i32) -> (i32, i32, i32) {
    %c0_i32 = arith.constant 0 : i32
    %c0_i32_0 = arith.constant 0 : i32
    %c0_i32_1 = arith.constant 0 : i32
    %c0_i32_2 = arith.constant 0 : i32
    return %c0_i32, %c0_i32_0, %c0_i32_1 : i32, i32, i32
  }
  func.func @transform_5(%arg0: i32) -> (i32, i32) {
    %c0_i32 = arith.constant 0 : i32
    %c0_i32_0 = arith.constant 0 : i32
    %c0_i32_1 = arith.constant 0 : i32
    return %c0_i32, %c0_i32_0 : i32, i32
  }
  func.func @transform_6(%arg0: i32) -> (i32, i32, i32) {
    %c0_i32 = arith.constant 0 : i32
    %c0_i32_0 = arith.constant 0 : i32
    %c0_i32_1 = arith.constant 0 : i32
    return %arg0, %c0_i32, %c0_i32_0 : i32, i32, i32
  }
}

module attributes {stable_mosaic.version = 11 : i64} {
  func.func @_conv3x3_pool_relu_kernel(%arg0: i32, %arg1: memref<1x12x30xbf16, #tpu.memory_space<vmem>>, %arg2: memref<1x12x30xbf16, #tpu.memory_space<vmem>>, %arg3: memref<1x12x30xbf16, #tpu.memory_space<vmem>>, %arg4: memref<1x12x30xbf16, #tpu.memory_space<vmem>>, %arg5: memref<9x24x12xbf16, #tpu.memory_space<vmem>>, %arg6: memref<24x1xf32, #tpu.memory_space<vmem>>, %arg7: memref<1x24x20xbf16, #tpu.memory_space<vmem>>) attributes {dimension_semantics = [#tpu.dimension_semantics<parallel>], iteration_bounds = array<i64: 2>, scalar_prefetch = 0 : i64, scratch_operands = 0 : i64, tpu.core_type = #tpu.core_type<tc>, window_params = [{transform_indices = @transform_0, window_bounds = array<i64: 1, 12, 30>}, {transform_indices = @transform_1, window_bounds = array<i64: 1, 12, 30>}, {transform_indices = @transform_2, window_bounds = array<i64: 1, 12, 30>}, {transform_indices = @transform_3, window_bounds = array<i64: 1, 12, 30>}, {pipeline_mode = #tpu.pipeline_mode<synchronous>, transform_indices = @transform_4, window_bounds = array<i64: 9, 24, 12>}, {pipeline_mode = #tpu.pipeline_mode<synchronous>, transform_indices = @transform_5, window_bounds = array<i64: 24, 1>}, {transform_indices = @transform_6, window_bounds = array<i64: 1, 24, 20>}]} {
    %c0 = arith.constant 0 : index
    %c0_0 = arith.constant 0 : index
    %c0_1 = arith.constant 0 : index
    %0 = vector.load %arg1[%c0, %c0_0, %c0_1] : memref<1x12x30xbf16, #tpu.memory_space<vmem>>, vector<1x12x20xbf16>
    %1 = vector.shape_cast %0 : vector<1x12x20xbf16> to vector<12x20xbf16>
    %c0_2 = arith.constant 0 : index
    %c0_3 = arith.constant 0 : index
    %c0_4 = arith.constant 0 : index
    %2 = vector.load %arg5[%c0_2, %c0_3, %c0_4] : memref<9x24x12xbf16, #tpu.memory_space<vmem>>, vector<1x24x12xbf16>
    %3 = vector.shape_cast %2 : vector<1x24x12xbf16> to vector<24x12xbf16>
    %cst = arith.constant dense<0.000000e+00> : vector<24x20xf32>
    %4 = tpu.matmul %3, %1, %cst {dimension_numbers = #tpu.dot_dimension_numbers<[1], [0], [0], [1], [0, 0, 1, 1], [], []>} : vector<24x12xbf16>, vector<12x20xbf16>, vector<24x20xf32> -> vector<24x20xf32>
    %c0_5 = arith.constant 0 : index
    %c0_6 = arith.constant 0 : index
    %c0_7 = arith.constant 0 : index
    %5 = vector.load %arg2[%c0_5, %c0_6, %c0_7] : memref<1x12x30xbf16, #tpu.memory_space<vmem>>, vector<1x12x20xbf16>
    %6 = vector.shape_cast %5 : vector<1x12x20xbf16> to vector<12x20xbf16>
    %c1 = arith.constant 1 : index
    %c0_8 = arith.constant 0 : index
    %c0_9 = arith.constant 0 : index
    %7 = vector.load %arg5[%c1, %c0_8, %c0_9] : memref<9x24x12xbf16, #tpu.memory_space<vmem>>, vector<1x24x12xbf16>
    %8 = vector.shape_cast %7 : vector<1x24x12xbf16> to vector<24x12xbf16>
    %cst_10 = arith.constant dense<0.000000e+00> : vector<24x20xf32>
    %9 = tpu.matmul %8, %6, %cst_10 {dimension_numbers = #tpu.dot_dimension_numbers<[1], [0], [0], [1], [0, 0, 1, 1], [], []>} : vector<24x12xbf16>, vector<12x20xbf16>, vector<24x20xf32> -> vector<24x20xf32>
    %10 = arith.addf %4, %9 : vector<24x20xf32>
    %c0_11 = arith.constant 0 : index
    %c0_12 = arith.constant 0 : index
    %c1_13 = arith.constant 1 : index
    %11 = vector.load %arg1[%c0_11, %c0_12, %c1_13] : memref<1x12x30xbf16, #tpu.memory_space<vmem>>, vector<1x12x20xbf16>
    %12 = vector.shape_cast %11 : vector<1x12x20xbf16> to vector<12x20xbf16>
    %c2 = arith.constant 2 : index
    %c0_14 = arith.constant 0 : index
    %c0_15 = arith.constant 0 : index
    %13 = vector.load %arg5[%c2, %c0_14, %c0_15] : memref<9x24x12xbf16, #tpu.memory_space<vmem>>, vector<1x24x12xbf16>
    %14 = vector.shape_cast %13 : vector<1x24x12xbf16> to vector<24x12xbf16>
    %cst_16 = arith.constant dense<0.000000e+00> : vector<24x20xf32>
    %15 = tpu.matmul %14, %12, %cst_16 {dimension_numbers = #tpu.dot_dimension_numbers<[1], [0], [0], [1], [0, 0, 1, 1], [], []>} : vector<24x12xbf16>, vector<12x20xbf16>, vector<24x20xf32> -> vector<24x20xf32>
    %16 = arith.addf %10, %15 : vector<24x20xf32>
    %c0_17 = arith.constant 0 : index
    %c0_18 = arith.constant 0 : index
    %c0_19 = arith.constant 0 : index
    %17 = vector.load %arg3[%c0_17, %c0_18, %c0_19] : memref<1x12x30xbf16, #tpu.memory_space<vmem>>, vector<1x12x20xbf16>
    %18 = vector.shape_cast %17 : vector<1x12x20xbf16> to vector<12x20xbf16>
    %c3 = arith.constant 3 : index
    %c0_20 = arith.constant 0 : index
    %c0_21 = arith.constant 0 : index
    %19 = vector.load %arg5[%c3, %c0_20, %c0_21] : memref<9x24x12xbf16, #tpu.memory_space<vmem>>, vector<1x24x12xbf16>
    %20 = vector.shape_cast %19 : vector<1x24x12xbf16> to vector<24x12xbf16>
    %cst_22 = arith.constant dense<0.000000e+00> : vector<24x20xf32>
    %21 = tpu.matmul %20, %18, %cst_22 {dimension_numbers = #tpu.dot_dimension_numbers<[1], [0], [0], [1], [0, 0, 1, 1], [], []>} : vector<24x12xbf16>, vector<12x20xbf16>, vector<24x20xf32> -> vector<24x20xf32>
    %22 = arith.addf %16, %21 : vector<24x20xf32>
    %c0_23 = arith.constant 0 : index
    %c0_24 = arith.constant 0 : index
    %c0_25 = arith.constant 0 : index
    %23 = vector.load %arg4[%c0_23, %c0_24, %c0_25] : memref<1x12x30xbf16, #tpu.memory_space<vmem>>, vector<1x12x20xbf16>
    %24 = vector.shape_cast %23 : vector<1x12x20xbf16> to vector<12x20xbf16>
    %c4 = arith.constant 4 : index
    %c0_26 = arith.constant 0 : index
    %c0_27 = arith.constant 0 : index
    %25 = vector.load %arg5[%c4, %c0_26, %c0_27] : memref<9x24x12xbf16, #tpu.memory_space<vmem>>, vector<1x24x12xbf16>
    %26 = vector.shape_cast %25 : vector<1x24x12xbf16> to vector<24x12xbf16>
    %cst_28 = arith.constant dense<0.000000e+00> : vector<24x20xf32>
    %27 = tpu.matmul %26, %24, %cst_28 {dimension_numbers = #tpu.dot_dimension_numbers<[1], [0], [0], [1], [0, 0, 1, 1], [], []>} : vector<24x12xbf16>, vector<12x20xbf16>, vector<24x20xf32> -> vector<24x20xf32>
    %28 = arith.addf %22, %27 : vector<24x20xf32>
    %c0_29 = arith.constant 0 : index
    %c0_30 = arith.constant 0 : index
    %c1_31 = arith.constant 1 : index
    %29 = vector.load %arg3[%c0_29, %c0_30, %c1_31] : memref<1x12x30xbf16, #tpu.memory_space<vmem>>, vector<1x12x20xbf16>
    %30 = vector.shape_cast %29 : vector<1x12x20xbf16> to vector<12x20xbf16>
    %c5 = arith.constant 5 : index
    %c0_32 = arith.constant 0 : index
    %c0_33 = arith.constant 0 : index
    %31 = vector.load %arg5[%c5, %c0_32, %c0_33] : memref<9x24x12xbf16, #tpu.memory_space<vmem>>, vector<1x24x12xbf16>
    %32 = vector.shape_cast %31 : vector<1x24x12xbf16> to vector<24x12xbf16>
    %cst_34 = arith.constant dense<0.000000e+00> : vector<24x20xf32>
    %33 = tpu.matmul %32, %30, %cst_34 {dimension_numbers = #tpu.dot_dimension_numbers<[1], [0], [0], [1], [0, 0, 1, 1], [], []>} : vector<24x12xbf16>, vector<12x20xbf16>, vector<24x20xf32> -> vector<24x20xf32>
    %34 = arith.addf %28, %33 : vector<24x20xf32>
    %c0_35 = arith.constant 0 : index
    %c0_36 = arith.constant 0 : index
    %c5_37 = arith.constant 5 : index
    %35 = vector.load %arg1[%c0_35, %c0_36, %c5_37] : memref<1x12x30xbf16, #tpu.memory_space<vmem>>, vector<1x12x20xbf16>
    %36 = vector.shape_cast %35 : vector<1x12x20xbf16> to vector<12x20xbf16>
    %c6 = arith.constant 6 : index
    %c0_38 = arith.constant 0 : index
    %c0_39 = arith.constant 0 : index
    %37 = vector.load %arg5[%c6, %c0_38, %c0_39] : memref<9x24x12xbf16, #tpu.memory_space<vmem>>, vector<1x24x12xbf16>
    %38 = vector.shape_cast %37 : vector<1x24x12xbf16> to vector<24x12xbf16>
    %cst_40 = arith.constant dense<0.000000e+00> : vector<24x20xf32>
    %39 = tpu.matmul %38, %36, %cst_40 {dimension_numbers = #tpu.dot_dimension_numbers<[1], [0], [0], [1], [0, 0, 1, 1], [], []>} : vector<24x12xbf16>, vector<12x20xbf16>, vector<24x20xf32> -> vector<24x20xf32>
    %40 = arith.addf %34, %39 : vector<24x20xf32>
    %c0_41 = arith.constant 0 : index
    %c0_42 = arith.constant 0 : index
    %c5_43 = arith.constant 5 : index
    %41 = vector.load %arg2[%c0_41, %c0_42, %c5_43] : memref<1x12x30xbf16, #tpu.memory_space<vmem>>, vector<1x12x20xbf16>
    %42 = vector.shape_cast %41 : vector<1x12x20xbf16> to vector<12x20xbf16>
    %c7 = arith.constant 7 : index
    %c0_44 = arith.constant 0 : index
    %c0_45 = arith.constant 0 : index
    %43 = vector.load %arg5[%c7, %c0_44, %c0_45] : memref<9x24x12xbf16, #tpu.memory_space<vmem>>, vector<1x24x12xbf16>
    %44 = vector.shape_cast %43 : vector<1x24x12xbf16> to vector<24x12xbf16>
    %cst_46 = arith.constant dense<0.000000e+00> : vector<24x20xf32>
    %45 = tpu.matmul %44, %42, %cst_46 {dimension_numbers = #tpu.dot_dimension_numbers<[1], [0], [0], [1], [0, 0, 1, 1], [], []>} : vector<24x12xbf16>, vector<12x20xbf16>, vector<24x20xf32> -> vector<24x20xf32>
    %46 = arith.addf %40, %45 : vector<24x20xf32>
    %c0_47 = arith.constant 0 : index
    %c0_48 = arith.constant 0 : index
    %c6_49 = arith.constant 6 : index
    %47 = vector.load %arg1[%c0_47, %c0_48, %c6_49] : memref<1x12x30xbf16, #tpu.memory_space<vmem>>, vector<1x12x20xbf16>
    %48 = vector.shape_cast %47 : vector<1x12x20xbf16> to vector<12x20xbf16>
    %c8 = arith.constant 8 : index
    %c0_50 = arith.constant 0 : index
    %c0_51 = arith.constant 0 : index
    %49 = vector.load %arg5[%c8, %c0_50, %c0_51] : memref<9x24x12xbf16, #tpu.memory_space<vmem>>, vector<1x24x12xbf16>
    %50 = vector.shape_cast %49 : vector<1x24x12xbf16> to vector<24x12xbf16>
    %cst_52 = arith.constant dense<0.000000e+00> : vector<24x20xf32>
    %51 = tpu.matmul %50, %48, %cst_52 {dimension_numbers = #tpu.dot_dimension_numbers<[1], [0], [0], [1], [0, 0, 1, 1], [], []>} : vector<24x12xbf16>, vector<12x20xbf16>, vector<24x20xf32> -> vector<24x20xf32>
    %52 = arith.addf %46, %51 : vector<24x20xf32>
    %c0_53 = arith.constant 0 : index
    %c0_54 = arith.constant 0 : index
    %c0_55 = arith.constant 0 : index
    %53 = vector.load %arg2[%c0_53, %c0_54, %c0_55] : memref<1x12x30xbf16, #tpu.memory_space<vmem>>, vector<1x12x20xbf16>
    %54 = vector.shape_cast %53 : vector<1x12x20xbf16> to vector<12x20xbf16>
    %c0_56 = arith.constant 0 : index
    %c0_57 = arith.constant 0 : index
    %c0_58 = arith.constant 0 : index
    %55 = vector.load %arg5[%c0_56, %c0_57, %c0_58] : memref<9x24x12xbf16, #tpu.memory_space<vmem>>, vector<1x24x12xbf16>
    %56 = vector.shape_cast %55 : vector<1x24x12xbf16> to vector<24x12xbf16>
    %cst_59 = arith.constant dense<0.000000e+00> : vector<24x20xf32>
    %57 = tpu.matmul %56, %54, %cst_59 {dimension_numbers = #tpu.dot_dimension_numbers<[1], [0], [0], [1], [0, 0, 1, 1], [], []>} : vector<24x12xbf16>, vector<12x20xbf16>, vector<24x20xf32> -> vector<24x20xf32>
    %c0_60 = arith.constant 0 : index
    %c0_61 = arith.constant 0 : index
    %c1_62 = arith.constant 1 : index
    %58 = vector.load %arg1[%c0_60, %c0_61, %c1_62] : memref<1x12x30xbf16, #tpu.memory_space<vmem>>, vector<1x12x20xbf16>
    %59 = vector.shape_cast %58 : vector<1x12x20xbf16> to vector<12x20xbf16>
    %c1_63 = arith.constant 1 : index
    %c0_64 = arith.constant 0 : index
    %c0_65 = arith.constant 0 : index
    %60 = vector.load %arg5[%c1_63, %c0_64, %c0_65] : memref<9x24x12xbf16, #tpu.memory_space<vmem>>, vector<1x24x12xbf16>
    %61 = vector.shape_cast %60 : vector<1x24x12xbf16> to vector<24x12xbf16>
    %cst_66 = arith.constant dense<0.000000e+00> : vector<24x20xf32>
    %62 = tpu.matmul %61, %59, %cst_66 {dimension_numbers = #tpu.dot_dimension_numbers<[1], [0], [0], [1], [0, 0, 1, 1], [], []>} : vector<24x12xbf16>, vector<12x20xbf16>, vector<24x20xf32> -> vector<24x20xf32>
    %63 = arith.addf %57, %62 : vector<24x20xf32>
    %c0_67 = arith.constant 0 : index
    %c0_68 = arith.constant 0 : index
    %c1_69 = arith.constant 1 : index
    %64 = vector.load %arg2[%c0_67, %c0_68, %c1_69] : memref<1x12x30xbf16, #tpu.memory_space<vmem>>, vector<1x12x20xbf16>
    %65 = vector.shape_cast %64 : vector<1x12x20xbf16> to vector<12x20xbf16>
    %c2_70 = arith.constant 2 : index
    %c0_71 = arith.constant 0 : index
    %c0_72 = arith.constant 0 : index
    %66 = vector.load %arg5[%c2_70, %c0_71, %c0_72] : memref<9x24x12xbf16, #tpu.memory_space<vmem>>, vector<1x24x12xbf16>
    %67 = vector.shape_cast %66 : vector<1x24x12xbf16> to vector<24x12xbf16>
    %cst_73 = arith.constant dense<0.000000e+00> : vector<24x20xf32>
    %68 = tpu.matmul %67, %65, %cst_73 {dimension_numbers = #tpu.dot_dimension_numbers<[1], [0], [0], [1], [0, 0, 1, 1], [], []>} : vector<24x12xbf16>, vector<12x20xbf16>, vector<24x20xf32> -> vector<24x20xf32>
    %69 = arith.addf %63, %68 : vector<24x20xf32>
    %c0_74 = arith.constant 0 : index
    %c0_75 = arith.constant 0 : index
    %c0_76 = arith.constant 0 : index
    %70 = vector.load %arg4[%c0_74, %c0_75, %c0_76] : memref<1x12x30xbf16, #tpu.memory_space<vmem>>, vector<1x12x20xbf16>
    %71 = vector.shape_cast %70 : vector<1x12x20xbf16> to vector<12x20xbf16>
    %c3_77 = arith.constant 3 : index
    %c0_78 = arith.constant 0 : index
    %c0_79 = arith.constant 0 : index
    %72 = vector.load %arg5[%c3_77, %c0_78, %c0_79] : memref<9x24x12xbf16, #tpu.memory_space<vmem>>, vector<1x24x12xbf16>
    %73 = vector.shape_cast %72 : vector<1x24x12xbf16> to vector<24x12xbf16>
    %cst_80 = arith.constant dense<0.000000e+00> : vector<24x20xf32>
    %74 = tpu.matmul %73, %71, %cst_80 {dimension_numbers = #tpu.dot_dimension_numbers<[1], [0], [0], [1], [0, 0, 1, 1], [], []>} : vector<24x12xbf16>, vector<12x20xbf16>, vector<24x20xf32> -> vector<24x20xf32>
    %75 = arith.addf %69, %74 : vector<24x20xf32>
    %c0_81 = arith.constant 0 : index
    %c0_82 = arith.constant 0 : index
    %c1_83 = arith.constant 1 : index
    %76 = vector.load %arg3[%c0_81, %c0_82, %c1_83] : memref<1x12x30xbf16, #tpu.memory_space<vmem>>, vector<1x12x20xbf16>
    %77 = vector.shape_cast %76 : vector<1x12x20xbf16> to vector<12x20xbf16>
    %c4_84 = arith.constant 4 : index
    %c0_85 = arith.constant 0 : index
    %c0_86 = arith.constant 0 : index
    %78 = vector.load %arg5[%c4_84, %c0_85, %c0_86] : memref<9x24x12xbf16, #tpu.memory_space<vmem>>, vector<1x24x12xbf16>
    %79 = vector.shape_cast %78 : vector<1x24x12xbf16> to vector<24x12xbf16>
    %cst_87 = arith.constant dense<0.000000e+00> : vector<24x20xf32>
    %80 = tpu.matmul %79, %77, %cst_87 {dimension_numbers = #tpu.dot_dimension_numbers<[1], [0], [0], [1], [0, 0, 1, 1], [], []>} : vector<24x12xbf16>, vector<12x20xbf16>, vector<24x20xf32> -> vector<24x20xf32>
    %81 = arith.addf %75, %80 : vector<24x20xf32>
    %c0_88 = arith.constant 0 : index
    %c0_89 = arith.constant 0 : index
    %c1_90 = arith.constant 1 : index
    %82 = vector.load %arg4[%c0_88, %c0_89, %c1_90] : memref<1x12x30xbf16, #tpu.memory_space<vmem>>, vector<1x12x20xbf16>
    %83 = vector.shape_cast %82 : vector<1x12x20xbf16> to vector<12x20xbf16>
    %c5_91 = arith.constant 5 : index
    %c0_92 = arith.constant 0 : index
    %c0_93 = arith.constant 0 : index
    %84 = vector.load %arg5[%c5_91, %c0_92, %c0_93] : memref<9x24x12xbf16, #tpu.memory_space<vmem>>, vector<1x24x12xbf16>
    %85 = vector.shape_cast %84 : vector<1x24x12xbf16> to vector<24x12xbf16>
    %cst_94 = arith.constant dense<0.000000e+00> : vector<24x20xf32>
    %86 = tpu.matmul %85, %83, %cst_94 {dimension_numbers = #tpu.dot_dimension_numbers<[1], [0], [0], [1], [0, 0, 1, 1], [], []>} : vector<24x12xbf16>, vector<12x20xbf16>, vector<24x20xf32> -> vector<24x20xf32>
    %87 = arith.addf %81, %86 : vector<24x20xf32>
    %c0_95 = arith.constant 0 : index
    %c0_96 = arith.constant 0 : index
    %c5_97 = arith.constant 5 : index
    %88 = vector.load %arg2[%c0_95, %c0_96, %c5_97] : memref<1x12x30xbf16, #tpu.memory_space<vmem>>, vector<1x12x20xbf16>
    %89 = vector.shape_cast %88 : vector<1x12x20xbf16> to vector<12x20xbf16>
    %c6_98 = arith.constant 6 : index
    %c0_99 = arith.constant 0 : index
    %c0_100 = arith.constant 0 : index
    %90 = vector.load %arg5[%c6_98, %c0_99, %c0_100] : memref<9x24x12xbf16, #tpu.memory_space<vmem>>, vector<1x24x12xbf16>
    %91 = vector.shape_cast %90 : vector<1x24x12xbf16> to vector<24x12xbf16>
    %cst_101 = arith.constant dense<0.000000e+00> : vector<24x20xf32>
    %92 = tpu.matmul %91, %89, %cst_101 {dimension_numbers = #tpu.dot_dimension_numbers<[1], [0], [0], [1], [0, 0, 1, 1], [], []>} : vector<24x12xbf16>, vector<12x20xbf16>, vector<24x20xf32> -> vector<24x20xf32>
    %93 = arith.addf %87, %92 : vector<24x20xf32>
    %c0_102 = arith.constant 0 : index
    %c0_103 = arith.constant 0 : index
    %c6_104 = arith.constant 6 : index
    %94 = vector.load %arg1[%c0_102, %c0_103, %c6_104] : memref<1x12x30xbf16, #tpu.memory_space<vmem>>, vector<1x12x20xbf16>
    %95 = vector.shape_cast %94 : vector<1x12x20xbf16> to vector<12x20xbf16>
    %c7_105 = arith.constant 7 : index
    %c0_106 = arith.constant 0 : index
    %c0_107 = arith.constant 0 : index
    %96 = vector.load %arg5[%c7_105, %c0_106, %c0_107] : memref<9x24x12xbf16, #tpu.memory_space<vmem>>, vector<1x24x12xbf16>
    %97 = vector.shape_cast %96 : vector<1x24x12xbf16> to vector<24x12xbf16>
    %cst_108 = arith.constant dense<0.000000e+00> : vector<24x20xf32>
    %98 = tpu.matmul %97, %95, %cst_108 {dimension_numbers = #tpu.dot_dimension_numbers<[1], [0], [0], [1], [0, 0, 1, 1], [], []>} : vector<24x12xbf16>, vector<12x20xbf16>, vector<24x20xf32> -> vector<24x20xf32>
    %99 = arith.addf %93, %98 : vector<24x20xf32>
    %c0_109 = arith.constant 0 : index
    %c0_110 = arith.constant 0 : index
    %c6_111 = arith.constant 6 : index
    %100 = vector.load %arg2[%c0_109, %c0_110, %c6_111] : memref<1x12x30xbf16, #tpu.memory_space<vmem>>, vector<1x12x20xbf16>
    %101 = vector.shape_cast %100 : vector<1x12x20xbf16> to vector<12x20xbf16>
    %c8_112 = arith.constant 8 : index
    %c0_113 = arith.constant 0 : index
    %c0_114 = arith.constant 0 : index
    %102 = vector.load %arg5[%c8_112, %c0_113, %c0_114] : memref<9x24x12xbf16, #tpu.memory_space<vmem>>, vector<1x24x12xbf16>
    %103 = vector.shape_cast %102 : vector<1x24x12xbf16> to vector<24x12xbf16>
    %cst_115 = arith.constant dense<0.000000e+00> : vector<24x20xf32>
    %104 = tpu.matmul %103, %101, %cst_115 {dimension_numbers = #tpu.dot_dimension_numbers<[1], [0], [0], [1], [0, 0, 1, 1], [], []>} : vector<24x12xbf16>, vector<12x20xbf16>, vector<24x20xf32> -> vector<24x20xf32>
    %105 = arith.addf %99, %104 : vector<24x20xf32>
    %106 = arith.maximumf %52, %105 : vector<24x20xf32>
    %c0_116 = arith.constant 0 : index
    %c0_117 = arith.constant 0 : index
    %c0_118 = arith.constant 0 : index
    %107 = vector.load %arg3[%c0_116, %c0_117, %c0_118] : memref<1x12x30xbf16, #tpu.memory_space<vmem>>, vector<1x12x20xbf16>
    %108 = vector.shape_cast %107 : vector<1x12x20xbf16> to vector<12x20xbf16>
    %c0_119 = arith.constant 0 : index
    %c0_120 = arith.constant 0 : index
    %c0_121 = arith.constant 0 : index
    %109 = vector.load %arg5[%c0_119, %c0_120, %c0_121] : memref<9x24x12xbf16, #tpu.memory_space<vmem>>, vector<1x24x12xbf16>
    %110 = vector.shape_cast %109 : vector<1x24x12xbf16> to vector<24x12xbf16>
    %cst_122 = arith.constant dense<0.000000e+00> : vector<24x20xf32>
    %111 = tpu.matmul %110, %108, %cst_122 {dimension_numbers = #tpu.dot_dimension_numbers<[1], [0], [0], [1], [0, 0, 1, 1], [], []>} : vector<24x12xbf16>, vector<12x20xbf16>, vector<24x20xf32> -> vector<24x20xf32>
    %c0_123 = arith.constant 0 : index
    %c0_124 = arith.constant 0 : index
    %c0_125 = arith.constant 0 : index
    %112 = vector.load %arg4[%c0_123, %c0_124, %c0_125] : memref<1x12x30xbf16, #tpu.memory_space<vmem>>, vector<1x12x20xbf16>
    %113 = vector.shape_cast %112 : vector<1x12x20xbf16> to vector<12x20xbf16>
    %c1_126 = arith.constant 1 : index
    %c0_127 = arith.constant 0 : index
    %c0_128 = arith.constant 0 : index
    %114 = vector.load %arg5[%c1_126, %c0_127, %c0_128] : memref<9x24x12xbf16, #tpu.memory_space<vmem>>, vector<1x24x12xbf16>
    %115 = vector.shape_cast %114 : vector<1x24x12xbf16> to vector<24x12xbf16>
    %cst_129 = arith.constant dense<0.000000e+00> : vector<24x20xf32>
    %116 = tpu.matmul %115, %113, %cst_129 {dimension_numbers = #tpu.dot_dimension_numbers<[1], [0], [0], [1], [0, 0, 1, 1], [], []>} : vector<24x12xbf16>, vector<12x20xbf16>, vector<24x20xf32> -> vector<24x20xf32>
    %117 = arith.addf %111, %116 : vector<24x20xf32>
    %c0_130 = arith.constant 0 : index
    %c0_131 = arith.constant 0 : index
    %c1_132 = arith.constant 1 : index
    %118 = vector.load %arg3[%c0_130, %c0_131, %c1_132] : memref<1x12x30xbf16, #tpu.memory_space<vmem>>, vector<1x12x20xbf16>
    %119 = vector.shape_cast %118 : vector<1x12x20xbf16> to vector<12x20xbf16>
    %c2_133 = arith.constant 2 : index
    %c0_134 = arith.constant 0 : index
    %c0_135 = arith.constant 0 : index
    %120 = vector.load %arg5[%c2_133, %c0_134, %c0_135] : memref<9x24x12xbf16, #tpu.memory_space<vmem>>, vector<1x24x12xbf16>
    %121 = vector.shape_cast %120 : vector<1x24x12xbf16> to vector<24x12xbf16>
    %cst_136 = arith.constant dense<0.000000e+00> : vector<24x20xf32>
    %122 = tpu.matmul %121, %119, %cst_136 {dimension_numbers = #tpu.dot_dimension_numbers<[1], [0], [0], [1], [0, 0, 1, 1], [], []>} : vector<24x12xbf16>, vector<12x20xbf16>, vector<24x20xf32> -> vector<24x20xf32>
    %123 = arith.addf %117, %122 : vector<24x20xf32>
    %c0_137 = arith.constant 0 : index
    %c0_138 = arith.constant 0 : index
    %c5_139 = arith.constant 5 : index
    %124 = vector.load %arg1[%c0_137, %c0_138, %c5_139] : memref<1x12x30xbf16, #tpu.memory_space<vmem>>, vector<1x12x20xbf16>
    %125 = vector.shape_cast %124 : vector<1x12x20xbf16> to vector<12x20xbf16>
    %c3_140 = arith.constant 3 : index
    %c0_141 = arith.constant 0 : index
    %c0_142 = arith.constant 0 : index
    %126 = vector.load %arg5[%c3_140, %c0_141, %c0_142] : memref<9x24x12xbf16, #tpu.memory_space<vmem>>, vector<1x24x12xbf16>
    %127 = vector.shape_cast %126 : vector<1x24x12xbf16> to vector<24x12xbf16>
    %cst_143 = arith.constant dense<0.000000e+00> : vector<24x20xf32>
    %128 = tpu.matmul %127, %125, %cst_143 {dimension_numbers = #tpu.dot_dimension_numbers<[1], [0], [0], [1], [0, 0, 1, 1], [], []>} : vector<24x12xbf16>, vector<12x20xbf16>, vector<24x20xf32> -> vector<24x20xf32>
    %129 = arith.addf %123, %128 : vector<24x20xf32>
    %c0_144 = arith.constant 0 : index
    %c0_145 = arith.constant 0 : index
    %c5_146 = arith.constant 5 : index
    %130 = vector.load %arg2[%c0_144, %c0_145, %c5_146] : memref<1x12x30xbf16, #tpu.memory_space<vmem>>, vector<1x12x20xbf16>
    %131 = vector.shape_cast %130 : vector<1x12x20xbf16> to vector<12x20xbf16>
    %c4_147 = arith.constant 4 : index
    %c0_148 = arith.constant 0 : index
    %c0_149 = arith.constant 0 : index
    %132 = vector.load %arg5[%c4_147, %c0_148, %c0_149] : memref<9x24x12xbf16, #tpu.memory_space<vmem>>, vector<1x24x12xbf16>
    %133 = vector.shape_cast %132 : vector<1x24x12xbf16> to vector<24x12xbf16>
    %cst_150 = arith.constant dense<0.000000e+00> : vector<24x20xf32>
    %134 = tpu.matmul %133, %131, %cst_150 {dimension_numbers = #tpu.dot_dimension_numbers<[1], [0], [0], [1], [0, 0, 1, 1], [], []>} : vector<24x12xbf16>, vector<12x20xbf16>, vector<24x20xf32> -> vector<24x20xf32>
    %135 = arith.addf %129, %134 : vector<24x20xf32>
    %c0_151 = arith.constant 0 : index
    %c0_152 = arith.constant 0 : index
    %c6_153 = arith.constant 6 : index
    %136 = vector.load %arg1[%c0_151, %c0_152, %c6_153] : memref<1x12x30xbf16, #tpu.memory_space<vmem>>, vector<1x12x20xbf16>
    %137 = vector.shape_cast %136 : vector<1x12x20xbf16> to vector<12x20xbf16>
    %c5_154 = arith.constant 5 : index
    %c0_155 = arith.constant 0 : index
    %c0_156 = arith.constant 0 : index
    %138 = vector.load %arg5[%c5_154, %c0_155, %c0_156] : memref<9x24x12xbf16, #tpu.memory_space<vmem>>, vector<1x24x12xbf16>
    %139 = vector.shape_cast %138 : vector<1x24x12xbf16> to vector<24x12xbf16>
    %cst_157 = arith.constant dense<0.000000e+00> : vector<24x20xf32>
    %140 = tpu.matmul %139, %137, %cst_157 {dimension_numbers = #tpu.dot_dimension_numbers<[1], [0], [0], [1], [0, 0, 1, 1], [], []>} : vector<24x12xbf16>, vector<12x20xbf16>, vector<24x20xf32> -> vector<24x20xf32>
    %141 = arith.addf %135, %140 : vector<24x20xf32>
    %c0_158 = arith.constant 0 : index
    %c0_159 = arith.constant 0 : index
    %c5_160 = arith.constant 5 : index
    %142 = vector.load %arg3[%c0_158, %c0_159, %c5_160] : memref<1x12x30xbf16, #tpu.memory_space<vmem>>, vector<1x12x20xbf16>
    %143 = vector.shape_cast %142 : vector<1x12x20xbf16> to vector<12x20xbf16>
    %c6_161 = arith.constant 6 : index
    %c0_162 = arith.constant 0 : index
    %c0_163 = arith.constant 0 : index
    %144 = vector.load %arg5[%c6_161, %c0_162, %c0_163] : memref<9x24x12xbf16, #tpu.memory_space<vmem>>, vector<1x24x12xbf16>
    %145 = vector.shape_cast %144 : vector<1x24x12xbf16> to vector<24x12xbf16>
    %cst_164 = arith.constant dense<0.000000e+00> : vector<24x20xf32>
    %146 = tpu.matmul %145, %143, %cst_164 {dimension_numbers = #tpu.dot_dimension_numbers<[1], [0], [0], [1], [0, 0, 1, 1], [], []>} : vector<24x12xbf16>, vector<12x20xbf16>, vector<24x20xf32> -> vector<24x20xf32>
    %147 = arith.addf %141, %146 : vector<24x20xf32>
    %c0_165 = arith.constant 0 : index
    %c0_166 = arith.constant 0 : index
    %c5_167 = arith.constant 5 : index
    %148 = vector.load %arg4[%c0_165, %c0_166, %c5_167] : memref<1x12x30xbf16, #tpu.memory_space<vmem>>, vector<1x12x20xbf16>
    %149 = vector.shape_cast %148 : vector<1x12x20xbf16> to vector<12x20xbf16>
    %c7_168 = arith.constant 7 : index
    %c0_169 = arith.constant 0 : index
    %c0_170 = arith.constant 0 : index
    %150 = vector.load %arg5[%c7_168, %c0_169, %c0_170] : memref<9x24x12xbf16, #tpu.memory_space<vmem>>, vector<1x24x12xbf16>
    %151 = vector.shape_cast %150 : vector<1x24x12xbf16> to vector<24x12xbf16>
    %cst_171 = arith.constant dense<0.000000e+00> : vector<24x20xf32>
    %152 = tpu.matmul %151, %149, %cst_171 {dimension_numbers = #tpu.dot_dimension_numbers<[1], [0], [0], [1], [0, 0, 1, 1], [], []>} : vector<24x12xbf16>, vector<12x20xbf16>, vector<24x20xf32> -> vector<24x20xf32>
    %153 = arith.addf %147, %152 : vector<24x20xf32>
    %c0_172 = arith.constant 0 : index
    %c0_173 = arith.constant 0 : index
    %c6_174 = arith.constant 6 : index
    %154 = vector.load %arg3[%c0_172, %c0_173, %c6_174] : memref<1x12x30xbf16, #tpu.memory_space<vmem>>, vector<1x12x20xbf16>
    %155 = vector.shape_cast %154 : vector<1x12x20xbf16> to vector<12x20xbf16>
    %c8_175 = arith.constant 8 : index
    %c0_176 = arith.constant 0 : index
    %c0_177 = arith.constant 0 : index
    %156 = vector.load %arg5[%c8_175, %c0_176, %c0_177] : memref<9x24x12xbf16, #tpu.memory_space<vmem>>, vector<1x24x12xbf16>
    %157 = vector.shape_cast %156 : vector<1x24x12xbf16> to vector<24x12xbf16>
    %cst_178 = arith.constant dense<0.000000e+00> : vector<24x20xf32>
    %158 = tpu.matmul %157, %155, %cst_178 {dimension_numbers = #tpu.dot_dimension_numbers<[1], [0], [0], [1], [0, 0, 1, 1], [], []>} : vector<24x12xbf16>, vector<12x20xbf16>, vector<24x20xf32> -> vector<24x20xf32>
    %159 = arith.addf %153, %158 : vector<24x20xf32>
    %160 = arith.maximumf %106, %159 : vector<24x20xf32>
    %c0_179 = arith.constant 0 : index
    %c0_180 = arith.constant 0 : index
    %c0_181 = arith.constant 0 : index
    %161 = vector.load %arg4[%c0_179, %c0_180, %c0_181] : memref<1x12x30xbf16, #tpu.memory_space<vmem>>, vector<1x12x20xbf16>
    %162 = vector.shape_cast %161 : vector<1x12x20xbf16> to vector<12x20xbf16>
    %c0_182 = arith.constant 0 : index
    %c0_183 = arith.constant 0 : index
    %c0_184 = arith.constant 0 : index
    %163 = vector.load %arg5[%c0_182, %c0_183, %c0_184] : memref<9x24x12xbf16, #tpu.memory_space<vmem>>, vector<1x24x12xbf16>
    %164 = vector.shape_cast %163 : vector<1x24x12xbf16> to vector<24x12xbf16>
    %cst_185 = arith.constant dense<0.000000e+00> : vector<24x20xf32>
    %165 = tpu.matmul %164, %162, %cst_185 {dimension_numbers = #tpu.dot_dimension_numbers<[1], [0], [0], [1], [0, 0, 1, 1], [], []>} : vector<24x12xbf16>, vector<12x20xbf16>, vector<24x20xf32> -> vector<24x20xf32>
    %c0_186 = arith.constant 0 : index
    %c0_187 = arith.constant 0 : index
    %c1_188 = arith.constant 1 : index
    %166 = vector.load %arg3[%c0_186, %c0_187, %c1_188] : memref<1x12x30xbf16, #tpu.memory_space<vmem>>, vector<1x12x20xbf16>
    %167 = vector.shape_cast %166 : vector<1x12x20xbf16> to vector<12x20xbf16>
    %c1_189 = arith.constant 1 : index
    %c0_190 = arith.constant 0 : index
    %c0_191 = arith.constant 0 : index
    %168 = vector.load %arg5[%c1_189, %c0_190, %c0_191] : memref<9x24x12xbf16, #tpu.memory_space<vmem>>, vector<1x24x12xbf16>
    %169 = vector.shape_cast %168 : vector<1x24x12xbf16> to vector<24x12xbf16>
    %cst_192 = arith.constant dense<0.000000e+00> : vector<24x20xf32>
    %170 = tpu.matmul %169, %167, %cst_192 {dimension_numbers = #tpu.dot_dimension_numbers<[1], [0], [0], [1], [0, 0, 1, 1], [], []>} : vector<24x12xbf16>, vector<12x20xbf16>, vector<24x20xf32> -> vector<24x20xf32>
    %171 = arith.addf %165, %170 : vector<24x20xf32>
    %c0_193 = arith.constant 0 : index
    %c0_194 = arith.constant 0 : index
    %c1_195 = arith.constant 1 : index
    %172 = vector.load %arg4[%c0_193, %c0_194, %c1_195] : memref<1x12x30xbf16, #tpu.memory_space<vmem>>, vector<1x12x20xbf16>
    %173 = vector.shape_cast %172 : vector<1x12x20xbf16> to vector<12x20xbf16>
    %c2_196 = arith.constant 2 : index
    %c0_197 = arith.constant 0 : index
    %c0_198 = arith.constant 0 : index
    %174 = vector.load %arg5[%c2_196, %c0_197, %c0_198] : memref<9x24x12xbf16, #tpu.memory_space<vmem>>, vector<1x24x12xbf16>
    %175 = vector.shape_cast %174 : vector<1x24x12xbf16> to vector<24x12xbf16>
    %cst_199 = arith.constant dense<0.000000e+00> : vector<24x20xf32>
    %176 = tpu.matmul %175, %173, %cst_199 {dimension_numbers = #tpu.dot_dimension_numbers<[1], [0], [0], [1], [0, 0, 1, 1], [], []>} : vector<24x12xbf16>, vector<12x20xbf16>, vector<24x20xf32> -> vector<24x20xf32>
    %177 = arith.addf %171, %176 : vector<24x20xf32>
    %c0_200 = arith.constant 0 : index
    %c0_201 = arith.constant 0 : index
    %c5_202 = arith.constant 5 : index
    %178 = vector.load %arg2[%c0_200, %c0_201, %c5_202] : memref<1x12x30xbf16, #tpu.memory_space<vmem>>, vector<1x12x20xbf16>
    %179 = vector.shape_cast %178 : vector<1x12x20xbf16> to vector<12x20xbf16>
    %c3_203 = arith.constant 3 : index
    %c0_204 = arith.constant 0 : index
    %c0_205 = arith.constant 0 : index
    %180 = vector.load %arg5[%c3_203, %c0_204, %c0_205] : memref<9x24x12xbf16, #tpu.memory_space<vmem>>, vector<1x24x12xbf16>
    %181 = vector.shape_cast %180 : vector<1x24x12xbf16> to vector<24x12xbf16>
    %cst_206 = arith.constant dense<0.000000e+00> : vector<24x20xf32>
    %182 = tpu.matmul %181, %179, %cst_206 {dimension_numbers = #tpu.dot_dimension_numbers<[1], [0], [0], [1], [0, 0, 1, 1], [], []>} : vector<24x12xbf16>, vector<12x20xbf16>, vector<24x20xf32> -> vector<24x20xf32>
    %183 = arith.addf %177, %182 : vector<24x20xf32>
    %c0_207 = arith.constant 0 : index
    %c0_208 = arith.constant 0 : index
    %c6_209 = arith.constant 6 : index
    %184 = vector.load %arg1[%c0_207, %c0_208, %c6_209] : memref<1x12x30xbf16, #tpu.memory_space<vmem>>, vector<1x12x20xbf16>
    %185 = vector.shape_cast %184 : vector<1x12x20xbf16> to vector<12x20xbf16>
    %c4_210 = arith.constant 4 : index
    %c0_211 = arith.constant 0 : index
    %c0_212 = arith.constant 0 : index
    %186 = vector.load %arg5[%c4_210, %c0_211, %c0_212] : memref<9x24x12xbf16, #tpu.memory_space<vmem>>, vector<1x24x12xbf16>
    %187 = vector.shape_cast %186 : vector<1x24x12xbf16> to vector<24x12xbf16>
    %cst_213 = arith.constant dense<0.000000e+00> : vector<24x20xf32>
    %188 = tpu.matmul %187, %185, %cst_213 {dimension_numbers = #tpu.dot_dimension_numbers<[1], [0], [0], [1], [0, 0, 1, 1], [], []>} : vector<24x12xbf16>, vector<12x20xbf16>, vector<24x20xf32> -> vector<24x20xf32>
    %189 = arith.addf %183, %188 : vector<24x20xf32>
    %c0_214 = arith.constant 0 : index
    %c0_215 = arith.constant 0 : index
    %c6_216 = arith.constant 6 : index
    %190 = vector.load %arg2[%c0_214, %c0_215, %c6_216] : memref<1x12x30xbf16, #tpu.memory_space<vmem>>, vector<1x12x20xbf16>
    %191 = vector.shape_cast %190 : vector<1x12x20xbf16> to vector<12x20xbf16>
    %c5_217 = arith.constant 5 : index
    %c0_218 = arith.constant 0 : index
    %c0_219 = arith.constant 0 : index
    %192 = vector.load %arg5[%c5_217, %c0_218, %c0_219] : memref<9x24x12xbf16, #tpu.memory_space<vmem>>, vector<1x24x12xbf16>
    %193 = vector.shape_cast %192 : vector<1x24x12xbf16> to vector<24x12xbf16>
    %cst_220 = arith.constant dense<0.000000e+00> : vector<24x20xf32>
    %194 = tpu.matmul %193, %191, %cst_220 {dimension_numbers = #tpu.dot_dimension_numbers<[1], [0], [0], [1], [0, 0, 1, 1], [], []>} : vector<24x12xbf16>, vector<12x20xbf16>, vector<24x20xf32> -> vector<24x20xf32>
    %195 = arith.addf %189, %194 : vector<24x20xf32>
    %c0_221 = arith.constant 0 : index
    %c0_222 = arith.constant 0 : index
    %c5_223 = arith.constant 5 : index
    %196 = vector.load %arg4[%c0_221, %c0_222, %c5_223] : memref<1x12x30xbf16, #tpu.memory_space<vmem>>, vector<1x12x20xbf16>
    %197 = vector.shape_cast %196 : vector<1x12x20xbf16> to vector<12x20xbf16>
    %c6_224 = arith.constant 6 : index
    %c0_225 = arith.constant 0 : index
    %c0_226 = arith.constant 0 : index
    %198 = vector.load %arg5[%c6_224, %c0_225, %c0_226] : memref<9x24x12xbf16, #tpu.memory_space<vmem>>, vector<1x24x12xbf16>
    %199 = vector.shape_cast %198 : vector<1x24x12xbf16> to vector<24x12xbf16>
    %cst_227 = arith.constant dense<0.000000e+00> : vector<24x20xf32>
    %200 = tpu.matmul %199, %197, %cst_227 {dimension_numbers = #tpu.dot_dimension_numbers<[1], [0], [0], [1], [0, 0, 1, 1], [], []>} : vector<24x12xbf16>, vector<12x20xbf16>, vector<24x20xf32> -> vector<24x20xf32>
    %201 = arith.addf %195, %200 : vector<24x20xf32>
    %c0_228 = arith.constant 0 : index
    %c0_229 = arith.constant 0 : index
    %c6_230 = arith.constant 6 : index
    %202 = vector.load %arg3[%c0_228, %c0_229, %c6_230] : memref<1x12x30xbf16, #tpu.memory_space<vmem>>, vector<1x12x20xbf16>
    %203 = vector.shape_cast %202 : vector<1x12x20xbf16> to vector<12x20xbf16>
    %c7_231 = arith.constant 7 : index
    %c0_232 = arith.constant 0 : index
    %c0_233 = arith.constant 0 : index
    %204 = vector.load %arg5[%c7_231, %c0_232, %c0_233] : memref<9x24x12xbf16, #tpu.memory_space<vmem>>, vector<1x24x12xbf16>
    %205 = vector.shape_cast %204 : vector<1x24x12xbf16> to vector<24x12xbf16>
    %cst_234 = arith.constant dense<0.000000e+00> : vector<24x20xf32>
    %206 = tpu.matmul %205, %203, %cst_234 {dimension_numbers = #tpu.dot_dimension_numbers<[1], [0], [0], [1], [0, 0, 1, 1], [], []>} : vector<24x12xbf16>, vector<12x20xbf16>, vector<24x20xf32> -> vector<24x20xf32>
    %207 = arith.addf %201, %206 : vector<24x20xf32>
    %c0_235 = arith.constant 0 : index
    %c0_236 = arith.constant 0 : index
    %c6_237 = arith.constant 6 : index
    %208 = vector.load %arg4[%c0_235, %c0_236, %c6_237] : memref<1x12x30xbf16, #tpu.memory_space<vmem>>, vector<1x12x20xbf16>
    %209 = vector.shape_cast %208 : vector<1x12x20xbf16> to vector<12x20xbf16>
    %c8_238 = arith.constant 8 : index
    %c0_239 = arith.constant 0 : index
    %c0_240 = arith.constant 0 : index
    %210 = vector.load %arg5[%c8_238, %c0_239, %c0_240] : memref<9x24x12xbf16, #tpu.memory_space<vmem>>, vector<1x24x12xbf16>
    %211 = vector.shape_cast %210 : vector<1x24x12xbf16> to vector<24x12xbf16>
    %cst_241 = arith.constant dense<0.000000e+00> : vector<24x20xf32>
    %212 = tpu.matmul %211, %209, %cst_241 {dimension_numbers = #tpu.dot_dimension_numbers<[1], [0], [0], [1], [0, 0, 1, 1], [], []>} : vector<24x12xbf16>, vector<12x20xbf16>, vector<24x20xf32> -> vector<24x20xf32>
    %213 = arith.addf %207, %212 : vector<24x20xf32>
    %214 = arith.maximumf %160, %213 : vector<24x20xf32>
    %c0_242 = arith.constant 0 : index
    %c0_243 = arith.constant 0 : index
    %215 = vector.load %arg6[%c0_242, %c0_243] : memref<24x1xf32, #tpu.memory_space<vmem>>, vector<24x1xf32>
    %216 = vector.broadcast %215 : vector<24x1xf32> to vector<24x20xf32>
    %217 = arith.addf %214, %216 : vector<24x20xf32>
    %cst_244 = arith.constant 0.000000e+00 : f32
    %218 = vector.broadcast %cst_244 : f32 to vector<24x20xf32>
    %219 = arith.maximumf %217, %218 : vector<24x20xf32>
    %220 = tpu.iota {dimensions = array<i32: 1>} : vector<24x20xi32>
    %c5_i32 = arith.constant 5 : i32
    %c0_i32 = arith.constant 0 : i32
    %221 = arith.cmpi eq, %c5_i32, %c0_i32 : i32
    %c1_i32 = arith.constant 1 : i32
    %222 = arith.select %221, %c1_i32, %c5_i32 : i32
    %223 = vector.broadcast %222 : i32 to vector<24x20xi32>
    %224 = arith.remsi %220, %223 : vector<24x20xi32>
    %c0_i32_245 = arith.constant 0 : i32
    %225 = vector.broadcast %c0_i32_245 : i32 to vector<24x20xi32>
    %226 = arith.cmpi ne, %224, %225 : vector<24x20xi32>
    %c0_i32_246 = arith.constant 0 : i32
    %227 = vector.broadcast %c0_i32_246 : i32 to vector<24x20xi32>
    %228 = arith.cmpi slt, %224, %227 : vector<24x20xi32>
    %c0_i32_247 = arith.constant 0 : i32
    %229 = arith.cmpi slt, %222, %c0_i32_247 : i32
    %230 = vector.broadcast %229 : i1 to vector<24x20xi1>
    %231 = vector.broadcast %230 : vector<24x20xi1> to vector<24x20xi1>
    %232 = arith.xori %228, %231 : vector<24x20xi1>
    %233 = arith.andi %232, %226 : vector<24x20xi1>
    %234 = vector.broadcast %222 : i32 to vector<24x20xi32>
    %235 = arith.addi %224, %234 : vector<24x20xi32>
    %236 = arith.select %233, %235, %224 : vector<24x20xi1>, vector<24x20xi32>
    %c4_i32 = arith.constant 4 : i32
    %237 = vector.broadcast %c4_i32 : i32 to vector<24x20xi32>
    %238 = arith.cmpi eq, %236, %237 : vector<24x20xi32>
    %cst_248 = arith.constant 0.000000e+00 : f32
    %239 = vector.broadcast %cst_248 : f32 to vector<24x20xf32>
    %240 = arith.select %238, %239, %219 : vector<24x20xi1>, vector<24x20xf32>
    %241 = arith.truncf %240 : vector<24x20xf32> to vector<24x20xbf16>
    %c0_249 = arith.constant 0 : index
    %c0_250 = arith.constant 0 : index
    %c0_251 = arith.constant 0 : index
    %242 = vector.load %arg7[%c0_249, %c0_250, %c0_251] : memref<1x24x20xbf16, #tpu.memory_space<vmem>>, vector<1x24x20xbf16>
    %243 = vector.shape_cast %242 : vector<1x24x20xbf16> to vector<24x20xbf16>
    %244 = vector.shape_cast %241 : vector<24x20xbf16> to vector<1x24x20xbf16>
    tpu.vector_store %arg7[%c0_249, %c0_250, %c0_251], %244 {strides = array<i32>} : memref<1x24x20xbf16, #tpu.memory_space<vmem>>, vector<1x24x20xbf16>,
    return
  }
  func.func @transform_0(%arg0: i32) -> (i32, i32, i32) {
    %c0_i32 = arith.constant 0 : i32
    %c0_i32_0 = arith.constant 0 : i32
    %c0_i32_1 = arith.constant 0 : i32
    return %arg0, %c0_i32, %c0_i32_0 : i32, i32, i32
  }
  func.func @transform_1(%arg0: i32) -> (i32, i32, i32) {
    %c0_i32 = arith.constant 0 : i32
    %c0_i32_0 = arith.constant 0 : i32
    %c0_i32_1 = arith.constant 0 : i32
    return %arg0, %c0_i32, %c0_i32_0 : i32, i32, i32
  }
  func.func @transform_2(%arg0: i32) -> (i32, i32, i32) {
    %c0_i32 = arith.constant 0 : i32
    %c0_i32_0 = arith.constant 0 : i32
    %c0_i32_1 = arith.constant 0 : i32
    return %arg0, %c0_i32, %c0_i32_0 : i32, i32, i32
  }
  func.func @transform_3(%arg0: i32) -> (i32, i32, i32) {
    %c0_i32 = arith.constant 0 : i32
    %c0_i32_0 = arith.constant 0 : i32
    %c0_i32_1 = arith.constant 0 : i32
    return %arg0, %c0_i32, %c0_i32_0 : i32, i32, i32
  }
  func.func @transform_4(%arg0: i32) -> (i32, i32, i32) {
    %c0_i32 = arith.constant 0 : i32
    %c0_i32_0 = arith.constant 0 : i32
    %c0_i32_1 = arith.constant 0 : i32
    %c0_i32_2 = arith.constant 0 : i32
    return %c0_i32, %c0_i32_0, %c0_i32_1 : i32, i32, i32
  }
  func.func @transform_5(%arg0: i32) -> (i32, i32) {
    %c0_i32 = arith.constant 0 : i32
    %c0_i32_0 = arith.constant 0 : i32
    %c0_i32_1 = arith.constant 0 : i32
    return %c0_i32, %c0_i32_0 : i32, i32
  }
  func.func @transform_6(%arg0: i32) -> (i32, i32, i32) {
    %c0_i32 = arith.constant 0 : i32
    %c0_i32_0 = arith.constant 0 : i32
    %c0_i32_1 = arith.constant 0 : i32
    return %arg0, %c0_i32, %c0_i32_0 : i32, i32, i32
  }
}

module attributes {stable_mosaic.version = 11 : i64} {
  func.func @_conv3x3_pool_relu_kernel(%arg0: i32, %arg1: memref<1x24x12xbf16, #tpu.memory_space<vmem>>, %arg2: memref<1x24x12xbf16, #tpu.memory_space<vmem>>, %arg3: memref<1x24x12xbf16, #tpu.memory_space<vmem>>, %arg4: memref<1x24x12xbf16, #tpu.memory_space<vmem>>, %arg5: memref<9x16x24xbf16, #tpu.memory_space<vmem>>, %arg6: memref<16x1xf32, #tpu.memory_space<vmem>>, %arg7: memref<1x16x6xbf16, #tpu.memory_space<vmem>>) attributes {dimension_semantics = [#tpu.dimension_semantics<parallel>], iteration_bounds = array<i64: 2>, scalar_prefetch = 0 : i64, scratch_operands = 0 : i64, tpu.core_type = #tpu.core_type<tc>, window_params = [{transform_indices = @transform_0, window_bounds = array<i64: 1, 24, 12>}, {transform_indices = @transform_1, window_bounds = array<i64: 1, 24, 12>}, {transform_indices = @transform_2, window_bounds = array<i64: 1, 24, 12>}, {transform_indices = @transform_3, window_bounds = array<i64: 1, 24, 12>}, {pipeline_mode = #tpu.pipeline_mode<synchronous>, transform_indices = @transform_4, window_bounds = array<i64: 9, 16, 24>}, {pipeline_mode = #tpu.pipeline_mode<synchronous>, transform_indices = @transform_5, window_bounds = array<i64: 16, 1>}, {transform_indices = @transform_6, window_bounds = array<i64: 1, 16, 6>}]} {
    %c0 = arith.constant 0 : index
    %c0_0 = arith.constant 0 : index
    %c0_1 = arith.constant 0 : index
    %0 = vector.load %arg1[%c0, %c0_0, %c0_1] : memref<1x24x12xbf16, #tpu.memory_space<vmem>>, vector<1x24x6xbf16>
    %1 = vector.shape_cast %0 : vector<1x24x6xbf16> to vector<24x6xbf16>
    %c0_2 = arith.constant 0 : index
    %c0_3 = arith.constant 0 : index
    %c0_4 = arith.constant 0 : index
    %2 = vector.load %arg5[%c0_2, %c0_3, %c0_4] : memref<9x16x24xbf16, #tpu.memory_space<vmem>>, vector<1x16x24xbf16>
    %3 = vector.shape_cast %2 : vector<1x16x24xbf16> to vector<16x24xbf16>
    %cst = arith.constant dense<0.000000e+00> : vector<16x6xf32>
    %4 = tpu.matmul %3, %1, %cst {dimension_numbers = #tpu.dot_dimension_numbers<[1], [0], [0], [1], [0, 0, 1, 1], [], []>} : vector<16x24xbf16>, vector<24x6xbf16>, vector<16x6xf32> -> vector<16x6xf32>
    %c0_5 = arith.constant 0 : index
    %c0_6 = arith.constant 0 : index
    %c0_7 = arith.constant 0 : index
    %5 = vector.load %arg2[%c0_5, %c0_6, %c0_7] : memref<1x24x12xbf16, #tpu.memory_space<vmem>>, vector<1x24x6xbf16>
    %6 = vector.shape_cast %5 : vector<1x24x6xbf16> to vector<24x6xbf16>
    %c1 = arith.constant 1 : index
    %c0_8 = arith.constant 0 : index
    %c0_9 = arith.constant 0 : index
    %7 = vector.load %arg5[%c1, %c0_8, %c0_9] : memref<9x16x24xbf16, #tpu.memory_space<vmem>>, vector<1x16x24xbf16>
    %8 = vector.shape_cast %7 : vector<1x16x24xbf16> to vector<16x24xbf16>
    %cst_10 = arith.constant dense<0.000000e+00> : vector<16x6xf32>
    %9 = tpu.matmul %8, %6, %cst_10 {dimension_numbers = #tpu.dot_dimension_numbers<[1], [0], [0], [1], [0, 0, 1, 1], [], []>} : vector<16x24xbf16>, vector<24x6xbf16>, vector<16x6xf32> -> vector<16x6xf32>
    %10 = arith.addf %4, %9 : vector<16x6xf32>
    %c0_11 = arith.constant 0 : index
    %c0_12 = arith.constant 0 : index
    %c1_13 = arith.constant 1 : index
    %11 = vector.load %arg1[%c0_11, %c0_12, %c1_13] : memref<1x24x12xbf16, #tpu.memory_space<vmem>>, vector<1x24x6xbf16>
    %12 = vector.shape_cast %11 : vector<1x24x6xbf16> to vector<24x6xbf16>
    %c2 = arith.constant 2 : index
    %c0_14 = arith.constant 0 : index
    %c0_15 = arith.constant 0 : index
    %13 = vector.load %arg5[%c2, %c0_14, %c0_15] : memref<9x16x24xbf16, #tpu.memory_space<vmem>>, vector<1x16x24xbf16>
    %14 = vector.shape_cast %13 : vector<1x16x24xbf16> to vector<16x24xbf16>
    %cst_16 = arith.constant dense<0.000000e+00> : vector<16x6xf32>
    %15 = tpu.matmul %14, %12, %cst_16 {dimension_numbers = #tpu.dot_dimension_numbers<[1], [0], [0], [1], [0, 0, 1, 1], [], []>} : vector<16x24xbf16>, vector<24x6xbf16>, vector<16x6xf32> -> vector<16x6xf32>
    %16 = arith.addf %10, %15 : vector<16x6xf32>
    %c0_17 = arith.constant 0 : index
    %c0_18 = arith.constant 0 : index
    %c0_19 = arith.constant 0 : index
    %17 = vector.load %arg3[%c0_17, %c0_18, %c0_19] : memref<1x24x12xbf16, #tpu.memory_space<vmem>>, vector<1x24x6xbf16>
    %18 = vector.shape_cast %17 : vector<1x24x6xbf16> to vector<24x6xbf16>
    %c3 = arith.constant 3 : index
    %c0_20 = arith.constant 0 : index
    %c0_21 = arith.constant 0 : index
    %19 = vector.load %arg5[%c3, %c0_20, %c0_21] : memref<9x16x24xbf16, #tpu.memory_space<vmem>>, vector<1x16x24xbf16>
    %20 = vector.shape_cast %19 : vector<1x16x24xbf16> to vector<16x24xbf16>
    %cst_22 = arith.constant dense<0.000000e+00> : vector<16x6xf32>
    %21 = tpu.matmul %20, %18, %cst_22 {dimension_numbers = #tpu.dot_dimension_numbers<[1], [0], [0], [1], [0, 0, 1, 1], [], []>} : vector<16x24xbf16>, vector<24x6xbf16>, vector<16x6xf32> -> vector<16x6xf32>
    %22 = arith.addf %16, %21 : vector<16x6xf32>
    %c0_23 = arith.constant 0 : index
    %c0_24 = arith.constant 0 : index
    %c0_25 = arith.constant 0 : index
    %23 = vector.load %arg4[%c0_23, %c0_24, %c0_25] : memref<1x24x12xbf16, #tpu.memory_space<vmem>>, vector<1x24x6xbf16>
    %24 = vector.shape_cast %23 : vector<1x24x6xbf16> to vector<24x6xbf16>
    %c4 = arith.constant 4 : index
    %c0_26 = arith.constant 0 : index
    %c0_27 = arith.constant 0 : index
    %25 = vector.load %arg5[%c4, %c0_26, %c0_27] : memref<9x16x24xbf16, #tpu.memory_space<vmem>>, vector<1x16x24xbf16>
    %26 = vector.shape_cast %25 : vector<1x16x24xbf16> to vector<16x24xbf16>
    %cst_28 = arith.constant dense<0.000000e+00> : vector<16x6xf32>
    %27 = tpu.matmul %26, %24, %cst_28 {dimension_numbers = #tpu.dot_dimension_numbers<[1], [0], [0], [1], [0, 0, 1, 1], [], []>} : vector<16x24xbf16>, vector<24x6xbf16>, vector<16x6xf32> -> vector<16x6xf32>
    %28 = arith.addf %22, %27 : vector<16x6xf32>
    %c0_29 = arith.constant 0 : index
    %c0_30 = arith.constant 0 : index
    %c1_31 = arith.constant 1 : index
    %29 = vector.load %arg3[%c0_29, %c0_30, %c1_31] : memref<1x24x12xbf16, #tpu.memory_space<vmem>>, vector<1x24x6xbf16>
    %30 = vector.shape_cast %29 : vector<1x24x6xbf16> to vector<24x6xbf16>
    %c5 = arith.constant 5 : index
    %c0_32 = arith.constant 0 : index
    %c0_33 = arith.constant 0 : index
    %31 = vector.load %arg5[%c5, %c0_32, %c0_33] : memref<9x16x24xbf16, #tpu.memory_space<vmem>>, vector<1x16x24xbf16>
    %32 = vector.shape_cast %31 : vector<1x16x24xbf16> to vector<16x24xbf16>
    %cst_34 = arith.constant dense<0.000000e+00> : vector<16x6xf32>
    %33 = tpu.matmul %32, %30, %cst_34 {dimension_numbers = #tpu.dot_dimension_numbers<[1], [0], [0], [1], [0, 0, 1, 1], [], []>} : vector<16x24xbf16>, vector<24x6xbf16>, vector<16x6xf32> -> vector<16x6xf32>
    %34 = arith.addf %28, %33 : vector<16x6xf32>
    %c0_35 = arith.constant 0 : index
    %c0_36 = arith.constant 0 : index
    %c3_37 = arith.constant 3 : index
    %35 = vector.load %arg1[%c0_35, %c0_36, %c3_37] : memref<1x24x12xbf16, #tpu.memory_space<vmem>>, vector<1x24x6xbf16>
    %36 = vector.shape_cast %35 : vector<1x24x6xbf16> to vector<24x6xbf16>
    %c6 = arith.constant 6 : index
    %c0_38 = arith.constant 0 : index
    %c0_39 = arith.constant 0 : index
    %37 = vector.load %arg5[%c6, %c0_38, %c0_39] : memref<9x16x24xbf16, #tpu.memory_space<vmem>>, vector<1x16x24xbf16>
    %38 = vector.shape_cast %37 : vector<1x16x24xbf16> to vector<16x24xbf16>
    %cst_40 = arith.constant dense<0.000000e+00> : vector<16x6xf32>
    %39 = tpu.matmul %38, %36, %cst_40 {dimension_numbers = #tpu.dot_dimension_numbers<[1], [0], [0], [1], [0, 0, 1, 1], [], []>} : vector<16x24xbf16>, vector<24x6xbf16>, vector<16x6xf32> -> vector<16x6xf32>
    %40 = arith.addf %34, %39 : vector<16x6xf32>
    %c0_41 = arith.constant 0 : index
    %c0_42 = arith.constant 0 : index
    %c3_43 = arith.constant 3 : index
    %41 = vector.load %arg2[%c0_41, %c0_42, %c3_43] : memref<1x24x12xbf16, #tpu.memory_space<vmem>>, vector<1x24x6xbf16>
    %42 = vector.shape_cast %41 : vector<1x24x6xbf16> to vector<24x6xbf16>
    %c7 = arith.constant 7 : index
    %c0_44 = arith.constant 0 : index
    %c0_45 = arith.constant 0 : index
    %43 = vector.load %arg5[%c7, %c0_44, %c0_45] : memref<9x16x24xbf16, #tpu.memory_space<vmem>>, vector<1x16x24xbf16>
    %44 = vector.shape_cast %43 : vector<1x16x24xbf16> to vector<16x24xbf16>
    %cst_46 = arith.constant dense<0.000000e+00> : vector<16x6xf32>
    %45 = tpu.matmul %44, %42, %cst_46 {dimension_numbers = #tpu.dot_dimension_numbers<[1], [0], [0], [1], [0, 0, 1, 1], [], []>} : vector<16x24xbf16>, vector<24x6xbf16>, vector<16x6xf32> -> vector<16x6xf32>
    %46 = arith.addf %40, %45 : vector<16x6xf32>
    %c0_47 = arith.constant 0 : index
    %c0_48 = arith.constant 0 : index
    %c4_49 = arith.constant 4 : index
    %47 = vector.load %arg1[%c0_47, %c0_48, %c4_49] : memref<1x24x12xbf16, #tpu.memory_space<vmem>>, vector<1x24x6xbf16>
    %48 = vector.shape_cast %47 : vector<1x24x6xbf16> to vector<24x6xbf16>
    %c8 = arith.constant 8 : index
    %c0_50 = arith.constant 0 : index
    %c0_51 = arith.constant 0 : index
    %49 = vector.load %arg5[%c8, %c0_50, %c0_51] : memref<9x16x24xbf16, #tpu.memory_space<vmem>>, vector<1x16x24xbf16>
    %50 = vector.shape_cast %49 : vector<1x16x24xbf16> to vector<16x24xbf16>
    %cst_52 = arith.constant dense<0.000000e+00> : vector<16x6xf32>
    %51 = tpu.matmul %50, %48, %cst_52 {dimension_numbers = #tpu.dot_dimension_numbers<[1], [0], [0], [1], [0, 0, 1, 1], [], []>} : vector<16x24xbf16>, vector<24x6xbf16>, vector<16x6xf32> -> vector<16x6xf32>
    %52 = arith.addf %46, %51 : vector<16x6xf32>
    %c0_53 = arith.constant 0 : index
    %c0_54 = arith.constant 0 : index
    %c0_55 = arith.constant 0 : index
    %53 = vector.load %arg2[%c0_53, %c0_54, %c0_55] : memref<1x24x12xbf16, #tpu.memory_space<vmem>>, vector<1x24x6xbf16>
    %54 = vector.shape_cast %53 : vector<1x24x6xbf16> to vector<24x6xbf16>
    %c0_56 = arith.constant 0 : index
    %c0_57 = arith.constant 0 : index
    %c0_58 = arith.constant 0 : index
    %55 = vector.load %arg5[%c0_56, %c0_57, %c0_58] : memref<9x16x24xbf16, #tpu.memory_space<vmem>>, vector<1x16x24xbf16>
    %56 = vector.shape_cast %55 : vector<1x16x24xbf16> to vector<16x24xbf16>
    %cst_59 = arith.constant dense<0.000000e+00> : vector<16x6xf32>
    %57 = tpu.matmul %56, %54, %cst_59 {dimension_numbers = #tpu.dot_dimension_numbers<[1], [0], [0], [1], [0, 0, 1, 1], [], []>} : vector<16x24xbf16>, vector<24x6xbf16>, vector<16x6xf32> -> vector<16x6xf32>
    %c0_60 = arith.constant 0 : index
    %c0_61 = arith.constant 0 : index
    %c1_62 = arith.constant 1 : index
    %58 = vector.load %arg1[%c0_60, %c0_61, %c1_62] : memref<1x24x12xbf16, #tpu.memory_space<vmem>>, vector<1x24x6xbf16>
    %59 = vector.shape_cast %58 : vector<1x24x6xbf16> to vector<24x6xbf16>
    %c1_63 = arith.constant 1 : index
    %c0_64 = arith.constant 0 : index
    %c0_65 = arith.constant 0 : index
    %60 = vector.load %arg5[%c1_63, %c0_64, %c0_65] : memref<9x16x24xbf16, #tpu.memory_space<vmem>>, vector<1x16x24xbf16>
    %61 = vector.shape_cast %60 : vector<1x16x24xbf16> to vector<16x24xbf16>
    %cst_66 = arith.constant dense<0.000000e+00> : vector<16x6xf32>
    %62 = tpu.matmul %61, %59, %cst_66 {dimension_numbers = #tpu.dot_dimension_numbers<[1], [0], [0], [1], [0, 0, 1, 1], [], []>} : vector<16x24xbf16>, vector<24x6xbf16>, vector<16x6xf32> -> vector<16x6xf32>
    %63 = arith.addf %57, %62 : vector<16x6xf32>
    %c0_67 = arith.constant 0 : index
    %c0_68 = arith.constant 0 : index
    %c1_69 = arith.constant 1 : index
    %64 = vector.load %arg2[%c0_67, %c0_68, %c1_69] : memref<1x24x12xbf16, #tpu.memory_space<vmem>>, vector<1x24x6xbf16>
    %65 = vector.shape_cast %64 : vector<1x24x6xbf16> to vector<24x6xbf16>
    %c2_70 = arith.constant 2 : index
    %c0_71 = arith.constant 0 : index
    %c0_72 = arith.constant 0 : index
    %66 = vector.load %arg5[%c2_70, %c0_71, %c0_72] : memref<9x16x24xbf16, #tpu.memory_space<vmem>>, vector<1x16x24xbf16>
    %67 = vector.shape_cast %66 : vector<1x16x24xbf16> to vector<16x24xbf16>
    %cst_73 = arith.constant dense<0.000000e+00> : vector<16x6xf32>
    %68 = tpu.matmul %67, %65, %cst_73 {dimension_numbers = #tpu.dot_dimension_numbers<[1], [0], [0], [1], [0, 0, 1, 1], [], []>} : vector<16x24xbf16>, vector<24x6xbf16>, vector<16x6xf32> -> vector<16x6xf32>
    %69 = arith.addf %63, %68 : vector<16x6xf32>
    %c0_74 = arith.constant 0 : index
    %c0_75 = arith.constant 0 : index
    %c0_76 = arith.constant 0 : index
    %70 = vector.load %arg4[%c0_74, %c0_75, %c0_76] : memref<1x24x12xbf16, #tpu.memory_space<vmem>>, vector<1x24x6xbf16>
    %71 = vector.shape_cast %70 : vector<1x24x6xbf16> to vector<24x6xbf16>
    %c3_77 = arith.constant 3 : index
    %c0_78 = arith.constant 0 : index
    %c0_79 = arith.constant 0 : index
    %72 = vector.load %arg5[%c3_77, %c0_78, %c0_79] : memref<9x16x24xbf16, #tpu.memory_space<vmem>>, vector<1x16x24xbf16>
    %73 = vector.shape_cast %72 : vector<1x16x24xbf16> to vector<16x24xbf16>
    %cst_80 = arith.constant dense<0.000000e+00> : vector<16x6xf32>
    %74 = tpu.matmul %73, %71, %cst_80 {dimension_numbers = #tpu.dot_dimension_numbers<[1], [0], [0], [1], [0, 0, 1, 1], [], []>} : vector<16x24xbf16>, vector<24x6xbf16>, vector<16x6xf32> -> vector<16x6xf32>
    %75 = arith.addf %69, %74 : vector<16x6xf32>
    %c0_81 = arith.constant 0 : index
    %c0_82 = arith.constant 0 : index
    %c1_83 = arith.constant 1 : index
    %76 = vector.load %arg3[%c0_81, %c0_82, %c1_83] : memref<1x24x12xbf16, #tpu.memory_space<vmem>>, vector<1x24x6xbf16>
    %77 = vector.shape_cast %76 : vector<1x24x6xbf16> to vector<24x6xbf16>
    %c4_84 = arith.constant 4 : index
    %c0_85 = arith.constant 0 : index
    %c0_86 = arith.constant 0 : index
    %78 = vector.load %arg5[%c4_84, %c0_85, %c0_86] : memref<9x16x24xbf16, #tpu.memory_space<vmem>>, vector<1x16x24xbf16>
    %79 = vector.shape_cast %78 : vector<1x16x24xbf16> to vector<16x24xbf16>
    %cst_87 = arith.constant dense<0.000000e+00> : vector<16x6xf32>
    %80 = tpu.matmul %79, %77, %cst_87 {dimension_numbers = #tpu.dot_dimension_numbers<[1], [0], [0], [1], [0, 0, 1, 1], [], []>} : vector<16x24xbf16>, vector<24x6xbf16>, vector<16x6xf32> -> vector<16x6xf32>
    %81 = arith.addf %75, %80 : vector<16x6xf32>
    %c0_88 = arith.constant 0 : index
    %c0_89 = arith.constant 0 : index
    %c1_90 = arith.constant 1 : index
    %82 = vector.load %arg4[%c0_88, %c0_89, %c1_90] : memref<1x24x12xbf16, #tpu.memory_space<vmem>>, vector<1x24x6xbf16>
    %83 = vector.shape_cast %82 : vector<1x24x6xbf16> to vector<24x6xbf16>
    %c5_91 = arith.constant 5 : index
    %c0_92 = arith.constant 0 : index
    %c0_93 = arith.constant 0 : index
    %84 = vector.load %arg5[%c5_91, %c0_92, %c0_93] : memref<9x16x24xbf16, #tpu.memory_space<vmem>>, vector<1x16x24xbf16>
    %85 = vector.shape_cast %84 : vector<1x16x24xbf16> to vector<16x24xbf16>
    %cst_94 = arith.constant dense<0.000000e+00> : vector<16x6xf32>
    %86 = tpu.matmul %85, %83, %cst_94 {dimension_numbers = #tpu.dot_dimension_numbers<[1], [0], [0], [1], [0, 0, 1, 1], [], []>} : vector<16x24xbf16>, vector<24x6xbf16>, vector<16x6xf32> -> vector<16x6xf32>
    %87 = arith.addf %81, %86 : vector<16x6xf32>
    %c0_95 = arith.constant 0 : index
    %c0_96 = arith.constant 0 : index
    %c3_97 = arith.constant 3 : index
    %88 = vector.load %arg2[%c0_95, %c0_96, %c3_97] : memref<1x24x12xbf16, #tpu.memory_space<vmem>>, vector<1x24x6xbf16>
    %89 = vector.shape_cast %88 : vector<1x24x6xbf16> to vector<24x6xbf16>
    %c6_98 = arith.constant 6 : index
    %c0_99 = arith.constant 0 : index
    %c0_100 = arith.constant 0 : index
    %90 = vector.load %arg5[%c6_98, %c0_99, %c0_100] : memref<9x16x24xbf16, #tpu.memory_space<vmem>>, vector<1x16x24xbf16>
    %91 = vector.shape_cast %90 : vector<1x16x24xbf16> to vector<16x24xbf16>
    %cst_101 = arith.constant dense<0.000000e+00> : vector<16x6xf32>
    %92 = tpu.matmul %91, %89, %cst_101 {dimension_numbers = #tpu.dot_dimension_numbers<[1], [0], [0], [1], [0, 0, 1, 1], [], []>} : vector<16x24xbf16>, vector<24x6xbf16>, vector<16x6xf32> -> vector<16x6xf32>
    %93 = arith.addf %87, %92 : vector<16x6xf32>
    %c0_102 = arith.constant 0 : index
    %c0_103 = arith.constant 0 : index
    %c4_104 = arith.constant 4 : index
    %94 = vector.load %arg1[%c0_102, %c0_103, %c4_104] : memref<1x24x12xbf16, #tpu.memory_space<vmem>>, vector<1x24x6xbf16>
    %95 = vector.shape_cast %94 : vector<1x24x6xbf16> to vector<24x6xbf16>
    %c7_105 = arith.constant 7 : index
    %c0_106 = arith.constant 0 : index
    %c0_107 = arith.constant 0 : index
    %96 = vector.load %arg5[%c7_105, %c0_106, %c0_107] : memref<9x16x24xbf16, #tpu.memory_space<vmem>>, vector<1x16x24xbf16>
    %97 = vector.shape_cast %96 : vector<1x16x24xbf16> to vector<16x24xbf16>
    %cst_108 = arith.constant dense<0.000000e+00> : vector<16x6xf32>
    %98 = tpu.matmul %97, %95, %cst_108 {dimension_numbers = #tpu.dot_dimension_numbers<[1], [0], [0], [1], [0, 0, 1, 1], [], []>} : vector<16x24xbf16>, vector<24x6xbf16>, vector<16x6xf32> -> vector<16x6xf32>
    %99 = arith.addf %93, %98 : vector<16x6xf32>
    %c0_109 = arith.constant 0 : index
    %c0_110 = arith.constant 0 : index
    %c4_111 = arith.constant 4 : index
    %100 = vector.load %arg2[%c0_109, %c0_110, %c4_111] : memref<1x24x12xbf16, #tpu.memory_space<vmem>>, vector<1x24x6xbf16>
    %101 = vector.shape_cast %100 : vector<1x24x6xbf16> to vector<24x6xbf16>
    %c8_112 = arith.constant 8 : index
    %c0_113 = arith.constant 0 : index
    %c0_114 = arith.constant 0 : index
    %102 = vector.load %arg5[%c8_112, %c0_113, %c0_114] : memref<9x16x24xbf16, #tpu.memory_space<vmem>>, vector<1x16x24xbf16>
    %103 = vector.shape_cast %102 : vector<1x16x24xbf16> to vector<16x24xbf16>
    %cst_115 = arith.constant dense<0.000000e+00> : vector<16x6xf32>
    %104 = tpu.matmul %103, %101, %cst_115 {dimension_numbers = #tpu.dot_dimension_numbers<[1], [0], [0], [1], [0, 0, 1, 1], [], []>} : vector<16x24xbf16>, vector<24x6xbf16>, vector<16x6xf32> -> vector<16x6xf32>
    %105 = arith.addf %99, %104 : vector<16x6xf32>
    %106 = arith.maximumf %52, %105 : vector<16x6xf32>
    %c0_116 = arith.constant 0 : index
    %c0_117 = arith.constant 0 : index
    %c0_118 = arith.constant 0 : index
    %107 = vector.load %arg3[%c0_116, %c0_117, %c0_118] : memref<1x24x12xbf16, #tpu.memory_space<vmem>>, vector<1x24x6xbf16>
    %108 = vector.shape_cast %107 : vector<1x24x6xbf16> to vector<24x6xbf16>
    %c0_119 = arith.constant 0 : index
    %c0_120 = arith.constant 0 : index
    %c0_121 = arith.constant 0 : index
    %109 = vector.load %arg5[%c0_119, %c0_120, %c0_121] : memref<9x16x24xbf16, #tpu.memory_space<vmem>>, vector<1x16x24xbf16>
    %110 = vector.shape_cast %109 : vector<1x16x24xbf16> to vector<16x24xbf16>
    %cst_122 = arith.constant dense<0.000000e+00> : vector<16x6xf32>
    %111 = tpu.matmul %110, %108, %cst_122 {dimension_numbers = #tpu.dot_dimension_numbers<[1], [0], [0], [1], [0, 0, 1, 1], [], []>} : vector<16x24xbf16>, vector<24x6xbf16>, vector<16x6xf32> -> vector<16x6xf32>
    %c0_123 = arith.constant 0 : index
    %c0_124 = arith.constant 0 : index
    %c0_125 = arith.constant 0 : index
    %112 = vector.load %arg4[%c0_123, %c0_124, %c0_125] : memref<1x24x12xbf16, #tpu.memory_space<vmem>>, vector<1x24x6xbf16>
    %113 = vector.shape_cast %112 : vector<1x24x6xbf16> to vector<24x6xbf16>
    %c1_126 = arith.constant 1 : index
    %c0_127 = arith.constant 0 : index
    %c0_128 = arith.constant 0 : index
    %114 = vector.load %arg5[%c1_126, %c0_127, %c0_128] : memref<9x16x24xbf16, #tpu.memory_space<vmem>>, vector<1x16x24xbf16>
    %115 = vector.shape_cast %114 : vector<1x16x24xbf16> to vector<16x24xbf16>
    %cst_129 = arith.constant dense<0.000000e+00> : vector<16x6xf32>
    %116 = tpu.matmul %115, %113, %cst_129 {dimension_numbers = #tpu.dot_dimension_numbers<[1], [0], [0], [1], [0, 0, 1, 1], [], []>} : vector<16x24xbf16>, vector<24x6xbf16>, vector<16x6xf32> -> vector<16x6xf32>
    %117 = arith.addf %111, %116 : vector<16x6xf32>
    %c0_130 = arith.constant 0 : index
    %c0_131 = arith.constant 0 : index
    %c1_132 = arith.constant 1 : index
    %118 = vector.load %arg3[%c0_130, %c0_131, %c1_132] : memref<1x24x12xbf16, #tpu.memory_space<vmem>>, vector<1x24x6xbf16>
    %119 = vector.shape_cast %118 : vector<1x24x6xbf16> to vector<24x6xbf16>
    %c2_133 = arith.constant 2 : index
    %c0_134 = arith.constant 0 : index
    %c0_135 = arith.constant 0 : index
    %120 = vector.load %arg5[%c2_133, %c0_134, %c0_135] : memref<9x16x24xbf16, #tpu.memory_space<vmem>>, vector<1x16x24xbf16>
    %121 = vector.shape_cast %120 : vector<1x16x24xbf16> to vector<16x24xbf16>
    %cst_136 = arith.constant dense<0.000000e+00> : vector<16x6xf32>
    %122 = tpu.matmul %121, %119, %cst_136 {dimension_numbers = #tpu.dot_dimension_numbers<[1], [0], [0], [1], [0, 0, 1, 1], [], []>} : vector<16x24xbf16>, vector<24x6xbf16>, vector<16x6xf32> -> vector<16x6xf32>
    %123 = arith.addf %117, %122 : vector<16x6xf32>
    %c0_137 = arith.constant 0 : index
    %c0_138 = arith.constant 0 : index
    %c3_139 = arith.constant 3 : index
    %124 = vector.load %arg1[%c0_137, %c0_138, %c3_139] : memref<1x24x12xbf16, #tpu.memory_space<vmem>>, vector<1x24x6xbf16>
    %125 = vector.shape_cast %124 : vector<1x24x6xbf16> to vector<24x6xbf16>
    %c3_140 = arith.constant 3 : index
    %c0_141 = arith.constant 0 : index
    %c0_142 = arith.constant 0 : index
    %126 = vector.load %arg5[%c3_140, %c0_141, %c0_142] : memref<9x16x24xbf16, #tpu.memory_space<vmem>>, vector<1x16x24xbf16>
    %127 = vector.shape_cast %126 : vector<1x16x24xbf16> to vector<16x24xbf16>
    %cst_143 = arith.constant dense<0.000000e+00> : vector<16x6xf32>
    %128 = tpu.matmul %127, %125, %cst_143 {dimension_numbers = #tpu.dot_dimension_numbers<[1], [0], [0], [1], [0, 0, 1, 1], [], []>} : vector<16x24xbf16>, vector<24x6xbf16>, vector<16x6xf32> -> vector<16x6xf32>
    %129 = arith.addf %123, %128 : vector<16x6xf32>
    %c0_144 = arith.constant 0 : index
    %c0_145 = arith.constant 0 : index
    %c3_146 = arith.constant 3 : index
    %130 = vector.load %arg2[%c0_144, %c0_145, %c3_146] : memref<1x24x12xbf16, #tpu.memory_space<vmem>>, vector<1x24x6xbf16>
    %131 = vector.shape_cast %130 : vector<1x24x6xbf16> to vector<24x6xbf16>
    %c4_147 = arith.constant 4 : index
    %c0_148 = arith.constant 0 : index
    %c0_149 = arith.constant 0 : index
    %132 = vector.load %arg5[%c4_147, %c0_148, %c0_149] : memref<9x16x24xbf16, #tpu.memory_space<vmem>>, vector<1x16x24xbf16>
    %133 = vector.shape_cast %132 : vector<1x16x24xbf16> to vector<16x24xbf16>
    %cst_150 = arith.constant dense<0.000000e+00> : vector<16x6xf32>
    %134 = tpu.matmul %133, %131, %cst_150 {dimension_numbers = #tpu.dot_dimension_numbers<[1], [0], [0], [1], [0, 0, 1, 1], [], []>} : vector<16x24xbf16>, vector<24x6xbf16>, vector<16x6xf32> -> vector<16x6xf32>
    %135 = arith.addf %129, %134 : vector<16x6xf32>
    %c0_151 = arith.constant 0 : index
    %c0_152 = arith.constant 0 : index
    %c4_153 = arith.constant 4 : index
    %136 = vector.load %arg1[%c0_151, %c0_152, %c4_153] : memref<1x24x12xbf16, #tpu.memory_space<vmem>>, vector<1x24x6xbf16>
    %137 = vector.shape_cast %136 : vector<1x24x6xbf16> to vector<24x6xbf16>
    %c5_154 = arith.constant 5 : index
    %c0_155 = arith.constant 0 : index
    %c0_156 = arith.constant 0 : index
    %138 = vector.load %arg5[%c5_154, %c0_155, %c0_156] : memref<9x16x24xbf16, #tpu.memory_space<vmem>>, vector<1x16x24xbf16>
    %139 = vector.shape_cast %138 : vector<1x16x24xbf16> to vector<16x24xbf16>
    %cst_157 = arith.constant dense<0.000000e+00> : vector<16x6xf32>
    %140 = tpu.matmul %139, %137, %cst_157 {dimension_numbers = #tpu.dot_dimension_numbers<[1], [0], [0], [1], [0, 0, 1, 1], [], []>} : vector<16x24xbf16>, vector<24x6xbf16>, vector<16x6xf32> -> vector<16x6xf32>
    %141 = arith.addf %135, %140 : vector<16x6xf32>
    %c0_158 = arith.constant 0 : index
    %c0_159 = arith.constant 0 : index
    %c3_160 = arith.constant 3 : index
    %142 = vector.load %arg3[%c0_158, %c0_159, %c3_160] : memref<1x24x12xbf16, #tpu.memory_space<vmem>>, vector<1x24x6xbf16>
    %143 = vector.shape_cast %142 : vector<1x24x6xbf16> to vector<24x6xbf16>
    %c6_161 = arith.constant 6 : index
    %c0_162 = arith.constant 0 : index
    %c0_163 = arith.constant 0 : index
    %144 = vector.load %arg5[%c6_161, %c0_162, %c0_163] : memref<9x16x24xbf16, #tpu.memory_space<vmem>>, vector<1x16x24xbf16>
    %145 = vector.shape_cast %144 : vector<1x16x24xbf16> to vector<16x24xbf16>
    %cst_164 = arith.constant dense<0.000000e+00> : vector<16x6xf32>
    %146 = tpu.matmul %145, %143, %cst_164 {dimension_numbers = #tpu.dot_dimension_numbers<[1], [0], [0], [1], [0, 0, 1, 1], [], []>} : vector<16x24xbf16>, vector<24x6xbf16>, vector<16x6xf32> -> vector<16x6xf32>
    %147 = arith.addf %141, %146 : vector<16x6xf32>
    %c0_165 = arith.constant 0 : index
    %c0_166 = arith.constant 0 : index
    %c3_167 = arith.constant 3 : index
    %148 = vector.load %arg4[%c0_165, %c0_166, %c3_167] : memref<1x24x12xbf16, #tpu.memory_space<vmem>>, vector<1x24x6xbf16>
    %149 = vector.shape_cast %148 : vector<1x24x6xbf16> to vector<24x6xbf16>
    %c7_168 = arith.constant 7 : index
    %c0_169 = arith.constant 0 : index
    %c0_170 = arith.constant 0 : index
    %150 = vector.load %arg5[%c7_168, %c0_169, %c0_170] : memref<9x16x24xbf16, #tpu.memory_space<vmem>>, vector<1x16x24xbf16>
    %151 = vector.shape_cast %150 : vector<1x16x24xbf16> to vector<16x24xbf16>
    %cst_171 = arith.constant dense<0.000000e+00> : vector<16x6xf32>
    %152 = tpu.matmul %151, %149, %cst_171 {dimension_numbers = #tpu.dot_dimension_numbers<[1], [0], [0], [1], [0, 0, 1, 1], [], []>} : vector<16x24xbf16>, vector<24x6xbf16>, vector<16x6xf32> -> vector<16x6xf32>
    %153 = arith.addf %147, %152 : vector<16x6xf32>
    %c0_172 = arith.constant 0 : index
    %c0_173 = arith.constant 0 : index
    %c4_174 = arith.constant 4 : index
    %154 = vector.load %arg3[%c0_172, %c0_173, %c4_174] : memref<1x24x12xbf16, #tpu.memory_space<vmem>>, vector<1x24x6xbf16>
    %155 = vector.shape_cast %154 : vector<1x24x6xbf16> to vector<24x6xbf16>
    %c8_175 = arith.constant 8 : index
    %c0_176 = arith.constant 0 : index
    %c0_177 = arith.constant 0 : index
    %156 = vector.load %arg5[%c8_175, %c0_176, %c0_177] : memref<9x16x24xbf16, #tpu.memory_space<vmem>>, vector<1x16x24xbf16>
    %157 = vector.shape_cast %156 : vector<1x16x24xbf16> to vector<16x24xbf16>
    %cst_178 = arith.constant dense<0.000000e+00> : vector<16x6xf32>
    %158 = tpu.matmul %157, %155, %cst_178 {dimension_numbers = #tpu.dot_dimension_numbers<[1], [0], [0], [1], [0, 0, 1, 1], [], []>} : vector<16x24xbf16>, vector<24x6xbf16>, vector<16x6xf32> -> vector<16x6xf32>
    %159 = arith.addf %153, %158 : vector<16x6xf32>
    %160 = arith.maximumf %106, %159 : vector<16x6xf32>
    %c0_179 = arith.constant 0 : index
    %c0_180 = arith.constant 0 : index
    %c0_181 = arith.constant 0 : index
    %161 = vector.load %arg4[%c0_179, %c0_180, %c0_181] : memref<1x24x12xbf16, #tpu.memory_space<vmem>>, vector<1x24x6xbf16>
    %162 = vector.shape_cast %161 : vector<1x24x6xbf16> to vector<24x6xbf16>
    %c0_182 = arith.constant 0 : index
    %c0_183 = arith.constant 0 : index
    %c0_184 = arith.constant 0 : index
    %163 = vector.load %arg5[%c0_182, %c0_183, %c0_184] : memref<9x16x24xbf16, #tpu.memory_space<vmem>>, vector<1x16x24xbf16>
    %164 = vector.shape_cast %163 : vector<1x16x24xbf16> to vector<16x24xbf16>
    %cst_185 = arith.constant dense<0.000000e+00> : vector<16x6xf32>
    %165 = tpu.matmul %164, %162, %cst_185 {dimension_numbers = #tpu.dot_dimension_numbers<[1], [0], [0], [1], [0, 0, 1, 1], [], []>} : vector<16x24xbf16>, vector<24x6xbf16>, vector<16x6xf32> -> vector<16x6xf32>
    %c0_186 = arith.constant 0 : index
    %c0_187 = arith.constant 0 : index
    %c1_188 = arith.constant 1 : index
    %166 = vector.load %arg3[%c0_186, %c0_187, %c1_188] : memref<1x24x12xbf16, #tpu.memory_space<vmem>>, vector<1x24x6xbf16>
    %167 = vector.shape_cast %166 : vector<1x24x6xbf16> to vector<24x6xbf16>
    %c1_189 = arith.constant 1 : index
    %c0_190 = arith.constant 0 : index
    %c0_191 = arith.constant 0 : index
    %168 = vector.load %arg5[%c1_189, %c0_190, %c0_191] : memref<9x16x24xbf16, #tpu.memory_space<vmem>>, vector<1x16x24xbf16>
    %169 = vector.shape_cast %168 : vector<1x16x24xbf16> to vector<16x24xbf16>
    %cst_192 = arith.constant dense<0.000000e+00> : vector<16x6xf32>
    %170 = tpu.matmul %169, %167, %cst_192 {dimension_numbers = #tpu.dot_dimension_numbers<[1], [0], [0], [1], [0, 0, 1, 1], [], []>} : vector<16x24xbf16>, vector<24x6xbf16>, vector<16x6xf32> -> vector<16x6xf32>
    %171 = arith.addf %165, %170 : vector<16x6xf32>
    %c0_193 = arith.constant 0 : index
    %c0_194 = arith.constant 0 : index
    %c1_195 = arith.constant 1 : index
    %172 = vector.load %arg4[%c0_193, %c0_194, %c1_195] : memref<1x24x12xbf16, #tpu.memory_space<vmem>>, vector<1x24x6xbf16>
    %173 = vector.shape_cast %172 : vector<1x24x6xbf16> to vector<24x6xbf16>
    %c2_196 = arith.constant 2 : index
    %c0_197 = arith.constant 0 : index
    %c0_198 = arith.constant 0 : index
    %174 = vector.load %arg5[%c2_196, %c0_197, %c0_198] : memref<9x16x24xbf16, #tpu.memory_space<vmem>>, vector<1x16x24xbf16>
    %175 = vector.shape_cast %174 : vector<1x16x24xbf16> to vector<16x24xbf16>
    %cst_199 = arith.constant dense<0.000000e+00> : vector<16x6xf32>
    %176 = tpu.matmul %175, %173, %cst_199 {dimension_numbers = #tpu.dot_dimension_numbers<[1], [0], [0], [1], [0, 0, 1, 1], [], []>} : vector<16x24xbf16>, vector<24x6xbf16>, vector<16x6xf32> -> vector<16x6xf32>
    %177 = arith.addf %171, %176 : vector<16x6xf32>
    %c0_200 = arith.constant 0 : index
    %c0_201 = arith.constant 0 : index
    %c3_202 = arith.constant 3 : index
    %178 = vector.load %arg2[%c0_200, %c0_201, %c3_202] : memref<1x24x12xbf16, #tpu.memory_space<vmem>>, vector<1x24x6xbf16>
    %179 = vector.shape_cast %178 : vector<1x24x6xbf16> to vector<24x6xbf16>
    %c3_203 = arith.constant 3 : index
    %c0_204 = arith.constant 0 : index
    %c0_205 = arith.constant 0 : index
    %180 = vector.load %arg5[%c3_203, %c0_204, %c0_205] : memref<9x16x24xbf16, #tpu.memory_space<vmem>>, vector<1x16x24xbf16>
    %181 = vector.shape_cast %180 : vector<1x16x24xbf16> to vector<16x24xbf16>
    %cst_206 = arith.constant dense<0.000000e+00> : vector<16x6xf32>
    %182 = tpu.matmul %181, %179, %cst_206 {dimension_numbers = #tpu.dot_dimension_numbers<[1], [0], [0], [1], [0, 0, 1, 1], [], []>} : vector<16x24xbf16>, vector<24x6xbf16>, vector<16x6xf32> -> vector<16x6xf32>
    %183 = arith.addf %177, %182 : vector<16x6xf32>
    %c0_207 = arith.constant 0 : index
    %c0_208 = arith.constant 0 : index
    %c4_209 = arith.constant 4 : index
    %184 = vector.load %arg1[%c0_207, %c0_208, %c4_209] : memref<1x24x12xbf16, #tpu.memory_space<vmem>>, vector<1x24x6xbf16>
    %185 = vector.shape_cast %184 : vector<1x24x6xbf16> to vector<24x6xbf16>
    %c4_210 = arith.constant 4 : index
    %c0_211 = arith.constant 0 : index
    %c0_212 = arith.constant 0 : index
    %186 = vector.load %arg5[%c4_210, %c0_211, %c0_212] : memref<9x16x24xbf16, #tpu.memory_space<vmem>>, vector<1x16x24xbf16>
    %187 = vector.shape_cast %186 : vector<1x16x24xbf16> to vector<16x24xbf16>
    %cst_213 = arith.constant dense<0.000000e+00> : vector<16x6xf32>
    %188 = tpu.matmul %187, %185, %cst_213 {dimension_numbers = #tpu.dot_dimension_numbers<[1], [0], [0], [1], [0, 0, 1, 1], [], []>} : vector<16x24xbf16>, vector<24x6xbf16>, vector<16x6xf32> -> vector<16x6xf32>
    %189 = arith.addf %183, %188 : vector<16x6xf32>
    %c0_214 = arith.constant 0 : index
    %c0_215 = arith.constant 0 : index
    %c4_216 = arith.constant 4 : index
    %190 = vector.load %arg2[%c0_214, %c0_215, %c4_216] : memref<1x24x12xbf16, #tpu.memory_space<vmem>>, vector<1x24x6xbf16>
    %191 = vector.shape_cast %190 : vector<1x24x6xbf16> to vector<24x6xbf16>
    %c5_217 = arith.constant 5 : index
    %c0_218 = arith.constant 0 : index
    %c0_219 = arith.constant 0 : index
    %192 = vector.load %arg5[%c5_217, %c0_218, %c0_219] : memref<9x16x24xbf16, #tpu.memory_space<vmem>>, vector<1x16x24xbf16>
    %193 = vector.shape_cast %192 : vector<1x16x24xbf16> to vector<16x24xbf16>
    %cst_220 = arith.constant dense<0.000000e+00> : vector<16x6xf32>
    %194 = tpu.matmul %193, %191, %cst_220 {dimension_numbers = #tpu.dot_dimension_numbers<[1], [0], [0], [1], [0, 0, 1, 1], [], []>} : vector<16x24xbf16>, vector<24x6xbf16>, vector<16x6xf32> -> vector<16x6xf32>
    %195 = arith.addf %189, %194 : vector<16x6xf32>
    %c0_221 = arith.constant 0 : index
    %c0_222 = arith.constant 0 : index
    %c3_223 = arith.constant 3 : index
    %196 = vector.load %arg4[%c0_221, %c0_222, %c3_223] : memref<1x24x12xbf16, #tpu.memory_space<vmem>>, vector<1x24x6xbf16>
    %197 = vector.shape_cast %196 : vector<1x24x6xbf16> to vector<24x6xbf16>
    %c6_224 = arith.constant 6 : index
    %c0_225 = arith.constant 0 : index
    %c0_226 = arith.constant 0 : index
    %198 = vector.load %arg5[%c6_224, %c0_225, %c0_226] : memref<9x16x24xbf16, #tpu.memory_space<vmem>>, vector<1x16x24xbf16>
    %199 = vector.shape_cast %198 : vector<1x16x24xbf16> to vector<16x24xbf16>
    %cst_227 = arith.constant dense<0.000000e+00> : vector<16x6xf32>
    %200 = tpu.matmul %199, %197, %cst_227 {dimension_numbers = #tpu.dot_dimension_numbers<[1], [0], [0], [1], [0, 0, 1, 1], [], []>} : vector<16x24xbf16>, vector<24x6xbf16>, vector<16x6xf32> -> vector<16x6xf32>
    %201 = arith.addf %195, %200 : vector<16x6xf32>
    %c0_228 = arith.constant 0 : index
    %c0_229 = arith.constant 0 : index
    %c4_230 = arith.constant 4 : index
    %202 = vector.load %arg3[%c0_228, %c0_229, %c4_230] : memref<1x24x12xbf16, #tpu.memory_space<vmem>>, vector<1x24x6xbf16>
    %203 = vector.shape_cast %202 : vector<1x24x6xbf16> to vector<24x6xbf16>
    %c7_231 = arith.constant 7 : index
    %c0_232 = arith.constant 0 : index
    %c0_233 = arith.constant 0 : index
    %204 = vector.load %arg5[%c7_231, %c0_232, %c0_233] : memref<9x16x24xbf16, #tpu.memory_space<vmem>>, vector<1x16x24xbf16>
    %205 = vector.shape_cast %204 : vector<1x16x24xbf16> to vector<16x24xbf16>
    %cst_234 = arith.constant dense<0.000000e+00> : vector<16x6xf32>
    %206 = tpu.matmul %205, %203, %cst_234 {dimension_numbers = #tpu.dot_dimension_numbers<[1], [0], [0], [1], [0, 0, 1, 1], [], []>} : vector<16x24xbf16>, vector<24x6xbf16>, vector<16x6xf32> -> vector<16x6xf32>
    %207 = arith.addf %201, %206 : vector<16x6xf32>
    %c0_235 = arith.constant 0 : index
    %c0_236 = arith.constant 0 : index
    %c4_237 = arith.constant 4 : index
    %208 = vector.load %arg4[%c0_235, %c0_236, %c4_237] : memref<1x24x12xbf16, #tpu.memory_space<vmem>>, vector<1x24x6xbf16>
    %209 = vector.shape_cast %208 : vector<1x24x6xbf16> to vector<24x6xbf16>
    %c8_238 = arith.constant 8 : index
    %c0_239 = arith.constant 0 : index
    %c0_240 = arith.constant 0 : index
    %210 = vector.load %arg5[%c8_238, %c0_239, %c0_240] : memref<9x16x24xbf16, #tpu.memory_space<vmem>>, vector<1x16x24xbf16>
    %211 = vector.shape_cast %210 : vector<1x16x24xbf16> to vector<16x24xbf16>
    %cst_241 = arith.constant dense<0.000000e+00> : vector<16x6xf32>
    %212 = tpu.matmul %211, %209, %cst_241 {dimension_numbers = #tpu.dot_dimension_numbers<[1], [0], [0], [1], [0, 0, 1, 1], [], []>} : vector<16x24xbf16>, vector<24x6xbf16>, vector<16x6xf32> -> vector<16x6xf32>
    %213 = arith.addf %207, %212 : vector<16x6xf32>
    %214 = arith.maximumf %160, %213 : vector<16x6xf32>
    %c0_242 = arith.constant 0 : index
    %c0_243 = arith.constant 0 : index
    %215 = vector.load %arg6[%c0_242, %c0_243] : memref<16x1xf32, #tpu.memory_space<vmem>>, vector<16x1xf32>
    %216 = vector.broadcast %215 : vector<16x1xf32> to vector<16x6xf32>
    %217 = arith.addf %214, %216 : vector<16x6xf32>
    %cst_244 = arith.constant 0.000000e+00 : f32
    %218 = vector.broadcast %cst_244 : f32 to vector<16x6xf32>
    %219 = arith.maximumf %217, %218 : vector<16x6xf32>
    %220 = tpu.iota {dimensions = array<i32: 1>} : vector<16x6xi32>
    %c3_i32 = arith.constant 3 : i32
    %c0_i32 = arith.constant 0 : i32
    %221 = arith.cmpi eq, %c3_i32, %c0_i32 : i32
    %c1_i32 = arith.constant 1 : i32
    %222 = arith.select %221, %c1_i32, %c3_i32 : i32
    %223 = vector.broadcast %222 : i32 to vector<16x6xi32>
    %224 = arith.remsi %220, %223 : vector<16x6xi32>
    %c0_i32_245 = arith.constant 0 : i32
    %225 = vector.broadcast %c0_i32_245 : i32 to vector<16x6xi32>
    %226 = arith.cmpi ne, %224, %225 : vector<16x6xi32>
    %c0_i32_246 = arith.constant 0 : i32
    %227 = vector.broadcast %c0_i32_246 : i32 to vector<16x6xi32>
    %228 = arith.cmpi slt, %224, %227 : vector<16x6xi32>
    %c0_i32_247 = arith.constant 0 : i32
    %229 = arith.cmpi slt, %222, %c0_i32_247 : i32
    %230 = vector.broadcast %229 : i1 to vector<16x6xi1>
    %231 = vector.broadcast %230 : vector<16x6xi1> to vector<16x6xi1>
    %232 = arith.xori %228, %231 : vector<16x6xi1>
    %233 = arith.andi %232, %226 : vector<16x6xi1>
    %234 = vector.broadcast %222 : i32 to vector<16x6xi32>
    %235 = arith.addi %224, %234 : vector<16x6xi32>
    %236 = arith.select %233, %235, %224 : vector<16x6xi1>, vector<16x6xi32>
    %c2_i32 = arith.constant 2 : i32
    %237 = vector.broadcast %c2_i32 : i32 to vector<16x6xi32>
    %238 = arith.cmpi eq, %236, %237 : vector<16x6xi32>
    %cst_248 = arith.constant 0.000000e+00 : f32
    %239 = vector.broadcast %cst_248 : f32 to vector<16x6xf32>
    %240 = arith.select %238, %239, %219 : vector<16x6xi1>, vector<16x6xf32>
    %241 = arith.truncf %240 : vector<16x6xf32> to vector<16x6xbf16>
    %c0_249 = arith.constant 0 : index
    %c0_250 = arith.constant 0 : index
    %c0_251 = arith.constant 0 : index
    %242 = vector.load %arg7[%c0_249, %c0_250, %c0_251] : memref<1x16x6xbf16, #tpu.memory_space<vmem>>, vector<1x16x6xbf16>
    %243 = vector.shape_cast %242 : vector<1x16x6xbf16> to vector<16x6xbf16>
    %244 = vector.shape_cast %241 : vector<16x6xbf16> to vector<1x16x6xbf16>
    tpu.vector_store %arg7[%c0_249, %c0_250, %c0_251], %244 {strides = array<i32>} : memref<1x16x6xbf16, #tpu.memory_space<vmem>>, vector<1x16x6xbf16>,
    return
  }
  func.func @transform_0(%arg0: i32) -> (i32, i32, i32) {
    %c0_i32 = arith.constant 0 : i32
    %c0_i32_0 = arith.constant 0 : i32
    %c0_i32_1 = arith.constant 0 : i32
    return %arg0, %c0_i32, %c0_i32_0 : i32, i32, i32
  }
  func.func @transform_1(%arg0: i32) -> (i32, i32, i32) {
    %c0_i32 = arith.constant 0 : i32
    %c0_i32_0 = arith.constant 0 : i32
    %c0_i32_1 = arith.constant 0 : i32
    return %arg0, %c0_i32, %c0_i32_0 : i32, i32, i32
  }
  func.func @transform_2(%arg0: i32) -> (i32, i32, i32) {
    %c0_i32 = arith.constant 0 : i32
    %c0_i32_0 = arith.constant 0 : i32
    %c0_i32_1 = arith.constant 0 : i32
    return %arg0, %c0_i32, %c0_i32_0 : i32, i32, i32
  }
  func.func @transform_3(%arg0: i32) -> (i32, i32, i32) {
    %c0_i32 = arith.constant 0 : i32
    %c0_i32_0 = arith.constant 0 : i32
    %c0_i32_1 = arith.constant 0 : i32
    return %arg0, %c0_i32, %c0_i32_0 : i32, i32, i32
  }
  func.func @transform_4(%arg0: i32) -> (i32, i32, i32) {
    %c0_i32 = arith.constant 0 : i32
    %c0_i32_0 = arith.constant 0 : i32
    %c0_i32_1 = arith.constant 0 : i32
    %c0_i32_2 = arith.constant 0 : i32
    return %c0_i32, %c0_i32_0, %c0_i32_1 : i32, i32, i32
  }
  func.func @transform_5(%arg0: i32) -> (i32, i32) {
    %c0_i32 = arith.constant 0 : i32
    %c0_i32_0 = arith.constant 0 : i32
    %c0_i32_1 = arith.constant 0 : i32
    return %c0_i32, %c0_i32_0 : i32, i32
  }
  func.func @transform_6(%arg0: i32) -> (i32, i32, i32) {
    %c0_i32 = arith.constant 0 : i32
    %c0_i32_0 = arith.constant 0 : i32
    %c0_i32_1 = arith.constant 0 : i32
    return %arg0, %c0_i32, %c0_i32_0 : i32, i32, i32
  }
}

module attributes {stable_mosaic.version = 11 : i64} {
  func.func @_deconv2x2_act_kernel(%arg0: i32, %arg1: memref<1x16x4xbf16, #tpu.memory_space<vmem>>, %arg2: memref<96x16xbf16, #tpu.memory_space<vmem>>, %arg3: memref<96x1xf32, #tpu.memory_space<vmem>>, %arg4: memref<1x96x4xbf16, #tpu.memory_space<vmem>>) attributes {dimension_semantics = [#tpu.dimension_semantics<parallel>], iteration_bounds = array<i64: 2>, scalar_prefetch = 0 : i64, scratch_operands = 0 : i64, tpu.core_type = #tpu.core_type<tc>, window_params = [{transform_indices = @transform_0, window_bounds = array<i64: 1, 16, 4>}, {pipeline_mode = #tpu.pipeline_mode<synchronous>, transform_indices = @transform_1, window_bounds = array<i64: 96, 16>}, {pipeline_mode = #tpu.pipeline_mode<synchronous>, transform_indices = @transform_2, window_bounds = array<i64: 96, 1>}, {transform_indices = @transform_3, window_bounds = array<i64: 1, 96, 4>}]} {
    %c0 = arith.constant 0 : index
    %c0_0 = arith.constant 0 : index
    %0 = vector.load %arg2[%c0, %c0_0] : memref<96x16xbf16, #tpu.memory_space<vmem>>, vector<96x16xbf16>
    %c0_1 = arith.constant 0 : index
    %c0_2 = arith.constant 0 : index
    %c0_3 = arith.constant 0 : index
    %1 = vector.load %arg1[%c0_1, %c0_2, %c0_3] : memref<1x16x4xbf16, #tpu.memory_space<vmem>>, vector<1x16x4xbf16>
    %2 = vector.shape_cast %1 : vector<1x16x4xbf16> to vector<16x4xbf16>
    %cst = arith.constant dense<0.000000e+00> : vector<96x4xf32>
    %3 = tpu.matmul %0, %2, %cst {dimension_numbers = #tpu.dot_dimension_numbers<[1], [0], [0], [1], [0, 0, 1, 1], [], []>} : vector<96x16xbf16>, vector<16x4xbf16>, vector<96x4xf32> -> vector<96x4xf32>
    %c0_4 = arith.constant 0 : index
    %c0_5 = arith.constant 0 : index
    %4 = vector.load %arg3[%c0_4, %c0_5] : memref<96x1xf32, #tpu.memory_space<vmem>>, vector<96x1xf32>
    %5 = vector.broadcast %4 : vector<96x1xf32> to vector<96x4xf32>
    %6 = arith.addf %3, %5 : vector<96x4xf32>
    %cst_6 = arith.constant 0.000000e+00 : f32
    %7 = vector.broadcast %cst_6 : f32 to vector<96x4xf32>
    %8 = arith.maximumf %6, %7 : vector<96x4xf32>
    %9 = arith.truncf %8 : vector<96x4xf32> to vector<96x4xbf16>
    %c0_7 = arith.constant 0 : index
    %c0_8 = arith.constant 0 : index
    %c0_9 = arith.constant 0 : index
    %10 = vector.load %arg4[%c0_7, %c0_8, %c0_9] : memref<1x96x4xbf16, #tpu.memory_space<vmem>>, vector<1x96x4xbf16>
    %11 = vector.shape_cast %10 : vector<1x96x4xbf16> to vector<96x4xbf16>
    %12 = vector.shape_cast %9 : vector<96x4xbf16> to vector<1x96x4xbf16>
    tpu.vector_store %arg4[%c0_7, %c0_8, %c0_9], %12 {strides = array<i32>} : memref<1x96x4xbf16, #tpu.memory_space<vmem>>, vector<1x96x4xbf16>,
    return
  }
  func.func @transform_0(%arg0: i32) -> (i32, i32, i32) {
    %c0_i32 = arith.constant 0 : i32
    %c0_i32_0 = arith.constant 0 : i32
    %c0_i32_1 = arith.constant 0 : i32
    return %arg0, %c0_i32, %c0_i32_0 : i32, i32, i32
  }
  func.func @transform_1(%arg0: i32) -> (i32, i32) {
    %c0_i32 = arith.constant 0 : i32
    %c0_i32_0 = arith.constant 0 : i32
    %c0_i32_1 = arith.constant 0 : i32
    return %c0_i32, %c0_i32_0 : i32, i32
  }
  func.func @transform_2(%arg0: i32) -> (i32, i32) {
    %c0_i32 = arith.constant 0 : i32
    %c0_i32_0 = arith.constant 0 : i32
    %c0_i32_1 = arith.constant 0 : i32
    return %c0_i32, %c0_i32_0 : i32, i32
  }
  func.func @transform_3(%arg0: i32) -> (i32, i32, i32) {
    %c0_i32 = arith.constant 0 : i32
    %c0_i32_0 = arith.constant 0 : i32
    %c0_i32_1 = arith.constant 0 : i32
    return %arg0, %c0_i32, %c0_i32_0 : i32, i32, i32
  }
}

module attributes {stable_mosaic.version = 11 : i64} {
  func.func @_deconv2x2_act_kernel(%arg0: i32, %arg1: memref<1x24x16xbf16, #tpu.memory_space<vmem>>, %arg2: memref<48x24xbf16, #tpu.memory_space<vmem>>, %arg3: memref<48x1xf32, #tpu.memory_space<vmem>>, %arg4: memref<1x48x16xbf16, #tpu.memory_space<vmem>>) attributes {dimension_semantics = [#tpu.dimension_semantics<parallel>], iteration_bounds = array<i64: 2>, scalar_prefetch = 0 : i64, scratch_operands = 0 : i64, tpu.core_type = #tpu.core_type<tc>, window_params = [{transform_indices = @transform_0, window_bounds = array<i64: 1, 24, 16>}, {pipeline_mode = #tpu.pipeline_mode<synchronous>, transform_indices = @transform_1, window_bounds = array<i64: 48, 24>}, {pipeline_mode = #tpu.pipeline_mode<synchronous>, transform_indices = @transform_2, window_bounds = array<i64: 48, 1>}, {transform_indices = @transform_3, window_bounds = array<i64: 1, 48, 16>}]} {
    %c0 = arith.constant 0 : index
    %c0_0 = arith.constant 0 : index
    %0 = vector.load %arg2[%c0, %c0_0] : memref<48x24xbf16, #tpu.memory_space<vmem>>, vector<48x24xbf16>
    %c0_1 = arith.constant 0 : index
    %c0_2 = arith.constant 0 : index
    %c0_3 = arith.constant 0 : index
    %1 = vector.load %arg1[%c0_1, %c0_2, %c0_3] : memref<1x24x16xbf16, #tpu.memory_space<vmem>>, vector<1x24x16xbf16>
    %2 = vector.shape_cast %1 : vector<1x24x16xbf16> to vector<24x16xbf16>
    %cst = arith.constant dense<0.000000e+00> : vector<48x16xf32>
    %3 = tpu.matmul %0, %2, %cst {dimension_numbers = #tpu.dot_dimension_numbers<[1], [0], [0], [1], [0, 0, 1, 1], [], []>} : vector<48x24xbf16>, vector<24x16xbf16>, vector<48x16xf32> -> vector<48x16xf32>
    %c0_4 = arith.constant 0 : index
    %c0_5 = arith.constant 0 : index
    %4 = vector.load %arg3[%c0_4, %c0_5] : memref<48x1xf32, #tpu.memory_space<vmem>>, vector<48x1xf32>
    %5 = vector.broadcast %4 : vector<48x1xf32> to vector<48x16xf32>
    %6 = arith.addf %3, %5 : vector<48x16xf32>
    %cst_6 = arith.constant 0.000000e+00 : f32
    %7 = vector.broadcast %cst_6 : f32 to vector<48x16xf32>
    %8 = arith.maximumf %6, %7 : vector<48x16xf32>
    %9 = arith.truncf %8 : vector<48x16xf32> to vector<48x16xbf16>
    %c0_7 = arith.constant 0 : index
    %c0_8 = arith.constant 0 : index
    %c0_9 = arith.constant 0 : index
    %10 = vector.load %arg4[%c0_7, %c0_8, %c0_9] : memref<1x48x16xbf16, #tpu.memory_space<vmem>>, vector<1x48x16xbf16>
    %11 = vector.shape_cast %10 : vector<1x48x16xbf16> to vector<48x16xbf16>
    %12 = vector.shape_cast %9 : vector<48x16xbf16> to vector<1x48x16xbf16>
    tpu.vector_store %arg4[%c0_7, %c0_8, %c0_9], %12 {strides = array<i32>} : memref<1x48x16xbf16, #tpu.memory_space<vmem>>, vector<1x48x16xbf16>,
    return
  }
  func.func @transform_0(%arg0: i32) -> (i32, i32, i32) {
    %c0_i32 = arith.constant 0 : i32
    %c0_i32_0 = arith.constant 0 : i32
    %c0_i32_1 = arith.constant 0 : i32
    return %arg0, %c0_i32, %c0_i32_0 : i32, i32, i32
  }
  func.func @transform_1(%arg0: i32) -> (i32, i32) {
    %c0_i32 = arith.constant 0 : i32
    %c0_i32_0 = arith.constant 0 : i32
    %c0_i32_1 = arith.constant 0 : i32
    return %c0_i32, %c0_i32_0 : i32, i32
  }
  func.func @transform_2(%arg0: i32) -> (i32, i32) {
    %c0_i32 = arith.constant 0 : i32
    %c0_i32_0 = arith.constant 0 : i32
    %c0_i32_1 = arith.constant 0 : i32
    return %c0_i32, %c0_i32_0 : i32, i32
  }
  func.func @transform_3(%arg0: i32) -> (i32, i32, i32) {
    %c0_i32 = arith.constant 0 : i32
    %c0_i32_0 = arith.constant 0 : i32
    %c0_i32_1 = arith.constant 0 : i32
    return %arg0, %c0_i32, %c0_i32_0 : i32, i32, i32
  }
}

module attributes {stable_mosaic.version = 11 : i64} {
  func.func @_deconv2x2_act_kernel(%arg0: i32, %arg1: memref<1x12x64xbf16, #tpu.memory_space<vmem>>, %arg2: memref<24x12xbf16, #tpu.memory_space<vmem>>, %arg3: memref<24x1xf32, #tpu.memory_space<vmem>>, %arg4: memref<1x24x64xbf16, #tpu.memory_space<vmem>>) attributes {dimension_semantics = [#tpu.dimension_semantics<parallel>], iteration_bounds = array<i64: 2>, scalar_prefetch = 0 : i64, scratch_operands = 0 : i64, tpu.core_type = #tpu.core_type<tc>, window_params = [{transform_indices = @transform_0, window_bounds = array<i64: 1, 12, 64>}, {pipeline_mode = #tpu.pipeline_mode<synchronous>, transform_indices = @transform_1, window_bounds = array<i64: 24, 12>}, {pipeline_mode = #tpu.pipeline_mode<synchronous>, transform_indices = @transform_2, window_bounds = array<i64: 24, 1>}, {transform_indices = @transform_3, window_bounds = array<i64: 1, 24, 64>}]} {
    %c0 = arith.constant 0 : index
    %c0_0 = arith.constant 0 : index
    %0 = vector.load %arg2[%c0, %c0_0] : memref<24x12xbf16, #tpu.memory_space<vmem>>, vector<24x12xbf16>
    %c0_1 = arith.constant 0 : index
    %c0_2 = arith.constant 0 : index
    %c0_3 = arith.constant 0 : index
    %1 = vector.load %arg1[%c0_1, %c0_2, %c0_3] : memref<1x12x64xbf16, #tpu.memory_space<vmem>>, vector<1x12x64xbf16>
    %2 = vector.shape_cast %1 : vector<1x12x64xbf16> to vector<12x64xbf16>
    %cst = arith.constant dense<0.000000e+00> : vector<24x64xf32>
    %3 = tpu.matmul %0, %2, %cst {dimension_numbers = #tpu.dot_dimension_numbers<[1], [0], [0], [1], [0, 0, 1, 1], [], []>} : vector<24x12xbf16>, vector<12x64xbf16>, vector<24x64xf32> -> vector<24x64xf32>
    %c0_4 = arith.constant 0 : index
    %c0_5 = arith.constant 0 : index
    %4 = vector.load %arg3[%c0_4, %c0_5] : memref<24x1xf32, #tpu.memory_space<vmem>>, vector<24x1xf32>
    %5 = vector.broadcast %4 : vector<24x1xf32> to vector<24x64xf32>
    %6 = arith.addf %3, %5 : vector<24x64xf32>
    %cst_6 = arith.constant 0.000000e+00 : f32
    %7 = vector.broadcast %cst_6 : f32 to vector<24x64xf32>
    %8 = arith.maximumf %6, %7 : vector<24x64xf32>
    %9 = arith.truncf %8 : vector<24x64xf32> to vector<24x64xbf16>
    %c0_7 = arith.constant 0 : index
    %c0_8 = arith.constant 0 : index
    %c0_9 = arith.constant 0 : index
    %10 = vector.load %arg4[%c0_7, %c0_8, %c0_9] : memref<1x24x64xbf16, #tpu.memory_space<vmem>>, vector<1x24x64xbf16>
    %11 = vector.shape_cast %10 : vector<1x24x64xbf16> to vector<24x64xbf16>
    %12 = vector.shape_cast %9 : vector<24x64xbf16> to vector<1x24x64xbf16>
    tpu.vector_store %arg4[%c0_7, %c0_8, %c0_9], %12 {strides = array<i32>} : memref<1x24x64xbf16, #tpu.memory_space<vmem>>, vector<1x24x64xbf16>,
    return
  }
  func.func @transform_0(%arg0: i32) -> (i32, i32, i32) {
    %c0_i32 = arith.constant 0 : i32
    %c0_i32_0 = arith.constant 0 : i32
    %c0_i32_1 = arith.constant 0 : i32
    return %arg0, %c0_i32, %c0_i32_0 : i32, i32, i32
  }
  func.func @transform_1(%arg0: i32) -> (i32, i32) {
    %c0_i32 = arith.constant 0 : i32
    %c0_i32_0 = arith.constant 0 : i32
    %c0_i32_1 = arith.constant 0 : i32
    return %c0_i32, %c0_i32_0 : i32, i32
  }
  func.func @transform_2(%arg0: i32) -> (i32, i32) {
    %c0_i32 = arith.constant 0 : i32
    %c0_i32_0 = arith.constant 0 : i32
    %c0_i32_1 = arith.constant 0 : i32
    return %c0_i32, %c0_i32_0 : i32, i32
  }
  func.func @transform_3(%arg0: i32) -> (i32, i32, i32) {
    %c0_i32 = arith.constant 0 : i32
    %c0_i32_0 = arith.constant 0 : i32
    %c0_i32_1 = arith.constant 0 : i32
    return %arg0, %c0_i32, %c0_i32_0 : i32, i32, i32
  }
}

module attributes {stable_mosaic.version = 11 : i64} {
  func.func @_deconv2x2_act_kernel(%arg0: i32, %arg1: memref<1x6x256xbf16, #tpu.memory_space<vmem>>, %arg2: memref<12x6xbf16, #tpu.memory_space<vmem>>, %arg3: memref<12x1xf32, #tpu.memory_space<vmem>>, %arg4: memref<1x12x256xf32, #tpu.memory_space<vmem>>) attributes {dimension_semantics = [#tpu.dimension_semantics<parallel>], iteration_bounds = array<i64: 2>, scalar_prefetch = 0 : i64, scratch_operands = 0 : i64, tpu.core_type = #tpu.core_type<tc>, window_params = [{transform_indices = @transform_0, window_bounds = array<i64: 1, 6, 256>}, {pipeline_mode = #tpu.pipeline_mode<synchronous>, transform_indices = @transform_1, window_bounds = array<i64: 12, 6>}, {pipeline_mode = #tpu.pipeline_mode<synchronous>, transform_indices = @transform_2, window_bounds = array<i64: 12, 1>}, {transform_indices = @transform_3, window_bounds = array<i64: 1, 12, 256>}]} {
    %c0 = arith.constant 0 : index
    %c0_0 = arith.constant 0 : index
    %0 = vector.load %arg2[%c0, %c0_0] : memref<12x6xbf16, #tpu.memory_space<vmem>>, vector<12x6xbf16>
    %c0_1 = arith.constant 0 : index
    %c0_2 = arith.constant 0 : index
    %c0_3 = arith.constant 0 : index
    %1 = vector.load %arg1[%c0_1, %c0_2, %c0_3] : memref<1x6x256xbf16, #tpu.memory_space<vmem>>, vector<1x6x256xbf16>
    %2 = vector.shape_cast %1 : vector<1x6x256xbf16> to vector<6x256xbf16>
    %cst = arith.constant dense<0.000000e+00> : vector<12x256xf32>
    %3 = tpu.matmul %0, %2, %cst {dimension_numbers = #tpu.dot_dimension_numbers<[1], [0], [0], [1], [0, 0, 1, 1], [], []>} : vector<12x6xbf16>, vector<6x256xbf16>, vector<12x256xf32> -> vector<12x256xf32>
    %c0_4 = arith.constant 0 : index
    %c0_5 = arith.constant 0 : index
    %4 = vector.load %arg3[%c0_4, %c0_5] : memref<12x1xf32, #tpu.memory_space<vmem>>, vector<12x1xf32>
    %5 = vector.broadcast %4 : vector<12x1xf32> to vector<12x256xf32>
    %6 = arith.addf %3, %5 : vector<12x256xf32>
    %7 = arith.negf %6 : vector<12x256xf32>
    %8 = math.exp %7 : vector<12x256xf32>
    %cst_6 = arith.constant 1.000000e+00 : f32
    %9 = vector.broadcast %cst_6 : f32 to vector<12x256xf32>
    %10 = arith.addf %9, %8 : vector<12x256xf32>
    %11 = arith.divf %9, %10 : vector<12x256xf32>
    %c0_7 = arith.constant 0 : index
    %c0_8 = arith.constant 0 : index
    %c0_9 = arith.constant 0 : index
    %12 = vector.load %arg4[%c0_7, %c0_8, %c0_9] : memref<1x12x256xf32, #tpu.memory_space<vmem>>, vector<1x12x256xf32>
    %13 = vector.shape_cast %12 : vector<1x12x256xf32> to vector<12x256xf32>
    %14 = vector.shape_cast %11 : vector<12x256xf32> to vector<1x12x256xf32>
    tpu.vector_store %arg4[%c0_7, %c0_8, %c0_9], %14 {strides = array<i32>} : memref<1x12x256xf32, #tpu.memory_space<vmem>>, vector<1x12x256xf32>,
    return
  }
  func.func @transform_0(%arg0: i32) -> (i32, i32, i32) {
    %c0_i32 = arith.constant 0 : i32
    %c0_i32_0 = arith.constant 0 : i32
    %c0_i32_1 = arith.constant 0 : i32
    return %arg0, %c0_i32, %c0_i32_0 : i32, i32, i32
  }
  func.func @transform_1(%arg0: i32) -> (i32, i32) {
    %c0_i32 = arith.constant 0 : i32
    %c0_i32_0 = arith.constant 0 : i32
    %c0_i32_1 = arith.constant 0 : i32
    return %c0_i32, %c0_i32_0 : i32, i32
  }
  func.func @transform_2(%arg0: i32) -> (i32, i32) {
    %c0_i32 = arith.constant 0 : i32
    %c0_i32_0 = arith.constant 0 : i32
    %c0_i32_1 = arith.constant 0 : i32
    return %c0_i32, %c0_i32_0 : i32, i32
  }
  func.func @transform_3(%arg0: i32) -> (i32, i32, i32) {
    %c0_i32 = arith.constant 0 : i32
    %c0_i32_0 = arith.constant 0 : i32
    %c0_i32_1 = arith.constant 0 : i32
    return %arg0, %c0_i32, %c0_i32_0 : i32, i32, i32
  }
}

</mosaic_0001>

<bundles_post_ra>
// kernel: autoencoder_forward.9
= control target key start
LH: loop header
LB: loop body
LE: loop exit
PB: predicated region body
PF: predicated region fallthrough
CT: control target
= control target key end

     0   :  { %s1379_s21 = smov 0   ;;  %s1628_s0 = inlined_call_operand.vmem [shape: bf16[2,6,90], index: 0, kind: input, shape index: {}]   ;;  %s1629_s1 = inlined_call_operand.vmem [shape: bf16[2,6,90], index: 1, kind: input, shape index: {}]   ;;  %s1630_s2 = inlined_call_operand.vmem [shape: bf16[2,6,90], index: 2, kind: input, shape index: {}]   ;;  %s1631_s3 = inlined_call_operand.vmem [shape: bf16[2,6,90], index: 3, kind: input, shape index: {}]   ;;  %s1632_s4 = inlined_call_operand.vmem [shape: bf16[9,12,6], index: 4, kind: input, shape index: {}]   ;;  %s1633_s5 = inlined_call_operand.vmem [shape: f32[12,1], index: 5, kind: input, shape index: {}]   ;;  %s1634_s6 = inlined_call_operand.vmem [shape: bf16[2,12,72], index: 6, kind: output, shape index: {}]  }
   0x1 LB: > { %s1207_s22 = sadd.s32 4294967295, %s1338_s21   ;;  %p1211_p0 = scmp.ge.s32.totalorder %s1338_s21, 1  ;;  %s1338_s21 = sphi %s1379_s21, %s16_s21  }
   0x2   : > { %p238_p1 = scmp.lt.s32.totalorder %s1338_s21, 3 }
   0x4   : > { %p239_p2 = pnand %p1211_p0, %p238_p1 }
   0x5   : > { %p279_p3 = scmp.lt.s32.totalorder (!%p239_p2), %s1207_s22, 1  ;;  %s1340_s20 = smov (!%p239_p2), 119  }
   0x6   : > { %242 = sbr.rel (%p239_p2) target bundleno = 421 (0x1a5), region = 44  ;;  %s1342_s24 = smov (!%p239_p2), 118  }
   0xb   : > { %s1638_s22 = smov (!%p279_p3, %s1207_s22), 1  ;;  %vm317_vm0 = vcmask 1042432   ;;  %v1222_v0 = vld [vmem:[%s1632_s4 + $0x8] sm:$0xf]  ;;  %v1310_v1 = vld [vmem:[%s1632_s4 + $0x8] sm:$0x30] }
   0xc   : > { %s1212_s23 = sshll.u32 %s1638_s22, 2  ;;  %v1241_v2 = vld [vmem:[%s1632_s4 + $0x18] sm:$0xf]  ;;  %v1312_v5 = vld [vmem:[%s1632_s4 + $0x18] sm:$0x30]  ;;  %v1418_v11 = vor.u32 %v1310_v1, %v1222_v0  ;;  %vm313_vm1 = vcmask 48128  }
   0xd   : > { %s286_s26 = scalar_lea.vmem %s1629_s1, %s1212_s23  ;;  %s282_s29 = scalar_lea.vmem %s1628_s0, %s1212_s23  ;;  %v1428_v16 = vor.u32 %v1312_v5, %v1241_v2  ;;  %v1248_v20 = vld [vmem:[%s1632_s4 + $0x20] sm:$0xf]  ;;  %v1313_v21 = vld [vmem:[%s1632_s4 + $0x20] sm:$0x30]  ;;  %v1234_v34 = vld [vmem:[%s1632_s4 + $0x10] sm:$0xf] }
   0xe   : > { %v304_v3 = vld [vmem:[%s286_s26] sm:$0x7]  ;;  %s290_s14 = scalar_lea.vmem %s1630_s2, %s1212_s23  ;;  %s294_s17 = scalar_lea.vmem %s1631_s3, %s1212_s23  ;;  %v1440_v23 = vor.u32 %v1313_v21, %v1248_v20  ;;  %v1309_v26 = vld [vmem:[%s1632_s4] sm:$0x30]  ;;  %v1311_v35 = vld [vmem:[%s1632_s4 + $0x10] sm:$0x30] }
   0xf   : > { %v301_v4 = vld [vmem:[%s282_s29] sm:$0x7]  ;;  %v533_v6 = vunpack.c.l.b16 %v304_v3  ;;  %v1415_v10 = vsel %vm317_vm0, %v304_v3, 0  ;;  %s1341_s23 = smov 127   ;;  %v1317_v29 = vld [vmem:[%s1632_s4 + $0x40] sm:$0x30]  ;;  %v1490_v43 = vor.u32 %v1311_v35, %v1234_v34 }
  0x10   : > { %v369_v7 = vunpack.c.l.b16 %v301_v4  ;;  %v395_v8 = vld [vmem:[%s290_s14] sm:$0x7]  ;;  %328 = vmatpush.bf16.msra.mxu0 %v1415_v10  ;;  %v344_v24 = vsel %vm317_vm0, %v301_v4, 0  ;;  %v1269_v36 = vld [vmem:[%s1632_s4 + $0x38] sm:$0xf]  ;;  %s1308_s11 = sshll.u32 %s1638_s22, 3 }
  0x11   : > { %v426_v9 = vld [vmem:[%s294_s17] sm:$0x7]  ;;  %v1424_v13 = vsel %vm317_vm0, %v395_v8, 0  ;;  %v534_v14 = vpack.c.b16 %v533_v6, %v533_v6  ;;  %v466_v17 = vunpack.c.l.b16 %v395_v8  ;;  %353 = vmatpush.bf16.msra.mxu1 %v344_v24  ;;  %v1316_v37 = vld [vmem:[%s1632_s4 + $0x38] sm:$0x30]  ;;  %s299_s14 = scalar_lea.vmem %s1634_s6, %s1308_s11  ;;  %vm1112_vm8 = vcmask 584704  }
  0x12   : > { %v1421_v12 = vsel %vm317_vm0, %v426_v9, 0  ;;  %v370_v15 = vpack.c.b16 %v369_v7, %v369_v7  ;;  %417 = vmatpush.bf16.msra.mxu3 %v1424_v13  ;;  %v673_v19 = vunpack.c.l.b16 %v426_v9  ;;  %v1227_v25 = vld [vmem:[%s1632_s4] sm:$0xf]  ;;  %v1492_v44 = vor.u32 %v1316_v37, %v1269_v36  ;;  %v1255_v45 = vld [vmem:[%s1632_s4 + $0x28] sm:$0xf] }
  0x13   : > { %535 = vrot.lane.b32.xlu1 %v534_v14, %s1340_s20  ;;  %1224 = vmatmul.msk.bf16.vlgmr.msra.gmra.mxu0 %vm313_vm1, %v1418_v11  ;;  %v467_v18 = vpack.c.b16 %v466_v17, %v466_v17  ;;  %v1451_v27 = vor.u32 %v1309_v26, %v1227_v25  ;;  %v1276_v28 = vld [vmem:[%s1632_s4 + $0x40] sm:$0xf]  ;;  %v1314_v46 = vld [vmem:[%s1632_s4 + $0x28] sm:$0x30]  ;;  %v1262_v52 = vld [vmem:[%s1632_s4 + $0x30] sm:$0xf] }
  0x14   : > { %448 = vmatpush.bf16.msrb.mxu0 %v1421_v12  ;;  %371 = vrot.lane.b32.xlu0 %v370_v15, %s1341_s23  ;;  %v674_v22 = vpack.c.b16 %v673_v19, %v673_v19  ;;  %v1464_v32 = vor.u32 %v1317_v29, %v1276_v28  ;;  %v1256_v51 = vor.u32 %v1314_v46, %v1255_v45  ;;  %v1315_v53 = vld [vmem:[%s1632_s4 + $0x30] sm:$0x30]  ;;  %vm1114_vm9 = vcmask 582656  }
  0x15   : > { %567 = vrot.lane.b32.xlu2 %v370_v15, %s1342_s24  ;;  %1243 = vmatmul.msk.bf16.vlgmr.msra.gmra.mxu3 %vm313_vm1, %v1428_v16  ;;  %v1518_v55 = vor.u32 %v1315_v53, %v1262_v52 }
  0x16   : > { %1229 = vmatmul.msk.bf16.vlgmr.msra.gmra.mxu1 %vm313_vm1, %v1451_v27 }
  0x1b   : > { %468 = vrot.lane.b32.xlu1 %v467_v18, %s1341_s23 }
  0x1c   : > { %500 = vrot.lane.b32.xlu0 %v370_v15, %s1340_s20  ;;  %v1056_v15 = vld [vmem:[%s1633_s5 + $0x8] sm:$0xf] }
  0x1d   : > { %619 = vrot.lane.b32.xlu2 %v534_v14, %s1341_s23 }
  0x23   : > { %728 = vrot.lane.b32.xlu1 %v534_v14, %s1342_s24  ;;  %1250 = vmatmul.msk.bf16.vlgmr.msrb.gmra.mxu0 %vm313_vm1, %v1440_v23 }
  0x24   : > { %675 = vrot.lane.b32.xlu0 %v674_v22, %s1341_s23 }
  0x25   : > { %885 = vrot.lane.b32.xlu2 %v467_v18, %s1342_s24 }
  0x2b   : > { %864 = vrot.lane.b32.xlu1 %v674_v22, %s1340_s20 }
  0x2c   : > { %843 = vrot.lane.b32.xlu0 %v467_v18, %s1340_s20 }
  0x2d   : > { %1032 = vrot.lane.b32.xlu2 %v674_v22, %s1342_s24 }
  0x6f   : > { %v568_v30 = vpop.permute.xlu2 %567 }
  0x70   : > { %v1462_v31 = vsel %vm317_vm0, %v568_v30, 0 }
  0x71   : > { %582 = vmatpush.bf16.msra.mxu0 %v1462_v31 }
  0x74   : > { %1278 = vmatmul.msk.bf16.vlgmr.msra.gmra.mxu0 %vm313_vm1, %v1464_v32 }
  0x75   : > { %647 = vmatpush.bf16.msrb.mxu0 %v1421_v12 }
  0x77   : > { %v620_v33 = vpop.permute.xlu2 %619 }
  0x78   : > { %v622_v40 = vsel %vm317_vm0, %v620_v33, 0 }
  0x79   : > { %719 = vmatpush.bf16.msra.mxu0 %v1462_v31 }
  0x7f   : > { %v886_v63 = vpop.permute.xlu2 %885 }
  0x80   : > { %v888_v0 = vsel %vm317_vm0, %v886_v63, 0 }
  0x84   : > { %1282 = vmatmul.msk.bf16.vlgmr.msrb.gmra.mxu0 %vm313_vm1, %v1428_v16 }
  0x85   : > { %v536_v38 = vpop.permute.xlu1 %535 }
  0x86   : > { %v372_v39 = vpop.permute.xlu0 %371  ;;  %v1487_v41 = vsel %vm317_vm0, %v536_v38, 0 }
  0x87   : > { %v377_v42 = vsel %vm317_vm0, %v372_v39, 0  ;;  %550 = vmatpush.bf16.msrb.mxu3 %v1487_v41  ;;  %v1033_v2 = vpop.permute.xlu2 %1032 }
  0x88   : > { %386 = vmatpush.bf16.msra.mxu2 %v377_v42  ;;  %v1035_v4 = vsel %vm317_vm0, %v1033_v2, 0 }
  0x8a   : > { %1271 = vmatmul.msk.bf16.vlgmr.msrb.gmra.mxu3 %vm313_vm1, %v1492_v44 }
  0x8b   : > { %631 = vmatpush.bf16.msra.mxu3 %v622_v40  ;;  %1236 = vmatmul.msk.bf16.vlgmr.msra.gmra.mxu2 %vm313_vm1, %v1490_v43 }
  0x8d   : > { %v469_v47 = vpop.permute.xlu1 %468 }
  0x8e   : > { %v501_v48 = vpop.permute.xlu0 %500  ;;  %v474_v49 = vsel %vm317_vm0, %v469_v47, 0 }
  0x8f   : > { %703 = vmatpush.bf16.msrb.mxu3 %v1487_v41  ;;  %v506_v50 = vsel %vm317_vm0, %v501_v48, 0  ;;  %483 = vmatpush.bf16.msrb.mxu1 %v474_v49 }
  0x90   : > { %515 = vmatpush.bf16.msrb.mxu2 %v506_v50  ;;  %786 = vmatpush.bf16.msrb.mxu0 %v474_v49  ;;  %v330_v1 = vpop.f32.mrf.mxu0 }
  0x92   : > { %1257 = vmatmul.msk.bf16.vlgmr.msrb.gmra.mxu1 %vm313_vm1, %v1256_v51 }
  0x93   : > { %598 = vmatpush.bf16.msra.mxu1 %v377_v42  ;;  %v355_v3 = vpop.f32.mrf.mxu1 }
  0x94   : > { %612 = vmatpush.bf16.msra.mxu2 %v1415_v10  ;;  %1286 = vmatmul.msk.bf16.vlgmr.msra.gmra.mxu0 %vm313_vm1, %v1492_v44  ;;  %v356_v5 = vadd.f32 %v355_v3, %v330_v1 }
  0x95   : > { %v729_v57 = vpop.permute.xlu1 %728 }
  0x96   : > { %v676_v54 = vpop.permute.xlu0 %675  ;;  %v731_v60 = vsel %vm317_vm0, %v729_v57, 0 }
  0x97   : > { %663 = vmatpush.bf16.msrb.mxu1 %v474_v49  ;;  %v678_v56 = vsel %vm317_vm0, %v676_v54, 0 }
  0x98   : > { %v332_v6 = vpop.f32.mrf.mxu0  ;;  %v419_v10 = vpop.f32.mrf.mxu3 }
  0x9a   : > { %1281 = vmatmul.msk.bf16.vlgmr.msra.gmra.mxu3 %vm313_vm1, %v1490_v43 }
  0x9b   : > { %1264 = vmatmul.msk.bf16.vlgmr.msrb.gmra.mxu2 %vm313_vm1, %v1518_v55  ;;  %772 = vmatpush.bf16.msra.mxu3 %v1424_v13  ;;  %v357_v7 = vpop.f32.mrf.mxu1 }
  0x9c   : > { %687 = vmatpush.bf16.msrb.mxu2 %v678_v56  ;;  %v358_v8 = vadd.f32 %v357_v7, %v332_v6 }
  0x9d   : > { %v865_v61 = vpop.permute.xlu1 %864 }
  0x9e   : > { %v844_v58 = vpop.permute.xlu0 %843  ;;  %v867_v62 = vsel %vm317_vm0, %v865_v61, 0 }
  0x9f   : > { %v846_v59 = vsel %vm317_vm0, %v844_v58, 0 }
  0xa0   : > { %855 = vmatpush.bf16.msra.mxu0 %v846_v59  ;;  %v450_v9 = vpop.f32.mrf.mxu0  ;;  %v421_v14 = vpop.f32.mrf.mxu3 }
  0xa2   : > { %1279 = vmatmul.msk.bf16.vlgmr.msra.gmra.mxu1 %vm313_vm1, %v1418_v11 }
  0xa3   : > { %740 = vmatpush.bf16.msra.mxu1 %v731_v60 }
  0xa4   : > { %1290 = vmatmul.msk.bf16.vlgmr.msrb.gmra.mxu0 %vm313_vm1, %v1490_v43 }
  0xa5   : > { %929 = vmatpush.bf16.msrb.mxu0 %v1421_v12 }
  0xa8   : > { %v452_v13 = vpop.f32.mrf.mxu0 }
  0xaa   : > { %1285 = vmatmul.msk.bf16.vlgmr.msrb.gmra.mxu3 %vm313_vm1, %v1518_v55 }
  0xab   : > { %1280 = vmatmul.msk.bf16.vlgmr.msra.gmra.mxu2 %vm313_vm1, %v1451_v27  ;;  %834 = vmatpush.bf16.msrb.mxu3 %v1462_v31 }
  0xac   : > { %758 = vmatpush.bf16.msra.mxu2 %v1421_v12  ;;  %v1343_v12 = vmov 0  }
  0xad   : > { %1330 = vset.pattern.permute.xlu0 %v1343_v12  ;;  %1331 = vset.pattern.permute.xlu1 %v1343_v12 }
  0xae   : > { %1064 = vperm.xlu1 %1331, %v1056_v15  }
  0xb2   : > { %1283 = vmatmul.msk.bf16.vlgmr.msrb.gmra.mxu1 %vm313_vm1, %v1440_v23 }
  0xb3   : > { %802 = vmatpush.bf16.msrb.mxu1 %v506_v50 }
  0xb4   : > { %1294 = vmatmul.msk.bf16.vlgmr.msra.gmra.mxu0 %vm313_vm1, %v1518_v55 }
  0xb5   : > { %991 = vmatpush.bf16.msra.mxu0 %v731_v60 }
  0xba   : > { %1289 = vmatmul.msk.bf16.vlgmr.msra.gmra.mxu3 %vm313_vm1, %v1451_v27 }
  0xbb   : > { %1284 = vmatmul.msk.bf16.vlgmr.msrb.gmra.mxu2 %vm313_vm1, %v1256_v51  ;;  %915 = vmatpush.bf16.msra.mxu3 %v474_v49 }
  0xbc   : > { %818 = vmatpush.bf16.msrb.mxu2 %v1487_v41 }
  0xc2   : > { %1287 = vmatmul.msk.bf16.vlgmr.msra.gmra.mxu1 %vm313_vm1, %v1464_v32 }
  0xc3   : > { %876 = vmatpush.bf16.msra.mxu1 %v867_v62 }
  0xc4   : > { %1298 = vmatmul.msk.bf16.vlgmr.msrb.gmra.mxu0 %vm313_vm1, %v1451_v27 }
  0xca   : > { %1293 = vmatmul.msk.bf16.vlgmr.msrb.gmra.mxu3 %vm313_vm1, %v1256_v51 }
  0xcb   : > { %1288 = vmatmul.msk.bf16.vlgmr.msra.gmra.mxu2 %vm313_vm1, %v1418_v11  ;;  %975 = vmatpush.bf16.msrb.mxu3 %v1462_v31 }
  0xcc   : > { %897 = vmatpush.bf16.msra.mxu2 %v888_v0 }
  0xd2   : > { %1291 = vmatmul.msk.bf16.vlgmr.msrb.gmra.mxu1 %vm313_vm1, %v1428_v16 }
  0xd3   : > { %943 = vmatpush.bf16.msrb.mxu1 %v678_v56 }
  0xd4   : > { %1302 = vmatmul.msk.bf16.vlgmr.msra.gmra.mxu0 %vm313_vm1, %v1256_v51 }
  0xda   : > { %1297 = vmatmul.msk.bf16.vlgmr.msra.gmra.mxu3 %vm313_vm1, %v1418_v11  ;;  %v1055_v11 = vld [vmem:[%s1633_s5] sm:$0xff] }
  0xdb   : > { %1292 = vmatmul.msk.bf16.vlgmr.msrb.gmra.mxu2 %vm313_vm1, %v1440_v23  ;;  %1044 = vmatpush.bf16.msra.mxu3 %v1035_v4 }
  0xdc   : > { %959 = vmatpush.bf16.msrb.mxu2 %v1487_v41  ;;  %1059 = vperm.xlu0 %1330, %v1055_v11  }
  0xe2   : > { %1295 = vmatmul.msk.bf16.vlgmr.msra.gmra.mxu1 %vm313_vm1, %v1492_v44 }
  0xe3   : > { %1007 = vmatpush.bf16.msra.mxu1 %v867_v62 }
  0xea   : > { %1301 = vmatmul.msk.bf16.vlgmr.msrb.gmra.mxu3 %vm313_vm1, %v1440_v23 }
  0xeb   : > { %1296 = vmatmul.msk.bf16.vlgmr.msra.gmra.mxu2 %vm313_vm1, %v1464_v32 }
  0xec   : > { %1023 = vmatpush.bf16.msra.mxu2 %v888_v0 }
  0xf2   : > { %1299 = vmatmul.msk.bf16.vlgmr.msrb.gmra.mxu1 %vm313_vm1, %v1490_v43 }
  0xfa   : > { %1305 = vmatmul.msk.bf16.vlgmr.msra.gmra.mxu3 %vm313_vm1, %v1464_v32 }
  0xfb   : > { %1300 = vmatmul.msk.bf16.vlgmr.msrb.gmra.mxu2 %vm313_vm1, %v1428_v16  ;;  %v584_v16 = vpop.f32.mrf.mxu0 }
 0x102   : > { %1303 = vmatmul.msk.bf16.vlgmr.msra.gmra.mxu1 %vm313_vm1, %v1518_v55 }
 0x103   : > { %v586_v27 = vpop.f32.mrf.mxu0 }
 0x10b   : > { %1304 = vmatmul.msk.bf16.vlgmr.msra.gmra.mxu2 %vm313_vm1, %v1492_v44  ;;  %v649_v37 = vpop.f32.mrf.mxu0 }
 0x10d   : > { %v552_v18 = vpop.f32.mrf.mxu3 }
 0x10e   : > { %v388_v17 = vpop.f32.mrf.mxu2 }
 0x10f   : > { %v393_v19 = vadd.f32 %v388_v17, %v356_v5  ;;  %v485_v20 = vpop.f32.mrf.mxu1 }
 0x111   : > { %v424_v21 = vadd.f32 %v419_v10, %v393_v19 }
 0x113   : > { %v455_v22 = vadd.f32 %v450_v9, %v424_v21  ;;  %v651_v44 = vpop.f32.mrf.mxu0  ;;  %v1071_v21 = vlaneseq }
 0x115   : > { %v490_v23 = vadd.f32 %v485_v20, %v455_v22  ;;  %v554_v25 = vpop.f32.mrf.mxu3 }
 0x116   : > { %v390_v24 = vpop.f32.mrf.mxu2 }
 0x117   : > { %v394_v26 = vadd.f32 %v390_v24, %v358_v8  ;;  %v487_v28 = vpop.f32.mrf.mxu1 }
 0x119   : > { %v425_v29 = vadd.f32 %v421_v14, %v394_v26 }
 0x11b   : > { %v456_v30 = vadd.f32 %v452_v13, %v425_v29  ;;  %v721_v53 = vpop.f32.mrf.mxu0 }
 0x11d   : > { %v491_v31 = vadd.f32 %v487_v28, %v456_v30  ;;  %v633_v33 = vpop.f32.mrf.mxu3 }
 0x11e   : > { %v517_v32 = vpop.f32.mrf.mxu2 }
 0x11f   : > { %v522_v34 = vadd.f32 %v517_v32, %v490_v23  ;;  %v600_v35 = vpop.f32.mrf.mxu1  ;;  %v1072_v23 = vand.u32 127, %v1071_v21 }
 0x121   : > { %v557_v36 = vadd.f32 %v552_v18, %v522_v34  ;;  %v1077_v29 = vshrl.u32 %v1072_v23, 16 }
 0x123   : > { %v1590_v38 = vadd.f32 %v584_v16, %v557_v36  ;;  %v723_v0 = vpop.f32.mrf.mxu0  ;;  %v1081_v34 = vmul.u32 14564, %v1077_v29 }
 0x125   : > { %v635_v40 = vpop.f32.mrf.mxu3 }
 0x126   : > { %v519_v39 = vpop.f32.mrf.mxu2 }
 0x127   : > { %v523_v41 = vadd.f32 %v519_v39, %v491_v31  ;;  %v602_v42 = vpop.f32.mrf.mxu1 }
 0x129   : > { %v558_v43 = vadd.f32 %v554_v25, %v523_v41  ;;  %v1082_v41 = vmul.u32 58254, %v1077_v29 }
 0x12b   : > { %v1592_v45 = vadd.f32 %v586_v27, %v558_v43  ;;  %v788_v11 = vpop.f32.mrf.mxu0  ;;  %v1076_v27 = vand.u32 65535, %v1072_v23 }
 0x12d   : > { %v705_v47 = vpop.f32.mrf.mxu3  ;;  %v1080_v30 = vmul.u32 58254, %v1076_v27 }
 0x12e   : > { %v614_v46 = vpop.f32.mrf.mxu2 }
 0x12f   : > { %v615_v48 = vadd.f32 %v614_v46, %v600_v35  ;;  %v665_v49 = vpop.f32.mrf.mxu1  ;;  %v1083_v35 = vshll.u32 %v1080_v30, 16 }
 0x131   : > { %v638_v50 = vadd.f32 %v633_v33, %v615_v48  ;;  %v1079_v33 = vmul.u32 14564, %v1076_v27 }
 0x133   : > { %v654_v51 = vadd.f32 %v649_v37, %v638_v50  ;;  %v790_v19 = vpop.f32.mrf.mxu0  ;;  %v1085_v37 = vshll.u32 %v1081_v34, 16  ;;  %vm1087_vm2 = vc.u32 %v1079_v33, %v1083_v35  ;;  %v1089_v39 = vadd.s32 %v1083_v35, %v1079_v33 }
 0x134   : > { %v1084_v50 = vshrl.u32 %v1080_v30, 16 }
 0x135   : > { %v670_v52 = vadd.f32 %v665_v49, %v654_v51  ;;  %v707_v55 = vpop.f32.mrf.mxu3  ;;  %vm1091_vm3 = vc.u32 %v1089_v39, %v1085_v37 }
 0x136   : > { %v616_v54 = vpop.f32.mrf.mxu2  ;;  %v1092_v48 = vsel %vm1091_vm3, 1, %v1343_v12 }
 0x137   : > { %v617_v56 = vadd.f32 %v616_v54, %v602_v42  ;;  %v667_v57 = vpop.f32.mrf.mxu1  ;;  %v1088_v42 = vsel %vm1087_vm2, 1, %v1343_v12 }
 0x138   : > { %v1090_v46 = vadd.s32 %v1088_v42, %v1082_v41 }
 0x139   : > { %v639_v58 = vadd.f32 %v635_v40, %v617_v56 }
 0x13a   : > { %v1094_v51 = vadd.s32 %v1092_v48, %v1090_v46 }
 0x13b   : > { %v655_v59 = vadd.f32 %v651_v44, %v639_v58  ;;  %v857_v25 = vpop.f32.mrf.mxu0 }
 0x13c   : > { %v1095_v56 = vadd.s32 %v1094_v51, %v1084_v50 }
 0x13d   : > { %v671_v60 = vadd.f32 %v667_v57, %v655_v59  ;;  %v774_v62 = vpop.f32.mrf.mxu3 }
 0x13e   : > { %v689_v61 = vpop.f32.mrf.mxu2 }
 0x13f   : > { %v694_v63 = vadd.f32 %v689_v61, %v670_v52  ;;  %v742_v1 = vpop.f32.mrf.mxu1 }
 0x141   : > { %v710_v2 = vadd.f32 %v705_v47, %v694_v63 }
 0x143   : > { %v726_v3 = vadd.f32 %v721_v53, %v710_v2  ;;  %v859_v36 = vpop.f32.mrf.mxu0 }
 0x145   : > { %v1594_v4 = vadd.f32 %v742_v1, %v726_v3  ;;  %v776_v9 = vpop.f32.mrf.mxu3 }
 0x146   : > { %v691_v5 = vpop.f32.mrf.mxu2 }
 0x147   : > { %v749_v6 = vmax.f32 %v1590_v38, %v1594_v4  ;;  %v695_v7 = vadd.f32 %v691_v5, %v671_v60  ;;  %v744_v8 = vpop.f32.mrf.mxu1 }
 0x149   : > { %v711_v10 = vadd.f32 %v707_v55, %v695_v7  ;;  %v1086_v55 = vshrl.u32 %v1081_v34, 16 }
 0x14b   : > { %v727_v13 = vadd.f32 %v723_v0, %v711_v10  ;;  %v931_v47 = vpop.f32.mrf.mxu0  ;;  %v1096_v61 = vadd.s32 %v1095_v56, %v1086_v55  ;;  %v1065_v55 = vpop.permute.xlu1 %1064 }
 0x14d   : > { %v1598_v14 = vadd.f32 %v744_v8, %v727_v13  ;;  %v836_v18 = vpop.f32.mrf.mxu3  ;;  %v1097_v5 = vshrl.u32 %v1096_v61, 3 }
 0x14e   : > { %v760_v15 = vpop.f32.mrf.mxu2 }
 0x14f   : > { %v750_v16 = vmax.f32 %v1592_v45, %v1598_v14  ;;  %v804_v17 = vpop.f32.mrf.mxu1  ;;  %v775_v49 = vadd.f32 %v774_v62, %v760_v15  ;;  %v1098_v13 = vmul.u32 9, %v1097_v5 }
 0x151   : > { %v793_v54 = vadd.f32 %v788_v11, %v775_v49 }
 0x153   : > { %v933_v59 = vpop.f32.mrf.mxu0  ;;  %v809_v60 = vadd.f32 %v804_v17, %v793_v54 }
 0x155   : > { %v838_v24 = vpop.f32.mrf.mxu3 }
 0x156   : > { %v762_v20 = vpop.f32.mrf.mxu2 }
 0x157   : > { %v806_v22 = vpop.f32.mrf.mxu1  ;;  %v777_v63 = vadd.f32 %v776_v9, %v762_v20 }
 0x159   : > { %v794_v12 = vadd.f32 %v790_v19, %v777_v63 }
 0x15b   : > { %v993_v8 = vpop.f32.mrf.mxu0  ;;  %v810_v11 = vadd.f32 %v806_v22, %v794_v12 }
 0x15d   : > { %v917_v32 = vpop.f32.mrf.mxu3 }
 0x15e   : > { %v820_v26 = vpop.f32.mrf.mxu2  ;;  %v932_v58 = vadd.f32 %v931_v47, %v917_v32 }
 0x15f   : > { %v878_v28 = vpop.f32.mrf.mxu1  ;;  %v825_v0 = vadd.f32 %v820_v26, %v809_v60  ;;  %v1099_v26 = vsub.s32 %v1072_v23, %v1098_v13 }
 0x161   : > { %v841_v7 = vadd.f32 %v836_v18, %v825_v0  ;;  %vm1102_vm4 = vcmp.ne.s32.totalorder %v1099_v26, 0  ;;  %vm1103_vm5 = vcmp.lt.s32.totalorder %v1099_v26, 0  ;;  %v1105_v42 = vadd.s32 9, %v1099_v26 }
 0x162   : > { %vm1104_vm6 = vmand %vm1103_vm5, %vm1102_vm4 }
 0x163   : > { %v862_v27 = vadd.f32 %v857_v25, %v841_v7  ;;  %v995_v18 = vpop.f32.mrf.mxu0  ;;  %v1106_v46 = vsel %vm1104_vm6, %v1105_v42, %v1099_v26 }
 0x164   : > { %vm1611_vm7 = vcmp.eq.s32.totalorder %v1106_v46, 8 }
 0x165   : > { %v919_v44 = vpop.f32.mrf.mxu3  ;;  %v883_v33 = vadd.f32 %v878_v28, %v862_v27 }
 0x166   : > { %v822_v31 = vpop.f32.mrf.mxu2  ;;  %v934_v15 = vadd.f32 %v933_v59, %v919_v44 }
 0x167   : > { %v1602_v40 = vpop.f32.mrf.mxu1  ;;  %v826_v30 = vadd.f32 %v822_v31, %v810_v11 }
 0x169   : > { %v842_v34 = vadd.f32 %v838_v24, %v826_v30 }
 0x16b   : > { %v863_v41 = vadd.f32 %v859_v36, %v842_v34 }
 0x16d   : > { %v977_v57 = vpop.f32.mrf.mxu3  ;;  %v884_v44 = vadd.f32 %v1602_v40, %v863_v41 }
 0x16e   : > { %v899_v43 = vpop.f32.mrf.mxu2 }
 0x16f   : > { %v945_v52 = vpop.f32.mrf.mxu1  ;;  %v904_v35 = vadd.f32 %v899_v43, %v883_v33  ;;  %v1060_v43 = vpop.permute.xlu0 %1059 }
 0x170   : > { %v950_v2 = vadd.f32 %v945_v52, %v932_v58 }
 0x171   : > { %v906_v31 = vmax.f32 %v749_v6, %v904_v35 }
 0x175   : > { %v979_v10 = vpop.f32.mrf.mxu3 }
 0x176   : > { %v901_v53 = vpop.f32.mrf.mxu2 }
 0x177   : > { %v947_v3 = vpop.f32.mrf.mxu1  ;;  %v905_v48 = vadd.f32 %v901_v53, %v884_v44 }
 0x178   : > { %v951_v17 = vadd.f32 %v947_v3, %v934_v15 }
 0x179   : > { %v907_v6 = vmax.f32 %v750_v16, %v905_v48 }
 0x17d   : > { %v1046_v39 = vpop.f32.mrf.mxu3 }
 0x17e   : > { %v961_v1 = vpop.f32.mrf.mxu2 }
 0x17f   : > { %v966_v62 = vadd.f32 %v961_v1, %v950_v2  ;;  %v1009_v32 = vpop.f32.mrf.mxu1 }
 0x181   : > { %v982_v21 = vadd.f32 %v977_v57, %v966_v62 }
 0x183   : > { %v998_v9 = vadd.f32 %v993_v8, %v982_v21 }
 0x185   : > { %v1014_v19 = vadd.f32 %v1009_v32, %v998_v9  ;;  %v1048_v4 = vpop.f32.mrf.mxu3 }
 0x186   : > { %v963_v29 = vpop.f32.mrf.mxu2 }
 0x187   : > { %v967_v20 = vadd.f32 %v963_v29, %v951_v17  ;;  %v1011_v24 = vpop.f32.mrf.mxu1 }
 0x189   : > { %v983_v37 = vadd.f32 %v979_v10, %v967_v20 }
 0x18b   : > { %v999_v23 = vadd.f32 %v995_v18, %v983_v37 }
 0x18d   : > { %v1015_v49 = vadd.f32 %v1011_v24, %v999_v23 }
 0x18e   : > { %v1025_v22 = vpop.f32.mrf.mxu2 }
 0x18f   : > { %v1030_v25 = vadd.f32 %v1025_v22, %v1014_v19 }
 0x191   : > { %v1051_v28 = vadd.f32 %v1046_v39, %v1030_v25 }
 0x193   : > { %v1053_v47 = vmax.f32 %v906_v31, %v1051_v28 }
 0x195   : > { %v1067_v50 = vadd.f32 %v1060_v43, %v1053_v47 }
 0x196   : > { %v1027_v51 = vpop.f32.mrf.mxu2 }
 0x197   : > { %v1069_v52 = vmax.f32 %v1067_v50, 0.0  ;;  %v1031_v38 = vadd.f32 %v1027_v51, %v1015_v49 }
 0x199   : > { %v1108_v40 = vsel %vm1611_vm7, 0.0, %v1069_v52  ;;  %v1052_v53 = vadd.f32 %v1048_v4, %v1031_v38 }
 0x19a   : > { %v1110_v54 = vpack.c.bf16 %v1108_v40, %v1108_v40 }
 0x19b   : > { %v1054_v56 = vmax.f32 %v907_v6, %v1052_v53 }
 0x19c   : > { %1113 = vst.msk [vmem:[%s299_s14] sm:$0xf] %vm1112_vm8, %v1110_v54 }
 0x19d   : > { %v1068_v57 = vadd.f32 %v1065_v55, %v1054_v56 }
 0x19f   : > { %v1070_v58 = vmax.f32 %v1068_v57, 0.0 }
 0x1a1   : > { %v1109_v45 = vsel %vm1611_vm7, 0.0, %v1070_v58 }
 0x1a2   : > { %v1111_v14 = vpack.c.bf16 %v1109_v45, %v1109_v45 }
 0x1a4   : > { %1115 = vst.msk [vmem:[%s299_s14 + $0x4] sm:$0x3] %vm1114_vm9, %v1111_v14 }
 0x1a5 PF: > { %s16_s21 = sadd.s32 1, %s1338_s21  }
 0x1a6   : > { %p13_p4 = scmp.ge.s32.totalorder %s16_s21, 4  }
 0x1a8   :  { %15 = sbr.rel (!%p13_p4) target bundleno = 1 (0x1), region = 91 }

// kernel: autoencoder_forward.8
= control target key start
LH: loop header
LB: loop body
LE: loop exit
PB: predicated region body
PF: predicated region fallthrough
CT: control target
= control target key end

     0   :  { %s3053_s21 = smov 0   ;;  %s3914_s0 = inlined_call_operand.vmem [shape: bf16[2,3,306], index: 0, kind: input, shape index: {}]   ;;  %s3915_s1 = inlined_call_operand.vmem [shape: bf16[2,3,306], index: 1, kind: input, shape index: {}]   ;;  %s3916_s2 = inlined_call_operand.vmem [shape: bf16[2,3,306], index: 2, kind: input, shape index: {}]   ;;  %s3917_s3 = inlined_call_operand.vmem [shape: bf16[2,3,306], index: 3, kind: input, shape index: {}]   ;;  %s3918_s4 = inlined_call_operand.vmem [shape: bf16[9,6,3], index: 4, kind: input, shape index: {}]   ;;  %s3919_s5 = inlined_call_operand.vmem [shape: f32[6,1], index: 5, kind: input, shape index: {}]   ;;  %s3920_s6 = inlined_call_operand.vmem [shape: bf16[2,6,272], index: 6, kind: output, shape index: {}]  }
   0x1 LB: > { %s2852_s22 = sadd.s32 4294967295, %s3011_s21   ;;  %p2856_p0 = scmp.ge.s32.totalorder %s3011_s21, 1  ;;  %s3011_s21 = sphi %s3053_s21, %s16_s21  }
   0x2   : > { %p242_p1 = scmp.lt.s32.totalorder %s3011_s21, 3 }
   0x4   : > { %p243_p2 = pnand %p2856_p0, %p242_p1 }
   0x5   : > { %p287_p3 = scmp.lt.s32.totalorder (!%p243_p2), %s2852_s22, 1  ;;  %s3013_s9 = smov (!%p243_p2), 127  }
   0x6   : > { %246 = sbr.rel (%p243_p2) target bundleno = 717 (0x2cd), region = 44  ;;  %s3014_s13 = smov (!%p243_p2), 111  }
   0x7   : > { %s3016_s18 = smov (!%p243_p2), 110  }
   0xb   : > { %s3926_s22 = smov (!%p287_p3, %s2852_s22), 1  ;;  %vm327_vm0 = vcmask 1040384   ;;  %vm328_vm1 = vcmask 1041408   ;;  %v3015_v29 = vmov 65535   ;;  %v3150_v36 = vld [vmem:[%s3918_s4 + $0x4] sm:$0x7] }
   0xc   : > { %s2980_s23 = smul.u32 6, %s3926_s22  ;;  %v329_v30 = vsel %vm327_vm0, 4294967295, %v3015_v29  ;;  %vm323_vm2 = vcmask 23552   ;;  %v3167_v42 = vld [vmem:[%s3918_s4] sm:$0x7]  ;;  %vm446_vm3 = vcmask 1039360  }
   0xd   : > { %v3139_v31 = vsel %vm328_vm1, %v329_v30, 0  ;;  %vm711_vm4 = vcmask 908288   ;;  %vm858_vm5 = vcmask 900096   ;;  %s2981_s11 = smul.u32 12, %s3926_s22 }
   0xe   : > { %s3067_s26 = scalar_lea.vmem %s3915_s1, %s2980_s23  ;;  %s3076_s29 = scalar_lea.vmem %s3914_s0, %s2980_s23 }
   0xf   : > { %v3070_v0 = vld [vmem:[%s3067_s26] sm:$0x3f]  ;;  %s3092_s8 = scalar_lea.vmem %s3916_s2, %s2980_s23  ;;  %s3103_s12 = scalar_lea.vmem %s3917_s3, %s2980_s23 }
  0x10   : > { %319 = vst [vmem:[#allocation1] ss:$4 sm:$0xff] %v3070_v0  ;;  %v313_v1 = vld [vmem:[%s3076_s29] sm:$0x3f] }
  0x11   : > { %v3082_v5 = vld [vmem:[%s3076_s29] sm:$0x3f] }
  0x12   : > { %v3095_v9 = vld [vmem:[%s3092_s8] sm:$0x3f] }
  0x13   : > { %v3106_v13 = vld [vmem:[%s3103_s12] sm:$0x3f] }
  0x14   : > { %v3117_v17 = vld [vmem:[%s3092_s8] sm:$0x3f] }
  0x15   : > { %v3127_v21 = vld [vmem:[%s3076_s29] sm:$0x3f] }
  0x16   : > { %v3133_v25 = vld [vmem:[%s3067_s26] sm:$0x3f] }
  0x17   : > { %v320_v2 = vld.sshfl [vmem:[#allocation1] sm:$0xff pattern:$0x73625140]  ;;  %v321_v3 = vld.sshfl [vmem:[#allocation1 + $0x8] sm:$0xff pattern:$0x73625140] }
  0x18   : > { %v3079_v4 = vld.sshfl [vmem:[#allocation1 + $0x10] sm:$0xff pattern:$0x73625140]  ;;  %v331_v32 = vand.u32 %v3139_v31, %v320_v2  ;;  %v333_v33 = vand.u32 %v3139_v31, %v321_v3  ;;  %v3145_v35 = vld [vmem:[%s3076_s29] sm:$0x3f] }
  0x19   : > { %377 = vst [vmem:[#allocation1] ss:$4 sm:$0xff] %v313_v1  ;;  %v335_v39 = vand.u32 %v3139_v31, %v3079_v4  ;;  %v1027_v49 = vld [vmem:[%s3067_s26] sm:$0x3f]  ;;  %v3217_v1 = vld [vmem:[%s3918_s4 + $0xc] sm:$0x7] }
  0x1a   : > { %344 = vmatpush.bf16.msra.mxu0 %v331_v32  ;;  %357 = vmatpush.bf16.msra.mxu1 %v333_v33  ;;  %v3207_v60 = vld [vmem:[%s3103_s12] sm:$0x3f] }
  0x1b   : > { %370 = vmatpush.bf16.msra.mxu2 %v335_v39  ;;  %v3255_v29 = vld [vmem:[%s3067_s26] sm:$0x3f] }
  0x1d   : > { %2863 = vmatmul.msk.bf16.vlgmr.msra.gmra.mxu0 %vm323_vm2, %v3150_v36  ;;  %2864 = vmatmul.msk.bf16.vlgmr.msra.gmra.mxu1 %vm323_vm2, %v3150_v36 }
  0x1e   : > { %2865 = vmatmul.msk.bf16.vlgmr.msra.gmra.mxu2 %vm323_vm2, %v3150_v36 }
  0x20   : > { %v3084_v6 = vld.sshfl [vmem:[#allocation1] sm:$0xff pattern:$0x73625140]  ;;  %v379_v7 = vld.sshfl [vmem:[#allocation1 + $0x8] sm:$0xff pattern:$0x73625140] }
  0x21   : > { %v3086_v8 = vld.sshfl [vmem:[#allocation1 + $0x10] sm:$0xff pattern:$0x73625140]  ;;  %v386_v34 = vand.u32 %v379_v7, %v3139_v31  ;;  %v384_v40 = vand.u32 %v3084_v6, %v3139_v31 }
  0x22   : > { %433 = vst [vmem:[#allocation1] ss:$4 sm:$0xff] %v3082_v5  ;;  %v388_v56 = vand.u32 %v3086_v8, %v3139_v31 }
  0x23   : > { %410 = vmatpush.bf16.msrb.mxu0 %v386_v34  ;;  %397 = vmatpush.bf16.msra.mxu3 %v384_v40 }
  0x24   : > { %423 = vmatpush.bf16.msrb.mxu1 %v388_v56 }
  0x26   : > { %2866 = vmatmul.msk.bf16.vlgmr.msra.gmra.mxu3 %vm323_vm2, %v3167_v42 }
  0x29   : > { %v434_v10 = vld.sshfl [vmem:[#allocation1] sm:$0xff pattern:$0x73625140]  ;;  %v438_v11 = vld.sshfl [vmem:[#allocation1 + $0x10] sm:$0xff pattern:$0x73625140] }
  0x2a   : > { %440 = vrot.lane.b32.xlu0 %v434_v10, %s3013_s9  ;;  %444 = vrot.lane.b32.xlu1 %v438_v11, %s3013_s9  ;;  %v436_v12 = vld.sshfl [vmem:[#allocation1 + $0x8] sm:$0xff pattern:$0x73625140] }
  0x2b   : > { %507 = vst [vmem:[#allocation1] ss:$4 sm:$0xff] %v3095_v9 }
  0x2d   : > { %2867 = vmatmul.msk.bf16.vlgmr.msrb.gmra.mxu0 %vm323_vm2, %v3167_v42  ;;  %2868 = vmatmul.msk.bf16.vlgmr.msrb.gmra.mxu1 %vm323_vm2, %v3167_v42 }
  0x32   : > { %442 = vrot.lane.b32.xlu0 %v436_v12, %s3013_s9  ;;  %v3109_v14 = vld.sshfl [vmem:[#allocation1] sm:$0xff pattern:$0x73625140]  ;;  %v3111_v15 = vld.sshfl [vmem:[#allocation1 + $0x8] sm:$0xff pattern:$0x73625140] }
  0x33   : > { %v3113_v16 = vld.sshfl [vmem:[#allocation1 + $0x10] sm:$0xff pattern:$0x73625140]  ;;  %v514_v61 = vand.u32 %v3109_v14, %v3139_v31  ;;  %v3233_v14 = vld [vmem:[%s3918_s4 + $0x8] sm:$0x7] }
  0x34   : > { %566 = vst [vmem:[#allocation1] ss:$4 sm:$0xff] %v3106_v13 }
  0x35   : > { %527 = vmatpush.bf16.msra.mxu1 %v514_v61 }
  0x3b   : > { %v3119_v18 = vld.sshfl [vmem:[#allocation1] sm:$0xff pattern:$0x73625140]  ;;  %v3121_v19 = vld.sshfl [vmem:[#allocation1 + $0x8] sm:$0xff pattern:$0x73625140] }
  0x3c   : > { %v3123_v20 = vld.sshfl [vmem:[#allocation1 + $0x10] sm:$0xff pattern:$0x73625140]  ;;  %v573_v8 = vand.u32 %v3119_v18, %v3139_v31 }
  0x3d   : > { %625 = vst [vmem:[#allocation1] ss:$4 sm:$0xff] %v3117_v17  ;;  %2874 = vmatmul.msk.bf16.vlgmr.msra.gmra.mxu1 %vm323_vm2, %v3217_v1  ;;  %v3241_v18 = vld [vmem:[%s3918_s4 + $0x10] sm:$0x7] }
  0x44   : > { %v626_v22 = vld.sshfl [vmem:[#allocation1] sm:$0xff pattern:$0x73625140]  ;;  %v630_v23 = vld.sshfl [vmem:[#allocation1 + $0x10] sm:$0xff pattern:$0x73625140] }
  0x45   : > { %632 = vrot.lane.b32.xlu1 %v626_v22, %s3013_s9  ;;  %v628_v24 = vld.sshfl [vmem:[#allocation1 + $0x8] sm:$0xff pattern:$0x73625140] }
  0x46   : > { %634 = vrot.lane.b32.xlu2 %v628_v24, %s3013_s9  ;;  %698 = vst [vmem:[#allocation1] ss:$4 sm:$0xff] %v3127_v21 }
  0x4d   : > { %v703_v26 = vld.sshfl [vmem:[#allocation1 + $0x10] sm:$0xff pattern:$0x73625140]  ;;  %v701_v27 = vld.sshfl [vmem:[#allocation1 + $0x8] sm:$0xff pattern:$0x73625140] }
  0x4e   : > { %709 = vrot.lane.b32.xlu1 %v703_v26, %s3014_s13  ;;  %707 = vrot.lane.b32.xlu0 %v701_v27, %s3014_s13  ;;  %v699_v28 = vld.sshfl [vmem:[#allocation1] sm:$0xff pattern:$0x73625140]  ;;  %v516_v27 = vand.u32 %v3111_v15, %v3139_v31 }
  0x4f   : > { %705 = vrot.lane.b32.xlu2 %v699_v28, %s3014_s13  ;;  %772 = vst [vmem:[#allocation1] ss:$4 sm:$0xff] %v3133_v25  ;;  %v518_v28 = vand.u32 %v3113_v16, %v3139_v31 }
  0x56   : > { %v777_v37 = vld.sshfl [vmem:[#allocation1 + $0x10] sm:$0xff pattern:$0x73625140]  ;;  %v773_v38 = vld.sshfl [vmem:[#allocation1] sm:$0xff pattern:$0x73625140] }
  0x57   : > { %783 = vrot.lane.b32.xlu1 %v777_v37, %s3014_s13  ;;  %v775_v41 = vld.sshfl [vmem:[#allocation1 + $0x8] sm:$0xff pattern:$0x73625140]  ;;  %636 = vrot.lane.b32.xlu2 %v630_v23, %s3013_s9 }
  0x58   : > { %781 = vrot.lane.b32.xlu0 %v775_v41, %s3014_s13  ;;  %845 = vst [vmem:[#allocation1] ss:$4 sm:$0xff] %v3145_v35 }
  0x5f   : > { %v846_v43 = vld.sshfl [vmem:[#allocation1] sm:$0xff pattern:$0x73625140]  ;;  %v848_v44 = vld.sshfl [vmem:[#allocation1 + $0x8] sm:$0xff pattern:$0x73625140]  ;;  %779 = vrot.lane.b32.xlu2 %v773_v38, %s3014_s13  ;;  %v577_v38 = vand.u32 %v3123_v20, %v3139_v31 }
  0x60   : > { %v850_v45 = vld.sshfl [vmem:[#allocation1 + $0x10] sm:$0xff pattern:$0x73625140] }
  0x61   : > { %915 = vst [vmem:[#allocation1] ss:$4 sm:$0xff] %v3082_v5  ;;  %v575_v5 = vand.u32 %v3121_v19, %v3139_v31 }
  0x63   : > { %599 = vmatpush.bf16.msrb.mxu1 %v575_v5 }
  0x66   : > { %2879 = vmatmul.msk.bf16.vlgmr.msrb.gmra.mxu1 %vm323_vm2, %v3241_v18 }
  0x67   : > { %856 = vrot.lane.b32.xlu2 %v850_v45, %s3016_s18 }
  0x68   : > { %v918_v46 = vld.sshfl [vmem:[#allocation1 + $0x8] sm:$0xff pattern:$0x73625140]  ;;  %v916_v47 = vld.sshfl [vmem:[#allocation1] sm:$0xff pattern:$0x73625140] }
  0x69   : > { %924 = vrot.lane.b32.xlu1 %v918_v46, %s3013_s9  ;;  %922 = vrot.lane.b32.xlu0 %v916_v47, %s3013_s9  ;;  %v920_v48 = vld.sshfl [vmem:[#allocation1 + $0x10] sm:$0xff pattern:$0x73625140] }
  0x6a   : > { %978 = vst [vmem:[#allocation1] ss:$4 sm:$0xff] %v3070_v0 }
  0x6f   : > { %926 = vrot.lane.b32.xlu2 %v920_v48, %s3013_s9 }
  0x71   : > { %854 = vrot.lane.b32.xlu1 %v848_v44, %s3016_s18  ;;  %852 = vrot.lane.b32.xlu0 %v846_v43, %s3016_s18  ;;  %v3185_v50 = vld.sshfl [vmem:[#allocation1] sm:$0xff pattern:$0x73625140]  ;;  %v3187_v51 = vld.sshfl [vmem:[#allocation1 + $0x8] sm:$0xff pattern:$0x73625140] }
  0x72   : > { %v3189_v52 = vld.sshfl [vmem:[#allocation1 + $0x10] sm:$0xff pattern:$0x73625140] }
  0x73   : > { %1029 = vst [vmem:[#allocation1] ss:$4 sm:$0xff] %v1027_v49  ;;  %v3278_v44 = vld [vmem:[%s3918_s4 + $0x14] sm:$0x7] }
  0x7a   : > { %v1032_v53 = vld.sshfl [vmem:[#allocation1 + $0x8] sm:$0xff pattern:$0x73625140]  ;;  %v1030_v54 = vld.sshfl [vmem:[#allocation1] sm:$0xff pattern:$0x73625140] }
  0x7b   : > { %1038 = vrot.lane.b32.xlu0 %v1032_v53, %s3013_s9  ;;  %v1034_v55 = vld.sshfl [vmem:[#allocation1 + $0x10] sm:$0xff pattern:$0x73625140]  ;;  %1036 = vrot.lane.b32.xlu2 %v1030_v54, %s3013_s9 }
  0x7c   : > { %1040 = vrot.lane.b32.xlu1 %v1034_v55, %s3013_s9  ;;  %1095 = vst [vmem:[#allocation1] ss:$4 sm:$0xff] %v3106_v13 }
  0x83   : > { %v3199_v57 = vld.sshfl [vmem:[#allocation1] sm:$0xff pattern:$0x73625140]  ;;  %v3201_v58 = vld.sshfl [vmem:[#allocation1 + $0x8] sm:$0xff pattern:$0x73625140] }
  0x84   : > { %v3203_v59 = vld.sshfl [vmem:[#allocation1 + $0x10] sm:$0xff pattern:$0x73625140] }
  0x85   : > { %1147 = vst [vmem:[#allocation1] ss:$4 sm:$0xff] %v3117_v17 }
  0x8c   : > { %v1150_v62 = vld.sshfl [vmem:[#allocation1 + $0x8] sm:$0xff pattern:$0x73625140]  ;;  %v1152_v63 = vld.sshfl [vmem:[#allocation1 + $0x10] sm:$0xff pattern:$0x73625140] }
  0x8d   : > { %1156 = vrot.lane.b32.xlu1 %v1150_v62, %s3013_s9  ;;  %v1148_v0 = vld.sshfl [vmem:[#allocation1] sm:$0xff pattern:$0x73625140] }
  0x8e   : > { %1154 = vrot.lane.b32.xlu0 %v1148_v0, %s3013_s9  ;;  %1215 = vst [vmem:[#allocation1] ss:$4 sm:$0xff] %v3207_v60 }
  0x95   : > { %v1220_v2 = vld.sshfl [vmem:[#allocation1 + $0x10] sm:$0xff pattern:$0x73625140]  ;;  %v1218_v3 = vld.sshfl [vmem:[#allocation1 + $0x8] sm:$0xff pattern:$0x73625140] }
  0x96   : > { %1226 = vrot.lane.b32.xlu1 %v1220_v2, %s3013_s9  ;;  %1224 = vrot.lane.b32.xlu0 %v1218_v3, %s3013_s9  ;;  %v1216_v4 = vld.sshfl [vmem:[#allocation1] sm:$0xff pattern:$0x73625140] }
  0x97   : > { %1222 = vrot.lane.b32.xlu2 %v1216_v4, %s3013_s9  ;;  %1281 = vst [vmem:[#allocation1] ss:$4 sm:$0xff] %v3133_v25 }
  0x9c   : > { %v441_v6 = vpop.permute.xlu0 %440  ;;  %v445_v7 = vpop.permute.xlu1 %444 }
  0x9d   : > { %v459_v10 = vand.u32 %v445_v7, %v3139_v31 }
  0x9e   : > { %v1286_v11 = vld.sshfl [vmem:[#allocation1 + $0x10] sm:$0xff pattern:$0x73625140]  ;;  %v1282_v12 = vld.sshfl [vmem:[#allocation1] sm:$0xff pattern:$0x73625140] }
  0x9f   : > { %494 = vmatpush.bf16.msra.mxu0 %v459_v10  ;;  %1292 = vrot.lane.b32.xlu1 %v1286_v11, %s3014_s13  ;;  %v1284_v19 = vld.sshfl [vmem:[#allocation1 + $0x8] sm:$0xff pattern:$0x73625140] }
  0xa0   : > { %v635_v22 = vpop.permute.xlu2 %634  ;;  %1290 = vrot.lane.b32.xlu0 %v1284_v19, %s3014_s13  ;;  %1347 = vst [vmem:[#allocation1] ss:$4 sm:$0xff] %v3145_v35  ;;  %1158 = vrot.lane.b32.xlu2 %v1152_v63, %s3013_s9 }
  0xa2   : > { %2872 = vmatmul.msk.bf16.vlgmr.msra.gmra.mxu0 %vm323_vm2, %v3233_v14 }
  0xa3   : > { %586 = vmatpush.bf16.msrb.mxu0 %v573_v8 }
  0xa4   : > { %v443_v23 = vpop.permute.xlu0 %442 }
  0xa5   : > { %v447_v24 = vsel %vm446_vm3, %v441_v6, %v443_v23  ;;  %v448_v26 = vsel %vm446_vm3, %v443_v23, %v445_v7  ;;  %v3330_v23 = vld [vmem:[%s3918_s4 + $0x18] sm:$0x7] }
  0xa6   : > { %v453_v30 = vand.u32 %v447_v24, %v3139_v31  ;;  %v456_v32 = vand.u32 %v448_v26, %v3139_v31 }
  0xa7   : > { %v1348_v33 = vld.sshfl [vmem:[#allocation1] sm:$0xff pattern:$0x73625140]  ;;  %v1350_v34 = vld.sshfl [vmem:[#allocation1 + $0x8] sm:$0xff pattern:$0x73625140] }
  0xa8   : > { %468 = vmatpush.bf16.msrb.mxu2 %v453_v30  ;;  %481 = vmatpush.bf16.msrb.mxu3 %v456_v32  ;;  %v1352_v37 = vld.sshfl [vmem:[#allocation1 + $0x10] sm:$0xff pattern:$0x73625140] }
  0xa9   : > { %v706_v39 = vpop.permute.xlu2 %705  ;;  %1415 = vst [vmem:[#allocation1] ss:$4 sm:$0xff] %v3255_v29  ;;  %1288 = vrot.lane.b32.xlu2 %v1282_v12, %s3014_s13 }
  0xab   : > { %2870 = vmatmul.msk.bf16.vlgmr.msrb.gmra.mxu2 %vm323_vm2, %v3233_v14  ;;  %2871 = vmatmul.msk.bf16.vlgmr.msrb.gmra.mxu3 %vm323_vm2, %v3233_v14 }
  0xac   : > { %540 = vmatpush.bf16.msra.mxu2 %v516_v27  ;;  %553 = vmatpush.bf16.msra.mxu3 %v518_v28 }
  0xb0   : > { %612 = vmatpush.bf16.msrb.mxu2 %v577_v38  ;;  %v1418_v15 = vld.sshfl [vmem:[#allocation1 + $0x8] sm:$0xff pattern:$0x73625140]  ;;  %v1416_v16 = vld.sshfl [vmem:[#allocation1] sm:$0xff pattern:$0x73625140] }
  0xb1   : > { %v637_v40 = vpop.permute.xlu2 %636  ;;  %1424 = vrot.lane.b32.xlu1 %v1418_v15, %s3016_s18  ;;  %1422 = vrot.lane.b32.xlu0 %v1416_v16, %s3016_s18  ;;  %v1420_v47 = vld.sshfl [vmem:[#allocation1 + $0x10] sm:$0xff pattern:$0x73625140] }
  0xb2   : > { %2878 = vmatmul.msk.bf16.vlgmr.msrb.gmra.mxu0 %vm323_vm2, %v3241_v18  ;;  %v639_v20 = vsel %vm446_vm3, %v635_v22, %v637_v40  ;;  %v650_v41 = vand.u32 %v637_v40, %v3139_v31  ;;  %1358 = vrot.lane.b32.xlu2 %v1352_v37, %s3016_s18  ;;  %1484 = vst [vmem:[#allocation1] ss:$4 sm:$0xff] %v3106_v13 }
  0xb3   : > { %v647_v43 = vand.u32 %v639_v20, %v3139_v31 }
  0xb4   : > { %685 = vmatpush.bf16.msra.mxu1 %v650_v41 }
  0xb5   : > { %672 = vmatpush.bf16.msra.mxu0 %v647_v43 }
  0xb7   : > { %v633_v45 = vpop.permute.xlu1 %632  ;;  %2884 = vmatmul.msk.bf16.vlgmr.msra.gmra.mxu1 %vm323_vm2, %v3278_v44 }
  0xb8   : > { %v638_v46 = vsel %vm446_vm3, %v633_v45, %v635_v22  ;;  %v3325_v22 = vld [vmem:[%s3918_s4 + $0x1c] sm:$0x7] }
  0xb9   : > { %v644_v48 = vand.u32 %v638_v46, %v3139_v31  ;;  %1356 = vrot.lane.b32.xlu1 %v1350_v34, %s3016_s18  ;;  %1354 = vrot.lane.b32.xlu0 %v1348_v33, %s3016_s18  ;;  %v3292_v54 = vld.sshfl [vmem:[#allocation1] sm:$0xff pattern:$0x73625140]  ;;  %v3294_v55 = vld.sshfl [vmem:[#allocation1 + $0x8] sm:$0xff pattern:$0x73625140]  ;;  %v780_v3 = vpop.permute.xlu2 %779 }
  0xba   : > { %1426 = vrot.lane.b32.xlu2 %v1420_v47, %s3016_s18  ;;  %v3299_v63 = vld.sshfl [vmem:[#allocation1 + $0x10] sm:$0xff pattern:$0x73625140] }
  0xbb   : > { %2875 = vmatmul.msk.bf16.vlgmr.msra.gmra.mxu2 %vm323_vm2, %v3217_v1  ;;  %2876 = vmatmul.msk.bf16.vlgmr.msra.gmra.mxu3 %vm323_vm2, %v3217_v1  ;;  %1533 = vst [vmem:[#allocation1] ss:$4 sm:$0xff] %v3095_v9 }
  0xbc   : > { %659 = vmatpush.bf16.msrb.mxu3 %v644_v48 }
  0xc0   : > { %v710_v49 = vpop.permute.xlu1 %709  ;;  %v708_v53 = vpop.permute.xlu0 %707 }
  0xc1   : > { %v724_v56 = vand.u32 %v710_v49, %v3139_v31  ;;  %v712_v61 = vsel %vm711_vm4, %v706_v39, %v708_v53  ;;  %v713_v62 = vsel %vm711_vm4, %v708_v53, %v710_v49  ;;  %v857_v28 = vpop.permute.xlu2 %856  ;;  %v3347_v39 = vpop.f32.mrf.mxu0 }
  0xc2   : > { %2883 = vmatmul.msk.bf16.vlgmr.msra.gmra.mxu0 %vm323_vm2, %v3278_v44  ;;  %v718_v0 = vand.u32 %v712_v61, %v3139_v31  ;;  %v721_v2 = vand.u32 %v713_v62, %v3139_v31  ;;  %v3306_v5 = vld.sshfl [vmem:[#allocation1] sm:$0xff pattern:$0x73625140]  ;;  %v3308_v6 = vld.sshfl [vmem:[#allocation1 + $0x8] sm:$0xff pattern:$0x73625140]  ;;  %v871_v30 = vand.u32 %v857_v28, %v3139_v31  ;;  %v986_v61 = vand.u32 %v3189_v52, %v3139_v31  ;;  %v359_v52 = vpop.f32.mrf.mxu1 }
  0xc3   : > { %759 = vmatpush.bf16.msrb.mxu0 %v724_v56  ;;  %v3311_v10 = vld.sshfl [vmem:[#allocation1 + $0x10] sm:$0xff pattern:$0x73625140]  ;;  %v3364_v56 = vld [vmem:[%s3918_s4 + $0x20] sm:$0x7]  ;;  %v982_v62 = vand.u32 %v3185_v50, %v3139_v31 }
  0xc4   : > { %733 = vmatpush.bf16.msra.mxu2 %v718_v0  ;;  %746 = vmatpush.bf16.msra.mxu3 %v721_v2  ;;  %1582 = vst [vmem:[#allocation1] ss:$4 sm:$0xff] %v3117_v17  ;;  %v984_v0 = vand.u32 %v3187_v51, %v3139_v31 }
  0xc9   : > { %v784_v4 = vpop.permute.xlu1 %783  ;;  %v927_v16 = vpop.permute.xlu2 %926 }
  0xca   : > { %v797_v7 = vand.u32 %v784_v4, %v3139_v31  ;;  %v782_v8 = vpop.permute.xlu0 %781  ;;  %v937_v47 = vand.u32 %v927_v16, %v3139_v31  ;;  %v348_v48 = vpop.f32.mrf.mxu0 }
  0xcb   : > { %2880 = vmatmul.msk.bf16.vlgmr.msrb.gmra.mxu2 %vm323_vm2, %v3241_v18  ;;  %2882 = vmatmul.msk.bf16.vlgmr.msrb.gmra.mxu3 %vm323_vm2, %v3278_v44  ;;  %v786_v9 = vsel %vm711_vm4, %v782_v8, %v784_v4  ;;  %v785_v11 = vsel %vm711_vm4, %v780_v3, %v782_v8  ;;  %v1583_v24 = vld.sshfl [vmem:[#allocation1] sm:$0xff pattern:$0x73625140]  ;;  %v1585_v26 = vld.sshfl [vmem:[#allocation1 + $0x8] sm:$0xff pattern:$0x73625140] }
  0xcc   : > { %v794_v12 = vand.u32 %v786_v9, %v3139_v31  ;;  %v791_v19 = vand.u32 %v785_v11, %v3139_v31  ;;  %832 = vmatpush.bf16.msrb.mxu3 %v797_v7  ;;  %v1587_v27 = vld.sshfl [vmem:[#allocation1 + $0x10] sm:$0xff pattern:$0x73625140] }
  0xcd   : > { %1648 = vst [vmem:[#allocation1] ss:$4 sm:$0xff] %v3127_v21  ;;  %1593 = vrot.lane.b32.xlu2 %v1587_v27, %s3013_s9  ;;  %v1846_v27 = vld [vmem:[%s3092_s8] sm:$0x3f] }
  0xce   : > { %806 = vmatpush.bf16.msrb.mxu1 %v791_v19  ;;  %819 = vmatpush.bf16.msrb.mxu2 %v794_v12  ;;  %v361_v19 = vpop.f32.mrf.mxu1 }
  0xd1   : > { %2890 = vmatmul.msk.bf16.vlgmr.msrb.gmra.mxu1 %vm323_vm2, %v3325_v22 }
  0xd2   : > { %2888 = vmatmul.msk.bf16.vlgmr.msrb.gmra.mxu0 %vm323_vm2, %v3330_v23  ;;  %v412_v3 = vpop.f32.mrf.mxu0 }
  0xd3   : > { %v3380_v8 = vadd.f32 %v412_v3, %v359_v52 }
  0xd4   : > { %v1651_v34 = vld.sshfl [vmem:[#allocation1 + $0x8] sm:$0xff pattern:$0x73625140]  ;;  %v3343_v37 = vld.sshfl [vmem:[#allocation1 + $0x10] sm:$0xff pattern:$0x73625140] }
  0xd5   : > { %1657 = vrot.lane.b32.xlu1 %v1651_v34, %s3014_s13  ;;  %v1649_v21 = vld.sshfl [vmem:[#allocation1] sm:$0xff pattern:$0x73625140]  ;;  %v1037_v2 = vpop.permute.xlu2 %1036 }
  0xd6   : > { %1655 = vrot.lane.b32.xlu0 %v1649_v21, %s3014_s13  ;;  %1714 = vst [vmem:[#allocation1] ss:$4 sm:$0xff] %v3133_v25  ;;  %v372_v21 = vpop.f32.mrf.mxu2 }
  0xdb   : > { %v925_v32 = vpop.permute.xlu1 %924  ;;  %v923_v33 = vpop.permute.xlu0 %922  ;;  %2886 = vmatmul.msk.bf16.vlgmr.msra.gmra.mxu2 %vm323_vm2, %v3330_v23  ;;  %2887 = vmatmul.msk.bf16.vlgmr.msra.gmra.mxu3 %vm323_vm2, %v3330_v23 }
  0xdc   : > { %v928_v38 = vsel %vm446_vm3, %v923_v33, %v925_v32  ;;  %906 = vmatpush.bf16.msra.mxu2 %v871_v30  ;;  %v929_v40 = vsel %vm446_vm3, %v925_v32, %v927_v16 }
  0xdd   : > { %v931_v15 = vand.u32 %v928_v38, %v3139_v31  ;;  %v934_v46 = vand.u32 %v929_v40, %v3139_v31  ;;  %1591 = vrot.lane.b32.xlu1 %v1585_v26, %s3013_s9  ;;  %v1719_v4 = vld.sshfl [vmem:[#allocation1 + $0x10] sm:$0xff pattern:$0x73625140]  ;;  %v1717_v50 = vld.sshfl [vmem:[#allocation1 + $0x8] sm:$0xff pattern:$0x73625140]  ;;  %v425_v40 = vpop.f32.mrf.mxu1 }
  0xde   : > { %1589 = vrot.lane.b32.xlu0 %v1583_v24, %s3013_s9  ;;  %v1715_v11 = vld.sshfl [vmem:[#allocation1] sm:$0xff pattern:$0x73625140]  ;;  %v414_v24 = vpop.f32.mrf.mxu0 }
  0xdf   : > { %946 = vmatpush.bf16.msra.mxu3 %v931_v15  ;;  %1721 = vrot.lane.b32.xlu2 %v1715_v11, %s3014_s13  ;;  %1780 = vst [vmem:[#allocation1] ss:$4 sm:$0xff] %v3145_v35  ;;  %v399_v15 = vpop.f32.mrf.mxu3 }
  0xe0   : > { %v3408_v16 = vadd.f32 %v399_v15, %v3347_v39  ;;  %v374_v39 = vpop.f32.mrf.mxu2 }
  0xe3   : > { %v855_v20 = vpop.permute.xlu1 %854  ;;  %v853_v41 = vpop.permute.xlu0 %852 }
  0xe4   : > { %v859_v43 = vsel %vm858_vm5, %v853_v41, %v855_v20  ;;  %v860_v45 = vsel %vm858_vm5, %v855_v20, %v857_v28  ;;  %v1099_v28 = vand.u32 %v3199_v57, %v3139_v31  ;;  %v3412_v20 = vld [vmem:[%s3103_s12] sm:$0x3f]  ;;  %v426_v41 = vadd.f32 %v425_v40, %v372_v21 }
  0xe5   : > { %v865_v49 = vand.u32 %v859_v43, %v3139_v31  ;;  %v868_v53 = vand.u32 %v860_v45, %v3139_v31  ;;  %1725 = vrot.lane.b32.xlu1 %v1719_v4, %s3014_s13 }
  0xe6   : > { %1723 = vrot.lane.b32.xlu0 %v1717_v50, %s3014_s13  ;;  %v1785_v32 = vld.sshfl [vmem:[#allocation1 + $0x10] sm:$0xff pattern:$0x73625140]  ;;  %v1781_v33 = vld.sshfl [vmem:[#allocation1] sm:$0xff pattern:$0x73625140]  ;;  %v1103_v50 = vand.u32 %v3203_v59, %v3139_v31 }
  0xe7   : > { %880 = vmatpush.bf16.msra.mxu0 %v865_v49  ;;  %893 = vmatpush.bf16.msra.mxu1 %v868_v53  ;;  %v1783_v38 = vld.sshfl [vmem:[#allocation1 + $0x8] sm:$0xff pattern:$0x73625140]  ;;  %v401_v48 = vpop.f32.mrf.mxu3 }
  0xe8   : > { %1659 = vrot.lane.b32.xlu2 %v3343_v37, %s3014_s13  ;;  %1848 = vst [vmem:[#allocation1] ss:$4 sm:$0xff] %v1846_v27  ;;  %v1101_v37 = vand.u32 %v3201_v58, %v3139_v31 }
  0xea   : > { %2894 = vmatmul.msk.bf16.vlgmr.msra.gmra.mxu0 %vm323_vm2, %v3364_v56  ;;  %2895 = vmatmul.msk.bf16.vlgmr.msra.gmra.mxu1 %vm323_vm2, %v3364_v56 }
  0xeb   : > { %959 = vmatpush.bf16.msrb.mxu0 %v934_v46  ;;  %972 = vmatpush.bf16.msrb.mxu1 %v937_v47 }
  0xec   : > { %2891 = vmatmul.msk.bf16.vlgmr.msrb.gmra.mxu2 %vm323_vm2, %v3325_v22  ;;  %2892 = vmatmul.msk.bf16.vlgmr.msrb.gmra.mxu3 %vm323_vm2, %v3325_v22 }
  0xed   : > { %995 = vmatpush.bf16.msrb.mxu2 %v982_v62  ;;  %1008 = vmatpush.bf16.msrb.mxu3 %v984_v0  ;;  %v1039_v7 = vpop.permute.xlu0 %1038  ;;  %v427_v62 = vpop.f32.mrf.mxu1 }
  0xee   : > { %v1042_v51 = vsel %vm446_vm3, %v1037_v2, %v1039_v7  ;;  %v1041_v12 = vpop.permute.xlu1 %1040  ;;  %1791 = vrot.lane.b32.xlu1 %v1785_v32, %s3016_s18  ;;  %1789 = vrot.lane.b32.xlu0 %v1783_v38, %s3016_s18  ;;  %v3420_v2 = vld [vmem:[%s3092_s8] sm:$0x3f] }
  0xef   : > { %1021 = vmatpush.bf16.msra.mxu0 %v986_v61  ;;  %v1045_v9 = vand.u32 %v1042_v51, %v3139_v31  ;;  %v1043_v26 = vsel %vm446_vm3, %v1039_v7, %v1041_v12  ;;  %v1051_v30 = vand.u32 %v1041_v12, %v3139_v31  ;;  %v1849_v43 = vld.sshfl [vmem:[#allocation1] sm:$0xff pattern:$0x73625140]  ;;  %v1851_v45 = vld.sshfl [vmem:[#allocation1 + $0x8] sm:$0xff pattern:$0x73625140] }
  0xf0   : > { %v1048_v34 = vand.u32 %v1043_v26, %v3139_v31  ;;  %1787 = vrot.lane.b32.xlu2 %v1781_v33, %s3016_s18  ;;  %v1853_v46 = vld.sshfl [vmem:[#allocation1 + $0x10] sm:$0xff pattern:$0x73625140] }
  0xf1   : > { %1060 = vmatpush.bf16.msra.mxu1 %v1045_v9  ;;  %v1223_v57 = vpop.permute.xlu2 %1222  ;;  %1916 = vst [vmem:[#allocation1] ss:$4 sm:$0xff] %v3412_v20 }
  0xf5   : > { %v529_v59 = vpop.f32.mrf.mxu1 }
  0xf8   : > { %1859 = vrot.lane.b32.xlu2 %v1853_v46, %s3014_s13  ;;  %v1919_v4 = vld.sshfl [vmem:[#allocation1 + $0x8] sm:$0xff pattern:$0x73625140]  ;;  %v3429_v7 = vld.sshfl [vmem:[#allocation1 + $0x10] sm:$0xff pattern:$0x73625140] }
  0xf9   : > { %v1917_v51 = vld.sshfl [vmem:[#allocation1] sm:$0xff pattern:$0x73625140]  ;;  %1925 = vrot.lane.b32.xlu1 %v1919_v4, %s3014_s13 }
  0xfa   : > { %2898 = vmatmul.msk.bf16.vlgmr.msrb.gmra.mxu0 %vm323_vm2, %v3150_v36  ;;  %2899 = vmatmul.msk.bf16.vlgmr.msrb.gmra.mxu1 %vm323_vm2, %v3150_v36  ;;  %v1159_v47 = vpop.permute.xlu2 %1158  ;;  %1984 = vst [vmem:[#allocation1] ss:$4 sm:$0xff] %v3420_v2 }
  0xfb   : > { %1112 = vmatpush.bf16.msrb.mxu0 %v1099_v28  ;;  %1125 = vmatpush.bf16.msrb.mxu1 %v1101_v37  ;;  %v1169_v3 = vand.u32 %v1159_v47, %v3139_v31 }
  0xfc   : > { %2896 = vmatmul.msk.bf16.vlgmr.msra.gmra.mxu2 %vm323_vm2, %v3364_v56  ;;  %2897 = vmatmul.msk.bf16.vlgmr.msra.gmra.mxu3 %vm323_vm2, %v3150_v36 }
  0xfd   : > { %1086 = vmatpush.bf16.msra.mxu3 %v1051_v30  ;;  %1073 = vmatpush.bf16.msra.mxu2 %v1048_v34  ;;  %v531_v24 = vpop.f32.mrf.mxu1 }
  0xfe   : > { %1923 = vrot.lane.b32.xlu0 %v1917_v51, %s3014_s13 }
  0xff   : > { %v1157_v58 = vpop.permute.xlu1 %1156 }
 0x100   : > { %v1155_v49 = vpop.permute.xlu0 %1154  ;;  %v1161_v53 = vsel %vm446_vm3, %v1157_v58, %v1159_v47 }
 0x101   : > { %v1160_v61 = vsel %vm446_vm3, %v1155_v49, %v1157_v58  ;;  %v1166_v0 = vand.u32 %v1161_v53, %v3139_v31  ;;  %1857 = vrot.lane.b32.xlu1 %v1851_v45, %s3014_s13  ;;  %v1985_v49 = vld.sshfl [vmem:[#allocation1] sm:$0xff pattern:$0x73625140]  ;;  %v1989_v53 = vld.sshfl [vmem:[#allocation1 + $0x10] sm:$0xff pattern:$0x73625140] }
 0x102   : > { %v1163_v52 = vand.u32 %v1160_v61, %v3139_v31  ;;  %1991 = vrot.lane.b32.xlu2 %v1985_v49, %s3016_s18 }
 0x103   : > { %v1289_v33 = vpop.permute.xlu2 %1288 }
 0x105   : > { %v3457_v21 = vpop.f32.mrf.mxu1 }
 0x106   : > { %1855 = vrot.lane.b32.xlu0 %v1849_v43, %s3014_s13 }
 0x108   : > { %v1227_v9 = vpop.permute.xlu1 %1226  ;;  %v1225_v11 = vpop.permute.xlu0 %1224 }
 0x109   : > { %v1228_v12 = vsel %vm446_vm3, %v1223_v57, %v1225_v11  ;;  %v1229_v19 = vsel %vm446_vm3, %v1225_v11, %v1227_v9  ;;  %v1237_v26 = vand.u32 %v1227_v9, %v3139_v31  ;;  %1995 = vrot.lane.b32.xlu1 %v1989_v53, %s3016_s18  ;;  %v1987_v9 = vld.sshfl [vmem:[#allocation1 + $0x8] sm:$0xff pattern:$0x73625140]  ;;  %v1490_v53 = vand.u32 %v3294_v55, %v3139_v31 }
 0x10a   : > { %2902 = vmatmul.msk.bf16.vlgmr.msra.gmra.mxu0 %vm323_vm2, %v3167_v42  ;;  %2903 = vmatmul.msk.bf16.vlgmr.msra.gmra.mxu1 %vm323_vm2, %v3233_v14  ;;  %v1231_v27 = vand.u32 %v1228_v12, %v3139_v31  ;;  %v1234_v28 = vand.u32 %v1229_v19, %v3139_v31  ;;  %2053 = vst [vmem:[#allocation1] ss:$4 sm:$0xff] %v3117_v17 }
 0x10b   : > { %1191 = vmatpush.bf16.msra.mxu0 %v1166_v0  ;;  %1204 = vmatpush.bf16.msra.mxu1 %v1169_v3 }
 0x10c   : > { %2900 = vmatmul.msk.bf16.vlgmr.msrb.gmra.mxu2 %vm323_vm2, %v3167_v42  ;;  %2901 = vmatmul.msk.bf16.vlgmr.msrb.gmra.mxu3 %vm323_vm2, %v3167_v42  ;;  %v1359_v39 = vpop.permute.xlu2 %1358 }
 0x10d   : > { %1138 = vmatpush.bf16.msrb.mxu2 %v1103_v50  ;;  %1178 = vmatpush.bf16.msrb.mxu3 %v1163_v52  ;;  %v603_v46 = vpop.f32.mrf.mxu1  ;;  %v1369_v17 = vand.u32 %v1359_v39, %v3139_v31 }
 0x10e   : > { %1993 = vrot.lane.b32.xlu0 %v1987_v9, %s3016_s18  ;;  %1927 = vrot.lane.b32.xlu2 %v3429_v7, %s3014_s13  ;;  %v1537_v9 = vand.u32 %v3306_v5, %v3139_v31 }
 0x111   : > { %v1293_v30 = vpop.permute.xlu1 %1292  ;;  %v2058_v7 = vld.sshfl [vmem:[#allocation1 + $0x10] sm:$0xff pattern:$0x73625140] }
 0x112   : > { %v1291_v32 = vpop.permute.xlu0 %1290  ;;  %v1303_v58 = vand.u32 %v1293_v30, %v3139_v31  ;;  %2064 = vrot.lane.b32.xlu1 %v2058_v7, %s3013_s9 }
 0x113   : > { %v1294_v34 = vsel %vm711_vm4, %v1289_v33, %v1291_v32  ;;  %v1295_v43 = vsel %vm711_vm4, %v1291_v32, %v1293_v30  ;;  %v2056_v33 = vld.sshfl [vmem:[#allocation1 + $0x8] sm:$0xff pattern:$0x73625140] }
 0x114   : > { %v1297_v38 = vand.u32 %v1294_v34, %v3139_v31  ;;  %v1300_v47 = vand.u32 %v1295_v43, %v3139_v31  ;;  %v1427_v12 = vpop.permute.xlu2 %1426  ;;  %v2054_v34 = vld.sshfl [vmem:[#allocation1] sm:$0xff pattern:$0x73625140] }
 0x115   : > { %2116 = vst [vmem:[#allocation1] ss:$4 sm:$0xff] %v3106_v13 }
 0x116   : > { %2062 = vrot.lane.b32.xlu0 %v2056_v33, %s3013_s9  ;;  %2060 = vrot.lane.b32.xlu2 %v2054_v34, %s3013_s9  ;;  %v1541_v33 = vand.u32 %v3311_v10, %v3139_v31 }
 0x11a   : > { %2906 = vmatmul.msk.bf16.vlgmr.msrb.gmra.mxu0 %vm323_vm2, %v3217_v1  ;;  %2907 = vmatmul.msk.bf16.vlgmr.msrb.gmra.mxu1 %vm323_vm2, %v3217_v1 }
 0x11b   : > { %1272 = vmatpush.bf16.msrb.mxu0 %v1237_v26  ;;  %1312 = vmatpush.bf16.msrb.mxu1 %v1297_v38 }
 0x11c   : > { %2904 = vmatmul.msk.bf16.vlgmr.msra.gmra.mxu2 %vm323_vm2, %v3233_v14  ;;  %2905 = vmatmul.msk.bf16.vlgmr.msra.gmra.mxu3 %vm323_vm2, %v3233_v14  ;;  %v3510_v13 = vld.sshfl [vmem:[#allocation1 + $0x8] sm:$0xff pattern:$0x73625140] }
 0x11d   : > { %1246 = vmatpush.bf16.msra.mxu2 %v1231_v27  ;;  %1259 = vmatpush.bf16.msra.mxu3 %v1234_v28 }
 0x11f   : > { %v496_v57 = vpop.f32.mrf.mxu0 }
 0x120   : > { %v3459_v15 = vadd.f32 %v496_v57, %v426_v41 }
 0x123   : > { %v1425_v37 = vpop.permute.xlu1 %1424  ;;  %v1423_v40 = vpop.permute.xlu0 %1422 }
 0x124   : > { %v1428_v26 = vsel %vm858_vm5, %v1423_v40, %v1425_v37  ;;  %v1429_v27 = vsel %vm858_vm5, %v1425_v37, %v1427_v12 }
 0x125   : > { %v1431_v30 = vand.u32 %v1428_v26, %v3139_v31  ;;  %v1434_v32 = vand.u32 %v1429_v27, %v3139_v31 }
 0x127   : > { %v498_v45 = vpop.f32.mrf.mxu0 }
 0x12a   : > { %2910 = vmatmul.msk.bf16.vlgmr.msra.gmra.mxu0 %vm323_vm2, %v3241_v18  ;;  %2911 = vmatmul.msk.bf16.vlgmr.msra.gmra.mxu1 %vm323_vm2, %v3241_v18 }
 0x12b   : > { %v1357_v41 = vpop.permute.xlu1 %1356  ;;  %v1355_v48 = vpop.permute.xlu0 %1354 }
 0x12c   : > { %2908 = vmatmul.msk.bf16.vlgmr.msrb.gmra.mxu2 %vm323_vm2, %v3217_v1  ;;  %2909 = vmatmul.msk.bf16.vlgmr.msrb.gmra.mxu3 %vm323_vm2, %v3241_v18  ;;  %v1360_v61 = vsel %vm858_vm5, %v1355_v48, %v1357_v41  ;;  %v1361_v62 = vsel %vm858_vm5, %v1357_v41, %v1359_v39  ;;  %v3512_v39 = vld.sshfl [vmem:[#allocation1 + $0x10] sm:$0xff pattern:$0x73625140] }
 0x12d   : > { %1338 = vmatpush.bf16.msrb.mxu3 %v1303_v58  ;;  %1325 = vmatpush.bf16.msrb.mxu2 %v1300_v47  ;;  %v1363_v0 = vand.u32 %v1360_v61, %v3139_v31  ;;  %v1366_v52 = vand.u32 %v1361_v62, %v3139_v31  ;;  %v3508_v47 = vld.sshfl [vmem:[#allocation1] sm:$0xff pattern:$0x73625140] }
 0x12e   : > { %v470_v3 = vpop.f32.mrf.mxu2  ;;  %v483_v18 = vpop.f32.mrf.mxu3  ;;  %2165 = vst [vmem:[#allocation1] ss:$4 sm:$0xff] %v3207_v60 }
 0x12f   : > { %v500_v4 = vadd.f32 %v470_v3, %v3408_v16  ;;  %v501_v50 = vadd.f32 %v483_v18, %v3380_v8  ;;  %v588_v51 = vpop.f32.mrf.mxu0  ;;  %1378 = vmatpush.bf16.msra.mxu0 %v1363_v0  ;;  %1391 = vmatpush.bf16.msra.mxu1 %v1366_v52 }
 0x131   : > { %v559_v11 = vadd.f32 %v529_v59, %v500_v4  ;;  %v1437_v59 = vand.u32 %v1427_v12, %v3139_v31 }
 0x133   : > { %v618_v19 = vadd.f32 %v588_v51, %v559_v11  ;;  %v3533_v51 = vpop.permute.xlu2 %1593 }
 0x134   : > { %v3482_v24 = vpop.f32.mrf.mxu1 }
 0x135   : > { %v2168_v60 = vld.sshfl [vmem:[#allocation1 + $0x8] sm:$0xff pattern:$0x73625140]  ;;  %v2166_v61 = vld.sshfl [vmem:[#allocation1] sm:$0xff pattern:$0x73625140] }
 0x136   : > { %v472_v8 = vpop.f32.mrf.mxu2  ;;  %v485_v16 = vpop.f32.mrf.mxu3  ;;  %2174 = vrot.lane.b32.xlu1 %v2168_v60, %s3013_s9  ;;  %2172 = vrot.lane.b32.xlu0 %v2166_v61, %s3013_s9  ;;  %v1604_v61 = vand.u32 %v3533_v51, %v3139_v31 }
 0x137   : > { %v590_v28 = vpop.f32.mrf.mxu0 }
 0x13a   : > { %2914 = vmatmul.msk.bf16.vlgmr.msrb.gmra.mxu0 %vm323_vm2, %v3278_v44  ;;  %2915 = vmatmul.msk.bf16.vlgmr.msrb.gmra.mxu1 %vm323_vm2, %v3330_v23 }
 0x13b   : > { %1459 = vmatpush.bf16.msrb.mxu0 %v1434_v32  ;;  %1472 = vmatpush.bf16.msrb.mxu1 %v1437_v59  ;;  %v3552_v59 = vpop.permute.xlu2 %1721 }
 0x13c   : > { %2912 = vmatmul.msk.bf16.vlgmr.msra.gmra.mxu2 %vm323_vm2, %v3278_v44  ;;  %2913 = vmatmul.msk.bf16.vlgmr.msra.gmra.mxu3 %vm323_vm2, %v3278_v44  ;;  %v689_v38 = vpop.f32.mrf.mxu1 }
 0x13d   : > { %1446 = vmatpush.bf16.msra.mxu3 %v1431_v30  ;;  %1404 = vmatpush.bf16.msra.mxu2 %v1369_v17 }
 0x13e   : > { %v542_v57 = vpop.f32.mrf.mxu2  ;;  %v555_v37 = vpop.f32.mrf.mxu3 }
 0x13f   : > { %v560_v40 = vadd.f32 %v542_v57, %v501_v50  ;;  %v561_v43 = vadd.f32 %v555_v37, %v3459_v15  ;;  %v674_v45 = vpop.f32.mrf.mxu0  ;;  %v1492_v15 = vand.u32 %v3299_v63, %v3139_v31  ;;  %v2170_v63 = vld.sshfl [vmem:[#allocation1 + $0x10] sm:$0xff pattern:$0x73625140] }
 0x140   : > { %2231 = vst [vmem:[#allocation1] ss:$4 sm:$0xff] %v3133_v25 }
 0x141   : > { %v619_v46 = vadd.f32 %v3457_v21, %v560_v40  ;;  %v1488_v21 = vand.u32 %v3292_v54, %v3139_v31 }
 0x143   : > { %v3506_v58 = vadd.f32 %v674_v45, %v619_v46 }
 0x146   : > { %v544_v41 = vpop.f32.mrf.mxu2  ;;  %v557_v48 = vpop.f32.mrf.mxu3 }
 0x147   : > { %v676_v49 = vpop.f32.mrf.mxu0  ;;  %v1658_v18 = vpop.permute.xlu1 %1657  ;;  %v2236_v12 = vld.sshfl [vmem:[#allocation1 + $0x10] sm:$0xff pattern:$0x73625140]  ;;  %v2234_v26 = vld.sshfl [vmem:[#allocation1 + $0x8] sm:$0xff pattern:$0x73625140] }
 0x148   : > { %v1656_v4 = vpop.permute.xlu0 %1655  ;;  %2242 = vrot.lane.b32.xlu1 %v2236_v12, %s3014_s13  ;;  %2240 = vrot.lane.b32.xlu0 %v2234_v26, %s3014_s13 }
 0x149   : > { %v1661_v45 = vsel %vm711_vm4, %v1656_v4, %v1658_v18 }
 0x14a   : > { %2918 = vmatmul.msk.bf16.vlgmr.msra.gmra.mxu0 %vm323_vm2, %v3325_v22  ;;  %2919 = vmatmul.msk.bf16.vlgmr.msra.gmra.mxu1 %vm323_vm2, %v3325_v22  ;;  %v1664_v60 = vand.u32 %v1661_v45, %v3139_v31 }
 0x14b   : > { %1527 = vmatpush.bf16.msra.mxu0 %v1492_v15  ;;  %1550 = vmatpush.bf16.msra.mxu1 %v1537_v9 }
 0x14c   : > { %2916 = vmatmul.msk.bf16.vlgmr.msrb.gmra.mxu2 %vm323_vm2, %v3330_v23  ;;  %2917 = vmatmul.msk.bf16.vlgmr.msrb.gmra.mxu3 %vm323_vm2, %v3330_v23 }
 0x14d   : > { %1501 = vmatpush.bf16.msrb.mxu2 %v1488_v21  ;;  %1514 = vmatpush.bf16.msrb.mxu3 %v1490_v53 }
 0x14e   : > { %v614_v62 = vpop.f32.mrf.mxu2  ;;  %v661_v0 = vpop.f32.mrf.mxu3 }
 0x14f   : > { %v620_v54 = vadd.f32 %v614_v62, %v561_v43  ;;  %v691_v55 = vadd.f32 %v661_v0, %v618_v19  ;;  %v761_v52 = vpop.f32.mrf.mxu0  ;;  %v808_v3 = vpop.f32.mrf.mxu1  ;;  %v2232_v19 = vld.sshfl [vmem:[#allocation1] sm:$0xff pattern:$0x73625140] }
 0x150   : > { %2238 = vrot.lane.b32.xlu2 %v2232_v19, %s3014_s13  ;;  %2297 = vst [vmem:[#allocation1] ss:$4 sm:$0xff] %v3145_v35  ;;  %v1590_v5 = vpop.permute.xlu0 %1589  ;;  %v1539_v35 = vand.u32 %v3308_v6, %v3139_v31  ;;  %v1660_v43 = vpop.permute.xlu2 %1659 }
 0x151   : > { %v693_v50 = vadd.f32 %v3482_v24, %v620_v54  ;;  %v1592_v24 = vpop.permute.xlu1 %1591  ;;  %v1662_v46 = vsel %vm711_vm4, %v1658_v18, %v1660_v43  ;;  %v1670_v62 = vand.u32 %v1660_v43, %v3139_v31 }
 0x152   : > { %v1596_v28 = vsel %vm446_vm3, %v1592_v24, %v3533_v51  ;;  %v1595_v30 = vsel %vm446_vm3, %v1590_v5, %v1592_v24 }
 0x153   : > { %v3537_v11 = vadd.f32 %v761_v52, %v693_v50  ;;  %v1601_v32 = vand.u32 %v1596_v28, %v3139_v31  ;;  %v1598_v17 = vand.u32 %v1595_v30, %v3139_v31  ;;  %v3609_v28 = vld [vmem:[%s3918_s4] sm:$0x7] }
 0x156   : > { %v616_v27 = vpop.f32.mrf.mxu2  ;;  %v663_v25 = vpop.f32.mrf.mxu3 }
 0x157   : > { %v763_v8 = vpop.f32.mrf.mxu0  ;;  %v810_v16 = vpop.f32.mrf.mxu1  ;;  %v2302_v38 = vld.sshfl [vmem:[#allocation1 + $0x10] sm:$0xff pattern:$0x73625140]  ;;  %v2298_v57 = vld.sshfl [vmem:[#allocation1] sm:$0xff pattern:$0x73625140] }
 0x158   : > { %2308 = vrot.lane.b32.xlu1 %v2302_v38, %s3016_s18  ;;  %v2300_v40 = vld.sshfl [vmem:[#allocation1 + $0x8] sm:$0xff pattern:$0x73625140]  ;;  %2176 = vrot.lane.b32.xlu2 %v2170_v63, %s3013_s9  ;;  %v1724_v54 = vpop.permute.xlu0 %1723  ;;  %s311_s9 = scalar_lea.vmem %s3920_s6, %s2981_s11 }
 0x159   : > { %2306 = vrot.lane.b32.xlu0 %v2300_v40, %s3016_s18  ;;  %2363 = vst [vmem:[#allocation1] ss:$4 sm:$0xff] %v3255_v29  ;;  %v1667_v29 = vand.u32 %v1662_v46, %v3139_v31  ;;  %v1726_v0 = vpop.permute.xlu1 %1725 }
 0x15a   : > { %2922 = vmatmul.msk.bf16.vlgmr.msrb.gmra.mxu0 %vm323_vm2, %v3364_v56  ;;  %2923 = vmatmul.msk.bf16.vlgmr.msrb.gmra.mxu1 %vm323_vm2, %v3364_v56  ;;  %v1728_v25 = vsel %vm711_vm4, %v1724_v54, %v1726_v0  ;;  %v1736_v16 = vand.u32 %v1726_v0, %v3139_v31 }
 0x15b   : > { %1613 = vmatpush.bf16.msrb.mxu0 %v1598_v17  ;;  %1626 = vmatpush.bf16.msrb.mxu1 %v1601_v32  ;;  %v1733_v5 = vand.u32 %v1728_v25, %v3139_v31 }
 0x15c   : > { %2920 = vmatmul.msk.bf16.vlgmr.msra.gmra.mxu2 %vm323_vm2, %v3325_v22  ;;  %2921 = vmatmul.msk.bf16.vlgmr.msra.gmra.mxu3 %vm323_vm2, %v3364_v56 }
 0x15d   : > { %1563 = vmatpush.bf16.msra.mxu2 %v1539_v35  ;;  %1576 = vmatpush.bf16.msra.mxu3 %v1541_v33 }
 0x15e   : > { %v735_v34 = vpop.f32.mrf.mxu2  ;;  %v748_v7 = vpop.f32.mrf.mxu3 }
 0x15f   : > { %v765_v37 = vadd.f32 %v735_v34, %v691_v55  ;;  %v766_v6 = vadd.f32 %v748_v7, %v3506_v58 }
 0x160   : > { %v2364_v58 = vld.sshfl [vmem:[#allocation1] sm:$0xff pattern:$0x73625140]  ;;  %v2366_v21 = vld.sshfl [vmem:[#allocation1 + $0x8] sm:$0xff pattern:$0x73625140]  ;;  %2304 = vrot.lane.b32.xlu2 %v2298_v57, %s3016_s18  ;;  %v1790_v12 = vpop.permute.xlu0 %1789 }
 0x161   : > { %v838_v10 = vadd.f32 %v808_v3, %v765_v37  ;;  %v2368_v63 = vld.sshfl [vmem:[#allocation1 + $0x10] sm:$0xff pattern:$0x73625140]  ;;  %v1792_v9 = vpop.permute.xlu1 %1791 }
 0x162   : > { %2429 = vst [vmem:[#allocation1] ss:$4 sm:$0xff] %v3412_v20  ;;  %v1794_v40 = vsel %vm858_vm5, %v1790_v12, %v1792_v9  ;;  %v1802_v46 = vand.u32 %v1792_v9, %v3139_v31 }
 0x166   : > { %v737_v41 = vpop.f32.mrf.mxu2  ;;  %v750_v48 = vpop.f32.mrf.mxu3 }
 0x167   : > { %v882_v49 = vpop.f32.mrf.mxu0  ;;  %v895_v15 = vpop.f32.mrf.mxu1 }
 0x168   : > { %v3570_v53 = vadd.f32 %v882_v49, %v838_v10  ;;  %2374 = vrot.lane.b32.xlu2 %v2368_v63, %s3016_s18  ;;  %v1799_v49 = vand.u32 %v1794_v40, %v3139_v31 }
 0x169   : > { %v2432_v50 = vld.sshfl [vmem:[#allocation1 + $0x8] sm:$0xff pattern:$0x73625140] }
 0x16a   : > { %2926 = vmatmul.msk.bf16.vlgmr.msra.gmra.mxu0 %vm323_vm2, %v3150_v36  ;;  %2927 = vmatmul.msk.bf16.vlgmr.msra.gmra.mxu1 %vm323_vm2, %v3167_v42  ;;  %v3588_v42 = vld.sshfl [vmem:[#allocation1 + $0x10] sm:$0xff pattern:$0x73625140] }
 0x16b   : > { %1692 = vmatpush.bf16.msra.mxu0 %v1667_v29  ;;  %1705 = vmatpush.bf16.msra.mxu1 %v1670_v62  ;;  %v1926_v7 = vpop.permute.xlu1 %1925  ;;  %v2561_v29 = vld [vmem:[%s3103_s12] sm:$0x3f] }
 0x16c   : > { %2924 = vmatmul.msk.bf16.vlgmr.msrb.gmra.mxu2 %vm323_vm2, %v3150_v36  ;;  %2925 = vmatmul.msk.bf16.vlgmr.msrb.gmra.mxu3 %vm323_vm2, %v3150_v36  ;;  %v2430_v36 = vld.sshfl [vmem:[#allocation1] sm:$0xff pattern:$0x73625140] }
 0x16d   : > { %1679 = vmatpush.bf16.msrb.mxu3 %v1664_v60  ;;  %1639 = vmatpush.bf16.msrb.mxu2 %v1604_v61  ;;  %2495 = vst [vmem:[#allocation1] ss:$4 sm:$0xff] %v3420_v2  ;;  %v1788_v2 = vpop.permute.xlu2 %1787 }
 0x16e   : > { %2438 = vrot.lane.b32.xlu1 %v2432_v50, %s3014_s13  ;;  %2436 = vrot.lane.b32.xlu0 %v2430_v36, %s3014_s13  ;;  %v1793_v30 = vsel %vm858_vm5, %v1788_v2, %v1790_v12 }
 0x16f   : > { %v821_v20 = vpop.f32.mrf.mxu2  ;;  %v834_v55 = vpop.f32.mrf.mxu3  ;;  %v1796_v32 = vand.u32 %v1793_v30, %v3139_v31 }
 0x170   : > { %v884_v52 = vpop.f32.mrf.mxu0  ;;  %v839_v3 = vadd.f32 %v821_v20, %v766_v6  ;;  %v840_v18 = vadd.f32 %v834_v55, %v3537_v11  ;;  %v897_v4 = vpop.f32.mrf.mxu1  ;;  %v1727_v11 = vsel %vm711_vm4, %v3552_v59, %v1724_v54 }
 0x171   : > { %v1730_v24 = vand.u32 %v1727_v11, %v3139_v31  ;;  %v1924_v38 = vpop.permute.xlu0 %1923 }
 0x172   : > { %v3590_v51 = vadd.f32 %v895_v15, %v839_v3  ;;  %v1929_v4 = vsel %vm711_vm4, %v1924_v38, %v1926_v7 }
 0x173   : > { %v1858_v41 = vpop.permute.xlu1 %1857  ;;  %v1932_v11 = vand.u32 %v1929_v4, %v3139_v31 }
 0x174   : > { %v2496_v52 = vld.sshfl [vmem:[#allocation1] sm:$0xff pattern:$0x73625140]  ;;  %v2500_v3 = vld.sshfl [vmem:[#allocation1 + $0x10] sm:$0xff pattern:$0x73625140] }
 0x175   : > { %v1860_v57 = vpop.permute.xlu2 %1859  ;;  %2502 = vrot.lane.b32.xlu2 %v2496_v52, %s3016_s18 }
 0x176   : > { %2372 = vrot.lane.b32.xlu1 %v2366_v21, %s3016_s18  ;;  %2370 = vrot.lane.b32.xlu0 %v2364_v58, %s3016_s18  ;;  %v1862_v15 = vsel %vm711_vm4, %v1858_v41, %v1860_v57 }
 0x177   : > { %v823_v26 = vpop.f32.mrf.mxu2  ;;  %v836_v27 = vpop.f32.mrf.mxu3  ;;  %v1867_v21 = vand.u32 %v1862_v15, %v3139_v31 }
 0x178   : > { %v961_v19 = vpop.f32.mrf.mxu0  ;;  %v974_v8 = vpop.f32.mrf.mxu1 }
 0x179   : > { %v1856_v48 = vpop.permute.xlu0 %1855 }
 0x17a   : > { %2930 = vmatmul.msk.bf16.vlgmr.msrb.gmra.mxu0 %vm323_vm2, %v3233_v14  ;;  %2931 = vmatmul.msk.bf16.vlgmr.msrb.gmra.mxu1 %vm323_vm2, %v3233_v14  ;;  %v1861_v58 = vsel %vm711_vm4, %v1856_v48, %v1858_v41  ;;  %v3676_v48 = vld [vmem:[%s3918_s4 + $0x14] sm:$0x7] }
 0x17b   : > { %1771 = vmatpush.bf16.msrb.mxu0 %v1736_v16  ;;  %1811 = vmatpush.bf16.msrb.mxu1 %v1796_v32  ;;  %v1864_v60 = vand.u32 %v1861_v58, %v3139_v31 }
 0x17c   : > { %2928 = vmatmul.msk.bf16.vlgmr.msra.gmra.mxu2 %vm323_vm2, %v3609_v28  ;;  %2929 = vmatmul.msk.bf16.vlgmr.msra.gmra.mxu3 %vm323_vm2, %v3609_v28 }
 0x17d   : > { %1745 = vmatpush.bf16.msra.mxu2 %v1730_v24  ;;  %1758 = vmatpush.bf16.msra.mxu3 %v1733_v5  ;;  %v1992_v63 = vpop.permute.xlu2 %1991 }
 0x17e   : > { %2506 = vrot.lane.b32.xlu1 %v2500_v3, %s3016_s18  ;;  %2440 = vrot.lane.b32.xlu2 %v3588_v42, %s3014_s13 }
 0x17f   : > { %v908_v17 = vpop.f32.mrf.mxu2  ;;  %v948_v59 = vpop.f32.mrf.mxu3 }
 0x180   : > { %v963_v35 = vpop.f32.mrf.mxu0  ;;  %v3618_v33 = vadd.f32 %v908_v17, %v840_v18  ;;  %v976_v34 = vpop.f32.mrf.mxu1 }
 0x181   : > { %v1994_v34 = vpop.permute.xlu0 %1993 }
 0x182   : > { %v1997_v38 = vsel %vm858_vm5, %v1992_v63, %v1994_v34 }
 0x187   : > { %v910_v37 = vpop.f32.mrf.mxu2  ;;  %v950_v6 = vpop.f32.mrf.mxu3 }
 0x188   : > { %v1023_v10 = vpop.f32.mrf.mxu0  ;;  %v1062_v43 = vpop.f32.mrf.mxu1 }
 0x189   : > { %v1024_v45 = vadd.f32 %v1023_v10, %v974_v8  ;;  %v3649_v8 = vld [vmem:[%s3918_s4 + $0x10] sm:$0x7] }
 0x18a   : > { %2934 = vmatmul.msk.bf16.vlgmr.msra.gmra.mxu0 %vm323_vm2, %v3217_v1  ;;  %2935 = vmatmul.msk.bf16.vlgmr.msra.gmra.mxu1 %vm323_vm2, %v3217_v1 }
 0x18b   : > { %1879 = vmatpush.bf16.msra.mxu0 %v1864_v60  ;;  %1892 = vmatpush.bf16.msra.mxu1 %v1867_v21 }
 0x18c   : > { %2932 = vmatmul.msk.bf16.vlgmr.msrb.gmra.mxu2 %vm323_vm2, %v3233_v14  ;;  %2933 = vmatmul.msk.bf16.vlgmr.msrb.gmra.mxu3 %vm323_vm2, %v3217_v1  ;;  %v2498_v14 = vld.sshfl [vmem:[#allocation1 + $0x8] sm:$0xff pattern:$0x73625140]  ;;  %v1928_v1 = vpop.permute.xlu2 %1927 }
 0x18d   : > { %1837 = vmatpush.bf16.msrb.mxu3 %v1802_v46  ;;  %1824 = vmatpush.bf16.msrb.mxu2 %v1799_v49  ;;  %2563 = vst [vmem:[#allocation1] ss:$4 sm:$0xff] %v2561_v29  ;;  %v1930_v50 = vsel %vm711_vm4, %v1926_v7, %v1928_v1  ;;  %v1938_v16 = vand.u32 %v1928_v1, %v3139_v31  ;;  %v1996_v7 = vpop.permute.xlu1 %1995  ;;  %v2063_v29 = vpop.permute.xlu0 %2062 }
 0x18e   : > { %2504 = vrot.lane.b32.xlu0 %v2498_v14, %s3016_s18  ;;  %v1935_v25 = vand.u32 %v1930_v50, %v3139_v31  ;;  %v1998_v6 = vsel %vm858_vm5, %v1994_v34, %v1996_v7  ;;  %v2006_v46 = vand.u32 %v1996_v7, %v3139_v31 }
 0x18f   : > { %v997_v61 = vpop.f32.mrf.mxu2  ;;  %v1010_v62 = vpop.f32.mrf.mxu3  ;;  %v2003_v41 = vand.u32 %v1998_v6, %v3139_v31 }
 0x190   : > { %v1025_v0 = vpop.f32.mrf.mxu0  ;;  %v998_v54 = vadd.f32 %v997_v61, %v948_v59  ;;  %v1011_v20 = vadd.f32 %v1010_v62, %v961_v19  ;;  %v1064_v55 = vpop.f32.mrf.mxu1  ;;  %v1870_v19 = vand.u32 %v1860_v57, %v3139_v31 }
 0x192   : > { %v1092_v18 = vadd.f32 %v1062_v43, %v998_v54 }
 0x194   : > { %v2566_v24 = vld.sshfl [vmem:[#allocation1 + $0x8] sm:$0xff pattern:$0x73625140]  ;;  %v2568_v35 = vld.sshfl [vmem:[#allocation1 + $0x10] sm:$0xff pattern:$0x73625140]  ;;  %v2061_v61 = vpop.permute.xlu2 %2060 }
 0x195   : > { %2574 = vrot.lane.b32.xlu1 %v2568_v35, %s3016_s18  ;;  %v2066_v62 = vsel %vm446_vm3, %v2061_v61, %v2063_v29  ;;  %v2564_v0 = vld.sshfl [vmem:[#allocation1] sm:$0xff pattern:$0x73625140]  ;;  %v2065_v1 = vpop.permute.xlu1 %2064 }
 0x196   : > { %2572 = vrot.lane.b32.xlu0 %v2566_v24, %s3016_s18  ;;  %v2069_v54 = vand.u32 %v2066_v62, %v3139_v31  ;;  %2570 = vrot.lane.b32.xlu2 %v2564_v0, %s3016_s18  ;;  %v2067_v50 = vsel %vm446_vm3, %v2063_v29, %v2065_v1 }
 0x197   : > { %v999_v36 = vpop.f32.mrf.mxu2  ;;  %v1012_v9 = vpop.f32.mrf.mxu3 }
 0x198   : > { %v1114_v12 = vpop.f32.mrf.mxu0  ;;  %v1127_v26 = vpop.f32.mrf.mxu1  ;;  %v2075_v36 = vand.u32 %v2065_v1, %v3139_v31 }
 0x199   : > { %v1144_v27 = vadd.f32 %v1114_v12, %v1092_v18  ;;  %v2120_v18 = vand.u32 %v3508_v47, %v3139_v31  ;;  %v2072_v47 = vand.u32 %v2067_v50, %v3139_v31 }
 0x19a   : > { %2938 = vmatmul.msk.bf16.vlgmr.msrb.gmra.mxu0 %vm323_vm2, %v3649_v8  ;;  %2939 = vmatmul.msk.bf16.vlgmr.msrb.gmra.mxu1 %vm323_vm2, %v3278_v44 }
 0x19b   : > { %1960 = vmatpush.bf16.msrb.mxu0 %v1935_v25  ;;  %1973 = vmatpush.bf16.msrb.mxu1 %v1938_v16 }
 0x19c   : > { %2936 = vmatmul.msk.bf16.vlgmr.msra.gmra.mxu2 %vm323_vm2, %v3649_v8  ;;  %2937 = vmatmul.msk.bf16.vlgmr.msra.gmra.mxu3 %vm323_vm2, %v3649_v8 }
 0x19d   : > { %1947 = vmatpush.bf16.msra.mxu3 %v1932_v11  ;;  %1905 = vmatpush.bf16.msra.mxu2 %v1870_v19 }
 0x19f   : > { %v1075_v42 = vpop.f32.mrf.mxu2  ;;  %v1088_v5 = vpop.f32.mrf.mxu3 }
 0x1a0   : > { %v1116_v2 = vpop.f32.mrf.mxu0  ;;  %v1093_v30 = vadd.f32 %v1075_v42, %v1011_v20  ;;  %v1094_v32 = vadd.f32 %v1088_v5, %v1024_v45  ;;  %v1129_v17 = vpop.f32.mrf.mxu1  ;;  %v2000_v45 = vand.u32 %v1997_v38, %v3139_v31  ;;  %v2124_v38 = vand.u32 %v3512_v39, %v3139_v31 }
 0x1a2   : > { %v1145_v59 = vadd.f32 %v1127_v26, %v1093_v30 }
 0x1a7   : > { %v1077_v57 = vpop.f32.mrf.mxu2  ;;  %v1090_v37 = vpop.f32.mrf.mxu3 }
 0x1a8   : > { %v1193_v40 = vpop.f32.mrf.mxu0  ;;  %v1206_v10 = vpop.f32.mrf.mxu1 }
 0x1a9   : > { %v1211_v43 = vadd.f32 %v1193_v40, %v1145_v59  ;;  %v2173_v24 = vpop.permute.xlu0 %2172 }
 0x1aa   : > { %2942 = vmatmul.msk.bf16.vlgmr.msra.gmra.mxu0 %vm323_vm2, %v3330_v23  ;;  %2943 = vmatmul.msk.bf16.vlgmr.msra.gmra.mxu1 %vm323_vm2, %v3330_v23  ;;  %v2239_v4 = vpop.permute.xlu2 %2238 }
 0x1ab   : > { %2041 = vmatpush.bf16.msra.mxu0 %v2006_v46  ;;  %2084 = vmatpush.bf16.msra.mxu1 %v2069_v54 }
 0x1ac   : > { %2940 = vmatmul.msk.bf16.vlgmr.msrb.gmra.mxu2 %vm323_vm2, %v3278_v44  ;;  %2941 = vmatmul.msk.bf16.vlgmr.msrb.gmra.mxu3 %vm323_vm2, %v3676_v48 }
 0x1ad   : > { %2015 = vmatpush.bf16.msrb.mxu2 %v2000_v45  ;;  %2028 = vmatpush.bf16.msrb.mxu3 %v2003_v41 }
 0x1af   : > { %v1140_v49 = vpop.f32.mrf.mxu2  ;;  %v1180_v15 = vpop.f32.mrf.mxu3 }
 0x1b0   : > { %v1195_v58 = vpop.f32.mrf.mxu0  ;;  %v1146_v21 = vadd.f32 %v1140_v49, %v1094_v32  ;;  %v1210_v60 = vadd.f32 %v1180_v15, %v1144_v27  ;;  %v1208_v63 = vpop.f32.mrf.mxu1 }
 0x1b2   : > { %v1212_v44 = vadd.f32 %v1206_v10, %v1146_v21  ;;  %v2177_v16 = vpop.permute.xlu2 %2176 }
 0x1b3   : > { %v2187_v7 = vand.u32 %v2177_v16, %v3139_v31 }
 0x1b7   : > { %v1142_v20 = vpop.f32.mrf.mxu2  ;;  %v1182_v55 = vpop.f32.mrf.mxu3 }
 0x1b8   : > { %v1274_v52 = vpop.f32.mrf.mxu0  ;;  %v1314_v3 = vpop.f32.mrf.mxu1 }
 0x1b9   : > { %v1280_v14 = vadd.f32 %v1274_v52, %v1212_v44 }
 0x1ba   : > { %2946 = vmatmul.msk.bf16.vlgmr.msrb.gmra.mxu0 %vm323_vm2, %v3325_v22  ;;  %2947 = vmatmul.msk.bf16.vlgmr.msrb.gmra.mxu1 %vm323_vm2, %v3325_v22  ;;  %v2241_v45 = vpop.permute.xlu0 %2240  ;;  %v2305_v54 = vpop.permute.xlu2 %2304 }
 0x1bb   : > { %2133 = vmatpush.bf16.msrb.mxu0 %v2120_v18  ;;  %v2244_v39 = vsel %vm711_vm4, %v2239_v4, %v2241_v45 }
 0x1bc   : > { %2944 = vmatmul.msk.bf16.vlgmr.msra.gmra.mxu2 %vm323_vm2, %v3330_v23  ;;  %2945 = vmatmul.msk.bf16.vlgmr.msra.gmra.mxu3 %vm323_vm2, %v3325_v22  ;;  %v2175_v23 = vpop.permute.xlu1 %2174  ;;  %v2122_v22 = vand.u32 %v3510_v13, %v3139_v31  ;;  %v2999_v13 = vld [vmem:[%s3918_s4 + $0x4] sm:$0x7]  ;;  %v2247_v29 = vand.u32 %v2244_v39, %v3139_v31 }
 0x1bd   : > { %2110 = vmatpush.bf16.msra.mxu3 %v2075_v36  ;;  %2097 = vmatpush.bf16.msra.mxu2 %v2072_v47  ;;  %v2179_v42 = vsel %vm446_vm3, %v2175_v23, %v2177_v16  ;;  %v2178_v30 = vsel %vm446_vm3, %v2173_v24, %v2175_v23  ;;  %v3000_v24 = vld [vmem:[%s3918_s4 + $0x8] sm:$0x7] }
 0x1be   : > { %2146 = vmatpush.bf16.msrb.mxu1 %v2122_v22  ;;  %v2184_v35 = vand.u32 %v2179_v42, %v3139_v31  ;;  %v2181_v34 = vand.u32 %v2178_v30, %v3139_v31 }
 0x1bf   : > { %v1248_v9 = vpop.f32.mrf.mxu2  ;;  %v1261_v12 = vpop.f32.mrf.mxu3 }
 0x1c0   : > { %v1276_v26 = vpop.f32.mrf.mxu0  ;;  %v1278_v27 = vadd.f32 %v1248_v9, %v1210_v60  ;;  %v1279_v11 = vadd.f32 %v1261_v12, %v1211_v43  ;;  %v1316_v25 = vpop.f32.mrf.mxu1 }
 0x1c2   : > { %v1344_v19 = vadd.f32 %v1314_v3, %v1278_v27  ;;  %v2375_v47 = vpop.permute.xlu2 %2374 }
 0x1c3   : > { %v2385_v39 = vand.u32 %v2375_v47, %v3139_v31 }
 0x1c4   : > { %v2243_v57 = vpop.permute.xlu1 %2242 }
 0x1c5   : > { %v2245_v58 = vsel %vm711_vm4, %v2241_v45, %v2243_v57  ;;  %v2253_v63 = vand.u32 %v2243_v57, %v3139_v31 }
 0x1c6   : > { %v2250_v61 = vand.u32 %v2245_v58, %v3139_v31 }
 0x1c7   : > { %v1250_v5 = vpop.f32.mrf.mxu2  ;;  %v1263_v2 = vpop.f32.mrf.mxu3 }
 0x1c8   : > { %v1380_v32 = vpop.f32.mrf.mxu0  ;;  %v1393_v17 = vpop.f32.mrf.mxu1 }
 0x1c9   : > { %v1410_v59 = vadd.f32 %v1380_v32, %v1344_v19 }
 0x1ca   : > { %2950 = vmatmul.msk.bf16.vlgmr.msra.gmra.mxu0 %vm323_vm2, %v3364_v56  ;;  %2951 = vmatmul.msk.bf16.vlgmr.msra.gmra.mxu1 %vm323_vm2, %v2999_v13 }
 0x1cb   : > { %2209 = vmatpush.bf16.msra.mxu0 %v2184_v35  ;;  %2222 = vmatpush.bf16.msra.mxu1 %v2187_v7  ;;  %v2307_v0 = vpop.permute.xlu0 %2306 }
 0x1cc   : > { %2948 = vmatmul.msk.bf16.vlgmr.msrb.gmra.mxu2 %vm323_vm2, %v3364_v56  ;;  %2949 = vmatmul.msk.bf16.vlgmr.msrb.gmra.mxu3 %vm323_vm2, %v3364_v56  ;;  %v2309_v44 = vpop.permute.xlu1 %2308  ;;  %v2310_v20 = vsel %vm858_vm5, %v2305_v54, %v2307_v0 }
 0x1cd   : > { %2159 = vmatpush.bf16.msrb.mxu2 %v2124_v38  ;;  %2196 = vmatpush.bf16.msrb.mxu3 %v2181_v34  ;;  %v2313_v55 = vand.u32 %v2310_v20, %v3139_v31  ;;  %v2311_v26 = vsel %vm858_vm5, %v2307_v0, %v2309_v44  ;;  %v2319_v16 = vand.u32 %v2309_v44, %v3139_v31 }
 0x1ce   : > { %v2316_v22 = vand.u32 %v2311_v26, %v3139_v31 }
 0x1cf   : > { %v1327_v37 = vpop.f32.mrf.mxu2  ;;  %v1340_v6 = vpop.f32.mrf.mxu3 }
 0x1d0   : > { %v1382_v40 = vpop.f32.mrf.mxu0  ;;  %v1345_v10 = vadd.f32 %v1327_v37, %v1279_v11  ;;  %v1346_v43 = vadd.f32 %v1340_v6, %v1280_v14  ;;  %v1395_v46 = vpop.f32.mrf.mxu1 }
 0x1d1   : > { %v2503_v42 = vpop.permute.xlu2 %2502 }
 0x1d2   : > { %v1411_v41 = vadd.f32 %v1393_v17, %v1345_v10 }
 0x1d7   : > { %v1329_v49 = vpop.f32.mrf.mxu2  ;;  %v1342_v15 = vpop.f32.mrf.mxu3 }
 0x1d8   : > { %v1461_v56 = vpop.f32.mrf.mxu0  ;;  %v1474_v21 = vpop.f32.mrf.mxu1  ;;  %v3001_v15 = vld [vmem:[%s3918_s4 + $0xc] sm:$0x7] }
 0x1d9   : > { %v3717_v60 = vadd.f32 %v1461_v56, %v1411_v41  ;;  %v2441_v38 = vpop.permute.xlu2 %2440 }
 0x1da   : > { %2954 = vmatmul.msk.bf16.vlgmr.msrb.gmra.mxu0 %vm323_vm2, %v3609_v28  ;;  %2955 = vmatmul.msk.bf16.vlgmr.msrb.gmra.mxu1 %vm323_vm2, %v3609_v28  ;;  %v2451_v49 = vand.u32 %v2441_v38, %v3139_v31 }
 0x1db   : > { %v1482_v62 = vmax.f32 %v3590_v51, %v3717_v60  ;;  %2288 = vmatpush.bf16.msrb.mxu0 %v2253_v63  ;;  %2328 = vmatpush.bf16.msrb.mxu1 %v2313_v55 }
 0x1dc   : > { %2952 = vmatmul.msk.bf16.vlgmr.msra.gmra.mxu2 %vm323_vm2, %v2999_v13  ;;  %2953 = vmatmul.msk.bf16.vlgmr.msra.gmra.mxu3 %vm323_vm2, %v2999_v13 }
 0x1dd   : > { %2262 = vmatpush.bf16.msra.mxu2 %v2247_v29  ;;  %2275 = vmatpush.bf16.msra.mxu3 %v2250_v61 }
 0x1df   : > { %v1406_v52 = vpop.f32.mrf.mxu2  ;;  %v1448_v3 = vpop.f32.mrf.mxu3 }
 0x1e0   : > { %v1463_v14 = vpop.f32.mrf.mxu0  ;;  %v1412_v18 = vadd.f32 %v1406_v52, %v1346_v43  ;;  %v3732_v1 = vadd.f32 %v1448_v3, %v1410_v59  ;;  %v1476_v4 = vpop.f32.mrf.mxu1 }
 0x1e1   : > { %v2439_v12 = vpop.permute.xlu1 %2438  ;;  %v2437_v27 = vpop.permute.xlu0 %2436 }
 0x1e2   : > { %v1481_v50 = vmax.f32 %v3570_v53, %v3732_v1  ;;  %v3736_v36 = vadd.f32 %v1474_v21, %v1412_v18  ;;  %v2442_v57 = vsel %vm711_vm4, %v2437_v27, %v2439_v12  ;;  %v2443_v37 = vsel %vm711_vm4, %v2439_v12, %v2441_v38 }
 0x1e3   : > { %v2445_v45 = vand.u32 %v2442_v57, %v3139_v31  ;;  %v2448_v41 = vand.u32 %v2443_v37, %v3139_v31 }
 0x1e4   : > { %v1483_v9 = vmax.f32 %v3618_v33, %v3736_v36 }
 0x1e7   : > { %v1408_v11 = vpop.f32.mrf.mxu2  ;;  %v1450_v25 = vpop.f32.mrf.mxu3 }
 0x1e8   : > { %v1529_v19 = vpop.f32.mrf.mxu0  ;;  %v1552_v23 = vpop.f32.mrf.mxu1 }
 0x1e9   : > { %v2373_v5 = vpop.permute.xlu1 %2372  ;;  %v2371_v7 = vpop.permute.xlu0 %2370 }
 0x1ea   : > { %2958 = vmatmul.msk.bf16.vlgmr.msra.gmra.mxu0 %vm323_vm2, %v3000_v24  ;;  %2959 = vmatmul.msk.bf16.vlgmr.msra.gmra.mxu1 %vm323_vm2, %v3000_v24  ;;  %v2377_v2 = vsel %vm858_vm5, %v2373_v5, %v2375_v47  ;;  %v2376_v13 = vsel %vm858_vm5, %v2371_v7, %v2373_v5 }
 0x1eb   : > { %v2382_v30 = vand.u32 %v2377_v2, %v3139_v31 }
 0x1ec   : > { %2956 = vmatmul.msk.bf16.vlgmr.msrb.gmra.mxu2 %vm323_vm2, %v3609_v28  ;;  %2957 = vmatmul.msk.bf16.vlgmr.msrb.gmra.mxu3 %vm323_vm2, %v3000_v24  ;;  %v2379_v28 = vand.u32 %v2376_v13, %v3139_v31  ;;  %v3002_v13 = vld [vmem:[%s3918_s4 + $0x18] sm:$0x7] }
 0x1ed   : > { %2354 = vmatpush.bf16.msrb.mxu3 %v2319_v16  ;;  %2341 = vmatpush.bf16.msrb.mxu2 %v2316_v22 }
 0x1ee   : > { %2407 = vmatpush.bf16.msra.mxu1 %v2382_v30  ;;  %2394 = vmatpush.bf16.msra.mxu0 %v2379_v28 }
 0x1ef   : > { %v1503_v32 = vpop.f32.mrf.mxu2  ;;  %v1516_v17 = vpop.f32.mrf.mxu3 }
 0x1f0   : > { %v1531_v59 = vpop.f32.mrf.mxu0  ;;  %v1553_v35 = vadd.f32 %v1552_v23, %v1503_v32  ;;  %v1554_v34 = vpop.f32.mrf.mxu1 }
 0x1f1   : > { %v2507_v54 = vpop.permute.xlu1 %2506  ;;  %v2571_v24 = vpop.permute.xlu2 %2570 }
 0x1f2   : > { %v2517_v47 = vand.u32 %v2507_v54, %v3139_v31 }
 0x1f7   : > { %v1505_v6 = vpop.f32.mrf.mxu2  ;;  %v1518_v40 = vpop.f32.mrf.mxu3 }
 0x1f8   : > { %v1615_v10 = vpop.f32.mrf.mxu0  ;;  %v1628_v43 = vpop.f32.mrf.mxu1 }
 0x1f9   : > { %v1645_v46 = vadd.f32 %v1615_v10, %v1553_v35 }
 0x1fa   : > { %2962 = vmatmul.msk.bf16.vlgmr.msrb.gmra.mxu0 %vm323_vm2, %v3001_v15  ;;  %2963 = vmatmul.msk.bf16.vlgmr.msrb.gmra.mxu1 %vm323_vm2, %v3649_v8 }
 0x1fb   : > { %2473 = vmatpush.bf16.msrb.mxu0 %v2448_v41  ;;  %2486 = vmatpush.bf16.msrb.mxu1 %v2451_v49 }
 0x1fc   : > { %2960 = vmatmul.msk.bf16.vlgmr.msra.gmra.mxu2 %vm323_vm2, %v3001_v15  ;;  %2961 = vmatmul.msk.bf16.vlgmr.msra.gmra.mxu3 %vm323_vm2, %v3001_v15  ;;  %v3003_v15 = vld [vmem:[%s3918_s4 + $0x1c] sm:$0x7] }
 0x1fd   : > { %2460 = vmatpush.bf16.msra.mxu3 %v2445_v45  ;;  %2420 = vmatpush.bf16.msra.mxu2 %v2385_v39  ;;  %v3017_v45 = vmov 0  }
 0x1fe   : > { %2995 = vset.pattern.permute.xlu0 %v3017_v45 }
 0x1ff   : > { %v1565_v58 = vpop.f32.mrf.mxu2  ;;  %v1578_v56 = vpop.f32.mrf.mxu3 }
 0x200   : > { %v1617_v21 = vpop.f32.mrf.mxu0  ;;  %v1566_v63 = vadd.f32 %v1565_v58, %v1516_v17  ;;  %v1579_v29 = vadd.f32 %v1578_v56, %v1529_v19  ;;  %v1630_v61 = vpop.f32.mrf.mxu1  ;;  %v3004_v58 = vld [vmem:[%s3918_s4 + $0x20] sm:$0x7] }
 0x201   : > { %v2505_v0 = vpop.permute.xlu0 %2504 }
 0x202   : > { %v1646_v44 = vadd.f32 %v1628_v43, %v1566_v63  ;;  %v2508_v20 = vsel %vm858_vm5, %v2503_v42, %v2505_v0  ;;  %v2509_v3 = vsel %vm858_vm5, %v2505_v0, %v2507_v54 }
 0x203   : > { %v2511_v12 = vand.u32 %v2508_v20, %v3139_v31  ;;  %v2514_v26 = vand.u32 %v2509_v3, %v3139_v31 }
 0x207   : > { %v1567_v55 = vpop.f32.mrf.mxu2  ;;  %v1580_v52 = vpop.f32.mrf.mxu3 }
 0x208   : > { %v1694_v14 = vpop.f32.mrf.mxu0  ;;  %v1707_v18 = vpop.f32.mrf.mxu1 }
 0x209   : > { %v1712_v4 = vadd.f32 %v1694_v14, %v1646_v44  ;;  %v2573_v22 = vpop.permute.xlu0 %2572  ;;  %v2575_v35 = vpop.permute.xlu1 %2574 }
 0x20a   : > { %2966 = vmatmul.msk.bf16.vlgmr.msra.gmra.mxu0 %vm323_vm2, %v3676_v48  ;;  %2967 = vmatmul.msk.bf16.vlgmr.msra.gmra.mxu1 %vm323_vm2, %v3676_v48  ;;  %v2576_v5 = vsel %vm858_vm5, %v2571_v24, %v2573_v22  ;;  %v2577_v34 = vsel %vm858_vm5, %v2573_v22, %v2575_v35  ;;  %v2585_v7 = vand.u32 %v2575_v35, %v3139_v31 }
 0x20b   : > { %2552 = vmatpush.bf16.msra.mxu0 %v2517_v47  ;;  %v2579_v2 = vand.u32 %v2576_v5, %v3139_v31  ;;  %v2582_v28 = vand.u32 %v2577_v34, %v3139_v31 }
 0x20c   : > { %2964 = vmatmul.msk.bf16.vlgmr.msrb.gmra.mxu2 %vm323_vm2, %v3649_v8  ;;  %2965 = vmatmul.msk.bf16.vlgmr.msrb.gmra.mxu3 %vm323_vm2, %v3649_v8 }
 0x20d   : > { %2526 = vmatpush.bf16.msrb.mxu2 %v2511_v12  ;;  %2539 = vmatpush.bf16.msrb.mxu3 %v2514_v26 }
 0x20e   : > { %2594 = vmatpush.bf16.msra.mxu1 %v2579_v2 }
 0x20f   : > { %v1641_v27 = vpop.f32.mrf.mxu2  ;;  %v1681_v11 = vpop.f32.mrf.mxu3 }
 0x210   : > { %v1696_v25 = vpop.f32.mrf.mxu0  ;;  %v1647_v19 = vadd.f32 %v1641_v27, %v1579_v29  ;;  %v1711_v23 = vadd.f32 %v1681_v11, %v1645_v46  ;;  %v1709_v16 = vpop.f32.mrf.mxu1  ;;  %v2632_v46 = vld [vmem:[%s3919_s5] sm:$0x3f] }
 0x211   : > { %2635 = vperm.xlu0 %2995, %v2632_v46  }
 0x212   : > { %v1713_v42 = vadd.f32 %v1707_v18, %v1647_v19 }
 0x217   : > { %v1643_v30 = vpop.f32.mrf.mxu2  ;;  %v1683_v32 = vpop.f32.mrf.mxu3 }
 0x218   : > { %v1773_v8 = vpop.f32.mrf.mxu0  ;;  %v1813_v17 = vpop.f32.mrf.mxu1 }
 0x219   : > { %v1779_v59 = vadd.f32 %v1773_v8, %v1713_v42 }
 0x21a   : > { %2970 = vmatmul.msk.bf16.vlgmr.msrb.gmra.mxu0 %vm323_vm2, %v3002_v13  ;;  %2971 = vmatmul.msk.bf16.vlgmr.msrb.gmra.mxu1 %vm323_vm2, %v3002_v13 }
 0x21c   : > { %2968 = vmatmul.msk.bf16.vlgmr.msra.gmra.mxu2 %vm323_vm2, %v3676_v48  ;;  %2969 = vmatmul.msk.bf16.vlgmr.msra.gmra.mxu3 %vm323_vm2, %v3002_v13 }
 0x21d   : > { %2620 = vmatpush.bf16.msra.mxu3 %v2585_v7  ;;  %2607 = vmatpush.bf16.msra.mxu2 %v2582_v28 }
 0x21f   : > { %v1747_v38 = vpop.f32.mrf.mxu2  ;;  %v1760_v57 = vpop.f32.mrf.mxu3 }
 0x220   : > { %v1775_v37 = vpop.f32.mrf.mxu0  ;;  %v1777_v6 = vadd.f32 %v1747_v38, %v1711_v23  ;;  %v1778_v40 = vadd.f32 %v1760_v57, %v1712_v4  ;;  %v1815_v10 = vpop.f32.mrf.mxu1 }
 0x222   : > { %v1843_v43 = vadd.f32 %v1813_v17, %v1777_v6 }
 0x227   : > { %v1749_v31 = vpop.f32.mrf.mxu2  ;;  %v1762_v48 = vpop.f32.mrf.mxu3 }
 0x228   : > { %v1881_v41 = vpop.f32.mrf.mxu0  ;;  %v1894_v39 = vpop.f32.mrf.mxu1 }
 0x229   : > { %v1911_v49 = vadd.f32 %v1881_v41, %v1843_v43 }
 0x22a   : > { %2974 = vmatmul.msk.bf16.vlgmr.msra.gmra.mxu0 %vm323_vm2, %v3003_v15  ;;  %2975 = vmatmul.msk.bf16.vlgmr.msra.gmra.mxu1 %vm323_vm2, %v3004_v58 }
 0x22c   : > { %2972 = vmatmul.msk.bf16.vlgmr.msrb.gmra.mxu2 %vm323_vm2, %v3003_v15  ;;  %2973 = vmatmul.msk.bf16.vlgmr.msrb.gmra.mxu3 %vm323_vm2, %v3003_v15 }
 0x22f   : > { %v1826_v56 = vpop.f32.mrf.mxu2  ;;  %v1839_v21 = vpop.f32.mrf.mxu3 }
 0x230   : > { %v1883_v63 = vpop.f32.mrf.mxu0  ;;  %v1844_v29 = vadd.f32 %v1826_v56, %v1778_v40  ;;  %v1845_v61 = vadd.f32 %v1839_v21, %v1779_v59  ;;  %v1896_v44 = vpop.f32.mrf.mxu1  ;;  %v2644_v56 = vlaneseq }
 0x232   : > { %v1912_v0 = vadd.f32 %v1894_v39, %v1844_v29  ;;  %v3844_v44 = vand.u32 127, %v2644_v56 }
 0x237   : > { %v1828_v54 = vpop.f32.mrf.mxu2  ;;  %v1841_v20 = vpop.f32.mrf.mxu3 }
 0x238   : > { %v1962_v55 = vpop.f32.mrf.mxu0  ;;  %v1975_v52 = vpop.f32.mrf.mxu1 }
 0x239   : > { %v1980_v3 = vadd.f32 %v1962_v55, %v1912_v0  ;;  %v2651_v0 = vand.u32 65535, %v3844_v44 }
 0x23c   : > { %2976 = vmatmul.msk.bf16.vlgmr.msra.gmra.mxu2 %vm323_vm2, %v3004_v58  ;;  %2977 = vmatmul.msk.bf16.vlgmr.msra.gmra.mxu3 %vm323_vm2, %v3004_v58 }
 0x23f   : > { %v1907_v14 = vpop.f32.mrf.mxu2  ;;  %v1949_v18 = vpop.f32.mrf.mxu3 }
 0x240   : > { %v1964_v4 = vpop.f32.mrf.mxu0  ;;  %v1913_v47 = vadd.f32 %v1907_v14, %v1845_v61  ;;  %v1979_v12 = vadd.f32 %v1949_v18, %v1911_v49  ;;  %v1977_v26 = vpop.f32.mrf.mxu1  ;;  %v2655_v14 = vmul.u32 61680, %v2651_v0  ;;  %v3853_v18 = vadd.s32 128, %v3844_v44 }
 0x241   : > { %v3856_v4 = vadd.s32 256, %v3844_v44 }
 0x242   : > { %v1981_v27 = vadd.f32 %v1975_v52, %v1913_v47  ;;  %v2654_v47 = vmul.u32 61681, %v2651_v0  ;;  %v2658_v26 = vshll.u32 %v2655_v14, 16 }
 0x244   : > { %vm2662_vm6 = vc.u32 %v2654_v47, %v2658_v26 }
 0x247   : > { %v1909_v11 = vpop.f32.mrf.mxu2  ;;  %v1951_v25 = vpop.f32.mrf.mxu3 }
 0x248   : > { %v2043_v19 = vpop.f32.mrf.mxu0  ;;  %v2086_v23 = vpop.f32.mrf.mxu1  ;;  %v2709_v11 = vand.u32 65535, %v3856_v4 }
 0x249   : > { %v2049_v16 = vadd.f32 %v2043_v19, %v1981_v27  ;;  %v2680_v27 = vand.u32 65535, %v3853_v18 }
 0x24b   : > { %v3814_v22 = vmax.f32 %v1483_v9, %v2049_v16  ;;  %v2684_v16 = vmul.u32 61680, %v2680_v27 }
 0x24f   : > { %v2017_v24 = vpop.f32.mrf.mxu2  ;;  %v2030_v42 = vpop.f32.mrf.mxu3 }
 0x250   : > { %v2045_v5 = vpop.f32.mrf.mxu0  ;;  %v2047_v2 = vadd.f32 %v2017_v24, %v1979_v12  ;;  %v2048_v30 = vadd.f32 %v2030_v42, %v1980_v3  ;;  %v2088_v32 = vpop.f32.mrf.mxu1  ;;  %v2652_v3 = vshrl.u32 %v3844_v44, 16  ;;  %v2710_v24 = vshrl.u32 %v3856_v4, 16 }
 0x251   : > { %v2713_v32 = vmul.u32 61680, %v2709_v11 }
 0x252   : > { %v3819_v8 = vmax.f32 %v1481_v50, %v2047_v2  ;;  %v3824_v17 = vmax.f32 %v1482_v62, %v2048_v30  ;;  %v3858_v12 = vmul.u32 61681, %v2652_v3  ;;  %v2664_v30 = vadd.s32 %v2658_v26, %v2654_v47 }
 0x253   : > { %v2717_v26 = vshrl.u32 %v2713_v32, 16 }
 0x254   : > { %v2660_v2 = vshll.u32 %v3858_v12, 16 }
 0x256   : > { %vm2666_vm7 = vc.u32 %v2664_v30, %v2660_v2 }
 0x257   : > { %v2019_v59 = vpop.f32.mrf.mxu2  ;;  %v2032_v33 = vpop.f32.mrf.mxu3 }
 0x258   : > { %v2135_v36 = vpop.f32.mrf.mxu0  ;;  %v2148_v9 = vpop.f32.mrf.mxu1  ;;  %v2657_v59 = vmul.u32 61680, %v2652_v3  ;;  %v2683_v33 = vmul.u32 61681, %v2680_v27 }
 0x259   : > { %v2136_v35 = vadd.f32 %v2135_v36, %v2086_v23  ;;  %v2681_v23 = vshrl.u32 %v3853_v18, 16 }
 0x25b   : > { %v2685_v36 = vmul.u32 61681, %v2681_v23 }
 0x25f   : > { %v2099_v34 = vpop.f32.mrf.mxu2  ;;  %v2112_v7 = vpop.f32.mrf.mxu3 }
 0x260   : > { %v2137_v13 = vpop.f32.mrf.mxu0  ;;  %v2149_v28 = vadd.f32 %v2148_v9, %v2099_v34  ;;  %v2150_v38 = vpop.f32.mrf.mxu1  ;;  %v2687_v9 = vshll.u32 %v2684_v16, 16  ;;  %v2714_v34 = vmul.u32 61681, %v2710_v24 }
 0x261   : > { %v2663_v13 = vsel %vm2662_vm6, 1, %v3017_v45  ;;  %v2689_v38 = vshll.u32 %v2685_v36, 16 }
 0x262   : > { %vm2691_vm8 = vc.u32 %v2683_v33, %v2687_v9 }
 0x267   : > { %v2101_v57 = vpop.f32.mrf.mxu2  ;;  %v2114_v37 = vpop.f32.mrf.mxu3 }
 0x268   : > { %v2211_v53 = vpop.f32.mrf.mxu0  ;;  %v2224_v1 = vpop.f32.mrf.mxu1  ;;  %v2693_v57 = vadd.s32 %v2687_v9, %v2683_v33  ;;  %v2692_v37 = vsel %vm2691_vm8, 1, %v3017_v45  ;;  %v2719_v33 = vshrl.u32 %v2714_v34, 16  ;;  %vm2759_vm8 = vcmask 124928  }
 0x269   : > { %v3826_v50 = vadd.f32 %v2211_v53, %v2149_v28  ;;  %v2686_v28 = vmul.u32 61680, %v2681_v23  ;;  %v2715_v53 = vmul.u32 61680, %v2710_v24  ;;  %v2690_v24 = vshrl.u32 %v2685_v36, 16 }
 0x26a   : > { %vm2695_vm10 = vc.u32 %v2693_v57, %v2689_v38 }
 0x26b   : > { %v2696_v56 = vsel %vm2695_vm10, 1, %v3017_v45 }
 0x26f   : > { %v2161_v6 = vpop.f32.mrf.mxu2  ;;  %v2198_v51 = vpop.f32.mrf.mxu3 }
 0x270   : > { %v2213_v60 = vpop.f32.mrf.mxu0  ;;  %v2162_v62 = vadd.f32 %v2161_v6, %v2112_v7  ;;  %v3828_v40 = vadd.f32 %v2198_v51, %v2136_v35  ;;  %v2226_v10 = vpop.f32.mrf.mxu1  ;;  %v2712_v35 = vmul.u32 61681, %v2709_v11  ;;  %v2716_v7 = vshll.u32 %v2713_v32, 16 }
 0x271   : > { %v2665_v6 = vadd.s32 %v2663_v13, %v2657_v59  ;;  %v2661_v11 = vshrl.u32 %v3858_v12, 16 }
 0x272   : > { %v3830_v43 = vadd.f32 %v2224_v1, %v2162_v62  ;;  %vm2720_vm9 = vc.u32 %v2712_v35, %v2716_v7  ;;  %v2718_v1 = vshll.u32 %v2714_v34, 16  ;;  %v2722_v60 = vadd.s32 %v2716_v7, %v2712_v35 }
 0x273   : > { %v2721_v51 = vsel %vm2720_vm9, 1, %v3017_v45 }
 0x274   : > { %vm2724_vm11 = vc.u32 %v2722_v60, %v2718_v1 }
 0x277   : > { %v2163_v46 = vpop.f32.mrf.mxu2  ;;  %v2200_v31 = vpop.f32.mrf.mxu3 }
 0x278   : > { %v3832_v48 = vpop.f32.mrf.mxu0  ;;  %v3834_v41 = vpop.f32.mrf.mxu1  ;;  %v2667_v46 = vsel %vm2666_vm7, 1, %v3017_v45  ;;  %v2694_v31 = vadd.s32 %v2692_v37, %v2686_v28 }
 0x279   : > { %v2669_v0 = vadd.s32 %v2667_v46, %v2665_v6 }
 0x27a   : > { %v2698_v3 = vadd.s32 %v2696_v56, %v2694_v31 }
 0x27f   : > { %v3836_v39 = vpop.f32.mrf.mxu2  ;;  %v3838_v49 = vpop.f32.mrf.mxu3 }
 0x280   : > { %v2292_v15 = vpop.f32.mrf.mxu0  ;;  %v2332_v58 = vpop.f32.mrf.mxu1  ;;  %v2294_v47 = vadd.f32 %v3836_v39, %v3828_v40  ;;  %v2295_v34 = vadd.f32 %v3838_v49, %v3826_v50 }
 0x282   : > { %v2360_v30 = vadd.f32 %v3834_v41, %v2294_v47  ;;  %v2296_v41 = vadd.f32 %v3832_v48, %v3830_v43 }
 0x287   : > { %v2266_v21 = vpop.f32.mrf.mxu2  ;;  %v2279_v63 = vpop.f32.mrf.mxu3 }
 0x288   : > { %v3840_v29 = vpop.f32.mrf.mxu0  ;;  %v3842_v61 = vpop.f32.mrf.mxu1  ;;  %v2723_v21 = vadd.s32 %v2721_v51, %v2715_v53  ;;  %v2659_v63 = vshrl.u32 %v2655_v14, 16 }
 0x289   : > { %v2426_v35 = vadd.f32 %v3840_v29, %v2360_v30 }
 0x28f   : > { %v3847_v54 = vpop.f32.mrf.mxu2  ;;  %v3849_v20 = vpop.f32.mrf.mxu3 }
 0x290   : > { %v2398_v55 = vpop.f32.mrf.mxu0  ;;  %v2411_v52 = vpop.f32.mrf.mxu1  ;;  %v2361_v29 = vadd.f32 %v3847_v54, %v2295_v34  ;;  %v2362_v6 = vadd.f32 %v3849_v20, %v2296_v41 }
 0x291   : > { %v2725_v55 = vsel %vm2724_vm11, 1, %v3017_v45  ;;  %v2688_v52 = vshrl.u32 %v2684_v16, 16  ;;  %v2636_v20 = vpop.permute.xlu0 %2635 }
 0x292   : > { %v2727_v27 = vadd.s32 %v2725_v55, %v2723_v21  ;;  %v2427_v48 = vadd.f32 %v3842_v61, %v2361_v29 }
 0x293   : > { %v2699_v2 = vadd.s32 %v2698_v3, %v2688_v52 }
 0x294   : > { %v2728_v45 = vadd.s32 %v2727_v27, %v2717_v26 }
 0x295   : > { %v2700_v9 = vadd.s32 %v2699_v2, %v2690_v24 }
 0x296   : > { %v2729_v40 = vadd.s32 %v2728_v45, %v2719_v33 }
 0x297   : > { %v2345_v25 = vpop.f32.mrf.mxu2  ;;  %v2358_v19 = vpop.f32.mrf.mxu3  ;;  %v2701_v13 = vshrl.u32 %v2700_v9, 4 }
 0x298   : > { %v3864_v42 = vpop.f32.mrf.mxu0  ;;  %v3866_v5 = vpop.f32.mrf.mxu1  ;;  %v2670_v25 = vadd.s32 %v2669_v0, %v2659_v63  ;;  %v2730_v38 = vshrl.u32 %v2729_v40, 4 }
 0x299   : > { %v2702_v1 = vmul.u32 17, %v2701_v13 }
 0x29a   : > { %v2671_v16 = vadd.s32 %v2670_v25, %v2661_v11  ;;  %v2731_v60 = vmul.u32 17, %v2730_v38 }
 0x29b   : > { %v2703_v43 = vsub.s32 %v3853_v18, %v2702_v1 }
 0x29c   : > { %v2672_v32 = vshrl.u32 %v2671_v16, 4  ;;  %v2732_v50 = vsub.s32 %v3856_v4, %v2731_v60 }
 0x29d   : > { %vm2736_vm14 = vcmp.ne.s32.totalorder %v2703_v43, 0  ;;  %vm2739_vm15 = vcmp.lt.s32.totalorder %v2703_v43, 0 }
 0x29e   : > { %v2673_v53 = vmul.u32 17, %v2672_v32  ;;  %vm2737_vm0 = vcmp.ne.s32.totalorder %v2732_v50, 0  ;;  %vm2740_vm1 = vcmp.lt.s32.totalorder %v2732_v50, 0  ;;  %vm3897_vm3 = vmand %vm2739_vm15, %vm2736_vm14 }
 0x29f   : > { %v2422_v62 = vpop.f32.mrf.mxu2  ;;  %v2462_v10 = vpop.f32.mrf.mxu3  ;;  %vm2743_vm4 = vmand %vm2740_vm1, %vm2737_vm0 }
 0x2a0   : > { %v2477_v15 = vpop.f32.mrf.mxu0  ;;  %v2490_v58 = vpop.f32.mrf.mxu1  ;;  %v2492_v39 = vadd.f32 %v2462_v10, %v2426_v35  ;;  %v2428_v10 = vadd.f32 %v2422_v62, %v2362_v6  ;;  %v2674_v46 = vsub.s32 %v3844_v44, %v2673_v53  ;;  %v2746_v62 = vadd.s32 17, %v2732_v50 }
 0x2a2   : > { %v2494_v49 = vadd.f32 %v3866_v5, %v2428_v10  ;;  %vm2735_vm12 = vcmp.ne.s32.totalorder %v2674_v46, 0  ;;  %vm2738_vm13 = vcmp.lt.s32.totalorder %v2674_v46, 0  ;;  %v2744_v54 = vadd.s32 17, %v2674_v46 }
 0x2a3   : > { %vm3893_vm2 = vmand %vm2738_vm13, %vm2735_vm12  ;;  %v2745_v5 = vadd.s32 17, %v2703_v43  ;;  %v2749_v47 = vsel %vm2743_vm4, %v2746_v62, %v2732_v50 }
 0x2a4   : > { %v2747_v0 = vsel %vm3893_vm2, %v2744_v54, %v2674_v46  ;;  %vm2752_vm7 = vcmp.eq.s32.totalorder %v2749_v47, 16 }
 0x2a5   : > { %v2748_v52 = vsel %vm3897_vm3, %v2745_v5, %v2703_v43  ;;  %vm2750_vm5 = vcmp.eq.s32.totalorder %v2747_v0, 16 }
 0x2a6   : > { %vm2751_vm6 = vcmp.eq.s32.totalorder %v2748_v52, 16 }
 0x2a7   : > { %v2424_v19 = vpop.f32.mrf.mxu2  ;;  %v2464_v23 = vpop.f32.mrf.mxu3 }
 0x2a8   : > { %v2554_v14 = vpop.f32.mrf.mxu0  ;;  %v2596_v59 = vpop.f32.mrf.mxu1 }
 0x2a9   : > { %v2560_v18 = vadd.f32 %v2554_v14, %v2494_v49 }
 0x2af   : > { %v2528_v7 = vpop.f32.mrf.mxu2  ;;  %v2541_v12 = vpop.f32.mrf.mxu3 }
 0x2b0   : > { %v2558_v28 = vadd.f32 %v2528_v7, %v2492_v39  ;;  %v2556_v36 = vpop.f32.mrf.mxu0  ;;  %v2598_v57 = vpop.f32.mrf.mxu1 }
 0x2b2   : > { %v2626_v37 = vadd.f32 %v2596_v59, %v2558_v28 }
 0x2b4   : > { %v2629_v51 = vmax.f32 %v3819_v8, %v2626_v37  ;;  %v2493_v8 = vadd.f32 %v3864_v42, %v2427_v48 }
 0x2b6   : > { %v2559_v61 = vadd.f32 %v2541_v12, %v2493_v8  ;;  %v2638_v42 = vadd.f32 %v2636_v20, %v2629_v51 }
 0x2b7   : > { %v2530_v31 = vpop.f32.mrf.mxu2  ;;  %v2543_v15 = vpop.f32.mrf.mxu3 }
 0x2b8   : > { %v2641_v26 = vmax.f32 %v2638_v42, 0.0 }
 0x2ba   : > { %v2753_v2 = vsel %vm2750_vm5, 0.0, %v2641_v26 }
 0x2bf   : > { %v2609_v58 = vpop.f32.mrf.mxu2  ;;  %v2622_v56 = vpop.f32.mrf.mxu3 }
 0x2c0   : > { %v2627_v21 = vadd.f32 %v2609_v58, %v2559_v61  ;;  %v2628_v63 = vadd.f32 %v2622_v56, %v2560_v18 }
 0x2c2   : > { %v2630_v55 = vmax.f32 %v3824_v17, %v2627_v21  ;;  %v2631_v3 = vmax.f32 %v3814_v22, %v2628_v63 }
 0x2c4   : > { %v2639_v27 = vadd.f32 %v2636_v20, %v2630_v55  ;;  %v2640_v11 = vadd.f32 %v2636_v20, %v2631_v3 }
 0x2c6   : > { %v2642_v25 = vmax.f32 %v2639_v27, 0.0  ;;  %v2643_v19 = vmax.f32 %v2640_v11, 0.0 }
 0x2c7   : > { %v2611_v23 = vpop.f32.mrf.mxu2  ;;  %v2624_v24 = vpop.f32.mrf.mxu3 }
 0x2c8   : > { %v2754_v17 = vsel %vm2751_vm6, 0.0, %v2642_v25  ;;  %v2755_v30 = vsel %vm2752_vm7, 0.0, %v2643_v19 }
 0x2c9   : > { %v2756_v22 = vpack.c.bf16 %v2754_v17, %v2753_v2  ;;  %v2757_v14 = vpack.c.bf16 %v2755_v30, %v2755_v30 }
 0x2cb   : > { %2758 = vst [vmem:[%s311_s9] sm:$0x77] %v2756_v22 }
 0x2cc   : > { %2760 = vst.msk [vmem:[%s311_s9 + $0x8] sm:$0x7] %vm2759_vm8, %v2757_v14 }
 0x2cd PF: > { %s16_s21 = sadd.s32 1, %s3011_s21  }
 0x2ce   : > { %p13_p4 = scmp.ge.s32.totalorder %s16_s21, 4  }
 0x2d0   :  { %15 = sbr.rel (!%p13_p4) target bundleno = 1 (0x1), region = 91 }

// kernel: autoencoder_forward.12
= control target key start
LH: loop header
LB: loop body
LE: loop exit
PB: predicated region body
PF: predicated region fallthrough
CT: control target
= control target key end

     0   :  { %s541_s12 = smov 0   ;;  %s648_s0 = inlined_call_operand.vmem [shape: bf16[2,16,4], index: 0, kind: input, shape index: {}]   ;;  %s649_s1 = inlined_call_operand.vmem [shape: bf16[96,16], index: 1, kind: input, shape index: {}]   ;;  %s650_s2 = inlined_call_operand.vmem [shape: f32[96,1], index: 2, kind: input, shape index: {}]   ;;  %s651_s3 = inlined_call_operand.vmem [shape: bf16[2,96,4], index: 3, kind: output, shape index: {}]  }
   0x1 LB: > { %s444_s13 = sadd.s32 4294967295, %s518_s12   ;;  %p448_p0 = scmp.ge.s32.totalorder %s518_s12, 1  ;;  %s518_s12 = sphi %s541_s12, %s13_s12  }
   0x2   : > { %p137_p1 = scmp.lt.s32.totalorder %s518_s12, 3 }
   0x4   : > { %p138_p2 = pnand %p448_p0, %p137_p1 }
   0x5   : > { %p161_p3 = scmp.lt.s32.totalorder (!%p138_p2), %s444_s13, 1 }
   0x6   : > { %141 = sbr.rel (%p138_p2) target bundleno = 182 (0xb6), region = 32 }
   0xb   : > { %v188_v0 = vld [vmem:[%s650_s2 + $0x10] sm:$0xff]  ;;  %v186_v1 = vld [vmem:[%s650_s2] sm:$0xff]  ;;  %v520_v2 = vmov 0   ;;  %s653_s13 = smov (!%p161_p3, %s444_s13), 1  ;;  %v490_v6 = vld [vmem:[%s649_s1 + $0x8] sm:$0xff]  ;;  %vm294_vm0 = vcmask 130048  }
   0xc   : > { %510 = vset.pattern.permute.xlu1 %v520_v2  ;;  %509 = vset.pattern.permute.xlu0 %v520_v2  ;;  %s488_s18 = sshll.u32 %s653_s13, 3  ;;  %v190_v3 = vld [vmem:[%s650_s2 + $0x20] sm:$0xff]  ;;  %v189_v7 = vld [vmem:[%s650_s2 + $0x18] sm:$0xff]  ;;  %v187_v8 = vld [vmem:[%s650_s2 + $0x8] sm:$0xff]  ;;  %s499_s29 = smul.u32 48, %s653_s13  ;;  %vm376_vm1 = vcmask 27648  }
   0xd   : > { %210 = vperm.xlu1 %510, %v188_v0   ;;  %200 = vperm.xlu0 %509, %v186_v1   ;;  %s165_s23 = scalar_lea.vmem %s648_s0, %s488_s18  ;;  %v489_v5 = vld [vmem:[%s649_s1] sm:$0xff]  ;;  %v492_v9 = vld [vmem:[%s649_s1 + $0x18] sm:$0xff]  ;;  %v494_v10 = vld [vmem:[%s649_s1 + $0x28] sm:$0xff] }
   0xe   : > { %511 = vset.pattern.permute.xlu2 %v520_v2  ;;  %v495_v4 = vld [vmem:[%s165_s23] sm:$0xff]  ;;  %v191_v11 = vld [vmem:[%s650_s2 + $0x28] sm:$0xff]  ;;  %v193_v12 = vld [vmem:[%s650_s2 + $0x38] sm:$0xff]  ;;  %s619_s5 = scalar_lea.vmem %s651_s3, %s499_s29 }
   0xf   : > { %220 = vperm.xlu2 %511, %v190_v3   ;;  %320 = vmatpush.bf16.msra.mxu0 %v495_v4  ;;  %v192_v13 = vld [vmem:[%s650_s2 + $0x30] sm:$0xff]  ;;  %v194_v14 = vld [vmem:[%s650_s2 + $0x40] sm:$0xff]  ;;  %v195_v17 = vld [vmem:[%s650_s2 + $0x48] sm:$0xff] }
  0x10   : > { %496 = vmatpush.bf16.msra.mxu1 %v495_v4  ;;  %497 = vmatpush.bf16.msra.mxu2 %v495_v4  ;;  %v491_v15 = vld [vmem:[%s649_s1 + $0x10] sm:$0xff]  ;;  %v493_v18 = vld [vmem:[%s649_s1 + $0x20] sm:$0xff]  ;;  %v197_v19 = vld [vmem:[%s650_s2 + $0x58] sm:$0xff] }
  0x11   : > { %498 = vmatpush.bf16.msra.mxu3 %v495_v4  ;;  %v196_v16 = vld [vmem:[%s650_s2 + $0x50] sm:$0xff] }
  0x12   : > { %480 = vmatmul.msk.bf16.vlgmr.msra.gmra.mxu0 %vm294_vm0, %v489_v5 }
  0x13   : > { %481 = vmatmul.msk.bf16.vlgmr.msra.gmra.mxu1 %vm294_vm0, %v490_v6  ;;  %483 = vmatmul.msk.bf16.vlgmr.msra.gmra.mxu2 %vm294_vm0, %v492_v9 }
  0x14   : > { %485 = vmatmul.msk.bf16.vlgmr.msra.gmra.mxu3 %vm294_vm0, %v494_v10 }
  0x15   : > { %215 = vperm.xlu1 %510, %v189_v7   ;;  %205 = vperm.xlu0 %509, %v187_v8  }
  0x17   : > { %225 = vperm.xlu2 %511, %v191_v11  }
  0x1d   : > { %235 = vperm.xlu1 %510, %v193_v12   ;;  %230 = vperm.xlu0 %509, %v192_v13  }
  0x1f   : > { %240 = vperm.xlu2 %511, %v194_v14  }
  0x23   : > { %482 = vmatmul.msk.bf16.gmra.mxu1 %vm294_vm0, %v491_v15  ;;  %484 = vmatmul.msk.bf16.gmra.mxu2 %vm294_vm0, %v493_v18 }
  0x25   : > { %250 = vperm.xlu1 %510, %v196_v16   ;;  %245 = vperm.xlu0 %509, %v195_v17  }
  0x27   : > { %255 = vperm.xlu2 %511, %v197_v19  }
  0x69   : > { %v221_v21 = vpop.permute.xlu2 %220 }
  0x71   : > { %v226_v24 = vpop.permute.xlu2 %225 }
  0x79   : > { %v241_v33 = vpop.permute.xlu2 %240 }
  0x7f   : > { %v211_v20 = vpop.permute.xlu1 %210  ;;  %v201_v22 = vpop.permute.xlu0 %200 }
  0x81   : > { %v256_v54 = vpop.permute.xlu2 %255 }
  0x87   : > { %v216_v23 = vpop.permute.xlu1 %215  ;;  %v206_v25 = vpop.permute.xlu0 %205 }
  0x8f   : > { %v236_v26 = vpop.permute.xlu1 %235  ;;  %v322_v27 = vpop.f32.mrf.mxu0 }
  0x90   : > { %v327_v28 = vpop.f32.mrf.mxu1  ;;  %v323_v29 = vadd.f32 %v322_v27, %v201_v22  ;;  %v231_v37 = vpop.permute.xlu0 %230 }
  0x91   : > { %v328_v30 = vadd.f32 %v327_v28, %v211_v20 }
  0x92   : > { %v352_v31 = vmax.f32 %v323_v29, 0.0 }
  0x93   : > { %v354_v32 = vmax.f32 %v328_v30, 0.0 }
  0x94   : > { %v364_v34 = vpack.c.bf16 %v352_v31, %v352_v31 }
  0x95   : > { %v366_v35 = vpack.c.bf16 %v354_v32, %v354_v32 }
  0x96   : > { %377 = vst.msk [vmem:[%s619_s5] sm:$0xf] %vm376_vm1, %v364_v34  ;;  %v337_v38 = vpop.f32.mrf.mxu2 }
  0x97   : > { %v251_v36 = vpop.permute.xlu1 %250  ;;  %v347_v39 = vpop.f32.mrf.mxu3  ;;  %379 = vst.msk [vmem:[%s619_s5 + $0x8] sm:$0xf] %vm376_vm1, %v366_v35  ;;  %v338_v40 = vadd.f32 %v337_v38, %v231_v37 }
  0x98   : > { %v348_v41 = vadd.f32 %v347_v39, %v251_v36  ;;  %v324_v42 = vpop.f32.mrf.mxu0  ;;  %v329_v43 = vpop.f32.mrf.mxu1 }
  0x99   : > { %v325_v44 = vadd.f32 %v324_v42, %v206_v25  ;;  %v330_v45 = vadd.f32 %v329_v43, %v216_v23  ;;  %v358_v46 = vmax.f32 %v338_v40, 0.0  ;;  %v246_v11 = vpop.permute.xlu0 %245 }
  0x9a   : > { %v362_v47 = vmax.f32 %v348_v41, 0.0 }
  0x9b   : > { %v353_v48 = vmax.f32 %v325_v44, 0.0  ;;  %v355_v49 = vmax.f32 %v330_v45, 0.0  ;;  %v370_v50 = vpack.c.bf16 %v358_v46, %v358_v46 }
  0x9c   : > { %v374_v51 = vpack.c.bf16 %v362_v47, %v362_v47 }
  0x9d   : > { %v365_v52 = vpack.c.bf16 %v353_v48, %v353_v48  ;;  %v367_v53 = vpack.c.bf16 %v355_v49, %v355_v49  ;;  %383 = vst.msk [vmem:[%s619_s5 + $0x18] sm:$0xf] %vm376_vm1, %v370_v50 }
  0x9e   : > { %387 = vst.msk [vmem:[%s619_s5 + $0x28] sm:$0xf] %vm376_vm1, %v374_v51  ;;  %v339_v55 = vpop.f32.mrf.mxu2 }
  0x9f   : > { %v349_v56 = vpop.f32.mrf.mxu3  ;;  %378 = vst.msk [vmem:[%s619_s5 + $0x4] sm:$0xf] %vm376_vm1, %v365_v52  ;;  %v340_v57 = vadd.f32 %v339_v55, %v236_v26 }
  0xa0   : > { %v350_v58 = vadd.f32 %v349_v56, %v256_v54  ;;  %v332_v59 = vpop.f32.mrf.mxu1  ;;  %380 = vst.msk [vmem:[%s619_s5 + $0xc] sm:$0xf] %vm376_vm1, %v367_v53 }
  0xa1   : > { %v333_v60 = vadd.f32 %v332_v59, %v221_v21  ;;  %v359_v61 = vmax.f32 %v340_v57, 0.0 }
  0xa2   : > { %v363_v62 = vmax.f32 %v350_v58, 0.0 }
  0xa3   : > { %v356_v63 = vmax.f32 %v333_v60, 0.0  ;;  %v371_v0 = vpack.c.bf16 %v359_v61, %v359_v61 }
  0xa4   : > { %v375_v1 = vpack.c.bf16 %v363_v62, %v363_v62 }
  0xa5   : > { %v368_v2 = vpack.c.bf16 %v356_v63, %v356_v63  ;;  %384 = vst.msk [vmem:[%s619_s5 + $0x1c] sm:$0xf] %vm376_vm1, %v371_v0 }
  0xa6   : > { %388 = vst.msk [vmem:[%s619_s5 + $0x2c] sm:$0xf] %vm376_vm1, %v375_v1  ;;  %v342_v3 = vpop.f32.mrf.mxu2 }
  0xa7   : > { %381 = vst.msk [vmem:[%s619_s5 + $0x10] sm:$0xf] %vm376_vm1, %v368_v2  ;;  %v343_v4 = vadd.f32 %v342_v3, %v241_v33 }
  0xa8   : > { %v334_v5 = vpop.f32.mrf.mxu1 }
  0xa9   : > { %v335_v6 = vadd.f32 %v334_v5, %v226_v24  ;;  %v360_v7 = vmax.f32 %v343_v4, 0.0 }
  0xab   : > { %v357_v8 = vmax.f32 %v335_v6, 0.0  ;;  %v372_v9 = vpack.c.bf16 %v360_v7, %v360_v7 }
  0xad   : > { %v369_v10 = vpack.c.bf16 %v357_v8, %v357_v8  ;;  %385 = vst.msk [vmem:[%s619_s5 + $0x20] sm:$0xf] %vm376_vm1, %v372_v9 }
  0xae   : > { %v344_v12 = vpop.f32.mrf.mxu2 }
  0xaf   : > { %382 = vst.msk [vmem:[%s619_s5 + $0x14] sm:$0xf] %vm376_vm1, %v369_v10  ;;  %v345_v13 = vadd.f32 %v344_v12, %v246_v11 }
  0xb1   : > { %v361_v14 = vmax.f32 %v345_v13, 0.0 }
  0xb3   : > { %v373_v15 = vpack.c.bf16 %v361_v14, %v361_v14 }
  0xb5   : > { %386 = vst.msk [vmem:[%s619_s5 + $0x24] sm:$0xf] %vm376_vm1, %v373_v15 }
  0xb6 PF: > { %s13_s12 = sadd.s32 1, %s518_s12  }
  0xb7   : > { %p10_p4 = scmp.ge.s32.totalorder %s13_s12, 4  }
  0xb9   :  { %12 = sbr.rel (!%p10_p4) target bundleno = 1 (0x1), region = 62 }

// kernel: autoencoder_forward.10
= control target key start
LH: loop header
LB: loop body
LE: loop exit
PB: predicated region body
PF: predicated region fallthrough
CT: control target
= control target key end

     0   :  { %s1723_s21 = smov 0   ;;  %s2129_s0 = inlined_call_operand.vmem [shape: bf16[2,12,30], index: 0, kind: input, shape index: {}]   ;;  %s2130_s1 = inlined_call_operand.vmem [shape: bf16[2,12,30], index: 1, kind: input, shape index: {}]   ;;  %s2131_s2 = inlined_call_operand.vmem [shape: bf16[2,12,30], index: 2, kind: input, shape index: {}]   ;;  %s2132_s3 = inlined_call_operand.vmem [shape: bf16[2,12,30], index: 3, kind: input, shape index: {}]   ;;  %s2133_s4 = inlined_call_operand.vmem [shape: bf16[9,24,12], index: 4, kind: input, shape index: {}]   ;;  %s2134_s5 = inlined_call_operand.vmem [shape: f32[24,1], index: 5, kind: input, shape index: {}]   ;;  %s2135_s6 = inlined_call_operand.vmem [shape: bf16[2,24,20], index: 6, kind: output, shape index: {}]  }
   0x1 LB: > { %s1479_s22 = sadd.s32 4294967295, %s1682_s21   ;;  %p1483_p0 = scmp.ge.s32.totalorder %s1682_s21, 1  ;;  %s1682_s21 = sphi %s1723_s21, %s16_s21  }
   0x2   : > { %p242_p1 = scmp.lt.s32.totalorder %s1682_s21, 3 }
   0x4   : > { %p243_p2 = pnand %p1483_p0, %p242_p1 }
   0x5   : > { %p287_p3 = scmp.lt.s32.totalorder (!%p243_p2), %s1479_s22, 1  ;;  %s1684_s12 = smov (!%p243_p2), 123  }
   0x6   : > { %246 = sbr.rel (%p243_p2) target bundleno = 555 (0x22b), region = 44  ;;  %s1685_s15 = smov (!%p243_p2), 127  }
   0x7   : > { %s1686_s16 = smov (!%p243_p2), 122  }
   0xb   : > { %s2139_s22 = smov (!%p287_p3, %s1479_s22), 1  ;;  %vm344_vm0 = vcmask 1045504   ;;  %v1753_v9 = vld [vmem:[%s2133_s4 + $0xc] sm:$0xff]  ;;  %vm337_vm1 = vcmask 97280   ;;  %v1495_v15 = vld [vmem:[%s2133_s4 + $0x14] sm:$0xf] }
   0xc   : > { %s1643_s23 = sshll.u32 %s2139_s22, 3  ;;  %v329_v16 = vunpack.c.l.b16 %v1495_v15  ;;  %v1776_v19 = vld [vmem:[%s2133_s4 + $0x24] sm:$0xff]  ;;  %v1786_v20 = vld [vmem:[%s2133_s4 + $0x30] sm:$0xff]  ;;  %v1540_v21 = vld [vmem:[%s2133_s4 + $0x38] sm:$0xf]  ;;  %s1660_s13 = smul.u32 12, %s2139_s22 }
   0xd   : > { %s296_s26 = scalar_lea.vmem %s2130_s1, %s1643_s23  ;;  %s291_s29 = scalar_lea.vmem %s2129_s0, %s1643_s23  ;;  %v510_v22 = vunpack.c.l.b16 %v1540_v21  ;;  %v1801_v25 = vld [vmem:[%s2133_s4] sm:$0xff]  ;;  %v1527_v26 = vld [vmem:[%s2133_s4 + $0x2c] sm:$0xf]  ;;  %v317_v29 = vld [vmem:[%s2133_s4 + $0x8] sm:$0xf]  ;;  %vm1384_vm8 = vcmask 158720  }
   0xe   : > { %v1502_v0 = vld [vmem:[%s296_s26] sm:$0xf]  ;;  %v1649_v1 = vld [vmem:[%s296_s26] sm:$0x30]  ;;  %s306_s8 = scalar_lea.vmem %s2132_s3, %s1643_s23  ;;  %s301_s11 = scalar_lea.vmem %s2131_s2, %s1643_s23  ;;  %v1766_v17 = vpack.c.b16 %v329_v16, %v329_v16  ;;  %v461_v27 = vunpack.c.l.b16 %v1527_v26  ;;  %v371_v30 = vunpack.c.l.b16 %v317_v29  ;;  %v1580_v35 = vld [vmem:[%s2133_s4 + $0x68] sm:$0xf] }
   0xf   : > { %v1512_v2 = vld [vmem:[%s291_s29] sm:$0xf]  ;;  %v1503_v3 = vor.u32 %v1649_v1, %v1502_v0  ;;  %v1647_v4 = vld [vmem:[%s291_s29] sm:$0x30]  ;;  %v1793_v23 = vpack.c.b16 %v510_v22, %v510_v22  ;;  %v689_v36 = vunpack.c.l.b16 %v1580_v35  ;;  %v1846_v43 = vld [vmem:[%s2133_s4 + $0x54] sm:$0xff] }
  0x10   : > { %v1513_v5 = vor.u32 %v1647_v4, %v1512_v2  ;;  %v1547_v6 = vld [vmem:[%s306_s8] sm:$0xf]  ;;  %v1654_v7 = vld [vmem:[%s306_s8] sm:$0x30]  ;;  %v1808_v28 = vpack.c.b16 %v461_v27, %v461_v27  ;;  %v1815_v31 = vpack.c.b16 %v371_v30, %v371_v30  ;;  %v1853_v45 = vld [vmem:[%s2133_s4 + $0x18] sm:$0xff] }
  0x11   : > { %648 = vrot.lane.b32.xlu1 %v1503_v3, %s1684_s12  ;;  %v1748_v8 = vsel %vm344_vm0, %v1503_v3, 0  ;;  %v1548_v10 = vor.u32 %v1654_v7, %v1547_v6  ;;  %v1534_v11 = vld [vmem:[%s301_s11] sm:$0xf]  ;;  %v1652_v12 = vld [vmem:[%s301_s11] sm:$0x30]  ;;  %v1835_v37 = vpack.c.b16 %v689_v36, %v689_v36  ;;  %v1903_v60 = vld [vmem:[%s2133_s4 + $0x48] sm:$0xff] }
  0x12   : > { %418 = vrot.lane.b32.xlu0 %v1513_v5, %s1685_s15  ;;  %692 = vrot.lane.b32.xlu2 %v1513_v5, %s1686_s16  ;;  %v1535_v14 = vor.u32 %v1652_v12, %v1534_v11  ;;  %v386_v24 = vsel %vm344_vm0, %v1513_v5, 0  ;;  %v1825_v34 = vld [vmem:[%s2133_s4 + $0x60] sm:$0xff]  ;;  %v1571_v51 = vld [vmem:[%s2133_s4 + $0x5c] sm:$0xf] }
  0x13   : > { %355 = vmatpush.bf16.msra.mxu0 %v1748_v8  ;;  %v1757_v13 = vsel %vm344_vm0, %v1548_v10, 0  ;;  %395 = vmatpush.bf16.msra.mxu1 %v386_v24  ;;  %v1866_v49 = vld [vmem:[%s2133_s4 + $0x3c] sm:$0xff]  ;;  %v645_v53 = vunpack.c.l.b16 %v1571_v51  ;;  %v1553_v57 = vld [vmem:[%s2133_s4 + $0x44] sm:$0xf]  ;;  %v1562_v0 = vld [vmem:[%s2133_s4 + $0x50] sm:$0xf] }
  0x14   : > { %v1771_v18 = vsel %vm344_vm0, %v1535_v14, 0  ;;  %v1518_v52 = vld [vmem:[%s2133_s4 + $0x20] sm:$0xf]  ;;  %v557_v58 = vunpack.c.l.b16 %v1553_v57  ;;  %v601_v2 = vunpack.c.l.b16 %v1562_v0 }
  0x15   : > { %485 = vmatpush.bf16.msra.mxu3 %v1771_v18  ;;  %v415_v54 = vunpack.c.l.b16 %v1518_v52  ;;  %v1883_v55 = vpack.c.b16 %v645_v53, %v645_v53 }
  0x16   : > { %1504 = vmatmul.msk.bf16.vlgmr.msra.gmra.mxu0 %vm337_vm1, %v1753_v9  ;;  %1514 = vmatmul.msk.bf16.vlgmr.msra.gmra.mxu1 %vm337_vm1, %v1801_v25  ;;  %v1894_v59 = vpack.c.b16 %v557_v58, %v557_v58 }
  0x17   : > { %534 = vmatpush.bf16.msrb.mxu0 %v1757_v13  ;;  %v1885_v56 = vpack.c.b16 %v415_v54, %v415_v54 }
  0x18   : > { %1536 = vmatmul.msk.bf16.vlgmr.msra.gmra.mxu3 %vm337_vm1, %v1776_v19 }
  0x19   : > { %560 = vrot.lane.b32.xlu1 %v1535_v14, %s1685_s15 }
  0x1a   : > { %604 = vrot.lane.b32.xlu0 %v1513_v5, %s1684_s12  ;;  %760 = vrot.lane.b32.xlu2 %v1503_v3, %s1685_s15 }
  0x21   : > { %896 = vrot.lane.b32.xlu1 %v1503_v3, %s1686_s16  ;;  %v1922_v3 = vpack.c.b16 %v601_v2, %v601_v2 }
  0x22   : > { %828 = vrot.lane.b32.xlu0 %v1548_v10, %s1685_s15  ;;  %1097 = vrot.lane.b32.xlu2 %v1535_v14, %s1686_s16 }
  0x26   : > { %1505 = vmatmul.msk.bf16.gmra.mxu0 %vm337_vm1, %v1766_v17  ;;  %1515 = vmatmul.msk.bf16.gmra.mxu1 %vm337_vm1, %v1815_v31 }
  0x28   : > { %1537 = vmatmul.msk.bf16.gmra.mxu3 %vm337_vm1, %v1808_v28 }
  0x29   : > { %1071 = vrot.lane.b32.xlu1 %v1548_v10, %s1684_s12 }
  0x2a   : > { %1045 = vrot.lane.b32.xlu0 %v1535_v14, %s1684_s12  ;;  %1288 = vrot.lane.b32.xlu2 %v1548_v10, %s1686_s16  ;;  %s311_s16 = scalar_lea.vmem %s2135_s6, %s1660_s13 }
  0x36   : > { %1549 = vmatmul.msk.bf16.vlgmr.msrb.gmra.mxu0 %vm337_vm1, %v1786_v20 }
  0x46   : > { %1550 = vmatmul.msk.bf16.gmra.mxu0 %vm337_vm1, %v1793_v23 }
  0x6c   : > { %v693_v32 = vpop.permute.xlu2 %692 }
  0x6d   : > { %v1820_v33 = vsel %vm344_vm0, %v693_v32, 0 }
  0x6e   : > { %710 = vmatpush.bf16.msra.mxu0 %v1820_v33 }
  0x71   : > { %1585 = vmatmul.msk.bf16.vlgmr.msra.gmra.mxu0 %vm337_vm1, %v1825_v34 }
  0x72   : > { %793 = vmatpush.bf16.msrb.mxu0 %v1757_v13 }
  0x74   : > { %v761_v38 = vpop.permute.xlu2 %760 }
  0x75   : > { %v763_v40 = vsel %vm344_vm0, %v761_v38, 0 }
  0x76   : > { %882 = vmatpush.bf16.msra.mxu0 %v1820_v33 }
  0x7c   : > { %v1098_v36 = vpop.permute.xlu2 %1097 }
  0x7d   : > { %v1975_v38 = vsel %vm344_vm0, %v1098_v36, 0 }
  0x81   : > { %1586 = vmatmul.msk.bf16.gmra.mxu0 %vm337_vm1, %v1835_v37 }
  0x83   : > { %v649_v39 = vpop.permute.xlu1 %648 }
  0x84   : > { %v1841_v41 = vsel %vm344_vm0, %v649_v39, 0  ;;  %v419_v42 = vpop.permute.xlu0 %418 }
  0x85   : > { %v427_v44 = vsel %vm344_vm0, %v419_v42, 0  ;;  %666 = vmatpush.bf16.msrb.mxu3 %v1841_v41 }
  0x86   : > { %436 = vmatpush.bf16.msra.mxu2 %v427_v44 }
  0x88   : > { %1576 = vmatmul.msk.bf16.vlgmr.msrb.gmra.mxu3 %vm337_vm1, %v1846_v43 }
  0x89   : > { %772 = vmatpush.bf16.msra.mxu3 %v763_v40  ;;  %1523 = vmatmul.msk.bf16.vlgmr.msra.gmra.mxu2 %vm337_vm1, %v1853_v45 }
  0x8b   : > { %v561_v46 = vpop.permute.xlu1 %560 }
  0x8c   : > { %v1861_v47 = vsel %vm344_vm0, %v561_v46, 0  ;;  %v605_v48 = vpop.permute.xlu0 %604 }
  0x8d   : > { %861 = vmatpush.bf16.msrb.mxu3 %v1841_v41  ;;  %578 = vmatpush.bf16.msrb.mxu1 %v1861_v47  ;;  %v613_v50 = vsel %vm344_vm0, %v605_v48, 0 }
  0x8e   : > { %622 = vmatpush.bf16.msrb.mxu2 %v613_v50 }
  0x90   : > { %1558 = vmatmul.msk.bf16.vlgmr.msrb.gmra.mxu1 %vm337_vm1, %v1866_v49 }
  0x91   : > { %731 = vmatpush.bf16.msra.mxu1 %v427_v44  ;;  %1593 = vmatmul.msk.bf16.vlgmr.msrb.gmra.mxu0 %vm337_vm1, %v1776_v19 }
  0x92   : > { %749 = vmatpush.bf16.msra.mxu2 %v1748_v8  ;;  %968 = vmatpush.bf16.msrb.mxu0 %v1861_v47 }
  0x93   : > { %v897_v63 = vpop.permute.xlu1 %896  ;;  %v357_v4 = vpop.f32.mrf.mxu0 }
  0x94   : > { %v829_v61 = vpop.permute.xlu0 %828  ;;  %v899_v1 = vsel %vm344_vm0, %v897_v63, 0  ;;  %v397_v7 = vpop.f32.mrf.mxu1 }
  0x95   : > { %814 = vmatpush.bf16.msrb.mxu1 %v1861_v47  ;;  %v1911_v62 = vsel %vm344_vm0, %v829_v61, 0  ;;  %v398_v8 = vadd.f32 %v397_v7, %v357_v4 }
  0x98   : > { %1577 = vmatmul.msk.bf16.gmra.mxu3 %vm337_vm1, %v1883_v55 }
  0x99   : > { %1524 = vmatmul.msk.bf16.gmra.mxu2 %vm337_vm1, %v1885_v56 }
  0x9b   : > { %v359_v10 = vpop.f32.mrf.mxu0  ;;  %v487_v21 = vpop.f32.mrf.mxu3 }
  0x9c   : > { %v1046_v5 = vpop.permute.xlu0 %1045  ;;  %v399_v11 = vpop.f32.mrf.mxu1 }
  0x9d   : > { %v1048_v6 = vsel %vm344_vm0, %v1046_v5, 0  ;;  %v1072_v22 = vpop.permute.xlu1 %1071  ;;  %v400_v51 = vadd.f32 %v399_v11, %v359_v10 }
  0x9e   : > { %v1961_v26 = vsel %vm344_vm0, %v1072_v22, 0 }
  0xa0   : > { %1559 = vmatmul.msk.bf16.gmra.mxu1 %vm337_vm1, %v1894_v59 }
  0xa1   : > { %1594 = vmatmul.msk.bf16.gmra.mxu0 %vm337_vm1, %v1808_v28 }
  0xa3   : > { %v362_v12 = vpop.f32.mrf.mxu0  ;;  %v489_v24 = vpop.f32.mrf.mxu3 }
  0xa4   : > { %v402_v14 = vpop.f32.mrf.mxu1 }
  0xa5   : > { %v403_v15 = vadd.f32 %v402_v14, %v362_v12 }
  0xa8   : > { %1591 = vmatmul.msk.bf16.vlgmr.msra.gmra.mxu3 %vm337_vm1, %v1853_v45 }
  0xa9   : > { %1567 = vmatmul.msk.bf16.vlgmr.msrb.gmra.mxu2 %vm337_vm1, %v1903_v60  ;;  %950 = vmatpush.bf16.msra.mxu3 %v1771_v18 }
  0xaa   : > { %840 = vmatpush.bf16.msrb.mxu2 %v1911_v62 }
  0xab   : > { %v364_v16 = vpop.f32.mrf.mxu0  ;;  %v492_v29 = vpop.f32.mrf.mxu3 }
  0xac   : > { %v404_v18 = vpop.f32.mrf.mxu1 }
  0xb0   : > { %1587 = vmatmul.msk.bf16.vlgmr.msra.gmra.mxu1 %vm337_vm1, %v1753_v9 }
  0xb1   : > { %1601 = vmatmul.msk.bf16.vlgmr.msra.gmra.mxu0 %vm337_vm1, %v1846_v43  ;;  %908 = vmatpush.bf16.msra.mxu1 %v899_v1 }
  0xb2   : > { %1057 = vmatpush.bf16.msra.mxu0 %v1048_v6 }
  0xb3   : > { %v494_v32 = vpop.f32.mrf.mxu3 }
  0xb8   : > { %1592 = vmatmul.msk.bf16.gmra.mxu3 %vm337_vm1, %v1885_v56 }
  0xb9   : > { %1568 = vmatmul.msk.bf16.gmra.mxu2 %vm337_vm1, %v1922_v3 }
  0xc0   : > { %1588 = vmatmul.msk.bf16.gmra.mxu1 %vm337_vm1, %v1766_v17 }
  0xc1   : > { %1602 = vmatmul.msk.bf16.gmra.mxu0 %vm337_vm1, %v1883_v55 }
  0xc8   : > { %1599 = vmatmul.msk.bf16.vlgmr.msrb.gmra.mxu3 %vm337_vm1, %v1903_v60 }
  0xc9   : > { %1589 = vmatmul.msk.bf16.vlgmr.msra.gmra.mxu2 %vm337_vm1, %v1801_v25  ;;  %1031 = vmatpush.bf16.msrb.mxu3 %v1820_v33 }
  0xca   : > { %932 = vmatpush.bf16.msra.mxu2 %v1757_v13 }
  0xd0   : > { %1595 = vmatmul.msk.bf16.vlgmr.msrb.gmra.mxu1 %vm337_vm1, %v1786_v20 }
  0xd1   : > { %989 = vmatpush.bf16.msrb.mxu1 %v613_v50  ;;  %1609 = vmatmul.msk.bf16.vlgmr.msrb.gmra.mxu0 %vm337_vm1, %v1853_v45 }
  0xd2   : > { %1151 = vmatpush.bf16.msrb.mxu0 %v1757_v13  ;;  %v536_v13 = vpop.f32.mrf.mxu0 }
  0xd8   : > { %1600 = vmatmul.msk.bf16.gmra.mxu3 %vm337_vm1, %v1922_v3 }
  0xd9   : > { %1590 = vmatmul.msk.bf16.gmra.mxu2 %vm337_vm1, %v1815_v31 }
  0xda   : > { %v538_v27 = vpop.f32.mrf.mxu0 }
  0xe0   : > { %1596 = vmatmul.msk.bf16.gmra.mxu1 %vm337_vm1, %v1793_v23 }
  0xe1   : > { %1610 = vmatmul.msk.bf16.gmra.mxu0 %vm337_vm1, %v1885_v56 }
  0xe2   : > { %v541_v30 = vpop.f32.mrf.mxu0 }
  0xe8   : > { %1607 = vmatmul.msk.bf16.vlgmr.msra.gmra.mxu3 %vm337_vm1, %v1801_v25 }
  0xe9   : > { %1597 = vmatmul.msk.bf16.vlgmr.msrb.gmra.mxu2 %vm337_vm1, %v1866_v49  ;;  %1133 = vmatpush.bf16.msra.mxu3 %v1861_v47 }
  0xea   : > { %1010 = vmatpush.bf16.msrb.mxu2 %v1841_v41  ;;  %v543_v35 = vpop.f32.mrf.mxu0 }
  0xf0   : > { %1603 = vmatmul.msk.bf16.vlgmr.msra.gmra.mxu1 %vm337_vm1, %v1825_v34 }
  0xf1   : > { %1617 = vmatmul.msk.bf16.vlgmr.msra.gmra.mxu0 %vm337_vm1, %v1903_v60  ;;  %1083 = vmatpush.bf16.msra.mxu1 %v1961_v26 }
  0xf2   : > { %1232 = vmatpush.bf16.msra.mxu0 %v899_v1  ;;  %v712_v39 = vpop.f32.mrf.mxu0 }
  0xf8   : > { %1608 = vmatmul.msk.bf16.gmra.mxu3 %vm337_vm1, %v1815_v31 }
  0xf9   : > { %1598 = vmatmul.msk.bf16.gmra.mxu2 %vm337_vm1, %v1894_v59 }
  0xfa   : > { %v714_v48 = vpop.f32.mrf.mxu0 }
 0x100   : > { %1604 = vmatmul.msk.bf16.gmra.mxu1 %vm337_vm1, %v1835_v37 }
 0x101   : > { %1618 = vmatmul.msk.bf16.gmra.mxu0 %vm337_vm1, %v1922_v3 }
 0x102   : > { %v717_v61 = vpop.f32.mrf.mxu0 }
 0x108   : > { %1615 = vmatmul.msk.bf16.vlgmr.msrb.gmra.mxu3 %vm337_vm1, %v1866_v49 }
 0x109   : > { %1605 = vmatmul.msk.bf16.vlgmr.msra.gmra.mxu2 %vm337_vm1, %v1753_v9  ;;  %1211 = vmatpush.bf16.msrb.mxu3 %v1820_v33 }
 0x10a   : > { %1109 = vmatpush.bf16.msra.mxu2 %v1975_v38  ;;  %v719_v5 = vpop.f32.mrf.mxu0 }
 0x10b   : > { %v668_v40 = vpop.f32.mrf.mxu3 }
 0x10c   : > { %v438_v42 = vpop.f32.mrf.mxu2 }
 0x10d   : > { %v447_v44 = vadd.f32 %v438_v42, %v398_v8  ;;  %v580_v46 = vpop.f32.mrf.mxu1 }
 0x10f   : > { %v496_v47 = vadd.f32 %v487_v21, %v447_v44 }
 0x110   : > { %1611 = vmatmul.msk.bf16.vlgmr.msrb.gmra.mxu1 %vm337_vm1, %v1776_v19 }
 0x111   : > { %v545_v50 = vadd.f32 %v536_v13, %v496_v47  ;;  %1169 = vmatpush.bf16.msrb.mxu1 %v1911_v62  ;;  %1625 = vmatmul.msk.bf16.vlgmr.msrb.gmra.mxu0 %vm337_vm1, %v1801_v25 }
 0x112   : > { %v795_v12 = vpop.f32.mrf.mxu0 }
 0x113   : > { %v589_v52 = vadd.f32 %v580_v46, %v545_v50  ;;  %v670_v33 = vpop.f32.mrf.mxu3 }
 0x114   : > { %v440_v53 = vpop.f32.mrf.mxu2 }
 0x115   : > { %v448_v54 = vadd.f32 %v440_v53, %v400_v51  ;;  %v582_v57 = vpop.f32.mrf.mxu1 }
 0x117   : > { %v497_v58 = vadd.f32 %v489_v24, %v448_v54 }
 0x118   : > { %1616 = vmatmul.msk.bf16.gmra.mxu3 %vm337_vm1, %v1894_v59 }
 0x119   : > { %v546_v63 = vadd.f32 %v538_v27, %v497_v58  ;;  %1606 = vmatmul.msk.bf16.gmra.mxu2 %vm337_vm1, %v1766_v17 }
 0x11b   : > { %v590_v0 = vadd.f32 %v582_v57, %v546_v63  ;;  %v673_v62 = vpop.f32.mrf.mxu3 }
 0x11c   : > { %v443_v1 = vpop.f32.mrf.mxu2 }
 0x11d   : > { %v449_v2 = vadd.f32 %v443_v1, %v403_v15  ;;  %v585_v25 = vpop.f32.mrf.mxu1 }
 0x11f   : > { %v498_v4 = vadd.f32 %v492_v29, %v449_v2 }
 0x120   : > { %1612 = vmatmul.msk.bf16.gmra.mxu1 %vm337_vm1, %v1808_v28 }
 0x121   : > { %v547_v6 = vadd.f32 %v541_v30, %v498_v4  ;;  %1626 = vmatmul.msk.bf16.gmra.mxu0 %vm337_vm1, %v1815_v31  ;;  %v797_v31 = vpop.f32.mrf.mxu0 }
 0x123   : > { %v591_v7 = vadd.f32 %v585_v25, %v547_v6  ;;  %v675_v8 = vpop.f32.mrf.mxu3 }
 0x124   : > { %v445_v10 = vpop.f32.mrf.mxu2 }
 0x125   : > { %v587_v11 = vpop.f32.mrf.mxu1 }
 0x128   : > { %1623 = vmatmul.msk.bf16.vlgmr.msra.gmra.mxu3 %vm337_vm1, %v1753_v9 }
 0x129   : > { %1613 = vmatmul.msk.bf16.vlgmr.msrb.gmra.mxu2 %vm337_vm1, %v1786_v20  ;;  %v800_v29 = vpop.f32.mrf.mxu0 }
 0x12a   : > { %1190 = vmatpush.bf16.msrb.mxu2 %v1841_v41 }
 0x12b   : > { %v774_v14 = vpop.f32.mrf.mxu3 }
 0x12c   : > { %v624_v15 = vpop.f32.mrf.mxu2 }
 0x12d   : > { %v633_v16 = vadd.f32 %v624_v15, %v589_v52  ;;  %v733_v18 = vpop.f32.mrf.mxu1 }
 0x12f   : > { %v677_v21 = vadd.f32 %v668_v40, %v633_v16 }
 0x130   : > { %1619 = vmatmul.msk.bf16.vlgmr.msra.gmra.mxu1 %vm337_vm1, %v1846_v43 }
 0x131   : > { %1253 = vmatpush.bf16.msra.mxu1 %v1961_v26  ;;  %v2004_v13 = vadd.f32 %v712_v39, %v677_v21  ;;  %1633 = vmatmul.msk.bf16.vlgmr.msra.gmra.mxu0 %vm337_vm1, %v1866_v49  ;;  %v802_v49 = vpop.f32.mrf.mxu0 }
 0x133   : > { %v776_v9 = vpop.f32.mrf.mxu3 }
 0x134   : > { %v626_v22 = vpop.f32.mrf.mxu2 }
 0x135   : > { %v634_v24 = vadd.f32 %v626_v22, %v590_v0  ;;  %v735_v41 = vpop.f32.mrf.mxu1 }
 0x137   : > { %v678_v27 = vadd.f32 %v670_v33, %v634_v24  ;;  %v1289_v33 = vpop.permute.xlu2 %1288 }
 0x138   : > { %1624 = vmatmul.msk.bf16.gmra.mxu3 %vm337_vm1, %v1766_v17 }
 0x139   : > { %1614 = vmatmul.msk.bf16.gmra.mxu2 %vm337_vm1, %v1793_v23  ;;  %v2012_v30 = vadd.f32 %v714_v48, %v678_v27  ;;  %v884_v46 = vpop.f32.mrf.mxu0 }
 0x13b   : > { %v779_v26 = vpop.f32.mrf.mxu3 }
 0x13c   : > { %v629_v32 = vpop.f32.mrf.mxu2 }
 0x13d   : > { %v635_v35 = vadd.f32 %v629_v32, %v591_v7  ;;  %v738_v36 = vpop.f32.mrf.mxu1 }
 0x13f   : > { %v679_v39 = vadd.f32 %v673_v62, %v635_v35 }
 0x140   : > { %1620 = vmatmul.msk.bf16.gmra.mxu1 %vm337_vm1, %v1883_v55 }
 0x141   : > { %v2016_v40 = vadd.f32 %v717_v61, %v679_v39  ;;  %1634 = vmatmul.msk.bf16.gmra.mxu0 %vm337_vm1, %v1894_v59  ;;  %v1291_v59 = vsel %vm344_vm0, %v1289_v33, 0  ;;  %v886_v53 = vpop.f32.mrf.mxu0 }
 0x142   : > { %1300 = vmatpush.bf16.msra.mxu3 %v1291_v59 }
 0x143   : > { %v781_v17 = vpop.f32.mrf.mxu3 }
 0x144   : > { %v631_v42 = vpop.f32.mrf.mxu2 }
 0x145   : > { %v740_v44 = vpop.f32.mrf.mxu1  ;;  %v1687_v42 = vmov 0  }
 0x146   : > { %1673 = vset.pattern.permute.xlu0 %v1687_v42  ;;  %1674 = vset.pattern.permute.xlu1 %v1687_v42 }
 0x147   : > { %1675 = vset.pattern.permute.xlu2 %v1687_v42 }
 0x148   : > { %1631 = vmatmul.msk.bf16.vlgmr.msrb.gmra.mxu3 %vm337_vm1, %v1786_v20 }
 0x149   : > { %1621 = vmatmul.msk.bf16.vlgmr.msra.gmra.mxu2 %vm337_vm1, %v1825_v34  ;;  %v889_v0 = vpop.f32.mrf.mxu0 }
 0x14a   : > { %1274 = vmatpush.bf16.msra.mxu2 %v1975_v38 }
 0x14b   : > { %v863_v47 = vpop.f32.mrf.mxu3 }
 0x14c   : > { %v751_v48 = vpop.f32.mrf.mxu2 }
 0x14d   : > { %v752_v50 = vadd.f32 %v751_v48, %v733_v18  ;;  %v816_v51 = vpop.f32.mrf.mxu1 }
 0x14f   : > { %v783_v52 = vadd.f32 %v774_v14, %v752_v50 }
 0x150   : > { %1627 = vmatmul.msk.bf16.vlgmr.msrb.gmra.mxu1 %vm337_vm1, %v1853_v45 }
 0x151   : > { %v804_v54 = vadd.f32 %v795_v12, %v783_v52  ;;  %v891_v6 = vpop.f32.mrf.mxu0 }
 0x153   : > { %v825_v20 = vadd.f32 %v816_v51, %v804_v54  ;;  %v865_v57 = vpop.f32.mrf.mxu3  ;;  %v1318_v51 = vld [vmem:[%s2134_s5 + $0x8] sm:$0xff] }
 0x154   : > { %v753_v58 = vpop.f32.mrf.mxu2  ;;  %1327 = vperm.xlu1 %1674, %v1318_v51  }
 0x155   : > { %v754_v61 = vadd.f32 %v753_v58, %v735_v41  ;;  %v818_v63 = vpop.f32.mrf.mxu1 }
 0x157   : > { %v784_v38 = vadd.f32 %v776_v9, %v754_v61 }
 0x158   : > { %1632 = vmatmul.msk.bf16.gmra.mxu3 %vm337_vm1, %v1793_v23 }
 0x159   : > { %v805_v62 = vadd.f32 %v797_v31, %v784_v38  ;;  %1622 = vmatmul.msk.bf16.gmra.mxu2 %vm337_vm1, %v1835_v37  ;;  %v970_v12 = vpop.f32.mrf.mxu0 }
 0x15b   : > { %v826_v45 = vadd.f32 %v818_v63, %v805_v62  ;;  %v868_v1 = vpop.f32.mrf.mxu3 }
 0x15c   : > { %v756_v2 = vpop.f32.mrf.mxu2 }
 0x15d   : > { %v757_v25 = vadd.f32 %v756_v2, %v738_v36  ;;  %v821_v4 = vpop.f32.mrf.mxu1 }
 0x15f   : > { %v785_v5 = vadd.f32 %v779_v26, %v757_v25 }
 0x160   : > { %1628 = vmatmul.msk.bf16.gmra.mxu1 %vm337_vm1, %v1885_v56 }
 0x161   : > { %v806_v7 = vadd.f32 %v800_v29, %v785_v5  ;;  %v972_v56 = vpop.f32.mrf.mxu0 }
 0x163   : > { %v827_v8 = vadd.f32 %v821_v4, %v806_v7  ;;  %v870_v10 = vpop.f32.mrf.mxu3 }
 0x164   : > { %v758_v11 = vpop.f32.mrf.mxu2 }
 0x165   : > { %v823_v23 = vpop.f32.mrf.mxu1 }
 0x166   : > { %v1319_v23 = vld [vmem:[%s2134_s5 + $0x10] sm:$0xff] }
 0x167   : > { %1332 = vperm.xlu2 %1675, %v1319_v23  }
 0x168   : > { %1639 = vmatmul.msk.bf16.vlgmr.msra.gmra.mxu3 %vm337_vm1, %v1825_v34 }
 0x169   : > { %1629 = vmatmul.msk.bf16.vlgmr.msrb.gmra.mxu2 %vm337_vm1, %v1776_v19  ;;  %v975_v29 = vpop.f32.mrf.mxu0 }
 0x16b   : > { %v952_v14 = vpop.f32.mrf.mxu3 }
 0x16c   : > { %v842_v15 = vpop.f32.mrf.mxu2 }
 0x16d   : > { %v851_v16 = vadd.f32 %v842_v15, %v825_v20  ;;  %v910_v18 = vpop.f32.mrf.mxu1 }
 0x16f   : > { %v872_v21 = vadd.f32 %v863_v47, %v851_v16 }
 0x170   : > { %1635 = vmatmul.msk.bf16.vlgmr.msra.gmra.mxu1 %vm337_vm1, %v1903_v60 }
 0x171   : > { %v893_v31 = vadd.f32 %v884_v46, %v872_v21 }
 0x173   : > { %v2040_v9 = vadd.f32 %v910_v18, %v893_v31  ;;  %v954_v22 = vpop.f32.mrf.mxu3 }
 0x174   : > { %v844_v24 = vpop.f32.mrf.mxu2 }
 0x175   : > { %v922_v34 = vmax.f32 %v2004_v13, %v2040_v9  ;;  %v852_v41 = vadd.f32 %v844_v24, %v826_v45  ;;  %v912_v27 = vpop.f32.mrf.mxu1 }
 0x177   : > { %v873_v19 = vadd.f32 %v865_v57, %v852_v41 }
 0x178   : > { %1640 = vmatmul.msk.bf16.gmra.mxu3 %vm337_vm1, %v1835_v37  ;;  %v977_v37 = vpop.f32.mrf.mxu0 }
 0x179   : > { %v894_v26 = vadd.f32 %v886_v53, %v873_v19  ;;  %1630 = vmatmul.msk.bf16.gmra.mxu2 %vm337_vm1, %v1808_v28  ;;  %v1317_v28 = vld [vmem:[%s2134_s5] sm:$0xff] }
 0x17a   : > { %1322 = vperm.xlu0 %1673, %v1317_v28  }
 0x17b   : > { %v2048_v60 = vadd.f32 %v912_v27, %v894_v26  ;;  %v957_v32 = vpop.f32.mrf.mxu3 }
 0x17c   : > { %v847_v35 = vpop.f32.mrf.mxu2 }
 0x17d   : > { %v923_v36 = vmax.f32 %v2012_v30, %v2048_v60  ;;  %v853_v39 = vadd.f32 %v847_v35, %v827_v8  ;;  %v915_v49 = vpop.f32.mrf.mxu1 }
 0x17f   : > { %v874_v17 = vadd.f32 %v868_v1, %v853_v39 }
 0x180   : > { %1636 = vmatmul.msk.bf16.gmra.mxu1 %vm337_vm1, %v1922_v3  ;;  %v1059_v52 = vpop.f32.mrf.mxu0 }
 0x181   : > { %v895_v44 = vadd.f32 %v889_v0, %v874_v17 }
 0x183   : > { %v2060_v46 = vadd.f32 %v915_v49, %v895_v44  ;;  %v959_v47 = vpop.f32.mrf.mxu3 }
 0x184   : > { %v849_v48 = vpop.f32.mrf.mxu2 }
 0x185   : > { %v924_v3 = vmax.f32 %v2016_v40, %v2060_v46  ;;  %v917_v50 = vpop.f32.mrf.mxu1 }
 0x188   : > { %v1061_v57 = vpop.f32.mrf.mxu0 }
 0x189   : > { %1637 = vmatmul.msk.bf16.vlgmr.msra.gmra.mxu2 %vm337_vm1, %v1846_v43 }
 0x18b   : > { %v1033_v33 = vpop.f32.mrf.mxu3 }
 0x18c   : > { %v934_v59 = vpop.f32.mrf.mxu2 }
 0x18d   : > { %v953_v53 = vadd.f32 %v952_v14, %v934_v59  ;;  %v991_v54 = vpop.f32.mrf.mxu1 }
 0x18f   : > { %v979_v20 = vadd.f32 %v970_v12, %v953_v53 }
 0x190   : > { %v1064_v45 = vpop.f32.mrf.mxu0 }
 0x191   : > { %v1000_v58 = vadd.f32 %v991_v54, %v979_v20 }
 0x193   : > { %v1035_v61 = vpop.f32.mrf.mxu3 }
 0x194   : > { %v936_v63 = vpop.f32.mrf.mxu2 }
 0x195   : > { %v955_v38 = vadd.f32 %v954_v22, %v936_v63  ;;  %v993_v0 = vpop.f32.mrf.mxu1 }
 0x197   : > { %v980_v62 = vadd.f32 %v972_v56, %v955_v38 }
 0x198   : > { %v1066_v6 = vpop.f32.mrf.mxu0 }
 0x199   : > { %v1001_v1 = vadd.f32 %v993_v0, %v980_v62  ;;  %1638 = vmatmul.msk.bf16.gmra.mxu2 %vm337_vm1, %v1883_v55  ;;  %v1341_v0 = vlaneseq }
 0x19b   : > { %v1038_v2 = vpop.f32.mrf.mxu3 }
 0x19c   : > { %v939_v25 = vpop.f32.mrf.mxu2 }
 0x19d   : > { %v958_v43 = vadd.f32 %v957_v32, %v939_v25  ;;  %v996_v4 = vpop.f32.mrf.mxu1  ;;  %v1342_v25 = vand.u32 127, %v1341_v0 }
 0x19f   : > { %v981_v5 = vadd.f32 %v975_v29, %v958_v43 }
 0x1a0   : > { %v1153_v12 = vpop.f32.mrf.mxu0 }
 0x1a1   : > { %v1002_v7 = vadd.f32 %v996_v4, %v981_v5  ;;  %v1346_v5 = vand.u32 65535, %v1342_v25 }
 0x1a3   : > { %v1040_v8 = vpop.f32.mrf.mxu3 }
 0x1a4   : > { %v941_v10 = vpop.f32.mrf.mxu2  ;;  %v1350_v8 = vmul.u32 52428, %v1346_v5 }
 0x1a5   : > { %v998_v11 = vpop.f32.mrf.mxu1 }
 0x1a6   : > { %v1353_v11 = vshll.u32 %v1350_v8, 16 }
 0x1a8   : > { %v1155_v31 = vpop.f32.mrf.mxu0 }
 0x1ab   : > { %v1135_v14 = vpop.f32.mrf.mxu3 }
 0x1ac   : > { %v1012_v15 = vpop.f32.mrf.mxu2  ;;  %v2074_v16 = vadd.f32 %v1153_v12, %v1135_v14 }
 0x1ad   : > { %v1021_v55 = vadd.f32 %v1012_v15, %v1000_v58  ;;  %v1085_v18 = vpop.f32.mrf.mxu1 }
 0x1af   : > { %v1042_v21 = vadd.f32 %v1033_v33, %v1021_v55 }
 0x1b0   : > { %v1158_v44 = vpop.f32.mrf.mxu0 }
 0x1b1   : > { %v1068_v56 = vadd.f32 %v1059_v52, %v1042_v21 }
 0x1b3   : > { %v1094_v22 = vadd.f32 %v1085_v18, %v1068_v56  ;;  %v1137_v24 = vpop.f32.mrf.mxu3 }
 0x1b4   : > { %v1014_v41 = vpop.f32.mrf.mxu2  ;;  %v2076_v27 = vadd.f32 %v1155_v31, %v1137_v24  ;;  %v1354_v31 = vshrl.u32 %v1350_v8, 16 }
 0x1b5   : > { %v1022_v19 = vadd.f32 %v1014_v41, %v1001_v1  ;;  %v1087_v29 = vpop.f32.mrf.mxu1 }
 0x1b7   : > { %v1043_v26 = vadd.f32 %v1035_v61, %v1022_v19 }
 0x1b8   : > { %v1160_v59 = vpop.f32.mrf.mxu0 }
 0x1b9   : > { %v1069_v32 = vadd.f32 %v1061_v57, %v1043_v26 }
 0x1bb   : > { %v1095_v35 = vadd.f32 %v1087_v29, %v1069_v32  ;;  %v1140_v39 = vpop.f32.mrf.mxu3 }
 0x1bc   : > { %v1017_v49 = vpop.f32.mrf.mxu2  ;;  %v2078_v47 = vadd.f32 %v1158_v44, %v1140_v39 }
 0x1bd   : > { %v1023_v17 = vadd.f32 %v1017_v49, %v1002_v7  ;;  %v1090_v28 = vpop.f32.mrf.mxu1  ;;  %v1347_v7 = vshrl.u32 %v1342_v25, 16 }
 0x1bf   : > { %v1044_v37 = vadd.f32 %v1038_v2, %v1023_v17  ;;  %v1351_v10 = vmul.u32 52429, %v1347_v7  ;;  %v1352_v55 = vmul.u32 52428, %v1347_v7 }
 0x1c0   : > { %v1234_v61 = vpop.f32.mrf.mxu0 }
 0x1c1   : > { %v1070_v48 = vadd.f32 %v1064_v45, %v1044_v37  ;;  %v1355_v14 = vshll.u32 %v1351_v10, 16  ;;  %v1356_v26 = vshrl.u32 %v1351_v10, 16 }
 0x1c3   : > { %v1096_v50 = vadd.f32 %v1090_v28, %v1070_v48  ;;  %v1142_v51 = vpop.f32.mrf.mxu3 }
 0x1c4   : > { %v1019_v52 = vpop.f32.mrf.mxu2 }
 0x1c5   : > { %v1092_v33 = vpop.f32.mrf.mxu1 }
 0x1c8   : > { %v1236_v2 = vpop.f32.mrf.mxu0 }
 0x1cb   : > { %v1213_v53 = vpop.f32.mrf.mxu3 }
 0x1cc   : > { %v1111_v54 = vpop.f32.mrf.mxu2 }
 0x1cd   : > { %v1120_v20 = vadd.f32 %v1111_v54, %v1094_v22  ;;  %v1171_v58 = vpop.f32.mrf.mxu1 }
 0x1ce   : > { %v1180_v49 = vadd.f32 %v1171_v58, %v2074_v16 }
 0x1cf   : > { %v2083_v57 = vmax.f32 %v922_v34, %v1120_v20 }
 0x1d0   : > { %v2097_v6 = vpop.f32.mrf.mxu0 }
 0x1d3   : > { %v1215_v63 = vpop.f32.mrf.mxu3 }
 0x1d4   : > { %v1113_v38 = vpop.f32.mrf.mxu2 }
 0x1d5   : > { %v1121_v62 = vadd.f32 %v1113_v38, %v1095_v35  ;;  %v1173_v45 = vpop.f32.mrf.mxu1 }
 0x1d7   : > { %v2088_v1 = vmax.f32 %v923_v36, %v1121_v62  ;;  %v1349_v36 = vmul.u32 52429, %v1346_v5 }
 0x1d8   : > { %v1241_v12 = vpop.f32.mrf.mxu0 }
 0x1d9   : > { %vm1357_vm2 = vc.u32 %v1349_v36, %v1353_v11  ;;  %v1359_v15 = vadd.s32 %v1353_v11, %v1349_v36 }
 0x1da   : > { %v1358_v40 = vsel %vm1357_vm2, 1, %v1687_v42 }
 0x1db   : > { %v2090_v43 = vpop.f32.mrf.mxu3  ;;  %vm1361_vm3 = vc.u32 %v1359_v15, %v1355_v14  ;;  %v1360_v21 = vadd.s32 %v1358_v40, %v1352_v55 }
 0x1dc   : > { %v1116_v4 = vpop.f32.mrf.mxu2  ;;  %v1362_v56 = vsel %vm1361_vm3, 1, %v1687_v42  ;;  %v1181_v42 = vadd.f32 %v1173_v45, %v2076_v27 }
 0x1dd   : > { %v1122_v13 = vadd.f32 %v1116_v4, %v1096_v50  ;;  %v1176_v9 = vpop.f32.mrf.mxu1  ;;  %v1364_v22 = vadd.s32 %v1362_v56, %v1360_v21 }
 0x1de   : > { %v1182_v16 = vadd.f32 %v1176_v9, %v2078_v47 }
 0x1df   : > { %v2095_v34 = vmax.f32 %v924_v3, %v1122_v13  ;;  %v1365_v29 = vadd.s32 %v1364_v22, %v1354_v31 }
 0x1e1   : > { %v1366_v32 = vadd.s32 %v1365_v29, %v1356_v26 }
 0x1e3   : > { %v1220_v30 = vpop.f32.mrf.mxu3  ;;  %v1367_v37 = vshrl.u32 %v1366_v32, 2 }
 0x1e4   : > { %v1118_v60 = vpop.f32.mrf.mxu2 }
 0x1e5   : > { %v1178_v23 = vpop.f32.mrf.mxu1  ;;  %v1368_v48 = vmul.u32 5, %v1367_v37  ;;  %v1328_v60 = vpop.permute.xlu1 %1327 }
 0x1e7   : > { %v1369_v54 = vsub.s32 %v1342_v25, %v1368_v48 }
 0x1e9   : > { %vm1372_vm4 = vcmp.ne.s32.totalorder %v1369_v54, 0  ;;  %vm1373_vm5 = vcmp.lt.s32.totalorder %v1369_v54, 0  ;;  %v1375_v62 = vadd.s32 5, %v1369_v54 }
 0x1ea   : > { %vm1374_vm6 = vmand %vm1373_vm5, %vm1372_vm4 }
 0x1eb   : > { %v1302_v18 = vpop.f32.mrf.mxu3  ;;  %v1376_v27 = vsel %vm1374_vm6, %v1375_v62, %v1369_v54 }
 0x1ec   : > { %v1192_v46 = vpop.f32.mrf.mxu2  ;;  %v1323_v13 = vpop.permute.xlu0 %1322  ;;  %vm2107_vm7 = vcmp.eq.s32.totalorder %v1376_v27, 4 }
 0x1ed   : > { %v1255_v3 = vpop.f32.mrf.mxu1  ;;  %v1201_v28 = vadd.f32 %v1192_v46, %v1180_v49 }
 0x1ef   : > { %v1222_v44 = vadd.f32 %v1213_v53, %v1201_v28 }
 0x1f1   : > { %v1243_v33 = vadd.f32 %v1234_v61, %v1222_v44 }
 0x1f3   : > { %v1304_v24 = vpop.f32.mrf.mxu3  ;;  %v1264_v20 = vadd.f32 %v1255_v3, %v1243_v33 }
 0x1f4   : > { %v1194_v41 = vpop.f32.mrf.mxu2 }
 0x1f5   : > { %v1257_v19 = vpop.f32.mrf.mxu1  ;;  %v1202_v59 = vadd.f32 %v1194_v41, %v1181_v42 }
 0x1f7   : > { %v1223_v38 = vadd.f32 %v1215_v63, %v1202_v59 }
 0x1f9   : > { %v1244_v53 = vadd.f32 %v1236_v2, %v1223_v38 }
 0x1fb   : > { %v1307_v35 = vpop.f32.mrf.mxu3  ;;  %v1265_v45 = vadd.f32 %v1257_v19, %v1244_v53 }
 0x1fc   : > { %v1197_v39 = vpop.f32.mrf.mxu2 }
 0x1fd   : > { %v1260_v17 = vpop.f32.mrf.mxu1  ;;  %v1203_v4 = vadd.f32 %v1197_v39, %v1182_v16 }
 0x1ff   : > { %v1224_v25 = vadd.f32 %v2090_v43, %v1203_v4 }
 0x201   : > { %v1245_v2 = vadd.f32 %v2097_v6, %v1224_v25 }
 0x203   : > { %v1309_v50 = vpop.f32.mrf.mxu3  ;;  %v1266_v10 = vadd.f32 %v1260_v17, %v1245_v2 }
 0x204   : > { %v1199_v51 = vpop.f32.mrf.mxu2 }
 0x205   : > { %v1262_v52 = vpop.f32.mrf.mxu1 }
 0x20c   : > { %v1276_v0 = vpop.f32.mrf.mxu2 }
 0x20d   : > { %v1285_v58 = vadd.f32 %v1276_v0, %v1264_v20 }
 0x20f   : > { %v1311_v5 = vadd.f32 %v1302_v18, %v1285_v58  ;;  %v1333_v18 = vpop.permute.xlu2 %1332 }
 0x211   : > { %v1314_v61 = vmax.f32 %v2083_v57, %v1311_v5 }
 0x213   : > { %v1335_v63 = vadd.f32 %v1323_v13, %v1314_v61 }
 0x214   : > { %v1278_v47 = vpop.f32.mrf.mxu2 }
 0x215   : > { %v1338_v9 = vmax.f32 %v1335_v63, 0.0  ;;  %v1286_v8 = vadd.f32 %v1278_v47, %v1265_v45 }
 0x217   : > { %v1378_v57 = vsel %vm2107_vm7, 0.0, %v1338_v9  ;;  %v1312_v43 = vadd.f32 %v1304_v24, %v1286_v8 }
 0x218   : > { %v1381_v30 = vpack.c.bf16 %v1378_v57, %v1378_v57 }
 0x219   : > { %v1315_v36 = vmax.f32 %v2088_v1, %v1312_v43 }
 0x21a   : > { %1385 = vst.msk [vmem:[%s311_s16] sm:$0xf] %vm1384_vm8, %v1381_v30 }
 0x21b   : > { %v1336_v11 = vadd.f32 %v1328_v60, %v1315_v36 }
 0x21c   : > { %v1281_v23 = vpop.f32.mrf.mxu2 }
 0x21d   : > { %v1339_v12 = vmax.f32 %v1336_v11, 0.0  ;;  %v1287_v6 = vadd.f32 %v1281_v23, %v1266_v10 }
 0x21f   : > { %v1379_v14 = vsel %vm2107_vm7, 0.0, %v1339_v12  ;;  %v1313_v15 = vadd.f32 %v1307_v35, %v1287_v6 }
 0x220   : > { %v1382_v55 = vpack.c.bf16 %v1379_v14, %v1379_v14 }
 0x221   : > { %v1316_v40 = vmax.f32 %v2095_v34, %v1313_v15 }
 0x222   : > { %1386 = vst.msk [vmem:[%s311_s16 + $0x4] sm:$0xf] %vm1384_vm8, %v1382_v55 }
 0x223   : > { %v1337_v46 = vadd.f32 %v1333_v18, %v1316_v40 }
 0x224   : > { %v1283_v3 = vpop.f32.mrf.mxu2 }
 0x225   : > { %v1340_v1 = vmax.f32 %v1337_v46, 0.0 }
 0x227   : > { %v1380_v21 = vsel %vm2107_vm7, 0.0, %v1340_v1 }
 0x228   : > { %v1383_v56 = vpack.c.bf16 %v1380_v21, %v1380_v21 }
 0x22a   : > { %1387 = vst.msk [vmem:[%s311_s16 + $0x8] sm:$0xf] %vm1384_vm8, %v1383_v56 }
 0x22b PF: > { %s16_s21 = sadd.s32 1, %s1682_s21  }
 0x22c   : > { %p13_p4 = scmp.ge.s32.totalorder %s16_s21, 4  }
 0x22e   :  { %15 = sbr.rel (!%p13_p4) target bundleno = 1 (0x1), region = 91 }

// kernel: autoencoder_forward.13
= control target key start
LH: loop header
LB: loop body
LE: loop exit
PB: predicated region body
PF: predicated region fallthrough
CT: control target
= control target key end

     0   :  { %s432_s12 = smov 0   ;;  %s486_s0 = inlined_call_operand.vmem [shape: bf16[2,24,16], index: 0, kind: input, shape index: {}]   ;;  %s487_s1 = inlined_call_operand.vmem [shape: bf16[48,24], index: 1, kind: input, shape index: {}]   ;;  %s488_s2 = inlined_call_operand.vmem [shape: f32[48,1], index: 2, kind: input, shape index: {}]   ;;  %s489_s3 = inlined_call_operand.vmem [shape: bf16[2,48,16], index: 3, kind: output, shape index: {}]  }
   0x1 LB: > { %s353_s13 = sadd.s32 4294967295, %s409_s12   ;;  %p357_p0 = scmp.ge.s32.totalorder %s409_s12, 1  ;;  %s409_s12 = sphi %s432_s12, %s13_s12  }
   0x2   : > { %p137_p1 = scmp.lt.s32.totalorder %s409_s12, 3 }
   0x4   : > { %p138_p2 = pnand %p357_p0, %p137_p1 }
   0x5   : > { %p161_p3 = scmp.lt.s32.totalorder (!%p138_p2), %s353_s13, 1 }
   0x6   : > { %141 = sbr.rel (%p138_p2) target bundleno = 177 (0xb1), region = 32 }
   0xb   : > { %v183_v0 = vld [vmem:[%s488_s2 + $0x10] sm:$0xff]  ;;  %v181_v1 = vld [vmem:[%s488_s2] sm:$0xff]  ;;  %s491_s13 = smov (!%p161_p3, %s353_s13), 1  ;;  %v411_v2 = vmov 0   ;;  %v184_v6 = vld [vmem:[%s488_s2 + $0x18] sm:$0xff]  ;;  %vm251_vm0 = vcmask 1043456  }
   0xc   : > { %401 = vset.pattern.permute.xlu1 %v411_v2  ;;  %400 = vset.pattern.permute.xlu0 %v411_v2  ;;  %v185_v3 = vld [vmem:[%s488_s2 + $0x20] sm:$0xff]  ;;  %s389_s20 = smul.u32 12, %s491_s13  ;;  %v182_v7 = vld [vmem:[%s488_s2 + $0x8] sm:$0xff]  ;;  %vm241_vm1 = vcmask 195584   ;;  %v383_v14 = vld [vmem:[%s487_s1 + $0x10] sm:$0xff]  ;;  %vm291_vm2 = vcmask 125952  }
   0xd   : > { %199 = vperm.xlu1 %401, %v183_v0   ;;  %189 = vperm.xlu0 %400, %v181_v1   ;;  %v186_v9 = vld [vmem:[%s488_s2 + $0x28] sm:$0xff]  ;;  %v381_v12 = vld [vmem:[%s487_s1] sm:$0xff]  ;;  %s390_s9 = smul.u32 24, %s491_s13 }
   0xe   : > { %402 = vset.pattern.permute.xlu2 %v411_v2  ;;  %s165_s23 = scalar_lea.vmem %s486_s0, %s389_s20  ;;  %v382_v13 = vld [vmem:[%s487_s1 + $0x8] sm:$0xff] }
   0xf   : > { %209 = vperm.xlu2 %402, %v185_v3   ;;  %v180_v4 = vld [vmem:[%s165_s23 + $0x8] sm:$0xf]  ;;  %v384_v11 = vld [vmem:[%s165_s23] sm:$0xff]  ;;  %s170_s14 = scalar_lea.vmem %s489_s3, %s390_s9 }
  0x10   : > { %v237_v5 = vunpack.c.l.b16 %v180_v4 }
  0x12   : > { %v239_v8 = vpack.c.b16 %v237_v5, %v237_v5 }
  0x14   : > { %v253_v10 = vsel %vm251_vm0, %v239_v8, 0 }
  0x15   : > { %204 = vperm.xlu1 %401, %v184_v6   ;;  %194 = vperm.xlu0 %400, %v182_v7  }
  0x16   : > { %261 = vmatpush.bf16.msra.mxu0 %v253_v10  ;;  %385 = vmatpush.bf16.msra.mxu1 %v253_v10 }
  0x17   : > { %386 = vmatpush.bf16.msra.mxu2 %v253_v10  ;;  %214 = vperm.xlu2 %402, %v186_v9  }
  0x1a   : > { %262 = vmatpush.bf16.msra.mxu0 %v384_v11  ;;  %387 = vmatpush.bf16.msra.mxu1 %v384_v11 }
  0x1b   : > { %388 = vmatpush.bf16.msra.mxu2 %v384_v11 }
  0x1d   : > { %376 = vmatmul.msk.bf16.vlgmr.msra.gmra.mxu0 %vm241_vm1, %v381_v12  ;;  %377 = vmatmul.msk.bf16.vlgmr.msra.gmra.mxu1 %vm241_vm1, %v382_v13 }
  0x1e   : > { %378 = vmatmul.msk.bf16.vlgmr.msra.gmra.mxu2 %vm241_vm1, %v383_v14 }
  0x69   : > { %v210_v23 = vpop.permute.xlu2 %209 }
  0x71   : > { %v215_v40 = vpop.permute.xlu2 %214 }
  0x7f   : > { %v200_v15 = vpop.permute.xlu1 %199  ;;  %v190_v16 = vpop.permute.xlu0 %189 }
  0x87   : > { %v205_v26 = vpop.permute.xlu1 %204  ;;  %v195_v27 = vpop.permute.xlu0 %194 }
  0x9a   : > { %v264_v17 = vpop.f32.mrf.mxu0  ;;  %v269_v18 = vpop.f32.mrf.mxu1 }
  0x9b   : > { %v265_v19 = vadd.f32 %v264_v17, %v190_v16  ;;  %v270_v20 = vadd.f32 %v269_v18, %v200_v15 }
  0x9d   : > { %v279_v21 = vmax.f32 %v265_v19, 0.0  ;;  %v281_v22 = vmax.f32 %v270_v20, 0.0 }
  0x9f   : > { %v285_v24 = vpack.c.bf16 %v279_v21, %v279_v21  ;;  %v287_v25 = vpack.c.bf16 %v281_v22, %v281_v22 }
  0xa1   : > { %292 = vst.msk [vmem:[%s170_s14] sm:$0xf] %vm291_vm2, %v285_v24  ;;  %v274_v28 = vpop.f32.mrf.mxu2 }
  0xa2   : > { %294 = vst.msk [vmem:[%s170_s14 + $0x8] sm:$0xf] %vm291_vm2, %v287_v25  ;;  %v275_v29 = vadd.f32 %v274_v28, %v210_v23  ;;  %v266_v30 = vpop.f32.mrf.mxu0  ;;  %v271_v31 = vpop.f32.mrf.mxu1 }
  0xa3   : > { %v267_v32 = vadd.f32 %v266_v30, %v195_v27  ;;  %v272_v33 = vadd.f32 %v271_v31, %v205_v26 }
  0xa4   : > { %v283_v34 = vmax.f32 %v275_v29, 0.0 }
  0xa5   : > { %v280_v35 = vmax.f32 %v267_v32, 0.0  ;;  %v282_v36 = vmax.f32 %v272_v33, 0.0 }
  0xa6   : > { %v289_v37 = vpack.c.bf16 %v283_v34, %v283_v34 }
  0xa7   : > { %v286_v38 = vpack.c.bf16 %v280_v35, %v280_v35  ;;  %v288_v39 = vpack.c.bf16 %v282_v36, %v282_v36 }
  0xa8   : > { %296 = vst.msk [vmem:[%s170_s14 + $0x10] sm:$0xf] %vm291_vm2, %v289_v37 }
  0xa9   : > { %293 = vst.msk [vmem:[%s170_s14 + $0x4] sm:$0xf] %vm291_vm2, %v286_v38  ;;  %v276_v41 = vpop.f32.mrf.mxu2 }
  0xaa   : > { %295 = vst.msk [vmem:[%s170_s14 + $0xc] sm:$0xf] %vm291_vm2, %v288_v39  ;;  %v277_v42 = vadd.f32 %v276_v41, %v215_v40 }
  0xac   : > { %v284_v43 = vmax.f32 %v277_v42, 0.0 }
  0xae   : > { %v290_v44 = vpack.c.bf16 %v284_v43, %v284_v43 }
  0xb0   : > { %297 = vst.msk [vmem:[%s170_s14 + $0x14] sm:$0xf] %vm291_vm2, %v290_v44 }
  0xb1 PF: > { %s13_s12 = sadd.s32 1, %s409_s12  }
  0xb2   : > { %p10_p4 = scmp.ge.s32.totalorder %s13_s12, 4  }
  0xb4   :  { %12 = sbr.rel (!%p10_p4) target bundleno = 1 (0x1), region = 62 }

// kernel: autoencoder_forward.11
= control target key start
LH: loop header
LB: loop body
LE: loop exit
PB: predicated region body
PF: predicated region fallthrough
CT: control target
= control target key end

     0   :  { %s1479_s21 = smov 0   ;;  %s1782_s0 = inlined_call_operand.vmem [shape: bf16[2,24,12], index: 0, kind: input, shape index: {}]   ;;  %s1783_s1 = inlined_call_operand.vmem [shape: bf16[2,24,12], index: 1, kind: input, shape index: {}]   ;;  %s1784_s2 = inlined_call_operand.vmem [shape: bf16[2,24,12], index: 2, kind: input, shape index: {}]   ;;  %s1785_s3 = inlined_call_operand.vmem [shape: bf16[2,24,12], index: 3, kind: input, shape index: {}]   ;;  %s1786_s4 = inlined_call_operand.vmem [shape: bf16[9,16,24], index: 4, kind: input, shape index: {}]   ;;  %s1787_s5 = inlined_call_operand.vmem [shape: f32[16,1], index: 5, kind: input, shape index: {}]   ;;  %s1788_s6 = inlined_call_operand.vmem [shape: bf16[2,16,6], index: 6, kind: output, shape index: {}]  }
   0x1 LB: > { %s1286_s22 = sadd.s32 4294967295, %s1438_s21   ;;  %p1290_p0 = scmp.ge.s32.totalorder %s1438_s21, 1  ;;  %s1438_s21 = sphi %s1479_s21, %s16_s21  }
   0x2   : > { %p242_p1 = scmp.lt.s32.totalorder %s1438_s21, 3 }
   0x4   : > { %p243_p2 = pnand %p1290_p0, %p242_p1 }
   0x5   : > { %p287_p3 = scmp.lt.s32.totalorder (!%p243_p2), %s1286_s22, 1  ;;  %s1440_s9 = smov (!%p243_p2), 125  }
   0x6   : > { %246 = sbr.rel (%p243_p2) target bundleno = 428 (0x1ac), region = 44  ;;  %s1441_s10 = smov (!%p243_p2), 127  }
   0x7   : > { %s1442_s11 = smov (!%p243_p2), 124  }
   0xb   : > { %s1792_s22 = smov (!%p287_p3, %s1286_s22), 1  ;;  %vm342_vm0 = vcmask 1043456   ;;  %v1532_v19 = vld [vmem:[%s1786_s4 + $0x8] sm:$0xff]  ;;  %vm338_vm1 = vcmask 195584   ;;  %v1559_v20 = vld [vmem:[%s1786_s4] sm:$0xff]  ;;  %v1564_v21 = vld [vmem:[%s1786_s4 + $0x18] sm:$0xff] }
   0xc   : > { %s1417_s23 = smul.u32 12, %s1792_s22  ;;  %v1581_v25 = vld [vmem:[%s1786_s4 + $0x20] sm:$0xff]  ;;  %v1599_v35 = vld [vmem:[%s1786_s4 + $0x10] sm:$0xff]  ;;  %v1616_v39 = vld [vmem:[%s1786_s4 + $0x28] sm:$0xff]  ;;  %s1403_s15 = sshll.u32 %s1792_s22, 3  ;;  %vm1192_vm8 = vcmask 44032  }
   0xd   : > { %v1621_v40 = vld [vmem:[%s1786_s4 + $0x38] sm:$0xff]  ;;  %v1636_v44 = vld [vmem:[%s1786_s4 + $0x30] sm:$0xff]  ;;  %v1641_v45 = vld [vmem:[%s1786_s4 + $0x40] sm:$0xff]  ;;  %s311_s18 = scalar_lea.vmem %s1788_s6, %s1403_s15 }
   0xe   : > { %s291_s26 = scalar_lea.vmem %s1782_s0, %s1417_s23  ;;  %s296_s29 = scalar_lea.vmem %s1783_s1, %s1417_s23 }
   0xf   : > { %v315_v0 = vld [vmem:[%s291_s26 + $0x8] sm:$0xf]  ;;  %s301_s8 = scalar_lea.vmem %s1784_s2, %s1417_s23  ;;  %v1404_v9 = vld [vmem:[%s291_s26] sm:$0xff]  ;;  %s306_s14 = scalar_lea.vmem %s1785_s3, %s1417_s23 }
  0x10   : > { %v370_v1 = vunpack.c.l.b16 %v315_v0  ;;  %v431_v2 = vld [vmem:[%s301_s8 + $0x8] sm:$0xf]  ;;  %v1505_v10 = vld [vmem:[%s296_s29] sm:$0xff] }
  0x11   : > { %v320_v3 = vld [vmem:[%s296_s29 + $0x8] sm:$0xf]  ;;  %v445_v4 = vunpack.c.l.b16 %v431_v2  ;;  %v1507_v11 = vld [vmem:[%s301_s8] sm:$0xff] }
  0x12   : > { %v372_v5 = vpack.c.b16 %v370_v1, %v370_v1  ;;  %v334_v7 = vunpack.c.l.b16 %v320_v3  ;;  %v473_v12 = vld [vmem:[%s306_s14 + $0x8] sm:$0xf]  ;;  %v1527_v17 = vld [vmem:[%s306_s14] sm:$0xff] }
  0x13   : > { %v447_v6 = vpack.c.b16 %v445_v4, %v445_v4  ;;  %v487_v13 = vunpack.c.l.b16 %v473_v12 }
  0x14   : > { %558 = vrot.lane.b32.xlu1 %v372_v5, %s1440_s9  ;;  %404 = vrot.lane.b32.xlu0 %v372_v5, %s1441_s10  ;;  %v336_v8 = vpack.c.b16 %v334_v7, %v334_v7  ;;  %v378_v15 = vsel %vm342_vm0, %v372_v5, 0  ;;  %v1135_v7 = vld [vmem:[%s1787_s5] sm:$0xff] }
  0x15   : > { %523 = vrot.lane.b32.xlu2 %v447_v6, %s1441_s10  ;;  %v1524_v16 = vsel %vm342_vm0, %v447_v6, 0  ;;  %386 = vmatpush.bf16.msra.mxu1 %v378_v15  ;;  %v489_v18 = vpack.c.b16 %v487_v13, %v487_v13 }
  0x16   : > { %v344_v14 = vsel %vm342_vm0, %v336_v8, 0  ;;  %461 = vmatpush.bf16.msra.mxu3 %v1524_v16 }
  0x17   : > { %352 = vmatpush.bf16.msra.mxu0 %v344_v14  ;;  %v1567_v22 = vsel %vm342_vm0, %v489_v18, 0 }
  0x19   : > { %387 = vmatpush.bf16.msra.mxu1 %v1404_v9 }
  0x1a   : > { %462 = vmatpush.bf16.msra.mxu3 %v1507_v11 }
  0x1b   : > { %353 = vmatpush.bf16.msra.mxu0 %v1505_v10 }
  0x1c   : > { %593 = vrot.lane.b32.xlu1 %v336_v8, %s1440_s9  ;;  %402 = vrot.lane.b32.xlu0 %v1404_v9, %s1441_s10 }
  0x1d   : > { %556 = vrot.lane.b32.xlu2 %v1404_v9, %s1440_s9  ;;  %1316 = vmatmul.msk.bf16.vlgmr.msra.gmra.mxu1 %vm338_vm1, %v1559_v20 }
  0x1e   : > { %1307 = vmatmul.msk.bf16.vlgmr.msra.gmra.mxu0 %vm338_vm1, %v1532_v19  ;;  %1334 = vmatmul.msk.bf16.vlgmr.msra.gmra.mxu3 %vm338_vm1, %v1564_v21 }
  0x1f   : > { %503 = vmatpush.bf16.msrb.mxu0 %v1567_v22 }
  0x23   : > { %504 = vmatpush.bf16.msrb.mxu0 %v1527_v17 }
  0x24   : > { %521 = vrot.lane.b32.xlu1 %v1507_v11, %s1441_s10  ;;  %591 = vrot.lane.b32.xlu0 %v1505_v10, %s1440_s9 }
  0x25   : > { %628 = vrot.lane.b32.xlu2 %v372_v5, %s1442_s11 }
  0x2c   : > { %626 = vrot.lane.b32.xlu1 %v1404_v9, %s1442_s11  ;;  %683 = vrot.lane.b32.xlu0 %v336_v8, %s1441_s10  ;;  %v1443_v9 = vmov 0  }
  0x2d   : > { %681 = vrot.lane.b32.xlu2 %v1505_v10, %s1441_s10  ;;  %1430 = vset.pattern.permute.xlu0 %v1443_v9 }
  0x2e   : > { %1345 = vmatmul.msk.bf16.vlgmr.msrb.gmra.mxu0 %vm338_vm1, %v1581_v25  ;;  %1431 = vset.pattern.permute.xlu1 %v1443_v9 }
  0x34   : > { %739 = vrot.lane.b32.xlu0 %v489_v18, %s1441_s10  ;;  %737 = vrot.lane.b32.xlu1 %v1527_v17, %s1441_s10 }
  0x35   : > { %795 = vrot.lane.b32.xlu2 %v336_v8, %s1442_s11 }
  0x3c   : > { %793 = vrot.lane.b32.xlu0 %v1505_v10, %s1442_s11  ;;  %961 = vrot.lane.b32.xlu1 %v447_v6, %s1442_s11 }
  0x3d   : > { %913 = vrot.lane.b32.xlu2 %v447_v6, %s1440_s9 }
  0x44   : > { %937 = vrot.lane.b32.xlu0 %v489_v18, %s1440_s9  ;;  %959 = vrot.lane.b32.xlu1 %v1507_v11, %s1442_s11 }
  0x45   : > { %911 = vrot.lane.b32.xlu2 %v1507_v11, %s1440_s9 }
  0x4c   : > { %935 = vrot.lane.b32.xlu0 %v1527_v17, %s1440_s9  ;;  %1111 = vrot.lane.b32.xlu1 %v489_v18, %s1442_s11 }
  0x4d   : > { %1109 = vrot.lane.b32.xlu2 %v1527_v17, %s1442_s11 }
  0x54   : > { %1139 = vperm.xlu0 %1430, %v1135_v7  }
  0x6f   : > { %v524_v23 = vpop.permute.xlu2 %523 }
  0x70   : > { %v1576_v24 = vsel %vm342_vm0, %v524_v23, 0 }
  0x71   : > { %538 = vmatpush.bf16.msrb.mxu1 %v1576_v24 }
  0x77   : > { %v1586_v26 = vpop.permute.xlu2 %556 }
  0x7f   : > { %v629_v27 = vpop.permute.xlu2 %628 }
  0x80   : > { %v1589_v28 = vsel %vm342_vm0, %v629_v27, 0 }
  0x81   : > { %643 = vmatpush.bf16.msra.mxu0 %v1589_v28 }
  0x86   : > { %v559_v29 = vpop.permute.xlu1 %558  ;;  %v405_v30 = vpop.permute.xlu0 %404 }
  0x87   : > { %v411_v31 = vsel %vm342_vm0, %v405_v30, 0  ;;  %v1594_v32 = vsel %vm342_vm0, %v559_v29, 0  ;;  %v682_v41 = vpop.permute.xlu2 %681 }
  0x88   : > { %419 = vmatpush.bf16.msra.mxu2 %v411_v31 }
  0x8e   : > { %v594_v33 = vpop.permute.xlu1 %593  ;;  %v403_v34 = vpop.permute.xlu0 %402 }
  0x8f   : > { %v1602_v36 = vsel %vm342_vm0, %v594_v33, 0  ;;  %420 = vmatpush.bf16.msra.mxu2 %v403_v34  ;;  %v796_v47 = vpop.permute.xlu2 %795 }
  0x90   : > { %608 = vmatpush.bf16.msrb.mxu3 %v1602_v36  ;;  %v799_v50 = vsel %vm342_vm0, %v796_v47, 0 }
  0x92   : > { %1323 = vmatmul.msk.bf16.vlgmr.msra.gmra.mxu2 %vm338_vm1, %v1599_v35 }
  0x93   : > { %573 = vmatpush.bf16.msrb.mxu2 %v1594_v32 }
  0x96   : > { %v1609_v37 = vpop.permute.xlu1 %521  ;;  %v1611_v38 = vpop.permute.xlu0 %591 }
  0x97   : > { %574 = vmatpush.bf16.msrb.mxu2 %v1586_v26  ;;  %539 = vmatpush.bf16.msrb.mxu1 %v1609_v37  ;;  %v914_v53 = vpop.permute.xlu2 %913 }
  0x98   : > { %609 = vmatpush.bf16.msrb.mxu3 %v1611_v38  ;;  %v917_v54 = vsel %vm342_vm0, %v914_v53, 0 }
  0x9a   : > { %1352 = vmatmul.msk.bf16.vlgmr.msrb.gmra.mxu1 %vm338_vm1, %v1616_v39  ;;  %v389_v0 = vpop.f32.mrf.mxu1 }
  0x9b   : > { %673 = vmatpush.bf16.msra.mxu2 %v344_v14  ;;  %659 = vmatpush.bf16.msra.mxu1 %v411_v31  ;;  %v355_v62 = vpop.f32.mrf.mxu0 }
  0x9c   : > { %1366 = vmatmul.msk.bf16.vlgmr.msrb.gmra.mxu3 %vm338_vm1, %v1621_v40  ;;  %v390_v2 = vadd.f32 %v389_v0, %v355_v62 }
  0x9e   : > { %v1631_v42 = vpop.permute.xlu1 %626  ;;  %v684_v43 = vpop.permute.xlu0 %683 }
  0x9f   : > { %674 = vmatpush.bf16.msra.mxu2 %v1505_v10  ;;  %660 = vmatpush.bf16.msra.mxu1 %v403_v34  ;;  %v687_v46 = vsel %vm342_vm0, %v684_v43, 0  ;;  %v912_v56 = vpop.permute.xlu2 %911 }
  0xa0   : > { %644 = vmatpush.bf16.msra.mxu0 %v1631_v42  ;;  %695 = vmatpush.bf16.msra.mxu3 %v687_v46 }
  0xa1   : > { %v464_v8 = vpop.f32.mrf.mxu3 }
  0xa2   : > { %1359 = vmatmul.msk.bf16.vlgmr.msrb.gmra.mxu2 %vm338_vm1, %v1636_v44  ;;  %v391_v5 = vpop.f32.mrf.mxu1 }
  0xa3   : > { %727 = vmatpush.bf16.msrb.mxu1 %v1576_v24  ;;  %1373 = vmatmul.msk.bf16.vlgmr.msra.gmra.mxu0 %vm338_vm1, %v1641_v45  ;;  %v357_v4 = vpop.f32.mrf.mxu0 }
  0xa4   : > { %711 = vmatpush.bf16.msrb.mxu0 %v1567_v22  ;;  %696 = vmatpush.bf16.msra.mxu3 %v682_v41  ;;  %v392_v6 = vadd.f32 %v391_v5, %v357_v4 }
  0xa6   : > { %v740_v48 = vpop.permute.xlu0 %739  ;;  %v738_v51 = vpop.permute.xlu1 %737 }
  0xa7   : > { %728 = vmatpush.bf16.msrb.mxu1 %v1609_v37  ;;  %v743_v49 = vsel %vm342_vm0, %v740_v48, 0  ;;  %v1110_v3 = vpop.permute.xlu2 %1109 }
  0xa8   : > { %712 = vmatpush.bf16.msrb.mxu0 %v1527_v17  ;;  %767 = vmatpush.bf16.msrb.mxu3 %v1602_v36 }
  0xa9   : > { %751 = vmatpush.bf16.msrb.mxu2 %v743_v49  ;;  %v466_v12 = vpop.f32.mrf.mxu3 }
  0xaa   : > { %1374 = vmatmul.msk.bf16.vlgmr.msra.gmra.mxu1 %vm338_vm1, %v1532_v19 }
  0xab   : > { %807 = vmatpush.bf16.msra.mxu1 %v799_v50  ;;  %v506_v10 = vpop.f32.mrf.mxu0 }
  0xac   : > { %783 = vmatpush.bf16.msra.mxu0 %v1589_v28  ;;  %768 = vmatpush.bf16.msrb.mxu3 %v1611_v38 }
  0xad   : > { %1376 = vmatmul.msk.bf16.vlgmr.msra.gmra.mxu3 %vm338_vm1, %v1599_v35  ;;  %752 = vmatpush.bf16.msrb.mxu2 %v738_v51 }
  0xae   : > { %v794_v52 = vpop.permute.xlu0 %793  ;;  %v962_v58 = vpop.permute.xlu1 %961 }
  0xaf   : > { %808 = vmatpush.bf16.msra.mxu1 %v794_v52  ;;  %v965_v60 = vsel %vm342_vm0, %v962_v58, 0 }
  0xb0   : > { %784 = vmatpush.bf16.msra.mxu0 %v1631_v42  ;;  %839 = vmatpush.bf16.msra.mxu3 %v1524_v16 }
  0xb2   : > { %1375 = vmatmul.msk.bf16.vlgmr.msra.gmra.mxu2 %vm338_vm1, %v1559_v20 }
  0xb3   : > { %1377 = vmatmul.msk.bf16.vlgmr.msrb.gmra.mxu0 %vm338_vm1, %v1564_v21  ;;  %825 = vmatpush.bf16.msra.mxu2 %v1567_v22  ;;  %v508_v14 = vpop.f32.mrf.mxu0 }
  0xb4   : > { %840 = vmatpush.bf16.msra.mxu3 %v1507_v11  ;;  %853 = vmatpush.bf16.msrb.mxu0 %v1576_v24  ;;  %v1136_v11 = vld [vmem:[%s1787_s5 + $0x8] sm:$0xff] }
  0xb5   : > { %1144 = vperm.xlu1 %1431, %v1136_v11  }
  0xb6   : > { %v938_v55 = vpop.permute.xlu0 %937  ;;  %v960_v61 = vpop.permute.xlu1 %959 }
  0xb7   : > { %826 = vmatpush.bf16.msra.mxu2 %v1527_v17  ;;  %v941_v57 = vsel %vm342_vm0, %v938_v55, 0 }
  0xb8   : > { %854 = vmatpush.bf16.msrb.mxu0 %v1609_v37 }
  0xba   : > { %1378 = vmatmul.msk.bf16.vlgmr.msrb.gmra.mxu1 %vm338_vm1, %v1581_v25 }
  0xbb   : > { %869 = vmatpush.bf16.msrb.mxu1 %v1594_v32 }
  0xbd   : > { %1380 = vmatmul.msk.bf16.vlgmr.msrb.gmra.mxu3 %vm338_vm1, %v1636_v44 }
  0xbe   : > { %901 = vmatpush.bf16.msrb.mxu3 %v1589_v28  ;;  %v936_v59 = vpop.permute.xlu0 %935  ;;  %v1112_v63 = vpop.permute.xlu1 %1111 }
  0xbf   : > { %870 = vmatpush.bf16.msrb.mxu1 %v1586_v26  ;;  %v1115_v1 = vsel %vm342_vm0, %v1112_v63, 0 }
  0xc2   : > { %902 = vmatpush.bf16.msrb.mxu3 %v1631_v42  ;;  %1379 = vmatmul.msk.bf16.vlgmr.msrb.gmra.mxu2 %vm338_vm1, %v1616_v39 }
  0xc3   : > { %1381 = vmatmul.msk.bf16.vlgmr.msra.gmra.mxu0 %vm338_vm1, %v1621_v40  ;;  %885 = vmatpush.bf16.msrb.mxu2 %v1602_v36 }
  0xc4   : > { %925 = vmatpush.bf16.msra.mxu0 %v917_v54 }
  0xc7   : > { %886 = vmatpush.bf16.msrb.mxu2 %v1611_v38 }
  0xc8   : > { %926 = vmatpush.bf16.msra.mxu0 %v912_v56 }
  0xca   : > { %1382 = vmatmul.msk.bf16.vlgmr.msra.gmra.mxu1 %vm338_vm1, %v1641_v45 }
  0xcb   : > { %949 = vmatpush.bf16.msra.mxu1 %v941_v57 }
  0xcd   : > { %1384 = vmatmul.msk.bf16.vlgmr.msra.gmra.mxu3 %vm338_vm1, %v1559_v20 }
  0xce   : > { %991 = vmatpush.bf16.msra.mxu3 %v1576_v24 }
  0xcf   : > { %950 = vmatpush.bf16.msra.mxu1 %v936_v59 }
  0xd2   : > { %992 = vmatpush.bf16.msra.mxu3 %v1609_v37  ;;  %1383 = vmatmul.msk.bf16.vlgmr.msra.gmra.mxu2 %vm338_vm1, %v1532_v19 }
  0xd3   : > { %1385 = vmatmul.msk.bf16.vlgmr.msrb.gmra.mxu0 %vm338_vm1, %v1599_v35  ;;  %973 = vmatpush.bf16.msra.mxu2 %v965_v60 }
  0xd4   : > { %1005 = vmatpush.bf16.msrb.mxu0 %v1567_v22 }
  0xd7   : > { %974 = vmatpush.bf16.msra.mxu2 %v960_v61 }
  0xd8   : > { %1006 = vmatpush.bf16.msrb.mxu0 %v1527_v17 }
  0xda   : > { %1386 = vmatmul.msk.bf16.vlgmr.msrb.gmra.mxu1 %vm338_vm1, %v1564_v21 }
  0xdb   : > { %1019 = vmatpush.bf16.msrb.mxu1 %v743_v49 }
  0xdd   : > { %1388 = vmatmul.msk.bf16.vlgmr.msrb.gmra.mxu3 %vm338_vm1, %v1616_v39 }
  0xde   : > { %1051 = vmatpush.bf16.msrb.mxu3 %v1589_v28 }
  0xdf   : > { %1020 = vmatpush.bf16.msrb.mxu1 %v738_v51 }
  0xe2   : > { %1052 = vmatpush.bf16.msrb.mxu3 %v1631_v42  ;;  %1387 = vmatmul.msk.bf16.vlgmr.msrb.gmra.mxu2 %vm338_vm1, %v1581_v25 }
  0xe3   : > { %1389 = vmatmul.msk.bf16.vlgmr.msra.gmra.mxu0 %vm338_vm1, %v1636_v44  ;;  %1035 = vmatpush.bf16.msrb.mxu2 %v1602_v36 }
  0xe4   : > { %1067 = vmatpush.bf16.msra.mxu0 %v799_v50 }
  0xe7   : > { %1036 = vmatpush.bf16.msrb.mxu2 %v1611_v38 }
  0xe8   : > { %1068 = vmatpush.bf16.msra.mxu0 %v794_v52 }
  0xea   : > { %1390 = vmatmul.msk.bf16.vlgmr.msra.gmra.mxu1 %vm338_vm1, %v1621_v40 }
  0xeb   : > { %1083 = vmatpush.bf16.msra.mxu1 %v941_v57 }
  0xed   : > { %1392 = vmatmul.msk.bf16.vlgmr.msra.gmra.mxu3 %vm338_vm1, %v1532_v19 }
  0xee   : > { %1123 = vmatpush.bf16.msra.mxu3 %v1115_v1 }
  0xef   : > { %1084 = vmatpush.bf16.msra.mxu1 %v936_v59 }
  0xf2   : > { %1124 = vmatpush.bf16.msra.mxu3 %v1110_v3  ;;  %1391 = vmatmul.msk.bf16.vlgmr.msra.gmra.mxu2 %vm338_vm1, %v1641_v45 }
  0xf3   : > { %1393 = vmatmul.msk.bf16.vlgmr.msrb.gmra.mxu0 %vm338_vm1, %v1559_v20  ;;  %1099 = vmatpush.bf16.msra.mxu2 %v965_v60 }
  0xf7   : > { %1100 = vmatpush.bf16.msra.mxu2 %v960_v61 }
  0xfa   : > { %1394 = vmatmul.msk.bf16.vlgmr.msrb.gmra.mxu1 %vm338_vm1, %v1599_v35 }
  0xfd   : > { %1396 = vmatmul.msk.bf16.vlgmr.msrb.gmra.mxu3 %vm338_vm1, %v1581_v25 }
 0x102   : > { %1395 = vmatmul.msk.bf16.vlgmr.msrb.gmra.mxu2 %vm338_vm1, %v1564_v21 }
 0x103   : > { %1397 = vmatmul.msk.bf16.vlgmr.msra.gmra.mxu0 %vm338_vm1, %v1616_v39 }
 0x10a   : > { %1398 = vmatmul.msk.bf16.vlgmr.msra.gmra.mxu1 %vm338_vm1, %v1636_v44 }
 0x10d   : > { %1400 = vmatmul.msk.bf16.vlgmr.msra.gmra.mxu3 %vm338_vm1, %v1641_v45 }
 0x112   : > { %1399 = vmatmul.msk.bf16.vlgmr.msra.gmra.mxu2 %vm338_vm1, %v1621_v40 }
 0x115   : > { %v422_v13 = vpop.f32.mrf.mxu2 }
 0x116   : > { %v427_v15 = vadd.f32 %v422_v13, %v390_v2 }
 0x117   : > { %v541_v16 = vpop.f32.mrf.mxu1 }
 0x118   : > { %v469_v17 = vadd.f32 %v464_v8, %v427_v15 }
 0x11a   : > { %v511_v18 = vadd.f32 %v506_v10, %v469_v17 }
 0x11c   : > { %v546_v19 = vadd.f32 %v541_v16, %v511_v18 }
 0x11d   : > { %v424_v20 = vpop.f32.mrf.mxu2 }
 0x11e   : > { %v428_v22 = vadd.f32 %v424_v20, %v392_v6 }
 0x11f   : > { %v611_v21 = vpop.f32.mrf.mxu3  ;;  %v543_v23 = vpop.f32.mrf.mxu1 }
 0x120   : > { %v646_v24 = vpop.f32.mrf.mxu0  ;;  %v470_v25 = vadd.f32 %v466_v12, %v428_v22 }
 0x122   : > { %v512_v26 = vadd.f32 %v508_v14, %v470_v25 }
 0x124   : > { %v547_v27 = vadd.f32 %v543_v23, %v512_v26 }
 0x125   : > { %v576_v28 = vpop.f32.mrf.mxu2 }
 0x126   : > { %v581_v30 = vadd.f32 %v576_v28, %v546_v19  ;;  %v1151_v19 = vlaneseq }
 0x127   : > { %v613_v29 = vpop.f32.mrf.mxu3  ;;  %v662_v32 = vpop.f32.mrf.mxu1 }
 0x128   : > { %v648_v31 = vpop.f32.mrf.mxu0  ;;  %v616_v33 = vadd.f32 %v611_v21, %v581_v30  ;;  %v1152_v21 = vand.u32 127, %v1151_v19 }
 0x12a   : > { %v1744_v34 = vadd.f32 %v646_v24, %v616_v33  ;;  %v1156_v25 = vand.u32 65535, %v1152_v21 }
 0x12c   : > { %v1160_v28 = vmul.u32 43690, %v1156_v25 }
 0x12d   : > { %v578_v35 = vpop.f32.mrf.mxu2 }
 0x12e   : > { %v582_v37 = vadd.f32 %v578_v35, %v547_v27  ;;  %v1157_v27 = vshrl.u32 %v1152_v21, 16  ;;  %v1163_v33 = vshll.u32 %v1160_v28, 16 }
 0x12f   : > { %v664_v38 = vpop.f32.mrf.mxu1 }
 0x130   : > { %v698_v36 = vpop.f32.mrf.mxu3  ;;  %v714_v39 = vpop.f32.mrf.mxu0  ;;  %v617_v40 = vadd.f32 %v613_v29, %v582_v37 }
 0x132   : > { %v1746_v41 = vadd.f32 %v648_v31, %v617_v40  ;;  %v1159_v31 = vmul.u32 43691, %v1156_v25 }
 0x134   : > { %vm1167_vm2 = vc.u32 %v1159_v31, %v1163_v33  ;;  %v1169_v37 = vadd.s32 %v1163_v33, %v1159_v31 }
 0x135   : > { %v676_v42 = vpop.f32.mrf.mxu2  ;;  %v1168_v40 = vsel %vm1167_vm2, 1, %v1443_v9 }
 0x136   : > { %v677_v44 = vadd.f32 %v676_v42, %v662_v32  ;;  %v1161_v32 = vmul.u32 43691, %v1157_v27 }
 0x137   : > { %v730_v46 = vpop.f32.mrf.mxu1 }
 0x138   : > { %v700_v43 = vpop.f32.mrf.mxu3  ;;  %v716_v45 = vpop.f32.mrf.mxu0  ;;  %v703_v47 = vadd.f32 %v698_v36, %v677_v44  ;;  %v1165_v36 = vshll.u32 %v1161_v32, 16 }
 0x13a   : > { %v719_v48 = vadd.f32 %v714_v39, %v703_v47  ;;  %v1162_v39 = vmul.u32 43690, %v1157_v27  ;;  %vm1171_vm3 = vc.u32 %v1169_v37, %v1165_v36 }
 0x13c   : > { %v735_v49 = vadd.f32 %v730_v46, %v719_v48  ;;  %v1170_v44 = vadd.s32 %v1168_v40, %v1162_v39  ;;  %v1172_v46 = vsel %vm1171_vm3, 1, %v1443_v9  ;;  %v1164_v48 = vshrl.u32 %v1160_v28, 16 }
 0x13d   : > { %v678_v50 = vpop.f32.mrf.mxu2 }
 0x13e   : > { %v679_v52 = vadd.f32 %v678_v50, %v664_v38 }
 0x13f   : > { %v732_v53 = vpop.f32.mrf.mxu1 }
 0x140   : > { %v770_v51 = vpop.f32.mrf.mxu3  ;;  %v786_v54 = vpop.f32.mrf.mxu0  ;;  %v704_v55 = vadd.f32 %v700_v43, %v679_v52 }
 0x142   : > { %v720_v56 = vadd.f32 %v716_v45, %v704_v55 }
 0x144   : > { %v736_v57 = vadd.f32 %v732_v53, %v720_v56  ;;  %v1166_v53 = vshrl.u32 %v1161_v32, 16 }
 0x145   : > { %v754_v58 = vpop.f32.mrf.mxu2 }
 0x146   : > { %v759_v60 = vadd.f32 %v754_v58, %v735_v49  ;;  %v1174_v49 = vadd.s32 %v1172_v46, %v1170_v44 }
 0x147   : > { %v810_v62 = vpop.f32.mrf.mxu1 }
 0x148   : > { %v772_v59 = vpop.f32.mrf.mxu3  ;;  %v788_v61 = vpop.f32.mrf.mxu0  ;;  %v775_v63 = vadd.f32 %v770_v51, %v759_v60 }
 0x14a   : > { %v791_v0 = vadd.f32 %v786_v54, %v775_v63  ;;  %v1175_v54 = vadd.s32 %v1174_v49, %v1164_v48 }
 0x14c   : > { %v1748_v1 = vadd.f32 %v810_v62, %v791_v0 }
 0x14d   : > { %v756_v2 = vpop.f32.mrf.mxu2 }
 0x14e   : > { %v817_v4 = vmax.f32 %v1744_v34, %v1748_v1  ;;  %v760_v5 = vadd.f32 %v756_v2, %v736_v57 }
 0x14f   : > { %v812_v6 = vpop.f32.mrf.mxu1 }
 0x150   : > { %v842_v3 = vpop.f32.mrf.mxu3  ;;  %v776_v7 = vadd.f32 %v772_v59, %v760_v5  ;;  %v856_v8 = vpop.f32.mrf.mxu0  ;;  %v1176_v59 = vadd.s32 %v1175_v54, %v1166_v53 }
 0x151   : > { %v1145_v53 = vpop.permute.xlu1 %1144 }
 0x152   : > { %v792_v10 = vadd.f32 %v788_v61, %v776_v7  ;;  %v1177_v2 = vshrl.u32 %v1176_v59, 1 }
 0x154   : > { %v1752_v11 = vadd.f32 %v812_v6, %v792_v10  ;;  %v1178_v10 = vmul.u32 3, %v1177_v2 }
 0x155   : > { %v828_v12 = vpop.f32.mrf.mxu2 }
 0x156   : > { %v818_v14 = vmax.f32 %v1746_v41, %v1752_v11  ;;  %v843_v47 = vadd.f32 %v842_v3, %v828_v12 }
 0x157   : > { %v872_v15 = vpop.f32.mrf.mxu1 }
 0x158   : > { %v844_v13 = vpop.f32.mrf.mxu3  ;;  %v858_v16 = vpop.f32.mrf.mxu0  ;;  %v861_v52 = vadd.f32 %v856_v8, %v843_v47 }
 0x15a   : > { %v877_v58 = vadd.f32 %v872_v15, %v861_v52 }
 0x15d   : > { %v830_v17 = vpop.f32.mrf.mxu2 }
 0x15e   : > { %v845_v60 = vadd.f32 %v844_v13, %v830_v17 }
 0x15f   : > { %v874_v20 = vpop.f32.mrf.mxu1 }
 0x160   : > { %v904_v18 = vpop.f32.mrf.mxu3  ;;  %v928_v22 = vpop.f32.mrf.mxu0  ;;  %v862_v9 = vadd.f32 %v858_v16, %v845_v60 }
 0x162   : > { %v878_v8 = vadd.f32 %v874_v20, %v862_v9 }
 0x165   : > { %v888_v23 = vpop.f32.mrf.mxu2 }
 0x166   : > { %v893_v61 = vadd.f32 %v888_v23, %v877_v58  ;;  %v1179_v23 = vsub.s32 %v1152_v21, %v1178_v10 }
 0x167   : > { %v952_v26 = vpop.f32.mrf.mxu1 }
 0x168   : > { %v906_v24 = vpop.f32.mrf.mxu3  ;;  %v930_v35 = vpop.f32.mrf.mxu0  ;;  %v909_v5 = vadd.f32 %v904_v18, %v893_v61  ;;  %vm1182_vm4 = vcmp.ne.s32.totalorder %v1179_v23, 0  ;;  %vm1183_vm5 = vcmp.lt.s32.totalorder %v1179_v23, 0  ;;  %v1185_v40 = vadd.s32 3, %v1179_v23 }
 0x169   : > { %vm1184_vm6 = vmand %vm1183_vm5, %vm1182_vm4 }
 0x16a   : > { %v933_v25 = vadd.f32 %v928_v22, %v909_v5  ;;  %v1186_v44 = vsel %vm1184_vm6, %v1185_v40, %v1179_v23 }
 0x16b   : > { %vm1765_vm7 = vcmp.eq.s32.totalorder %v1186_v44, 2 }
 0x16c   : > { %v957_v31 = vadd.f32 %v952_v26, %v933_v25 }
 0x16d   : > { %v890_v29 = vpop.f32.mrf.mxu2 }
 0x16e   : > { %v894_v28 = vadd.f32 %v890_v29, %v878_v8 }
 0x16f   : > { %v1756_v38 = vpop.f32.mrf.mxu1 }
 0x170   : > { %v994_v30 = vpop.f32.mrf.mxu3  ;;  %v1008_v45 = vpop.f32.mrf.mxu0  ;;  %v910_v32 = vadd.f32 %v906_v24, %v894_v28 }
 0x171   : > { %v1009_v56 = vadd.f32 %v1008_v45, %v994_v30 }
 0x172   : > { %v934_v39 = vadd.f32 %v930_v35, %v910_v32 }
 0x175   : > { %v976_v42 = vpop.f32.mrf.mxu2 }
 0x176   : > { %v981_v33 = vadd.f32 %v976_v42, %v957_v31  ;;  %v1140_v42 = vpop.permute.xlu0 %1139 }
 0x177   : > { %v1022_v50 = vpop.f32.mrf.mxu1 }
 0x178   : > { %v996_v43 = vpop.f32.mrf.mxu3  ;;  %v1010_v57 = vpop.f32.mrf.mxu0  ;;  %v1027_v63 = vadd.f32 %v1022_v50, %v1009_v56  ;;  %v983_v29 = vmax.f32 %v817_v4, %v981_v33 }
 0x179   : > { %v1011_v12 = vadd.f32 %v1010_v57, %v996_v43  ;;  %v958_v43 = vadd.f32 %v1756_v38, %v934_v39 }
 0x17d   : > { %v978_v51 = vpop.f32.mrf.mxu2 }
 0x17e   : > { %v982_v46 = vadd.f32 %v978_v51, %v958_v43 }
 0x17f   : > { %v1024_v0 = vpop.f32.mrf.mxu1 }
 0x180   : > { %v1054_v55 = vpop.f32.mrf.mxu3  ;;  %v1070_v6 = vpop.f32.mrf.mxu0  ;;  %v1028_v15 = vadd.f32 %v1024_v0, %v1011_v12  ;;  %v984_v4 = vmax.f32 %v818_v14, %v982_v46 }
 0x185   : > { %v1038_v62 = vpop.f32.mrf.mxu2 }
 0x186   : > { %v1043_v3 = vadd.f32 %v1038_v62, %v1027_v63 }
 0x187   : > { %v1086_v30 = vpop.f32.mrf.mxu1 }
 0x188   : > { %v1056_v7 = vpop.f32.mrf.mxu3  ;;  %v1059_v19 = vadd.f32 %v1054_v55, %v1043_v3  ;;  %v1072_v18 = vpop.f32.mrf.mxu0 }
 0x18a   : > { %v1075_v13 = vadd.f32 %v1070_v6, %v1059_v19 }
 0x18c   : > { %v1091_v16 = vadd.f32 %v1086_v30, %v1075_v13 }
 0x18d   : > { %v1040_v27 = vpop.f32.mrf.mxu2 }
 0x18e   : > { %v1044_v17 = vadd.f32 %v1040_v27, %v1028_v15 }
 0x18f   : > { %v1088_v24 = vpop.f32.mrf.mxu1 }
 0x190   : > { %v1060_v36 = vadd.f32 %v1056_v7, %v1044_v17  ;;  %v1126_v37 = vpop.f32.mrf.mxu3 }
 0x192   : > { %v1076_v21 = vadd.f32 %v1072_v18, %v1060_v36 }
 0x194   : > { %v1092_v47 = vadd.f32 %v1088_v24, %v1076_v21 }
 0x195   : > { %v1102_v20 = vpop.f32.mrf.mxu2 }
 0x196   : > { %v1107_v22 = vadd.f32 %v1102_v20, %v1091_v16 }
 0x198   : > { %v1131_v26 = vadd.f32 %v1126_v37, %v1107_v22  ;;  %v1128_v1 = vpop.f32.mrf.mxu3 }
 0x19a   : > { %v1133_v45 = vmax.f32 %v983_v29, %v1131_v26 }
 0x19c   : > { %v1147_v48 = vadd.f32 %v1140_v42, %v1133_v45 }
 0x19d   : > { %v1104_v49 = vpop.f32.mrf.mxu2 }
 0x19e   : > { %v1149_v50 = vmax.f32 %v1147_v48, 0.0  ;;  %v1108_v34 = vadd.f32 %v1104_v49, %v1092_v47 }
 0x1a0   : > { %v1188_v38 = vsel %vm1765_vm7, 0.0, %v1149_v50  ;;  %v1132_v51 = vadd.f32 %v1128_v1, %v1108_v34 }
 0x1a1   : > { %v1190_v52 = vpack.c.bf16 %v1188_v38, %v1188_v38 }
 0x1a2   : > { %v1134_v54 = vmax.f32 %v984_v4, %v1132_v51 }
 0x1a3   : > { %1193 = vst.msk [vmem:[%s311_s18] sm:$0xf] %vm1192_vm8, %v1190_v52 }
 0x1a4   : > { %v1148_v55 = vadd.f32 %v1145_v53, %v1134_v54 }
 0x1a6   : > { %v1150_v56 = vmax.f32 %v1148_v55, 0.0 }
 0x1a8   : > { %v1189_v57 = vsel %vm1765_vm7, 0.0, %v1150_v56 }
 0x1a9   : > { %v1191_v41 = vpack.c.bf16 %v1189_v57, %v1189_v57 }
 0x1ab   : > { %1194 = vst.msk [vmem:[%s311_s18 + $0x4] sm:$0xf] %vm1192_vm8, %v1191_v41 }
 0x1ac PF: > { %s16_s21 = sadd.s32 1, %s1438_s21  }
 0x1ad   : > { %p13_p4 = scmp.ge.s32.totalorder %s16_s21, 4  }
 0x1af   :  { %15 = sbr.rel (!%p13_p4) target bundleno = 1 (0x1), region = 91 }

// kernel: autoencoder_forward.14
= control target key start
LH: loop header
LB: loop body
LE: loop exit
PB: predicated region body
PF: predicated region fallthrough
CT: control target
= control target key end

     0   :  { %s367_s12 = smov 0   ;;  %s403_s0 = inlined_call_operand.vmem [shape: bf16[2,12,64], index: 0, kind: input, shape index: {}]   ;;  %s404_s1 = inlined_call_operand.vmem [shape: bf16[24,12], index: 1, kind: input, shape index: {}]   ;;  %s405_s2 = inlined_call_operand.vmem [shape: f32[24,1], index: 2, kind: input, shape index: {}]   ;;  %s406_s3 = inlined_call_operand.vmem [shape: bf16[2,24,64], index: 3, kind: output, shape index: {}]  }
   0x1 LB: > { %s302_s13 = sadd.s32 4294967295, %s344_s12   ;;  %p306_p0 = scmp.ge.s32.totalorder %s344_s12, 1  ;;  %s344_s12 = sphi %s367_s12, %s13_s12  }
   0x2   : > { %p137_p1 = scmp.lt.s32.totalorder %s344_s12, 3 }
   0x4   : > { %p138_p2 = pnand %p306_p0, %p137_p1 }
   0x5   : > { %p161_p3 = scmp.lt.s32.totalorder (!%p138_p2), %s302_s13, 1 }
   0x6   : > { %141 = sbr.rel (%p138_p2) target bundleno = 162 (0xa2), region = 32 }
   0xb   : > { %v177_v0 = vld [vmem:[%s405_s2] sm:$0xff]  ;;  %v179_v1 = vld [vmem:[%s405_s2 + $0x10] sm:$0xff]  ;;  %s408_s13 = smov (!%p161_p3, %s302_s13), 1  ;;  %v174_v2 = vld [vmem:[%s404_s1 + $0x8] sm:$0xf]  ;;  %v346_v3 = vmov 0  }
   0xc   : > { %336 = vset.pattern.permute.xlu0 %v346_v3  ;;  %337 = vset.pattern.permute.xlu1 %v346_v3  ;;  %s322_s20 = sshll.u32 %s408_s13, 3  ;;  %v200_v4 = vunpack.c.l.b16 %v174_v2  ;;  %vm215_vm0 = vcmask 1045504   ;;  %v178_v8 = vld [vmem:[%s405_s2 + $0x8] sm:$0xff]  ;;  %v323_v10 = vld [vmem:[%s404_s1] sm:$0xff]  ;;  %vm208_vm1 = vcmask 97280   ;;  %s326_s28 = smul.u32 12, %s408_s13 }
   0xd   : > { %182 = vperm.xlu0 %336, %v177_v0   ;;  %192 = vperm.xlu1 %337, %v179_v1   ;;  %s165_s23 = scalar_lea.vmem %s403_s0, %s322_s20  ;;  %vm243_vm2 = vcmask 519168  }
   0xe   : > { %v316_v5 = vld [vmem:[%s165_s23] sm:$0xf]  ;;  %v324_v6 = vld [vmem:[%s165_s23] sm:$0x30]  ;;  %v202_v11 = vpack.c.b16 %v200_v4, %v200_v4  ;;  %s170_s4 = scalar_lea.vmem %s406_s3, %s326_s28 }
   0xf   : > { %v317_v7 = vor.u32 %v324_v6, %v316_v5 }
  0x11   : > { %v217_v9 = vsel %vm215_vm0, %v317_v7, 0 }
  0x12   : > { %226 = vmatpush.bf16.msra.mxu0 %v217_v9  ;;  %325 = vmatpush.bf16.msra.mxu1 %v217_v9 }
  0x15   : > { %187 = vperm.xlu0 %336, %v178_v8   ;;  %318 = vmatmul.msk.bf16.vlgmr.msra.gmra.mxu0 %vm208_vm1, %v323_v10 }
  0x16   : > { %319 = vmatmul.msk.bf16.vlgmr.msra.gmra.mxu1 %vm208_vm1, %v202_v11 }
  0x7f   : > { %v183_v12 = vpop.permute.xlu0 %182  ;;  %v193_v13 = vpop.permute.xlu1 %192 }
  0x87   : > { %v188_v22 = vpop.permute.xlu0 %187 }
  0x92   : > { %v228_v14 = vpop.f32.mrf.mxu0 }
  0x93   : > { %v233_v15 = vpop.f32.mrf.mxu1  ;;  %v229_v16 = vadd.f32 %v228_v14, %v183_v12 }
  0x94   : > { %v234_v17 = vadd.f32 %v233_v15, %v193_v13 }
  0x95   : > { %v237_v18 = vmax.f32 %v229_v16, 0.0 }
  0x96   : > { %v239_v19 = vmax.f32 %v234_v17, 0.0 }
  0x97   : > { %v240_v20 = vpack.c.bf16 %v237_v18, %v237_v18 }
  0x98   : > { %v242_v21 = vpack.c.bf16 %v239_v19, %v239_v19 }
  0x99   : > { %244 = vst.msk [vmem:[%s170_s4] sm:$0xf] %vm243_vm2, %v240_v20 }
  0x9a   : > { %246 = vst.msk [vmem:[%s170_s4 + $0x8] sm:$0xf] %vm243_vm2, %v242_v21  ;;  %v230_v23 = vpop.f32.mrf.mxu0 }
  0x9b   : > { %v235_v24 = vpop.f32.mrf.mxu1  ;;  %v231_v25 = vadd.f32 %v230_v23, %v188_v22 }
  0x9d   : > { %v238_v26 = vmax.f32 %v231_v25, 0.0 }
  0x9f   : > { %v241_v27 = vpack.c.bf16 %v238_v26, %v238_v26 }
  0xa1   : > { %245 = vst.msk [vmem:[%s170_s4 + $0x4] sm:$0xf] %vm243_vm2, %v241_v27 }
  0xa2 PF: > { %s13_s12 = sadd.s32 1, %s344_s12  }
  0xa3   : > { %p10_p4 = scmp.ge.s32.totalorder %s13_s12, 4  }
  0xa5   :  { %12 = sbr.rel (!%p10_p4) target bundleno = 1 (0x1), region = 62 }

// kernel: autoencoder_forward.15
= control target key start
LH: loop header
LB: loop body
LE: loop exit
PB: predicated region body
PF: predicated region fallthrough
CT: control target
= control target key end

     0   :  { %s450_s12 = smov 0   ;;  %s489_s0 = inlined_call_operand.vmem [shape: bf16[2,6,256], index: 0, kind: input, shape index: {}]   ;;  %s490_s1 = inlined_call_operand.vmem [shape: bf16[12,6], index: 1, kind: input, shape index: {}]   ;;  %s491_s2 = inlined_call_operand.vmem [shape: f32[12,1], index: 2, kind: input, shape index: {}]   ;;  %s492_s3 = inlined_call_operand.vmem [shape: f32[2,12,256], index: 3, kind: output, shape index: {}]  }
   0x1 LB: > { %s371_s13 = sadd.s32 4294967295, %s427_s12   ;;  %p375_p0 = scmp.ge.s32.totalorder %s427_s12, 1  ;;  %s427_s12 = sphi %s450_s12, %s13_s12  }
   0x2   : > { %p137_p1 = scmp.lt.s32.totalorder %s427_s12, 3 }
   0x4   : > { %p138_p2 = pnand %p375_p0, %p137_p1 }
   0x5   : > { %p161_p3 = scmp.lt.s32.totalorder (!%p138_p2), %s371_s13, 1 }
   0x6   : > { %141 = sbr.rel (%p138_p2) target bundleno = 191 (0xbf), region = 32 }
   0xb   : > { %v175_v0 = vld [vmem:[%s491_s2] sm:$0xff]  ;;  %s494_s13 = smov (!%p161_p3, %s371_s13), 1  ;;  %v429_v1 = vmov 0   ;;  %vm201_vm0 = vcmask 1042432   ;;  %v176_v7 = vld [vmem:[%s491_s2 + $0x8] sm:$0xf] }
   0xc   : > { %404 = vset.pattern.permute.xlu0 %v429_v1  ;;  %s392_s16 = sshll.u32 %s494_s13, 3  ;;  %v382_v5 = vld [vmem:[%s490_s1] sm:$0xf]  ;;  %v394_v6 = vld [vmem:[%s490_s1] sm:$0x30]  ;;  %vm197_vm1 = vcmask 48128  }
   0xd   : > { %179 = vperm.xlu0 %404, %v175_v0   ;;  %s165_s19 = scalar_lea.vmem %s489_s0, %s392_s16  ;;  %v383_v12 = vor.u32 %v394_v6, %v382_v5  ;;  %s393_s26 = sshll.u32 %s494_s13, 5 }
   0xe   : > { %v174_v2 = vld [vmem:[%s165_s19] sm:$0x77]  ;;  %s480_s29 = scalar_lea.vmem %s492_s3, %s393_s26 }
   0xf   : > { %v193_v3 = vunpack.c.l.b16 %v174_v2  ;;  %v194_v4 = vunpack.c.h.b16 %v174_v2 }
  0x11   : > { %v195_v8 = vpack.c.b16 %v193_v3, %v193_v3  ;;  %v196_v9 = vpack.c.b16 %v194_v4, %v194_v4 }
  0x13   : > { %v203_v10 = vsel %vm201_vm0, %v195_v8, 0  ;;  %v206_v11 = vsel %vm201_vm0, %v196_v9, 0 }
  0x14   : > { %215 = vmatpush.bf16.msra.mxu0 %v203_v10  ;;  %229 = vmatpush.bf16.msra.mxu1 %v206_v11 }
  0x15   : > { %184 = vperm.xlu0 %404, %v176_v7  }
  0x17   : > { %384 = vmatmul.msk.bf16.vlgmr.msra.gmra.mxu0 %vm197_vm1, %v383_v12  ;;  %385 = vmatmul.msk.bf16.vlgmr.msra.gmra.mxu1 %vm197_vm1, %v383_v12 }
  0x7f   : > { %v180_v13 = vpop.permute.xlu0 %179 }
  0x87   : > { %v185_v20 = vpop.permute.xlu0 %184 }
  0x94   : > { %v217_v14 = vpop.f32.mrf.mxu0  ;;  %v231_v15 = vpop.f32.mrf.mxu1 }
  0x95   : > { %v218_v16 = vadd.f32 %v217_v14, %v180_v13  ;;  %v232_v17 = vadd.f32 %v231_v15, %v180_v13 }
  0x97   : > { %v386_v18 = vmul.f32 -1.442695, %v218_v16  ;;  %v387_v19 = vmul.f32 -1.442695, %v232_v17 }
  0x99   : > { %405 = vpow2.f32 %v386_v18 }
  0x9a   : > { %407 = vpow2.f32 %v387_v19 }
  0x9c   : > { %v219_v21 = vpop.f32.mrf.mxu0  ;;  %v233_v22 = vpop.f32.mrf.mxu1 }
  0x9d   : > { %v220_v23 = vadd.f32 %v219_v21, %v185_v20  ;;  %v234_v24 = vadd.f32 %v233_v22, %v185_v20 }
  0x9f   : > { %v406_v25 = vpop.eup %405  ;;  %v388_v26 = vmul.f32 -1.442695, %v220_v23  ;;  %v389_v29 = vmul.f32 -1.442695, %v234_v24 }
  0xa0   : > { %v408_v27 = vpop.eup %407  ;;  %v248_v28 = vadd.f32 1.0, %v406_v25 }
  0xa1   : > { %v249_v30 = vadd.f32 1.0, %v408_v27  ;;  %409 = vpow2.f32 %v388_v26 }
  0xa2   : > { %411 = vrcp.f32 %v248_v28  ;;  %v261_v40 = vand.u32 2147483647, %v248_v28  ;;  %v263_v41 = vand.u32 2147483648, %v248_v28  ;;  %vm257_vm4 = vweird.f32 %v248_v28 }
  0xa3   : > { %413 = vrcp.f32 %v249_v30  ;;  %v278_v44 = vand.u32 2147483648, %v249_v30  ;;  %v276_v46 = vand.u32 2147483647, %v249_v30  ;;  %vm272_vm6 = vweird.f32 %v249_v30 }
  0xa4   : > { %415 = vpow2.f32 %v389_v29  ;;  %v264_v49 = vor.u32 1.1754944e-38, %v263_v41  ;;  %vm262_vm7 = vcmp.eq.f32.partialorder %v261_v40, 8.507059e+37 }
  0xa5   : > { %v279_v52 = vor.u32 1.1754944e-38, %v278_v44  ;;  %vm277_vm9 = vcmp.eq.f32.partialorder %v276_v46, 8.507059e+37 }
  0xa7   : > { %v410_v31 = vpop.eup %409 }
  0xa8   : > { %v412_v32 = vpop.eup %411  ;;  %v250_v33 = vadd.f32 1.0, %v410_v31 }
  0xa9   : > { %v414_v34 = vpop.eup %413  ;;  %v253_v35 = vmul.f32 %v412_v32, %v248_v28  ;;  %vm258_vm2 = vweird.f32 %v412_v32 }
  0xaa   : > { %v416_v36 = vpop.eup %415  ;;  %v268_v37 = vmul.f32 %v414_v34, %v249_v30  ;;  %417 = vrcp.f32 %v250_v33  ;;  %vm273_vm3 = vweird.f32 %v414_v34  ;;  %vm259_vm5 = vmor %vm257_vm4, %vm258_vm2  ;;  %v293_v59 = vand.u32 2147483648, %v250_v33 }
  0xab   : > { %v254_v38 = vsub.f32 1.0, %v253_v35  ;;  %v251_v39 = vadd.f32 1.0, %v416_v36  ;;  %vm274_vm8 = vmor %vm272_vm6, %vm273_vm3  ;;  %v291_v62 = vand.u32 2147483647, %v250_v33  ;;  %vm287_vm11 = vweird.f32 %v250_v33 }
  0xac   : > { %v269_v42 = vsub.f32 1.0, %v268_v37  ;;  %v294_v2 = vor.u32 1.1754944e-38, %v293_v59 }
  0xad   : > { %v255_v43 = vmul.f32 %v412_v32, %v254_v38  ;;  %419 = vrcp.f32 %v251_v39  ;;  %v308_v1 = vand.u32 2147483648, %v251_v39  ;;  %v306_v4 = vand.u32 2147483647, %v251_v39 }
  0xae   : > { %v270_v45 = vmul.f32 %v414_v34, %v269_v42  ;;  %vm292_vm14 = vcmp.eq.f32.partialorder %v291_v62, 8.507059e+37  ;;  %vm302_vm15 = vweird.f32 %v251_v39 }
  0xaf   : > { %v256_v47 = vadd.f32 %v412_v32, %v255_v43  ;;  %v309_v8 = vor.u32 1.1754944e-38, %v308_v1  ;;  %vm307_vm1 = vcmp.eq.f32.partialorder %v306_v4, 8.507059e+37 }
  0xb0   : > { %v418_v48 = vpop.eup %417  ;;  %v271_v50 = vadd.f32 %v414_v34, %v270_v45 }
  0xb1   : > { %v260_v51 = vsel %vm259_vm5, %v412_v32, %v256_v47  ;;  %v283_v53 = vmul.f32 %v418_v48, %v250_v33  ;;  %vm288_vm10 = vweird.f32 %v418_v48 }
  0xb2   : > { %v265_v54 = vsel %vm262_vm7, %v264_v49, %v260_v51  ;;  %v275_v55 = vsel %vm274_vm8, %v414_v34, %v271_v50  ;;  %vm289_vm12 = vmor %vm287_vm11, %vm288_vm10 }
  0xb3   : > { %v420_v56 = vpop.eup %419  ;;  %312 = vst [vmem:[%s480_s29] sm:$0xff] %v265_v54  ;;  %v280_v57 = vsel %vm277_vm9, %v279_v52, %v275_v55  ;;  %v284_v58 = vsub.f32 1.0, %v283_v53 }
  0xb4   : > { %313 = vst [vmem:[%s480_s29 + $0x8] sm:$0xff] %v280_v57  ;;  %v298_v60 = vmul.f32 %v420_v56, %v251_v39  ;;  %vm303_vm13 = vweird.f32 %v420_v56 }
  0xb5   : > { %v285_v61 = vmul.f32 %v418_v48, %v284_v58  ;;  %vm304_vm0 = vmor %vm302_vm15, %vm303_vm13 }
  0xb6   : > { %v299_v63 = vsub.f32 1.0, %v298_v60 }
  0xb7   : > { %v286_v0 = vadd.f32 %v418_v48, %v285_v61 }
  0xb8   : > { %v300_v3 = vmul.f32 %v420_v56, %v299_v63 }
  0xb9   : > { %v290_v5 = vsel %vm289_vm12, %v418_v48, %v286_v0 }
  0xba   : > { %v295_v6 = vsel %vm292_vm14, %v294_v2, %v290_v5  ;;  %v301_v7 = vadd.f32 %v420_v56, %v300_v3 }
  0xbb   : > { %314 = vst [vmem:[%s480_s29 + $0x10] sm:$0xf] %v295_v6 }
  0xbc   : > { %v305_v9 = vsel %vm304_vm0, %v420_v56, %v301_v7 }
  0xbd   : > { %v310_v10 = vsel %vm307_vm1, %v309_v8, %v305_v9 }
  0xbe   : > { %315 = vst [vmem:[%s480_s29 + $0x18] sm:$0xf] %v310_v10 }
  0xbf PF: > { %s13_s12 = sadd.s32 1, %s427_s12  }
  0xc0   : > { %p10_p4 = scmp.ge.s32.totalorder %s13_s12, 4  }
  0xc2   :  { %12 = sbr.rel (!%p10_p4) target bundleno = 1 (0x1), region = 62 }

</bundles_post_ra>
